<compile_context>
chip_gen: v7x
topology: tpu7x:2x2x1
jax: 0.10.0
libtpu: 0.0.40
codegen_flags: <defaults>
</compile_context>

<pallas_src>
import jax
import jax.numpy as jnp
from jax.experimental import pallas as pl
from jax.experimental.pallas import tpu as pltpu

C1, C2, C3 = 56, 924, 5
IN_FEATURES = C1 * C2 * C3          # 258720  (fc1 input dim from __init__)
H1, H2, H3, OUT = 1024, 1024, 256, 3

# fc1 tiling (chosen to be safe on v5e/v6e/v7x, see header comment).
TK = 4096                           # K tile (reduction)
TN = 512                            # N tile -> 2 parallel j-tiles for megacore
KPAD = ((IN_FEATURES + TK - 1) // TK) * TK   # 262144


def _round_up(x, m):
    return ((x + m - 1) // m) * m


# ----------------------------------------------------------------------------
# Layer 1: fused |h| = sqrt(re^2 + im^2)  +  fc1 matmul (bf16 weights)
#          +  bias  +  ReLU.
# Grid = (N // TN, KPAD // TK); reduction axis (K) last, f32 VMEM accumulator.
# ----------------------------------------------------------------------------
def _fused_mag_fc1_kernel(re_ref, im_ref, w_ref, b_ref, o_ref, acc_ref):
    k = pl.program_id(1)

    @pl.when(k == 0)
    def _():
        acc_ref[...] = jnp.zeros_like(acc_ref)

    # Elementwise magnitude on the K-tile (f32), cast to bf16 to match the
    # bf16 weight stream; MXU accumulates in f32 (preferred_element_type).
    re = re_ref[...]
    im = im_ref[...]
    h = jnp.sqrt(re * re + im * im).astype(jnp.bfloat16)
    acc_ref[...] += jnp.dot(h, w_ref[...], preferred_element_type=jnp.float32)

    @pl.when(k == pl.num_programs(1) - 1)
    def _():
        o_ref[...] = jnp.maximum(acc_ref[...] + b_ref[...], 0.0).astype(o_ref.dtype)


def fused_magnitude_fc1_relu(h_re, h_im, w1_padded_bf16, b1):
    """h_re/h_im: (B, C1, C2, C3) f32.  w1_padded_bf16: (KPAD, H1) bf16 (pre-padded)."""
    B = h_re.shape[0]
    K = IN_FEATURES
    Kpad, N = w1_padded_bf16.shape
    assert Kpad == KPAD and N % TN == 0 and Kpad % TK == 0

    # Only the small activations are padded per call (~2 MB each); the big
    # weight was padded/cast once at prepare time.
    re = jnp.pad(h_re.reshape(B, K), ((0, 0), (0, Kpad - K)))
    im = jnp.pad(h_im.reshape(B, K), ((0, 0), (0, Kpad - K)))
    b2d = b1.reshape(1, N)

    grid = (N // TN, Kpad // TK)     # (2, 64)
    return pl.pallas_call(
        _fused_mag_fc1_kernel,
        out_shape=jax.ShapeDtypeStruct((B, N), jnp.float32),
        grid_spec=pltpu.PrefetchScalarGridSpec(
            num_scalar_prefetch=0,
            grid=grid,
            in_specs=[
                pl.BlockSpec((B, TK), lambda j, k: (0, k)),    # h_re tile
                pl.BlockSpec((B, TK), lambda j, k: (0, k)),    # h_im tile
                pl.BlockSpec((TK, TN), lambda j, k: (k, j)),   # w1 tile (bf16)
                pl.BlockSpec((1, TN), lambda j, k: (0, j)),    # bias tile
            ],
            out_specs=pl.BlockSpec((B, TN), lambda j, k: (0, j)),
            scratch_shapes=[pltpu.VMEM((B, TN), jnp.float32)],
        ),
        compiler_params=pltpu.CompilerParams(
            dimension_semantics=("parallel", "arbitrary"),
            vmem_limit_bytes=32 * 1024 * 1024,
        ),
    )(re, im, w1_padded_bf16, b2d)


# ----------------------------------------------------------------------------
# Layers 2-4 fused: fc2 -> ReLU -> fc3 -> ReLU -> fc4 in one no-grid kernel.
# All weights (~5 MB) + tiny activations fit comfortably in VMEM.
# Dropout = identity (eval mode).
# ----------------------------------------------------------------------------
def _mlp_tail_kernel(x_ref, w2_ref, b2_ref, w3_ref, b3_ref, w4_ref, b4_ref, o_ref):
    x = x_ref[...]
    h2 = jnp.maximum(
        jnp.dot(x, w2_ref[...], preferred_element_type=jnp.float32) + b2_ref[...], 0.0)
    h3 = jnp.maximum(
        jnp.dot(h2, w3_ref[...], preferred_element_type=jnp.float32) + b3_ref[...], 0.0)
    y = jnp.dot(h3, w4_ref[...], preferred_element_type=jnp.float32) + b4_ref[...]
    o_ref[...] = y.astype(o_ref.dtype)


def mlp_tail(x, w2, b2, w3, b3, w4, b4):
    B = x.shape[0]
    vmem_spec = pl.BlockSpec(memory_space=pltpu.MemorySpace.VMEM)
    return pl.pallas_call(
        _mlp_tail_kernel,
        out_shape=jax.ShapeDtypeStruct((B, OUT), jnp.float32),
        in_specs=[vmem_spec] * 7,
        out_specs=pl.BlockSpec(memory_space=pltpu.MemorySpace.VMEM),
        compiler_params=pltpu.CompilerParams(
            vmem_limit_bytes=32 * 1024 * 1024),
    )(x, w2, b2.reshape(1, H2), w3, b3.reshape(1, H3), w4, b4.reshape(1, OUT))


# ----------------------------------------------------------------------------
# Full forward pass
# ----------------------------------------------------------------------------
def mlp_forward(params, h_re, h_im, snr=None):
    del snr  # unused in the reference forward
    x = fused_magnitude_fc1_relu(h_re, h_im, params["w1"], params["b1"])
    x = mlp_tail(x, params["w2"], params["b2"],
                 params["w3"], params["b3"],
                 params["w4"], params["b4"])
    return x


def init_params(key):
    """Deterministic synthetic init, PyTorch-Linear-style U(-1/sqrt(fan_in), +)."""
    def lin(k, fan_in, fan_out):
        kw, kb = jax.random.split(k)
        bound = 1.0 / float(fan_in) ** 0.5
        w = jax.random.uniform(kw, (fan_in, fan_out), jnp.float32, -bound, bound)
        b = jax.random.uniform(kb, (fan_out,), jnp.float32, -bound, bound)
        return w, b

    k1, k2, k3, k4 = jax.random.split(key, 4)
    w1, b1 = lin(k1, IN_FEATURES, H1)
    w2, b2 = lin(k2, H1, H2)
    w3, b3 = lin(k3, H2, H3)
    w4, b4 = lin(k4, H3, OUT)
    return dict(w1=w1, b1=b1, w2=w2, b2=b2, w3=w3, b3=b3, w4=w4, b4=b4)


def prepare_params(params):
    """One-time weight prep: pad fc1 weight along K to KPAD and cast to bf16.

    Done once so the per-call forward never pads/copies the ~1 GB weight.
    """
    w1p = jnp.pad(params["w1"], ((0, KPAD - IN_FEATURES), (0, 0))).astype(jnp.bfloat16)
    out = dict(params)
    out["w1"] = w1p
    return out


if __name__ == "__main__":
    key = jax.random.PRNGKey(0)
    kp, kr, ki, ks = jax.random.split(key, 4)

    params = init_params(kp)
    params = prepare_params(params)   # pad + bf16-cast fc1 weight ONCE

    B = 2  # small batch; feature dims (56, 924, 5) are fixed by the module's fc1
    h_re = jax.random.normal(kr, (B, C1, C2, C3), jnp.float32)
    h_im = jax.random.normal(ki, (B, C1, C2, C3), jnp.float32)
    snr = jax.random.normal(ks, (B,), jnp.float32)  # unused, as in the reference

    fwd = jax.jit(mlp_forward)
    out = fwd(params, h_re, h_im, snr)
    out = jax.block_until_ready(out)
    assert out.shape == (B, OUT) and out.dtype == jnp.float32

    print("KERNEL_OK")
</pallas_src>

<mosaic_0001>
module attributes {stable_mosaic.version = 11 : i64} {
  func.func @_fused_mag_fc1_kernel(%arg0: i32, %arg1: i32, %arg2: memref<2x4096xf32, #tpu.memory_space<vmem>>, %arg3: memref<2x4096xf32, #tpu.memory_space<vmem>>, %arg4: memref<4096x512xbf16, #tpu.memory_space<vmem>>, %arg5: memref<1x512xf32, #tpu.memory_space<vmem>>, %arg6: memref<2x512xf32, #tpu.memory_space<vmem>>, %arg7: memref<2x512xf32, #tpu.memory_space<vmem>>) attributes {dimension_semantics = [#tpu.dimension_semantics<parallel>, #tpu.dimension_semantics<arbitrary>], iteration_bounds = array<i64: 2, 64>, scalar_prefetch = 0 : i64, scratch_operands = 1 : i64, tpu.core_type = #tpu.core_type<tc>, window_params = [{transform_indices = @transform_0, window_bounds = array<i64: 2, 4096>}, {transform_indices = @transform_1, window_bounds = array<i64: 2, 4096>}, {transform_indices = @transform_2, window_bounds = array<i64: 4096, 512>}, {transform_indices = @transform_3, window_bounds = array<i64: 1, 512>}, {transform_indices = @transform_4, window_bounds = array<i64: 2, 512>}]} {
    %c0_i32 = arith.constant 0 : i32
    %0 = arith.cmpi eq, %arg1, %c0_i32 : i32
    %1 = arith.extui %0 : i1 to i32
    %c0_i32_0 = arith.constant 0 : i32
    %2 = arith.cmpi ne, %1, %c0_i32_0 : i32
    scf.if %2 {
      %cst_11 = arith.constant 0.000000e+00 : f32
      %18 = vector.broadcast %cst_11 : f32 to vector<2x512xf32>
      %c0_12 = arith.constant 0 : index
      %c0_13 = arith.constant 0 : index
      %19 = vector.load %arg7[%c0_12, %c0_13] : memref<2x512xf32, #tpu.memory_space<vmem>>, vector<2x512xf32>
      tpu.vector_store %arg7[%c0_12, %c0_13], %18 {strides = array<i32>} : memref<2x512xf32, #tpu.memory_space<vmem>>, vector<2x512xf32>,
    } else {
    }
    %c0 = arith.constant 0 : index
    %c0_1 = arith.constant 0 : index
    %3 = vector.load %arg2[%c0, %c0_1] : memref<2x4096xf32, #tpu.memory_space<vmem>>, vector<2x4096xf32>
    %c0_2 = arith.constant 0 : index
    %c0_3 = arith.constant 0 : index
    %4 = vector.load %arg3[%c0_2, %c0_3] : memref<2x4096xf32, #tpu.memory_space<vmem>>, vector<2x4096xf32>
    %5 = arith.mulf %3, %3 : vector<2x4096xf32>
    %6 = arith.mulf %4, %4 : vector<2x4096xf32>
    %7 = arith.addf %5, %6 : vector<2x4096xf32>
    %8 = math.sqrt %7 : vector<2x4096xf32>
    %9 = arith.truncf %8 : vector<2x4096xf32> to vector<2x4096xbf16>
    %c0_4 = arith.constant 0 : index
    %c0_5 = arith.constant 0 : index
    %10 = vector.load %arg7[%c0_4, %c0_5] : memref<2x512xf32, #tpu.memory_space<vmem>>, vector<2x512xf32>
    %c0_6 = arith.constant 0 : index
    %c0_7 = arith.constant 0 : index
    %11 = vector.load %arg4[%c0_6, %c0_7] : memref<4096x512xbf16, #tpu.memory_space<vmem>>, vector<4096x512xbf16>
    %cst = arith.constant dense<0.000000e+00> : vector<2x512xf32>
    %12 = tpu.matmul %9, %11, %cst {dimension_numbers = #tpu.dot_dimension_numbers<[1], [0], [0], [1], [0, 0, 1, 1], [], []>} : vector<2x4096xbf16>, vector<4096x512xbf16>, vector<2x512xf32> -> vector<2x512xf32>
    %13 = arith.addf %10, %12 : vector<2x512xf32>
    %c0_8 = arith.constant 0 : index
    %c0_9 = arith.constant 0 : index
    %14 = vector.load %arg7[%c0_8, %c0_9] : memref<2x512xf32, #tpu.memory_space<vmem>>, vector<2x512xf32>
    tpu.vector_store %arg7[%c0_8, %c0_9], %13 {strides = array<i32>} : memref<2x512xf32, #tpu.memory_space<vmem>>, vector<2x512xf32>,
    %c63_i32 = arith.constant 63 : i32
    %15 = arith.cmpi eq, %arg1, %c63_i32 : i32
    %16 = arith.extui %15 : i1 to i32
    %c0_i32_10 = arith.constant 0 : i32
    %17 = arith.cmpi ne, %16, %c0_i32_10 : i32
    scf.if %17 {
      %c0_11 = arith.constant 0 : index
      %c0_12 = arith.constant 0 : index
      %18 = vector.load %arg7[%c0_11, %c0_12] : memref<2x512xf32, #tpu.memory_space<vmem>>, vector<2x512xf32>
      %c0_13 = arith.constant 0 : index
      %c0_14 = arith.constant 0 : index
      %19 = vector.load %arg5[%c0_13, %c0_14] : memref<1x512xf32, #tpu.memory_space<vmem>>, vector<1x512xf32>
      %20 = vector.broadcast %19 : vector<1x512xf32> to vector<2x512xf32>
      %21 = arith.addf %18, %20 : vector<2x512xf32>
      %cst_15 = arith.constant 0.000000e+00 : f32
      %22 = vector.broadcast %cst_15 : f32 to vector<2x512xf32>
      %23 = arith.maximumf %21, %22 : vector<2x512xf32>
      %c0_16 = arith.constant 0 : index
      %c0_17 = arith.constant 0 : index
      %24 = vector.load %arg6[%c0_16, %c0_17] : memref<2x512xf32, #tpu.memory_space<vmem>>, vector<2x512xf32>
      tpu.vector_store %arg6[%c0_16, %c0_17], %23 {strides = array<i32>} : memref<2x512xf32, #tpu.memory_space<vmem>>, vector<2x512xf32>,
    } else {
    }
    return
  }
  func.func @transform_0(%arg0: i32, %arg1: i32) -> (i32, i32) {
    %c0_i32 = arith.constant 0 : i32
    %c0_i32_0 = arith.constant 0 : i32
    return %c0_i32, %arg1 : i32, i32
  }
  func.func @transform_1(%arg0: i32, %arg1: i32) -> (i32, i32) {
    %c0_i32 = arith.constant 0 : i32
    %c0_i32_0 = arith.constant 0 : i32
    return %c0_i32, %arg1 : i32, i32
  }
  func.func @transform_2(%arg0: i32, %arg1: i32) -> (i32, i32) {
    %c0_i32 = arith.constant 0 : i32
    return %arg1, %arg0 : i32, i32
  }
  func.func @transform_3(%arg0: i32, %arg1: i32) -> (i32, i32) {
    %c0_i32 = arith.constant 0 : i32
    %c0_i32_0 = arith.constant 0 : i32
    return %c0_i32, %arg0 : i32, i32
  }
  func.func @transform_4(%arg0: i32, %arg1: i32) -> (i32, i32) {
    %c0_i32 = arith.constant 0 : i32
    %c0_i32_0 = arith.constant 0 : i32
    return %c0_i32, %arg0 : i32, i32
  }
}

module attributes {stable_mosaic.version = 11 : i64} {
  func.func @_mlp_tail_kernel(%arg0: memref<2x1024xf32, #tpu.memory_space<vmem>>, %arg1: memref<1024x1024xf32, #tpu.memory_space<vmem>>, %arg2: memref<1x1024xf32, #tpu.memory_space<vmem>>, %arg3: memref<1024x256xf32, #tpu.memory_space<vmem>>, %arg4: memref<1x256xf32, #tpu.memory_space<vmem>>, %arg5: memref<256x3xf32, #tpu.memory_space<vmem>>, %arg6: memref<1x3xf32, #tpu.memory_space<vmem>>, %arg7: memref<2x3xf32, #tpu.memory_space<vmem>>) attributes {dimension_semantics = [], scalar_prefetch = 0 : i64, scratch_operands = 0 : i64, tpu.core_type = #tpu.core_type<tc>} {
    %c0 = arith.constant 0 : index
    %c0_0 = arith.constant 0 : index
    %0 = vector.load %arg0[%c0, %c0_0] : memref<2x1024xf32, #tpu.memory_space<vmem>>, vector<2x1024xf32>
    %c0_1 = arith.constant 0 : index
    %c0_2 = arith.constant 0 : index
    %1 = vector.load %arg1[%c0_1, %c0_2] : memref<1024x1024xf32, #tpu.memory_space<vmem>>, vector<1024x1024xf32>
    %cst = arith.constant dense<0.000000e+00> : vector<2x1024xf32>
    %2 = tpu.matmul %0, %1, %cst {dimension_numbers = #tpu.dot_dimension_numbers<[1], [0], [0], [1], [0, 0, 1, 1], [], []>} : vector<2x1024xf32>, vector<1024x1024xf32>, vector<2x1024xf32> -> vector<2x1024xf32>
    %c0_3 = arith.constant 0 : index
    %c0_4 = arith.constant 0 : index
    %3 = vector.load %arg2[%c0_3, %c0_4] : memref<1x1024xf32, #tpu.memory_space<vmem>>, vector<1x1024xf32>
    %4 = vector.broadcast %3 : vector<1x1024xf32> to vector<2x1024xf32>
    %5 = arith.addf %2, %4 : vector<2x1024xf32>
    %cst_5 = arith.constant 0.000000e+00 : f32
    %6 = vector.broadcast %cst_5 : f32 to vector<2x1024xf32>
    %7 = arith.maximumf %5, %6 : vector<2x1024xf32>
    %c0_6 = arith.constant 0 : index
    %c0_7 = arith.constant 0 : index
    %8 = vector.load %arg3[%c0_6, %c0_7] : memref<1024x256xf32, #tpu.memory_space<vmem>>, vector<1024x256xf32>
    %cst_8 = arith.constant dense<0.000000e+00> : vector<2x256xf32>
    %9 = tpu.matmul %7, %8, %cst_8 {dimension_numbers = #tpu.dot_dimension_numbers<[1], [0], [0], [1], [0, 0, 1, 1], [], []>} : vector<2x1024xf32>, vector<1024x256xf32>, vector<2x256xf32> -> vector<2x256xf32>
    %c0_9 = arith.constant 0 : index
    %c0_10 = arith.constant 0 : index
    %10 = vector.load %arg4[%c0_9, %c0_10] : memref<1x256xf32, #tpu.memory_space<vmem>>, vector<1x256xf32>
    %11 = vector.broadcast %10 : vector<1x256xf32> to vector<2x256xf32>
    %12 = arith.addf %9, %11 : vector<2x256xf32>
    %cst_11 = arith.constant 0.000000e+00 : f32
    %13 = vector.broadcast %cst_11 : f32 to vector<2x256xf32>
    %14 = arith.maximumf %12, %13 : vector<2x256xf32>
    %c0_12 = arith.constant 0 : index
    %c0_13 = arith.constant 0 : index
    %15 = vector.load %arg5[%c0_12, %c0_13] : memref<256x3xf32, #tpu.memory_space<vmem>>, vector<256x3xf32>
    %cst_14 = arith.constant dense<0.000000e+00> : vector<2x3xf32>
    %16 = tpu.matmul %14, %15, %cst_14 {dimension_numbers = #tpu.dot_dimension_numbers<[1], [0], [0], [1], [0, 0, 1, 1], [], []>} : vector<2x256xf32>, vector<256x3xf32>, vector<2x3xf32> -> vector<2x3xf32>
    %c0_15 = arith.constant 0 : index
    %c0_16 = arith.constant 0 : index
    %17 = vector.load %arg6[%c0_15, %c0_16] : memref<1x3xf32, #tpu.memory_space<vmem>>, vector<1x3xf32>
    %18 = vector.broadcast %17 : vector<1x3xf32> to vector<2x3xf32>
    %19 = arith.addf %16, %18 : vector<2x3xf32>
    %c0_17 = arith.constant 0 : index
    %c0_18 = arith.constant 0 : index
    %20 = vector.load %arg7[%c0_17, %c0_18] : memref<2x3xf32, #tpu.memory_space<vmem>>, vector<2x3xf32>
    tpu.vector_store %arg7[%c0_17, %c0_18], %19 {strides = array<i32>} : memref<2x3xf32, #tpu.memory_space<vmem>>, vector<2x3xf32>,
    return
  }
}

</mosaic_0001>

<bundles_post_ra>
// kernel: mlp_forward.3
= control target key start
LH: loop header
LB: loop body
LE: loop exit
PB: predicated region body
PF: predicated region fallthrough
CT: control target
= control target key end

     0   :  { %12 = vsyncpa [#allocation3], 0  ;;  %s5480_s0 = inlined_call_operand.vmem [shape: f32[2,1024], index: 0, kind: input, shape index: {}]   ;;  %s5481_s1 = inlined_call_operand.hbm [shape: f32[1024,1024], index: 1, kind: input, shape index: {}]   ;;  %s5482_s2 = inlined_call_operand.vmem [shape: f32[1,1024], index: 2, kind: input, shape index: {}]   ;;  %s5483_s3 = inlined_call_operand.vmem [shape: f32[1024,256], index: 3, kind: input, shape index: {}]   ;;  %s5484_s4 = inlined_call_operand.vmem [shape: f32[1,256], index: 4, kind: input, shape index: {}]   ;;  %s5485_s5 = inlined_call_operand.vmem [shape: f32[256,3], index: 5, kind: input, shape index: {}]   ;;  %s5486_s6 = inlined_call_operand.vmem [shape: f32[1,3], index: 6, kind: input, shape index: {}]   ;;  %s5487_s7 = inlined_call_operand.hbm [shape: f32[2,3], index: 7, kind: output, shape index: {}]  }
   0x1   :  { %13 = vsyncpa [#allocation4], 0  ;;  %s4421_s24 = smov [#allocation2]   ;;  %s4373_s28 = scalar_lea.hbm %s5481_s1, 131072 }
   0x2   :  { %s21_s25 = sshll.u32 %s4421_s24, 4  ;;  %p4374_p0 = scmp.ne.s32.totalorder %s5481_s1, %s4373_s28  ;;  %s22_s25 = int_to_ptr.vmem [resolvable:$true] %s21_s25 }
   0x3   :  { %p4377_p1 = scmp.lt.u32.totalorder %s4373_s28, %s5481_s1 }
   0x5   :  { %p4379_p2 = pnand %p4377_p1, %p4374_p0 }
   0x7   :  { %4382 = shalt.err (!%p4379_p2)
}
   0x8   :  { %s4383_s10 = scalar_lea.vmem %s22_s25, 131072  ;;  %p4388_p4 = scmp.lt.s32.totalorder %s22_s25, %s22_s25 }
   0x9   :  { %p4384_p3 = scmp.ne.s32.totalorder %s22_s25, %s4383_s10  ;;  %p4389_p5 = scmp.lt.s32.totalorder %s4383_s10, %s4383_s10 }
   0xb   :  { %p4390_p6 = por %p4389_p5, %p4388_p4 }
   0xd   :  { %p4391_p7 = pnand %p4390_p6, %p4384_p3 }
   0xf   :  { %4394 = shalt.err (!%p4391_p7)
}
  0x10   :  { %s4422_s11 = smov 1024   ;;  %s4423_s12 = smov 64  }
  0x11   :  { %27 = dma.hbm_to_vmem [thread:$0]  %s5481_s1, 131072, %s22_s25, [#allocation3], %s4422_s11, %s4422_s11, %s4423_s12  }
  0x12   :  { %4417 = dma.done.wait [#allocation3], 131072  }
  0x13   :  { %4418 = vsyncadd [#allocation3], 4294836224  ;;  %v44_v0 = vld [vmem:[#allocation2 + $0x8] sm:$0xff]  ;;  %v43_v5 = vld [vmem:[#allocation2] sm:$0xff]  ;;  %vm2960_vm0 = vcmask 17408  }
  0x14   :  { %v52_v1 = vld [vmem:[#allocation2 + $0x48] sm:$0xff]  ;;  %v51_v6 = vld [vmem:[#allocation2 + $0x40] sm:$0xff] }
  0x15   :  { %v556_v2 = vld [vmem:[#allocation2 + $0x1008] sm:$0xff]  ;;  %v3013_v3 = vpack.c.bf16 %v52_v1, %v44_v0  ;;  %v3015_v8 = vpack.c.bf16 %v51_v6, %v43_v5  ;;  %v555_v9 = vld [vmem:[#allocation2 + $0x1000] sm:$0xff] }
  0x16   :  { %v564_v4 = vld [vmem:[#allocation2 + $0x1048] sm:$0xff]  ;;  %v563_v10 = vld [vmem:[#allocation2 + $0x1040] sm:$0xff] }
  0x17   :  { %v3141_v7 = vpack.c.bf16 %v564_v4, %v556_v2  ;;  %v60_v11 = vld [vmem:[#allocation2 + $0x88] sm:$0xff]  ;;  %3014 = vmatprep.subr.bf16.mxu1 %v3013_v3  ;;  %v3143_v12 = vpack.c.bf16 %v563_v10, %v555_v9  ;;  %v59_v18 = vld [vmem:[#allocation2 + $0x80] sm:$0xff] }
  0x18   :  { %v68_v13 = vld [vmem:[#allocation2 + $0xc8] sm:$0xff]  ;;  %3016 = vmatpush1.bf16.msra.mxu1 %v3015_v8  ;;  %v67_v19 = vld [vmem:[#allocation2 + $0xc0] sm:$0xff] }
  0x19   :  { %v572_v14 = vld [vmem:[#allocation2 + $0x1088] sm:$0xff]  ;;  %3142 = vmatprep.subr.bf16.mxu0 %v3141_v7  ;;  %v3017_v16 = vpack.c.bf16 %v68_v13, %v60_v11  ;;  %v571_v20 = vld [vmem:[#allocation2 + $0x1080] sm:$0xff]  ;;  %v3019_v21 = vpack.c.bf16 %v67_v19, %v59_v18 }
  0x1a   :  { %v580_v15 = vld [vmem:[#allocation2 + $0x10c8] sm:$0xff]  ;;  %3144 = vmatpush1.bf16.msra.mxu0 %v3143_v12  ;;  %v579_v22 = vld [vmem:[#allocation2 + $0x10c0] sm:$0xff] }
  0x1b   :  { %v3145_v17 = vpack.c.bf16 %v580_v15, %v572_v14  ;;  %v76_v23 = vld [vmem:[#allocation2 + $0x108] sm:$0xff]  ;;  %3018 = vmatprep.subr.bf16.mxu1 %v3017_v16  ;;  %v3147_v25 = vpack.c.bf16 %v579_v22, %v571_v20  ;;  %v75_v29 = vld [vmem:[#allocation2 + $0x100] sm:$0xff] }
  0x1c   :  { %v84_v24 = vld [vmem:[#allocation2 + $0x148] sm:$0xff]  ;;  %v83_v31 = vld [vmem:[#allocation2 + $0x140] sm:$0xff]  ;;  %3020 = vmatpush1.bf16.msra.mxu1 %v3019_v21 }
  0x1d   :  { %3146 = vmatprep.subr.bf16.mxu0 %v3145_v17  ;;  %v3021_v26 = vpack.c.bf16 %v84_v24, %v76_v23  ;;  %v588_v27 = vld [vmem:[#allocation2 + $0x1108] sm:$0xff]  ;;  %v587_v32 = vld [vmem:[#allocation2 + $0x1100] sm:$0xff]  ;;  %v3023_v34 = vpack.c.bf16 %v83_v31, %v75_v29 }
  0x1e   :  { %v596_v28 = vld [vmem:[#allocation2 + $0x1148] sm:$0xff]  ;;  %v595_v33 = vld [vmem:[#allocation2 + $0x1140] sm:$0xff]  ;;  %3148 = vmatpush1.bf16.msra.mxu0 %v3147_v25 }
  0x1f   :  { %v3149_v30 = vpack.c.bf16 %v596_v28, %v588_v27  ;;  %v92_v35 = vld [vmem:[#allocation2 + $0x188] sm:$0xff]  ;;  %3022 = vmatprep.subr.bf16.mxu1 %v3021_v26  ;;  %v3151_v38 = vpack.c.bf16 %v595_v33, %v587_v32  ;;  %v91_v41 = vld [vmem:[#allocation2 + $0x180] sm:$0xff] }
  0x20   :  { %v100_v36 = vld [vmem:[#allocation2 + $0x1c8] sm:$0xff]  ;;  %v99_v42 = vld [vmem:[#allocation2 + $0x1c0] sm:$0xff]  ;;  %3024 = vmatpush1.bf16.msra.mxu1 %v3023_v34 }
  0x21   :  { %v604_v37 = vld [vmem:[#allocation2 + $0x1188] sm:$0xff]  ;;  %v3025_v39 = vpack.c.bf16 %v100_v36, %v92_v35  ;;  %3150 = vmatprep.subr.bf16.mxu0 %v3149_v30  ;;  %v603_v44 = vld [vmem:[#allocation2 + $0x1180] sm:$0xff]  ;;  %v3027_v50 = vpack.c.bf16 %v99_v42, %v91_v41 }
  0x22   :  { %v612_v40 = vld [vmem:[#allocation2 + $0x11c8] sm:$0xff]  ;;  %v611_v45 = vld [vmem:[#allocation2 + $0x11c0] sm:$0xff]  ;;  %3152 = vmatpush1.bf16.msra.mxu0 %v3151_v38 }
  0x23   :  { %v3153_v43 = vpack.c.bf16 %v612_v40, %v604_v37  ;;  %v108_v46 = vld [vmem:[#allocation2 + $0x208] sm:$0xff]  ;;  %3026 = vmatprep.subr.bf16.mxu1 %v3025_v39  ;;  %v3155_v51 = vpack.c.bf16 %v611_v45, %v603_v44  ;;  %v107_v53 = vld [vmem:[#allocation2 + $0x200] sm:$0xff] }
  0x24   :  { %v116_v47 = vld [vmem:[#allocation2 + $0x248] sm:$0xff]  ;;  %v115_v54 = vld [vmem:[#allocation2 + $0x240] sm:$0xff]  ;;  %3028 = vmatpush1.bf16.msra.mxu1 %v3027_v50 }
  0x25   :  { %v620_v48 = vld [vmem:[#allocation2 + $0x1208] sm:$0xff]  ;;  %v3029_v52 = vpack.c.bf16 %v116_v47, %v108_v46  ;;  %v619_v55 = vld [vmem:[#allocation2 + $0x1200] sm:$0xff]  ;;  %3154 = vmatprep.subr.bf16.mxu0 %v3153_v43  ;;  %v3031_v62 = vpack.c.bf16 %v115_v54, %v107_v53  ;;  %v1069_v46 = vlaneseq  ;;  %v4424_v47 = vmov 1983009808  }
  0x26   :  { %v628_v49 = vld [vmem:[#allocation2 + $0x1248] sm:$0xff]  ;;  %v627_v57 = vld [vmem:[#allocation2 + $0x1240] sm:$0xff]  ;;  %3156 = vmatpush1.bf16.msra.mxu0 %v3155_v51 }
  0x27   :  { %v3157_v56 = vpack.c.bf16 %v628_v49, %v620_v48  ;;  %v124_v58 = vld [vmem:[#allocation2 + $0x288] sm:$0xff]  ;;  %3030 = vmatprep.subr.bf16.mxu1 %v3029_v52  ;;  %v3159_v63 = vpack.c.bf16 %v627_v57, %v619_v55  ;;  %v123_v1 = vld [vmem:[#allocation2 + $0x280] sm:$0xff]  ;;  %v1113_v48 = vunpack.c.l.s4 %v4424_v47 }
  0x28   :  { %v132_v59 = vld [vmem:[#allocation2 + $0x2c8] sm:$0xff]  ;;  %v131_v2 = vld [vmem:[#allocation2 + $0x2c0] sm:$0xff]  ;;  %3032 = vmatpush1.bf16.msra.mxu1 %v3031_v62 }
  0x29   :  { %v636_v60 = vld [vmem:[#allocation2 + $0x1288] sm:$0xff]  ;;  %v3033_v0 = vpack.c.bf16 %v132_v59, %v124_v58  ;;  %v635_v3 = vld [vmem:[#allocation2 + $0x1280] sm:$0xff]  ;;  %3158 = vmatprep.subr.bf16.mxu0 %v3157_v56  ;;  %v3035_v10 = vpack.c.bf16 %v131_v2, %v123_v1  ;;  %v1114_v62 = vunpack.c.0.s8 %v1113_v48 }
  0x2a   :  { %v644_v61 = vld [vmem:[#allocation2 + $0x12c8] sm:$0xff]  ;;  %v643_v5 = vld [vmem:[#allocation2 + $0x12c0] sm:$0xff]  ;;  %3160 = vmatpush1.bf16.msra.mxu0 %v3159_v63 }
  0x2b   :  { %v3161_v4 = vpack.c.bf16 %v644_v61, %v636_v60  ;;  %v140_v6 = vld [vmem:[#allocation2 + $0x308] sm:$0xff]  ;;  %3034 = vmatprep.subr.bf16.mxu1 %v3033_v0  ;;  %v3163_v11 = vpack.c.bf16 %v643_v5, %v635_v3  ;;  %v139_v13 = vld [vmem:[#allocation2 + $0x300] sm:$0xff]  ;;  %v4478_v61 = vshrl.u32 %v1069_v46, 7 }
  0x2c   :  { %v148_v7 = vld [vmem:[#allocation2 + $0x348] sm:$0xff]  ;;  %v147_v14 = vld [vmem:[#allocation2 + $0x340] sm:$0xff]  ;;  %3036 = vmatpush1.bf16.msra.mxu1 %v3035_v10 }
  0x2d   :  { %v652_v8 = vld [vmem:[#allocation2 + $0x1308] sm:$0xff]  ;;  %v3037_v12 = vpack.c.bf16 %v148_v7, %v140_v6  ;;  %v651_v15 = vld [vmem:[#allocation2 + $0x1300] sm:$0xff]  ;;  %3162 = vmatprep.subr.bf16.mxu0 %v3161_v4  ;;  %v3039_v22 = vpack.c.bf16 %v147_v14, %v139_v13 }
  0x2e   :  { %v660_v9 = vld [vmem:[#allocation2 + $0x1348] sm:$0xff]  ;;  %v659_v17 = vld [vmem:[#allocation2 + $0x1340] sm:$0xff]  ;;  %3164 = vmatpush1.bf16.msra.mxu0 %v3163_v11  ;;  %v4481_v11 = vsub.s32 %v1114_v62, %v4478_v61 }
  0x2f   :  { %v3165_v16 = vpack.c.bf16 %v660_v9, %v652_v8  ;;  %v156_v18 = vld [vmem:[#allocation2 + $0x388] sm:$0xff]  ;;  %3038 = vmatprep.subr.bf16.mxu1 %v3037_v12  ;;  %v3167_v23 = vpack.c.bf16 %v659_v17, %v651_v15  ;;  %v155_v25 = vld [vmem:[#allocation2 + $0x380] sm:$0xff] }
  0x30   :  { %v164_v19 = vld [vmem:[#allocation2 + $0x3c8] sm:$0xff]  ;;  %v163_v26 = vld [vmem:[#allocation2 + $0x3c0] sm:$0xff]  ;;  %3040 = vmatpush1.bf16.msra.mxu1 %v3039_v22 }
  0x31   :  { %v668_v20 = vld [vmem:[#allocation2 + $0x1388] sm:$0xff]  ;;  %v3041_v24 = vpack.c.bf16 %v164_v19, %v156_v18  ;;  %v667_v27 = vld [vmem:[#allocation2 + $0x1380] sm:$0xff]  ;;  %3166 = vmatprep.subr.bf16.mxu0 %v3165_v16  ;;  %v3043_v34 = vpack.c.bf16 %v163_v26, %v155_v25 }
  0x32   :  { %v676_v21 = vld [vmem:[#allocation2 + $0x13c8] sm:$0xff]  ;;  %v675_v29 = vld [vmem:[#allocation2 + $0x13c0] sm:$0xff]  ;;  %3168 = vmatpush1.bf16.msra.mxu0 %v3167_v23 }
  0x33   :  { %v3169_v28 = vpack.c.bf16 %v676_v21, %v668_v20  ;;  %v172_v30 = vld [vmem:[#allocation2 + $0x408] sm:$0xff]  ;;  %3042 = vmatprep.subr.bf16.mxu1 %v3041_v24  ;;  %v3171_v35 = vpack.c.bf16 %v675_v29, %v667_v27  ;;  %v171_v37 = vld [vmem:[#allocation2 + $0x400] sm:$0xff] }
  0x34   :  { %v180_v31 = vld [vmem:[#allocation2 + $0x448] sm:$0xff]  ;;  %v179_v38 = vld [vmem:[#allocation2 + $0x440] sm:$0xff]  ;;  %3044 = vmatpush1.bf16.msra.mxu1 %v3043_v34 }
  0x35   :  { %v684_v32 = vld [vmem:[#allocation2 + $0x1408] sm:$0xff]  ;;  %v3045_v36 = vpack.c.bf16 %v180_v31, %v172_v30  ;;  %v683_v39 = vld [vmem:[#allocation2 + $0x1400] sm:$0xff]  ;;  %3170 = vmatprep.subr.bf16.mxu0 %v3169_v28  ;;  %v3047_v49 = vpack.c.bf16 %v179_v38, %v171_v37 }
  0x36   :  { %v692_v33 = vld [vmem:[#allocation2 + $0x1448] sm:$0xff]  ;;  %v691_v41 = vld [vmem:[#allocation2 + $0x1440] sm:$0xff]  ;;  %3172 = vmatpush1.bf16.msra.mxu0 %v3171_v35 }
  0x37   :  { %v3173_v40 = vpack.c.bf16 %v692_v33, %v684_v32  ;;  %v188_v42 = vld [vmem:[#allocation2 + $0x488] sm:$0xff]  ;;  %3046 = vmatprep.subr.bf16.mxu1 %v3045_v36  ;;  %v3175_v50 = vpack.c.bf16 %v691_v41, %v683_v39  ;;  %v187_v52 = vld [vmem:[#allocation2 + $0x480] sm:$0xff] }
  0x38   :  { %v196_v43 = vld [vmem:[#allocation2 + $0x4c8] sm:$0xff]  ;;  %v195_v53 = vld [vmem:[#allocation2 + $0x4c0] sm:$0xff]  ;;  %3048 = vmatpush1.bf16.msra.mxu1 %v3047_v49 }
  0x39   :  { %v700_v44 = vld [vmem:[#allocation2 + $0x1488] sm:$0xff]  ;;  %v3049_v51 = vpack.c.bf16 %v196_v43, %v188_v42  ;;  %v699_v54 = vld [vmem:[#allocation2 + $0x1480] sm:$0xff]  ;;  %3174 = vmatprep.subr.bf16.mxu0 %v3173_v40  ;;  %v3051_v63 = vpack.c.bf16 %v195_v53, %v187_v52 }
  0x3a   :  { %v708_v45 = vld [vmem:[#allocation2 + $0x14c8] sm:$0xff]  ;;  %v707_v56 = vld [vmem:[#allocation2 + $0x14c0] sm:$0xff]  ;;  %3176 = vmatpush1.bf16.msra.mxu0 %v3175_v50 }
  0x3b   :  { %v3177_v55 = vpack.c.bf16 %v708_v45, %v700_v44  ;;  %v204_v57 = vld [vmem:[#allocation2 + $0x508] sm:$0xff]  ;;  %3050 = vmatprep.subr.bf16.mxu1 %v3049_v51  ;;  %v3179_v0 = vpack.c.bf16 %v707_v56, %v699_v54  ;;  %v203_v2 = vld [vmem:[#allocation2 + $0x500] sm:$0xff] }
  0x3c   :  { %v212_v58 = vld [vmem:[#allocation2 + $0x548] sm:$0xff]  ;;  %v211_v3 = vld [vmem:[#allocation2 + $0x540] sm:$0xff]  ;;  %3052 = vmatpush1.bf16.msra.mxu1 %v3051_v63 }
  0x3d   :  { %v716_v59 = vld [vmem:[#allocation2 + $0x1508] sm:$0xff]  ;;  %v3053_v1 = vpack.c.bf16 %v212_v58, %v204_v57  ;;  %v715_v4 = vld [vmem:[#allocation2 + $0x1500] sm:$0xff]  ;;  %3178 = vmatprep.subr.bf16.mxu0 %v3177_v55  ;;  %v3055_v12 = vpack.c.bf16 %v211_v3, %v203_v2 }
  0x3e   :  { %v724_v60 = vld [vmem:[#allocation2 + $0x1548] sm:$0xff]  ;;  %v723_v6 = vld [vmem:[#allocation2 + $0x1540] sm:$0xff]  ;;  %3180 = vmatpush1.bf16.msra.mxu0 %v3179_v0 }
  0x3f   :  { %v3181_v5 = vpack.c.bf16 %v724_v60, %v716_v59  ;;  %v220_v7 = vld [vmem:[#allocation2 + $0x588] sm:$0xff]  ;;  %v219_v13 = vld [vmem:[#allocation2 + $0x580] sm:$0xff]  ;;  %3054 = vmatprep.subr.bf16.mxu1 %v3053_v1  ;;  %v3183_v14 = vpack.c.bf16 %v723_v6, %v715_v4 }
  0x40   :  { %v228_v8 = vld [vmem:[#allocation2 + $0x5c8] sm:$0xff]  ;;  %v227_v16 = vld [vmem:[#allocation2 + $0x5c0] sm:$0xff]  ;;  %3056 = vmatpush1.bf16.msra.mxu1 %v3055_v12 }
  0x41   :  { %v732_v9 = vld [vmem:[#allocation2 + $0x1588] sm:$0xff]  ;;  %v3057_v15 = vpack.c.bf16 %v228_v8, %v220_v7  ;;  %v731_v17 = vld [vmem:[#allocation2 + $0x1580] sm:$0xff]  ;;  %3182 = vmatprep.subr.bf16.mxu0 %v3181_v5  ;;  %v3059_v27 = vpack.c.bf16 %v227_v16, %v219_v13 }
  0x42   :  { %v740_v10 = vld [vmem:[#allocation2 + $0x15c8] sm:$0xff]  ;;  %v739_v18 = vld [vmem:[#allocation2 + $0x15c0] sm:$0xff]  ;;  %3184 = vmatpush1.bf16.msra.mxu0 %v3183_v14 }
  0x43   :  { %v3185_v19 = vpack.c.bf16 %v740_v10, %v732_v9  ;;  %v236_v20 = vld [vmem:[#allocation2 + $0x608] sm:$0xff]  ;;  %v4486_v22 = vld [vmem:[%s5480_s0] sm:$0xff]  ;;  %3058 = vmatprep.subr.bf16.mxu1 %v3057_v15  ;;  %v3187_v29 = vpack.c.bf16 %v739_v18, %v731_v17 }
  0x44   :  { %v244_v21 = vld [vmem:[#allocation2 + $0x648] sm:$0xff]  ;;  %v4490_v25 = vrot.slane %v4486_v22, %v4481_v11  ;;  %v235_v31 = vld [vmem:[#allocation2 + $0x600] sm:$0xff]  ;;  %3060 = vmatpush1.bf16.msra.mxu1 %v3059_v27  ;;  %v1111_v14 = vcombine.high %v4486_v22, %v4486_v22 }
  0x45   :  { %v748_v23 = vld [vmem:[#allocation2 + $0x1608] sm:$0xff]  ;;  %v3061_v30 = vpack.c.bf16 %v244_v21, %v236_v20  ;;  %v243_v32 = vld [vmem:[#allocation2 + $0x640] sm:$0xff]  ;;  %3186 = vmatprep.subr.bf16.mxu0 %v3185_v19 }
  0x46   :  { %v756_v24 = vld [vmem:[#allocation2 + $0x1648] sm:$0xff]  ;;  %v747_v33 = vld [vmem:[#allocation2 + $0x1600] sm:$0xff]  ;;  %v4503_v34 = vcombine.high %v4490_v25, %v4490_v25  ;;  %v3063_v42 = vpack.c.bf16 %v243_v32, %v235_v31  ;;  %3188 = vmatpush1.bf16.msra.mxu0 %v3187_v29  ;;  %v4516_v22 = vrot.slane %v1111_v14, %v4481_v11 }
  0x47   :  { %v4495_v26 = vld [vmem:[%s5480_s0 + $0x8] sm:$0xff]  ;;  %v3189_v35 = vpack.c.bf16 %v756_v24, %v748_v23  ;;  %v755_v36 = vld [vmem:[#allocation2 + $0x1640] sm:$0xff]  ;;  %3062 = vmatprep.subr.bf16.mxu1 %v3061_v30 }
  0x48   :  { %v4499_v28 = vrot.slane %v4495_v26, %v4481_v11  ;;  %v252_v37 = vld [vmem:[#allocation2 + $0x688] sm:$0xff]  ;;  %1217 = vmatprep.mubr.f32.mxu1 %v4503_v34  ;;  %v3191_v43 = vpack.c.bf16 %v755_v36, %v747_v33  ;;  %v251_v45 = vld [vmem:[#allocation2 + $0x680] sm:$0xff]  ;;  %3064 = vmatpush1.bf16.msra.mxu1 %v3063_v42  ;;  %v1128_v17 = vcombine.high %v4495_v26, %v4495_v26 }
  0x49   :  { %v260_v38 = vld [vmem:[#allocation2 + $0x6c8] sm:$0xff]  ;;  %v259_v46 = vld [vmem:[#allocation2 + $0x6c0] sm:$0xff]  ;;  %3190 = vmatprep.subr.bf16.mxu0 %v3189_v35 }
  0x4a   :  { %v4507_v39 = vcombine.high %v4499_v28, %v4499_v28  ;;  %v764_v40 = vld [vmem:[#allocation2 + $0x1688] sm:$0xff]  ;;  %v3065_v44 = vpack.c.bf16 %v260_v38, %v252_v37  ;;  %v763_v47 = vld [vmem:[#allocation2 + $0x1680] sm:$0xff]  ;;  %v3067_v54 = vpack.c.bf16 %v259_v46, %v251_v45  ;;  %3192 = vmatpush1.bf16.msra.mxu0 %v3191_v43  ;;  %v4519_v26 = vrot.slane %v1128_v17, %v4481_v11 }
  0x4b   :  { %v772_v41 = vld [vmem:[#allocation2 + $0x16c8] sm:$0xff]  ;;  %v771_v49 = vld [vmem:[#allocation2 + $0x16c0] sm:$0xff]  ;;  %v4523_v46 = vcombine.high %v4516_v22, %v4516_v22 }
  0x4c   :  { %1359 = vmatprep.mubr.f32.mxu0 %v4507_v39  ;;  %v3193_v48 = vpack.c.bf16 %v772_v41, %v764_v40  ;;  %v268_v50 = vld [vmem:[#allocation2 + $0x708] sm:$0xff]  ;;  %3066 = vmatprep.subr.bf16.mxu1 %v3065_v44  ;;  %v3195_v55 = vpack.c.bf16 %v771_v49, %v763_v47  ;;  %v267_v57 = vld [vmem:[#allocation2 + $0x700] sm:$0xff] }
  0x4d   :  { %v276_v51 = vld [vmem:[#allocation2 + $0x748] sm:$0xff]  ;;  %v275_v58 = vld [vmem:[#allocation2 + $0x740] sm:$0xff]  ;;  %3068 = vmatpush1.bf16.msra.mxu1 %v3067_v54 }
  0x4e   :  { %v780_v52 = vld [vmem:[#allocation2 + $0x1708] sm:$0xff]  ;;  %v3069_v56 = vpack.c.bf16 %v276_v51, %v268_v50  ;;  %v779_v59 = vld [vmem:[#allocation2 + $0x1700] sm:$0xff]  ;;  %3194 = vmatprep.subr.bf16.mxu0 %v3193_v48  ;;  %v3071_v3 = vpack.c.bf16 %v275_v58, %v267_v57  ;;  %v4528_v48 = vcombine.high %v4519_v26, %v4519_v26 }
  0x4f   :  { %v788_v53 = vld [vmem:[#allocation2 + $0x1748] sm:$0xff]  ;;  %v787_v62 = vld [vmem:[#allocation2 + $0x1740] sm:$0xff]  ;;  %3196 = vmatpush1.bf16.msra.mxu0 %v3195_v55 }
  0x50   :  { %v3197_v60 = vpack.c.bf16 %v788_v53, %v780_v52  ;;  %v284_v63 = vld [vmem:[#allocation2 + $0x788] sm:$0xff]  ;;  %3070 = vmatprep.subr.bf16.mxu1 %v3069_v56  ;;  %v3199_v4 = vpack.c.bf16 %v787_v62, %v779_v59  ;;  %v283_v6 = vld [vmem:[#allocation2 + $0x780] sm:$0xff] }
  0x51   :  { %v292_v0 = vld [vmem:[#allocation2 + $0x7c8] sm:$0xff]  ;;  %v291_v7 = vld [vmem:[#allocation2 + $0x7c0] sm:$0xff]  ;;  %3072 = vmatpush1.bf16.msra.mxu1 %v3071_v3 }
  0x52   :  { %v796_v1 = vld [vmem:[#allocation2 + $0x1788] sm:$0xff]  ;;  %v3073_v5 = vpack.c.bf16 %v292_v0, %v284_v63  ;;  %v795_v8 = vld [vmem:[#allocation2 + $0x1780] sm:$0xff]  ;;  %3198 = vmatprep.subr.bf16.mxu0 %v3197_v60  ;;  %v3075_v18 = vpack.c.bf16 %v291_v7, %v283_v6 }
  0x53   :  { %v804_v2 = vld [vmem:[#allocation2 + $0x17c8] sm:$0xff]  ;;  %v803_v10 = vld [vmem:[#allocation2 + $0x17c0] sm:$0xff]  ;;  %3200 = vmatpush1.bf16.msra.mxu0 %v3199_v4 }
  0x54   :  { %v3201_v9 = vpack.c.bf16 %v804_v2, %v796_v1  ;;  %v300_v12 = vld [vmem:[#allocation2 + $0x808] sm:$0xff]  ;;  %3074 = vmatprep.subr.bf16.mxu1 %v3073_v5  ;;  %v3203_v19 = vpack.c.bf16 %v803_v10, %v795_v8  ;;  %v299_v21 = vld [vmem:[#allocation2 + $0x800] sm:$0xff] }
  0x55   :  { %v308_v13 = vld [vmem:[#allocation2 + $0x848] sm:$0xff]  ;;  %v307_v23 = vld [vmem:[#allocation2 + $0x840] sm:$0xff]  ;;  %3076 = vmatpush1.bf16.msra.mxu1 %v3075_v18 }
  0x56   :  { %v812_v15 = vld [vmem:[#allocation2 + $0x1808] sm:$0xff]  ;;  %v3077_v20 = vpack.c.bf16 %v308_v13, %v300_v12  ;;  %v811_v24 = vld [vmem:[#allocation2 + $0x1800] sm:$0xff]  ;;  %3202 = vmatprep.subr.bf16.mxu0 %v3201_v9  ;;  %v3079_v35 = vpack.c.bf16 %v307_v23, %v299_v21 }
  0x57   :  { %v820_v16 = vld [vmem:[#allocation2 + $0x1848] sm:$0xff]  ;;  %v819_v29 = vld [vmem:[#allocation2 + $0x1840] sm:$0xff]  ;;  %3204 = vmatpush1.bf16.msra.mxu0 %v3203_v19 }
  0x58   :  { %v3205_v27 = vpack.c.bf16 %v820_v16, %v812_v15  ;;  %v316_v30 = vld [vmem:[#allocation2 + $0x888] sm:$0xff]  ;;  %3078 = vmatprep.subr.bf16.mxu1 %v3077_v20  ;;  %v3207_v36 = vpack.c.bf16 %v819_v29, %v811_v24  ;;  %v315_v38 = vld [vmem:[#allocation2 + $0x880] sm:$0xff]  ;;  %1218 = vmatmul.mubr.f32.vlgmr.msra.gmra.mrb[0].mxu1 %v4490_v25 }
  0x59   :  { %v324_v31 = vld [vmem:[#allocation2 + $0x8c8] sm:$0xff]  ;;  %v323_v40 = vld [vmem:[#allocation2 + $0x8c0] sm:$0xff]  ;;  %3080 = vmatpush1.bf16.msra.mxu1 %v3079_v35  ;;  %1288 = vmatprep.mubr.f32.mxu1 %v4523_v46 }
  0x5a   :  { %v828_v32 = vld [vmem:[#allocation2 + $0x1888] sm:$0xff]  ;;  %v3081_v37 = vpack.c.bf16 %v324_v31, %v316_v30  ;;  %v827_v41 = vld [vmem:[#allocation2 + $0x1880] sm:$0xff]  ;;  %3206 = vmatprep.subr.bf16.mxu0 %v3205_v27  ;;  %1360 = vmatmul.mubr.f32.vlgmr.msra.gmra.mrb[0].mxu0 %v4499_v28  ;;  %v3083_v49 = vpack.c.bf16 %v323_v40, %v315_v38 }
  0x5b   :  { %v836_v33 = vld [vmem:[#allocation2 + $0x18c8] sm:$0xff]  ;;  %v835_v43 = vld [vmem:[#allocation2 + $0x18c0] sm:$0xff]  ;;  %3208 = vmatpush1.bf16.msra.mxu0 %v3207_v36  ;;  %1430 = vmatprep.mubr.f32.mxu0 %v4528_v48 }
  0x5c   :  { %v3209_v42 = vpack.c.bf16 %v836_v33, %v828_v32  ;;  %v332_v44 = vld [vmem:[#allocation2 + $0x908] sm:$0xff]  ;;  %3082 = vmatprep.subr.bf16.mxu1 %v3081_v37  ;;  %v3211_v50 = vpack.c.bf16 %v835_v43, %v827_v41  ;;  %v331_v52 = vld [vmem:[#allocation2 + $0x900] sm:$0xff] }
  0x5d   :  { %v340_v45 = vld [vmem:[#allocation2 + $0x948] sm:$0xff]  ;;  %v339_v53 = vld [vmem:[#allocation2 + $0x940] sm:$0xff]  ;;  %3084 = vmatpush1.bf16.msra.mxu1 %v3083_v49 }
  0x5e   :  { %v844_v11 = vld [vmem:[#allocation2 + $0x1908] sm:$0xff]  ;;  %v3085_v51 = vpack.c.bf16 %v340_v45, %v332_v44  ;;  %v843_v54 = vld [vmem:[#allocation2 + $0x1900] sm:$0xff]  ;;  %3210 = vmatprep.subr.bf16.mxu0 %v3209_v42  ;;  %v3087_v62 = vpack.c.bf16 %v339_v53, %v331_v52 }
  0x5f   :  { %v852_v47 = vld [vmem:[#allocation2 + $0x1948] sm:$0xff]  ;;  %v851_v56 = vld [vmem:[#allocation2 + $0x1940] sm:$0xff]  ;;  %3212 = vmatpush1.bf16.msra.mxu0 %v3211_v50 }
  0x60   :  { %v3213_v55 = vpack.c.bf16 %v852_v47, %v844_v11  ;;  %v348_v57 = vld [vmem:[#allocation2 + $0x988] sm:$0xff]  ;;  %3086 = vmatprep.subr.bf16.mxu1 %v3085_v51  ;;  %v3215_v63 = vpack.c.bf16 %v851_v56, %v843_v54  ;;  %v347_v1 = vld [vmem:[#allocation2 + $0x980] sm:$0xff] }
  0x61   :  { %v356_v58 = vld [vmem:[#allocation2 + $0x9c8] sm:$0xff]  ;;  %v355_v2 = vld [vmem:[#allocation2 + $0x9c0] sm:$0xff]  ;;  %3088 = vmatpush1.bf16.msra.mxu1 %v3087_v62 }
  0x62   :  { %v860_v59 = vld [vmem:[#allocation2 + $0x1988] sm:$0xff]  ;;  %v3089_v0 = vpack.c.bf16 %v356_v58, %v348_v57  ;;  %v859_v3 = vld [vmem:[#allocation2 + $0x1980] sm:$0xff]  ;;  %3214 = vmatprep.subr.bf16.mxu0 %v3213_v55  ;;  %v3091_v10 = vpack.c.bf16 %v355_v2, %v347_v1 }
  0x63   :  { %v868_v60 = vld [vmem:[#allocation2 + $0x19c8] sm:$0xff]  ;;  %v867_v5 = vld [vmem:[#allocation2 + $0x19c0] sm:$0xff]  ;;  %3216 = vmatpush1.bf16.msra.mxu0 %v3215_v63 }
  0x64   :  { %v3217_v4 = vpack.c.bf16 %v868_v60, %v860_v59  ;;  %v364_v6 = vld [vmem:[#allocation2 + $0xa08] sm:$0xff]  ;;  %3090 = vmatprep.subr.bf16.mxu1 %v3089_v0  ;;  %v3219_v12 = vpack.c.bf16 %v867_v5, %v859_v3  ;;  %v363_v14 = vld [vmem:[#allocation2 + $0xa00] sm:$0xff] }
  0x65   :  { %v372_v7 = vld [vmem:[#allocation2 + $0xa48] sm:$0xff]  ;;  %v371_v15 = vld [vmem:[#allocation2 + $0xa40] sm:$0xff]  ;;  %3092 = vmatpush1.bf16.msra.mxu1 %v3091_v10 }
  0x66   :  { %v876_v8 = vld [vmem:[#allocation2 + $0x1a08] sm:$0xff]  ;;  %v3093_v13 = vpack.c.bf16 %v372_v7, %v364_v6  ;;  %v875_v16 = vld [vmem:[#allocation2 + $0x1a00] sm:$0xff]  ;;  %3218 = vmatprep.subr.bf16.mxu0 %v3217_v4  ;;  %v3095_v24 = vpack.c.bf16 %v371_v15, %v363_v14 }
  0x67   :  { %v884_v9 = vld [vmem:[#allocation2 + $0x1a48] sm:$0xff]  ;;  %v883_v18 = vld [vmem:[#allocation2 + $0x1a40] sm:$0xff]  ;;  %3220 = vmatpush1.bf16.msra.mxu0 %v3219_v12 }
  0x68   :  { %v3221_v17 = vpack.c.bf16 %v884_v9, %v876_v8  ;;  %v380_v19 = vld [vmem:[#allocation2 + $0xa88] sm:$0xff]  ;;  %3094 = vmatprep.subr.bf16.mxu1 %v3093_v13  ;;  %v3223_v27 = vpack.c.bf16 %v883_v18, %v875_v16  ;;  %v379_v30 = vld [vmem:[#allocation2 + $0xa80] sm:$0xff] }
  0x69   :  { %v388_v20 = vld [vmem:[#allocation2 + $0xac8] sm:$0xff]  ;;  %v387_v31 = vld [vmem:[#allocation2 + $0xac0] sm:$0xff]  ;;  %3096 = vmatpush1.bf16.msra.mxu1 %v3095_v24 }
  0x6a   :  { %v892_v21 = vld [vmem:[#allocation2 + $0x1a88] sm:$0xff]  ;;  %v3097_v29 = vpack.c.bf16 %v388_v20, %v380_v19  ;;  %v891_v32 = vld [vmem:[#allocation2 + $0x1a80] sm:$0xff]  ;;  %3222 = vmatprep.subr.bf16.mxu0 %v3221_v17  ;;  %v3099_v41 = vpack.c.bf16 %v387_v31, %v379_v30 }
  0x6b   :  { %v900_v23 = vld [vmem:[#allocation2 + $0x1ac8] sm:$0xff]  ;;  %v899_v35 = vld [vmem:[#allocation2 + $0x1ac0] sm:$0xff]  ;;  %3224 = vmatpush1.bf16.msra.mxu0 %v3223_v27 }
  0x6c   :  { %v3225_v33 = vpack.c.bf16 %v900_v23, %v892_v21  ;;  %v396_v36 = vld [vmem:[#allocation2 + $0xb08] sm:$0xff]  ;;  %3098 = vmatprep.subr.bf16.mxu1 %v3097_v29  ;;  %v3227_v42 = vpack.c.bf16 %v899_v35, %v891_v32  ;;  %v395_v44 = vld [vmem:[#allocation2 + $0xb00] sm:$0xff] }
  0x6d   :  { %v404_v37 = vld [vmem:[#allocation2 + $0xb48] sm:$0xff]  ;;  %v403_v45 = vld [vmem:[#allocation2 + $0xb40] sm:$0xff]  ;;  %3100 = vmatpush1.bf16.msra.mxu1 %v3099_v41 }
  0x6e   :  { %v908_v38 = vld [vmem:[#allocation2 + $0x1b08] sm:$0xff]  ;;  %v3101_v43 = vpack.c.bf16 %v404_v37, %v396_v36  ;;  %v907_v11 = vld [vmem:[#allocation2 + $0x1b00] sm:$0xff]  ;;  %3226 = vmatprep.subr.bf16.mxu0 %v3225_v33  ;;  %v3103_v54 = vpack.c.bf16 %v403_v45, %v395_v44 }
  0x6f   :  { %v916_v40 = vld [vmem:[#allocation2 + $0x1b48] sm:$0xff]  ;;  %v915_v49 = vld [vmem:[#allocation2 + $0x1b40] sm:$0xff]  ;;  %3228 = vmatpush1.bf16.msra.mxu0 %v3227_v42 }
  0x70   :  { %v3229_v47 = vpack.c.bf16 %v916_v40, %v908_v38  ;;  %v412_v50 = vld [vmem:[#allocation2 + $0xb88] sm:$0xff]  ;;  %3102 = vmatprep.subr.bf16.mxu1 %v3101_v43  ;;  %v3231_v55 = vpack.c.bf16 %v915_v49, %v907_v11  ;;  %v411_v57 = vld [vmem:[#allocation2 + $0xb80] sm:$0xff] }
  0x71   :  { %v420_v51 = vld [vmem:[#allocation2 + $0xbc8] sm:$0xff]  ;;  %v419_v58 = vld [vmem:[#allocation2 + $0xbc0] sm:$0xff]  ;;  %3104 = vmatpush1.bf16.msra.mxu1 %v3103_v54 }
  0x72   :  { %v924_v52 = vld [vmem:[#allocation2 + $0x1b88] sm:$0xff]  ;;  %v3105_v56 = vpack.c.bf16 %v420_v51, %v412_v50  ;;  %v923_v59 = vld [vmem:[#allocation2 + $0x1b80] sm:$0xff]  ;;  %3230 = vmatprep.subr.bf16.mxu0 %v3229_v47  ;;  %v3107_v3 = vpack.c.bf16 %v419_v58, %v411_v57 }
  0x73   :  { %v932_v53 = vld [vmem:[#allocation2 + $0x1bc8] sm:$0xff]  ;;  %v931_v62 = vld [vmem:[#allocation2 + $0x1bc0] sm:$0xff]  ;;  %3232 = vmatpush1.bf16.msra.mxu0 %v3231_v55 }
  0x74   :  { %v3233_v60 = vpack.c.bf16 %v932_v53, %v924_v52  ;;  %v428_v63 = vld [vmem:[#allocation2 + $0xc08] sm:$0xff]  ;;  %3106 = vmatprep.subr.bf16.mxu1 %v3105_v56  ;;  %v3235_v4 = vpack.c.bf16 %v931_v62, %v923_v59  ;;  %v427_v6 = vld [vmem:[#allocation2 + $0xc00] sm:$0xff] }
  0x75   :  { %v436_v0 = vld [vmem:[#allocation2 + $0xc48] sm:$0xff]  ;;  %v435_v7 = vld [vmem:[#allocation2 + $0xc40] sm:$0xff]  ;;  %3108 = vmatpush1.bf16.msra.mxu1 %v3107_v3 }
  0x76   :  { %v940_v1 = vld [vmem:[#allocation2 + $0x1c08] sm:$0xff]  ;;  %v3109_v5 = vpack.c.bf16 %v436_v0, %v428_v63  ;;  %v939_v8 = vld [vmem:[#allocation2 + $0x1c00] sm:$0xff]  ;;  %3234 = vmatprep.subr.bf16.mxu0 %v3233_v60  ;;  %v3111_v16 = vpack.c.bf16 %v435_v7, %v427_v6 }
  0x77   :  { %v948_v2 = vld [vmem:[#allocation2 + $0x1c48] sm:$0xff]  ;;  %v947_v10 = vld [vmem:[#allocation2 + $0x1c40] sm:$0xff]  ;;  %3236 = vmatpush1.bf16.msra.mxu0 %v3235_v4 }
  0x78   :  { %v3237_v9 = vpack.c.bf16 %v948_v2, %v940_v1  ;;  %v444_v12 = vld [vmem:[#allocation2 + $0xc88] sm:$0xff]  ;;  %3110 = vmatprep.subr.bf16.mxu1 %v3109_v5  ;;  %v3239_v17 = vpack.c.bf16 %v947_v10, %v939_v8  ;;  %v443_v19 = vld [vmem:[#allocation2 + $0xc80] sm:$0xff] }
  0x79   :  { %v452_v13 = vld [vmem:[#allocation2 + $0xcc8] sm:$0xff]  ;;  %v451_v20 = vld [vmem:[#allocation2 + $0xcc0] sm:$0xff]  ;;  %3112 = vmatpush1.bf16.msra.mxu1 %v3111_v16 }
  0x7a   :  { %v956_v14 = vld [vmem:[#allocation2 + $0x1c88] sm:$0xff]  ;;  %v3113_v18 = vpack.c.bf16 %v452_v13, %v444_v12  ;;  %v955_v21 = vld [vmem:[#allocation2 + $0x1c80] sm:$0xff]  ;;  %3238 = vmatprep.subr.bf16.mxu0 %v3237_v9  ;;  %v3115_v32 = vpack.c.bf16 %v451_v20, %v443_v19 }
  0x7b   :  { %v964_v15 = vld [vmem:[#allocation2 + $0x1cc8] sm:$0xff]  ;;  %v963_v24 = vld [vmem:[#allocation2 + $0x1cc0] sm:$0xff]  ;;  %3240 = vmatpush1.bf16.msra.mxu0 %v3239_v17 }
  0x7c   :  { %v3241_v23 = vpack.c.bf16 %v964_v15, %v956_v14  ;;  %v460_v27 = vld [vmem:[#allocation2 + $0xd08] sm:$0xff]  ;;  %3114 = vmatprep.subr.bf16.mxu1 %v3113_v18  ;;  %v3243_v33 = vpack.c.bf16 %v963_v24, %v955_v21  ;;  %v459_v36 = vld [vmem:[#allocation2 + $0xd00] sm:$0xff] }
  0x7d   :  { %v468_v29 = vld [vmem:[#allocation2 + $0xd48] sm:$0xff]  ;;  %v467_v37 = vld [vmem:[#allocation2 + $0xd40] sm:$0xff]  ;;  %3116 = vmatpush1.bf16.msra.mxu1 %v3115_v32 }
  0x7e   :  { %v972_v30 = vld [vmem:[#allocation2 + $0x1d08] sm:$0xff]  ;;  %v3117_v35 = vpack.c.bf16 %v468_v29, %v460_v27  ;;  %v971_v38 = vld [vmem:[#allocation2 + $0x1d00] sm:$0xff]  ;;  %3242 = vmatprep.subr.bf16.mxu0 %v3241_v23  ;;  %v3119_v11 = vpack.c.bf16 %v467_v37, %v459_v36 }
  0x7f   :  { %v980_v31 = vld [vmem:[#allocation2 + $0x1d48] sm:$0xff]  ;;  %v979_v41 = vld [vmem:[#allocation2 + $0x1d40] sm:$0xff]  ;;  %3244 = vmatpush1.bf16.msra.mxu0 %v3243_v33 }
  0x80   :  { %v3245_v40 = vpack.c.bf16 %v980_v31, %v972_v30  ;;  %v476_v42 = vld [vmem:[#allocation2 + $0xd88] sm:$0xff]  ;;  %3118 = vmatprep.subr.bf16.mxu1 %v3117_v35  ;;  %v3247_v47 = vpack.c.bf16 %v979_v41, %v971_v38  ;;  %v475_v50 = vld [vmem:[#allocation2 + $0xd80] sm:$0xff] }
  0x81   :  { %v484_v43 = vld [vmem:[#allocation2 + $0xdc8] sm:$0xff]  ;;  %v483_v51 = vld [vmem:[#allocation2 + $0xdc0] sm:$0xff]  ;;  %3120 = vmatpush1.bf16.msra.mxu1 %v3119_v11 }
  0x82   :  { %v988_v44 = vld [vmem:[#allocation2 + $0x1d88] sm:$0xff]  ;;  %v3121_v49 = vpack.c.bf16 %v484_v43, %v476_v42  ;;  %v987_v52 = vld [vmem:[#allocation2 + $0x1d80] sm:$0xff]  ;;  %3246 = vmatprep.subr.bf16.mxu0 %v3245_v40  ;;  %v3123_v59 = vpack.c.bf16 %v483_v51, %v475_v50 }
  0x83   :  { %v996_v45 = vld [vmem:[#allocation2 + $0x1dc8] sm:$0xff]  ;;  %v995_v54 = vld [vmem:[#allocation2 + $0x1dc0] sm:$0xff]  ;;  %3248 = vmatpush1.bf16.msra.mxu0 %v3247_v47  ;;  %v46_v47 = vld [vmem:[#allocation2 + $0x18] sm:$0xff] }
  0x84   :  { %v3249_v53 = vpack.c.bf16 %v996_v45, %v988_v44  ;;  %v492_v55 = vld [vmem:[#allocation2 + $0xe08] sm:$0xff]  ;;  %3122 = vmatprep.subr.bf16.mxu1 %v3121_v49  ;;  %v3251_v60 = vpack.c.bf16 %v995_v54, %v987_v52  ;;  %v491_v63 = vld [vmem:[#allocation2 + $0xe00] sm:$0xff]  ;;  %v54_v49 = vld [vmem:[#allocation2 + $0x58] sm:$0xff] }
  0x85   :  { %v500_v56 = vld [vmem:[#allocation2 + $0xe48] sm:$0xff]  ;;  %v499_v0 = vld [vmem:[#allocation2 + $0xe40] sm:$0xff]  ;;  %3124 = vmatpush1.bf16.msra.mxu1 %v3123_v59  ;;  %v3269_v54 = vpack.c.bf16 %v54_v49, %v46_v47  ;;  %v109_v47 = vld [vmem:[#allocation2 + $0x210] sm:$0xff] }
  0x86   :  { %v1004_v57 = vld [vmem:[#allocation2 + $0x1e08] sm:$0xff]  ;;  %v3125_v62 = vpack.c.bf16 %v500_v56, %v492_v55  ;;  %v1003_v1 = vld [vmem:[#allocation2 + $0x1e00] sm:$0xff]  ;;  %3250 = vmatprep.subr.bf16.mxu0 %v3249_v53  ;;  %v3127_v8 = vpack.c.bf16 %v499_v0, %v491_v63  ;;  %v45_v55 = vld [vmem:[#allocation2 + $0x10] sm:$0xff] }
  0x87   :  { %v1012_v58 = vld [vmem:[#allocation2 + $0x1e48] sm:$0xff]  ;;  %v1011_v3 = vld [vmem:[#allocation2 + $0x1e40] sm:$0xff]  ;;  %3252 = vmatpush1.bf16.msra.mxu0 %v3251_v60  ;;  %v53_v56 = vld [vmem:[#allocation2 + $0x50] sm:$0xff] }
  0x88   :  { %v3253_v2 = vpack.c.bf16 %v1012_v58, %v1004_v57  ;;  %v508_v4 = vld [vmem:[#allocation2 + $0xe88] sm:$0xff]  ;;  %3126 = vmatprep.subr.bf16.mxu1 %v3125_v62  ;;  %v3255_v9 = vpack.c.bf16 %v1011_v3, %v1003_v1  ;;  %v507_v12 = vld [vmem:[#allocation2 + $0xe80] sm:$0xff]  ;;  %v62_v60 = vld [vmem:[#allocation2 + $0x98] sm:$0xff]  ;;  %v3271_v1 = vpack.c.bf16 %v53_v56, %v45_v55 }
  0x89   :  { %v516_v5 = vld [vmem:[#allocation2 + $0xec8] sm:$0xff]  ;;  %v515_v13 = vld [vmem:[#allocation2 + $0xec0] sm:$0xff]  ;;  %3128 = vmatpush1.bf16.msra.mxu1 %v3127_v8  ;;  %v70_v62 = vld [vmem:[#allocation2 + $0xd8] sm:$0xff] }
  0x8a   :  { %v1020_v6 = vld [vmem:[#allocation2 + $0x1e88] sm:$0xff]  ;;  %v3129_v10 = vpack.c.bf16 %v516_v5, %v508_v4  ;;  %v1019_v14 = vld [vmem:[#allocation2 + $0x1e80] sm:$0xff]  ;;  %3254 = vmatprep.subr.bf16.mxu0 %v3253_v2  ;;  %v3131_v21 = vpack.c.bf16 %v515_v13, %v507_v12  ;;  %v3273_v3 = vpack.c.bf16 %v70_v62, %v62_v60  ;;  %v61_v4 = vld [vmem:[#allocation2 + $0x90] sm:$0xff] }
  0x8b   :  { %v1028_v7 = vld [vmem:[#allocation2 + $0x1ec8] sm:$0xff]  ;;  %v1027_v16 = vld [vmem:[#allocation2 + $0x1ec0] sm:$0xff]  ;;  %3256 = vmatpush1.bf16.msra.mxu0 %v3255_v9  ;;  %v69_v5 = vld [vmem:[#allocation2 + $0xd0] sm:$0xff] }
  0x8c   :  { %v3257_v15 = vpack.c.bf16 %v1028_v7, %v1020_v6  ;;  %v524_v17 = vld [vmem:[#allocation2 + $0xf08] sm:$0xff]  ;;  %3130 = vmatprep.subr.bf16.mxu1 %v3129_v10  ;;  %v3259_v23 = vpack.c.bf16 %v1027_v16, %v1019_v14  ;;  %v523_v27 = vld [vmem:[#allocation2 + $0xf00] sm:$0xff]  ;;  %v78_v9 = vld [vmem:[#allocation2 + $0x118] sm:$0xff]  ;;  %v3275_v14 = vpack.c.bf16 %v69_v5, %v61_v4 }
  0x8d   :  { %v532_v18 = vld [vmem:[#allocation2 + $0xf48] sm:$0xff]  ;;  %v531_v29 = vld [vmem:[#allocation2 + $0xf40] sm:$0xff]  ;;  %3132 = vmatpush1.bf16.msra.mxu1 %v3131_v21  ;;  %v86_v10 = vld [vmem:[#allocation2 + $0x158] sm:$0xff] }
  0x8e   :  { %v1036_v19 = vld [vmem:[#allocation2 + $0x1f08] sm:$0xff]  ;;  %v3133_v24 = vpack.c.bf16 %v532_v18, %v524_v17  ;;  %v1035_v30 = vld [vmem:[#allocation2 + $0x1f00] sm:$0xff]  ;;  %3258 = vmatprep.subr.bf16.mxu0 %v3257_v15  ;;  %v3135_v38 = vpack.c.bf16 %v531_v29, %v523_v27  ;;  %v3277_v16 = vpack.c.bf16 %v86_v10, %v78_v9  ;;  %v77_v17 = vld [vmem:[#allocation2 + $0x110] sm:$0xff] }
  0x8f   :  { %v1044_v20 = vld [vmem:[#allocation2 + $0x1f48] sm:$0xff]  ;;  %v1043_v32 = vld [vmem:[#allocation2 + $0x1f40] sm:$0xff]  ;;  %3260 = vmatpush1.bf16.msra.mxu0 %v3259_v23  ;;  %v85_v18 = vld [vmem:[#allocation2 + $0x150] sm:$0xff] }
  0x90   :  { %v3261_v31 = vpack.c.bf16 %v1044_v20, %v1036_v19  ;;  %v540_v33 = vld [vmem:[#allocation2 + $0xf88] sm:$0xff]  ;;  %3134 = vmatprep.subr.bf16.mxu1 %v3133_v24  ;;  %v3263_v40 = vpack.c.bf16 %v1043_v32, %v1035_v30  ;;  %v539_v42 = vld [vmem:[#allocation2 + $0xf80] sm:$0xff]  ;;  %v94_v23 = vld [vmem:[#allocation2 + $0x198] sm:$0xff]  ;;  %v3279_v30 = vpack.c.bf16 %v85_v18, %v77_v17 }
  0x91   :  { %v548_v35 = vld [vmem:[#allocation2 + $0xfc8] sm:$0xff]  ;;  %v547_v43 = vld [vmem:[#allocation2 + $0xfc0] sm:$0xff]  ;;  %3136 = vmatpush1.bf16.msra.mxu1 %v3135_v38  ;;  %v102_v24 = vld [vmem:[#allocation2 + $0x1d8] sm:$0xff] }
  0x92   :  { %v1052_v36 = vld [vmem:[#allocation2 + $0x1f88] sm:$0xff]  ;;  %v3137_v41 = vpack.c.bf16 %v548_v35, %v540_v33  ;;  %v1051_v44 = vld [vmem:[#allocation2 + $0x1f80] sm:$0xff]  ;;  %3262 = vmatprep.subr.bf16.mxu0 %v3261_v31  ;;  %v3139_v52 = vpack.c.bf16 %v547_v43, %v539_v42  ;;  %v3281_v32 = vpack.c.bf16 %v102_v24, %v94_v23  ;;  %v93_v33 = vld [vmem:[#allocation2 + $0x190] sm:$0xff] }
  0x93   :  { %v1060_v37 = vld [vmem:[#allocation2 + $0x1fc8] sm:$0xff]  ;;  %v1059_v11 = vld [vmem:[#allocation2 + $0x1fc0] sm:$0xff]  ;;  %3264 = vmatpush1.bf16.msra.mxu0 %v3263_v40  ;;  %v101_v35 = vld [vmem:[#allocation2 + $0x1d0] sm:$0xff] }
  0x94   :  { %v3265_v45 = vpack.c.bf16 %v1060_v37, %v1052_v36  ;;  %v48_v50 = vld [vmem:[#allocation2 + $0x28] sm:$0xff]  ;;  %3138 = vmatprep.subr.bf16.mxu1 %v3137_v41  ;;  %v3267_v53 = vpack.c.bf16 %v1059_v11, %v1051_v44  ;;  %v47_v57 = vld [vmem:[#allocation2 + $0x20] sm:$0xff]  ;;  %v110_v40 = vld [vmem:[#allocation2 + $0x218] sm:$0xff]  ;;  %v3283_v44 = vpack.c.bf16 %v101_v35, %v93_v33 }
  0x95   :  { %v56_v51 = vld [vmem:[#allocation2 + $0x68] sm:$0xff]  ;;  %v55_v59 = vld [vmem:[#allocation2 + $0x60] sm:$0xff]  ;;  %3140 = vmatpush1.bf16.msra.mxu1 %v3139_v52  ;;  %v118_v41 = vld [vmem:[#allocation2 + $0x258] sm:$0xff] }
  0x96   :  { %3266 = vmatprep.subr.bf16.mxu0 %v3265_v45  ;;  %v3525_v58 = vpack.c.bf16 %v56_v51, %v48_v50  ;;  %v64_v63 = vld [vmem:[#allocation2 + $0xa8] sm:$0xff]  ;;  %3270 = vmatprep.subr.bf16.mxu1 %v3269_v54  ;;  %v3527_v2 = vpack.c.bf16 %v55_v59, %v47_v57  ;;  %v63_v6 = vld [vmem:[#allocation2 + $0xa0] sm:$0xff]  ;;  %v3285_v11 = vpack.c.bf16 %v118_v41, %v110_v40  ;;  %v117_v49 = vld [vmem:[#allocation2 + $0x250] sm:$0xff] }
  0x97   :  { %v72_v0 = vld [vmem:[#allocation2 + $0xe8] sm:$0xff]  ;;  %3268 = vmatpush1.bf16.msra.mxu0 %v3267_v53  ;;  %v71_v8 = vld [vmem:[#allocation2 + $0xe0] sm:$0xff]  ;;  %v126_v53 = vld [vmem:[#allocation2 + $0x298] sm:$0xff]  ;;  %v3287_v57 = vpack.c.bf16 %v117_v49, %v109_v47 }
  0x98   :  { %3526 = vmatprep.subr.bf16.mxu0 %v3525_v58  ;;  %v3529_v7 = vpack.c.bf16 %v72_v0, %v64_v63  ;;  %1289 = vmatmul.mubr.f32.vlgmr.msra.gmra.mrb[0].mxu1 %v4516_v22  ;;  %v80_v12 = vld [vmem:[#allocation2 + $0x128] sm:$0xff]  ;;  %v3531_v15 = vpack.c.bf16 %v71_v8, %v63_v6  ;;  %v79_v19 = vld [vmem:[#allocation2 + $0x120] sm:$0xff]  ;;  %v134_v54 = vld [vmem:[#allocation2 + $0x2d8] sm:$0xff] }
  0x99   :  { %v88_v13 = vld [vmem:[#allocation2 + $0x168] sm:$0xff]  ;;  %3272 = vmatpush1.bf16.msra.mxu1 %v3271_v1  ;;  %v87_v21 = vld [vmem:[#allocation2 + $0x160] sm:$0xff]  ;;  %1501 = vmatprep.mubr.f32.mxu1 %v4503_v34  ;;  %v3289_v59 = vpack.c.bf16 %v134_v54, %v126_v53  ;;  %v125_v60 = vld [vmem:[#allocation2 + $0x290] sm:$0xff] }
  0x9a   :  { %1431 = vmatmul.mubr.f32.vlgmr.msra.gmra.mrb[0].mxu0 %v4519_v26  ;;  %3274 = vmatprep.subr.bf16.mxu1 %v3273_v3  ;;  %v3533_v20 = vpack.c.bf16 %v88_v13, %v80_v12  ;;  %v96_v27 = vld [vmem:[#allocation2 + $0x1a8] sm:$0xff]  ;;  %v3535_v31 = vpack.c.bf16 %v87_v21, %v79_v19  ;;  %v95_v36 = vld [vmem:[#allocation2 + $0x1a0] sm:$0xff]  ;;  %v133_v62 = vld [vmem:[#allocation2 + $0x2d0] sm:$0xff] }
  0x9b   :  { %3528 = vmatpush1.bf16.msra.mxu0 %v3527_v2  ;;  %v104_v29 = vld [vmem:[#allocation2 + $0x1e8] sm:$0xff]  ;;  %1785 = vmatprep.mubr.f32.mxu0 %v4503_v34  ;;  %v103_v38 = vld [vmem:[#allocation2 + $0x1e0] sm:$0xff]  ;;  %v142_v2 = vld [vmem:[#allocation2 + $0x318] sm:$0xff]  ;;  %v3291_v6 = vpack.c.bf16 %v133_v62, %v125_v60 }
  0x9c   :  { %3530 = vmatprep.subr.bf16.mxu0 %v3529_v7  ;;  %v3537_v37 = vpack.c.bf16 %v104_v29, %v96_v27  ;;  %v112_v42 = vld [vmem:[#allocation2 + $0x228] sm:$0xff]  ;;  %v3539_v45 = vpack.c.bf16 %v103_v38, %v95_v36  ;;  %v111_v50 = vld [vmem:[#allocation2 + $0x220] sm:$0xff]  ;;  %v150_v3 = vld [vmem:[#allocation2 + $0x358] sm:$0xff] }
  0x9d   :  { %3276 = vmatpush1.bf16.msra.mxu1 %v3275_v14  ;;  %v120_v43 = vld [vmem:[#allocation2 + $0x268] sm:$0xff]  ;;  %v119_v52 = vld [vmem:[#allocation2 + $0x260] sm:$0xff]  ;;  %v3293_v8 = vpack.c.bf16 %v150_v3, %v142_v2  ;;  %v141_v9 = vld [vmem:[#allocation2 + $0x310] sm:$0xff] }
  0x9e   :  { %3278 = vmatprep.subr.bf16.mxu1 %v3277_v16  ;;  %v3541_v51 = vpack.c.bf16 %v120_v43, %v112_v42  ;;  %v128_v55 = vld [vmem:[#allocation2 + $0x2a8] sm:$0xff]  ;;  %v3543_v58 = vpack.c.bf16 %v119_v52, %v111_v50  ;;  %v127_v63 = vld [vmem:[#allocation2 + $0x2a0] sm:$0xff]  ;;  %v149_v10 = vld [vmem:[#allocation2 + $0x350] sm:$0xff] }
  0x9f   :  { %3532 = vmatpush1.bf16.msra.mxu0 %v3531_v15  ;;  %v136_v56 = vld [vmem:[#allocation2 + $0x2e8] sm:$0xff]  ;;  %v135_v1 = vld [vmem:[#allocation2 + $0x2e0] sm:$0xff]  ;;  %v158_v15 = vld [vmem:[#allocation2 + $0x398] sm:$0xff]  ;;  %v3295_v19 = vpack.c.bf16 %v149_v10, %v141_v9 }
  0xa0   :  { %3534 = vmatprep.subr.bf16.mxu0 %v3533_v20  ;;  %v3545_v0 = vpack.c.bf16 %v136_v56, %v128_v55  ;;  %v144_v4 = vld [vmem:[#allocation2 + $0x328] sm:$0xff]  ;;  %v3547_v7 = vpack.c.bf16 %v135_v1, %v127_v63  ;;  %v143_v12 = vld [vmem:[#allocation2 + $0x320] sm:$0xff]  ;;  %v166_v16 = vld [vmem:[#allocation2 + $0x3d8] sm:$0xff] }
  0xa1   :  { %3280 = vmatpush1.bf16.msra.mxu1 %v3279_v30  ;;  %v152_v5 = vld [vmem:[#allocation2 + $0x368] sm:$0xff]  ;;  %v151_v14 = vld [vmem:[#allocation2 + $0x360] sm:$0xff]  ;;  %v3297_v21 = vpack.c.bf16 %v166_v16, %v158_v15  ;;  %v157_v23 = vld [vmem:[#allocation2 + $0x390] sm:$0xff] }
  0xa2   :  { %3282 = vmatprep.subr.bf16.mxu1 %v3281_v32  ;;  %v3549_v13 = vpack.c.bf16 %v152_v5, %v144_v4  ;;  %v160_v17 = vld [vmem:[#allocation2 + $0x3a8] sm:$0xff]  ;;  %v3551_v20 = vpack.c.bf16 %v151_v14, %v143_v12  ;;  %v165_v24 = vld [vmem:[#allocation2 + $0x3d0] sm:$0xff]  ;;  %v159_v27 = vld [vmem:[#allocation2 + $0x3a0] sm:$0xff] }
  0xa3   :  { %3536 = vmatpush1.bf16.msra.mxu0 %v3535_v31  ;;  %v168_v18 = vld [vmem:[#allocation2 + $0x3e8] sm:$0xff]  ;;  %v167_v30 = vld [vmem:[#allocation2 + $0x3e0] sm:$0xff]  ;;  %v174_v31 = vld [vmem:[#allocation2 + $0x418] sm:$0xff]  ;;  %v3299_v36 = vpack.c.bf16 %v165_v24, %v157_v23 }
  0xa4   :  { %3538 = vmatprep.subr.bf16.mxu0 %v3537_v37  ;;  %v3553_v29 = vpack.c.bf16 %v168_v18, %v160_v17  ;;  %v182_v32 = vld [vmem:[#allocation2 + $0x458] sm:$0xff]  ;;  %v176_v33 = vld [vmem:[#allocation2 + $0x428] sm:$0xff]  ;;  %v3555_v37 = vpack.c.bf16 %v167_v30, %v159_v27  ;;  %v173_v40 = vld [vmem:[#allocation2 + $0x410] sm:$0xff] }
  0xa5   :  { %3284 = vmatpush1.bf16.msra.mxu1 %v3283_v44  ;;  %v184_v35 = vld [vmem:[#allocation2 + $0x468] sm:$0xff]  ;;  %v3301_v38 = vpack.c.bf16 %v182_v32, %v174_v31  ;;  %v181_v41 = vld [vmem:[#allocation2 + $0x450] sm:$0xff]  ;;  %v175_v42 = vld [vmem:[#allocation2 + $0x420] sm:$0xff] }
  0xa6   :  { %3286 = vmatprep.subr.bf16.mxu1 %v3285_v11  ;;  %v3557_v43 = vpack.c.bf16 %v184_v35, %v176_v33  ;;  %v183_v44 = vld [vmem:[#allocation2 + $0x460] sm:$0xff]  ;;  %v198_v11 = vld [vmem:[#allocation2 + $0x4d8] sm:$0xff]  ;;  %v192_v47 = vld [vmem:[#allocation2 + $0x4a8] sm:$0xff]  ;;  %v3303_v50 = vpack.c.bf16 %v181_v41, %v173_v40 }
  0xa7   :  { %3540 = vmatpush1.bf16.msra.mxu0 %v3539_v45  ;;  %v190_v45 = vld [vmem:[#allocation2 + $0x498] sm:$0xff]  ;;  %v200_v49 = vld [vmem:[#allocation2 + $0x4e8] sm:$0xff]  ;;  %v189_v53 = vld [vmem:[#allocation2 + $0x490] sm:$0xff] }
  0xa8   :  { %3542 = vmatprep.subr.bf16.mxu0 %v3541_v51  ;;  %v3559_v51 = vpack.c.bf16 %v183_v44, %v175_v42  ;;  %v3305_v52 = vpack.c.bf16 %v198_v11, %v190_v45  ;;  %v197_v54 = vld [vmem:[#allocation2 + $0x4d0] sm:$0xff]  ;;  %v191_v55 = vld [vmem:[#allocation2 + $0x4a0] sm:$0xff]  ;;  %v3561_v56 = vpack.c.bf16 %v200_v49, %v192_v47  ;;  %v208_v60 = vld [vmem:[#allocation2 + $0x528] sm:$0xff] }
  0xa9   :  { %3288 = vmatpush1.bf16.msra.mxu1 %v3287_v57  ;;  %v199_v57 = vld [vmem:[#allocation2 + $0x4e0] sm:$0xff]  ;;  %v216_v62 = vld [vmem:[#allocation2 + $0x568] sm:$0xff]  ;;  %v3307_v63 = vpack.c.bf16 %v197_v54, %v189_v53  ;;  %v205_v2 = vld [vmem:[#allocation2 + $0x510] sm:$0xff] }
  0xaa   :  { %3290 = vmatprep.subr.bf16.mxu1 %v3289_v59  ;;  %v214_v59 = vld [vmem:[#allocation2 + $0x558] sm:$0xff]  ;;  %v213_v3 = vld [vmem:[#allocation2 + $0x550] sm:$0xff]  ;;  %v207_v4 = vld [vmem:[#allocation2 + $0x520] sm:$0xff]  ;;  %v3565_v5 = vpack.c.bf16 %v216_v62, %v208_v60 }
  0xab   :  { %3544 = vmatpush1.bf16.msra.mxu0 %v3543_v58  ;;  %v206_v58 = vld [vmem:[#allocation2 + $0x518] sm:$0xff]  ;;  %v224_v9 = vld [vmem:[#allocation2 + $0x5a8] sm:$0xff]  ;;  %v3311_v12 = vpack.c.bf16 %v213_v3, %v205_v2  ;;  %v221_v15 = vld [vmem:[#allocation2 + $0x590] sm:$0xff] }
  0xac   :  { %3546 = vmatprep.subr.bf16.mxu0 %v3545_v0  ;;  %v3563_v0 = vpack.c.bf16 %v199_v57, %v191_v55  ;;  %v3309_v1 = vpack.c.bf16 %v214_v59, %v206_v58  ;;  %v232_v10 = vld [vmem:[#allocation2 + $0x5e8] sm:$0xff]  ;;  %v229_v16 = vld [vmem:[#allocation2 + $0x5d0] sm:$0xff]  ;;  %v223_v17 = vld [vmem:[#allocation2 + $0x5a0] sm:$0xff] }
  0xad   :  { %3292 = vmatpush1.bf16.msra.mxu1 %v3291_v6  ;;  %v215_v6 = vld [vmem:[#allocation2 + $0x560] sm:$0xff]  ;;  %v3569_v18 = vpack.c.bf16 %v232_v10, %v224_v9  ;;  %v240_v23 = vld [vmem:[#allocation2 + $0x628] sm:$0xff]  ;;  %v3315_v27 = vpack.c.bf16 %v229_v16, %v221_v15  ;;  %v237_v31 = vld [vmem:[#allocation2 + $0x610] sm:$0xff] }
  0xae   :  { %3294 = vmatprep.subr.bf16.mxu1 %v3293_v8  ;;  %v230_v8 = vld [vmem:[#allocation2 + $0x5d8] sm:$0xff]  ;;  %v248_v24 = vld [vmem:[#allocation2 + $0x668] sm:$0xff]  ;;  %v245_v32 = vld [vmem:[#allocation2 + $0x650] sm:$0xff] }
  0xaf   :  { %3548 = vmatpush1.bf16.msra.mxu0 %v3547_v7  ;;  %v222_v7 = vld [vmem:[#allocation2 + $0x598] sm:$0xff]  ;;  %v239_v33 = vld [vmem:[#allocation2 + $0x620] sm:$0xff]  ;;  %v3573_v35 = vpack.c.bf16 %v248_v24, %v240_v23  ;;  %v256_v40 = vld [vmem:[#allocation2 + $0x6a8] sm:$0xff]  ;;  %v3319_v42 = vpack.c.bf16 %v245_v32, %v237_v31 }
  0xb0   :  { %3550 = vmatprep.subr.bf16.mxu0 %v3549_v13  ;;  %v3567_v13 = vpack.c.bf16 %v215_v6, %v207_v4  ;;  %v3313_v14 = vpack.c.bf16 %v230_v8, %v222_v7  ;;  %v264_v41 = vld [vmem:[#allocation2 + $0x6e8] sm:$0xff]  ;;  %v253_v45 = vld [vmem:[#allocation2 + $0x690] sm:$0xff]  ;;  %v255_v47 = vld [vmem:[#allocation2 + $0x6a0] sm:$0xff] }
  0xb1   :  { %3296 = vmatpush1.bf16.msra.mxu1 %v3295_v19  ;;  %v231_v19 = vld [vmem:[#allocation2 + $0x5e0] sm:$0xff]  ;;  %v261_v11 = vld [vmem:[#allocation2 + $0x6d0] sm:$0xff]  ;;  %v3577_v49 = vpack.c.bf16 %v264_v41, %v256_v40  ;;  %v272_v53 = vld [vmem:[#allocation2 + $0x728] sm:$0xff] }
  0xb2   :  { %3298 = vmatprep.subr.bf16.mxu1 %v3297_v21  ;;  %v246_v21 = vld [vmem:[#allocation2 + $0x658] sm:$0xff]  ;;  %v280_v54 = vld [vmem:[#allocation2 + $0x768] sm:$0xff]  ;;  %v3323_v55 = vpack.c.bf16 %v261_v11, %v253_v45  ;;  %v269_v58 = vld [vmem:[#allocation2 + $0x710] sm:$0xff] }
  0xb3   :  { %3552 = vmatpush1.bf16.msra.mxu0 %v3551_v20  ;;  %v238_v20 = vld [vmem:[#allocation2 + $0x618] sm:$0xff]  ;;  %v277_v59 = vld [vmem:[#allocation2 + $0x750] sm:$0xff]  ;;  %v271_v60 = vld [vmem:[#allocation2 + $0x720] sm:$0xff]  ;;  %v3581_v62 = vpack.c.bf16 %v280_v54, %v272_v53 }
  0xb4   :  { %3554 = vmatprep.subr.bf16.mxu0 %v3553_v29  ;;  %v3571_v29 = vpack.c.bf16 %v231_v19, %v223_v17  ;;  %v3317_v30 = vpack.c.bf16 %v246_v21, %v238_v20  ;;  %v288_v2 = vld [vmem:[#allocation2 + $0x7a8] sm:$0xff]  ;;  %v3327_v4 = vpack.c.bf16 %v277_v59, %v269_v58  ;;  %v285_v7 = vld [vmem:[#allocation2 + $0x790] sm:$0xff]  ;;  %v287_v9 = vld [vmem:[#allocation2 + $0x7a0] sm:$0xff] }
  0xb5   :  { %3300 = vmatpush1.bf16.msra.mxu1 %v3299_v36  ;;  %v247_v36 = vld [vmem:[#allocation2 + $0x660] sm:$0xff]  ;;  %v296_v3 = vld [vmem:[#allocation2 + $0x7e8] sm:$0xff]  ;;  %v293_v8 = vld [vmem:[#allocation2 + $0x7d0] sm:$0xff] }
  0xb6   :  { %3302 = vmatprep.subr.bf16.mxu1 %v3301_v38  ;;  %v262_v38 = vld [vmem:[#allocation2 + $0x6d8] sm:$0xff]  ;;  %v3585_v10 = vpack.c.bf16 %v296_v3, %v288_v2  ;;  %v304_v15 = vld [vmem:[#allocation2 + $0x828] sm:$0xff]  ;;  %v3331_v17 = vpack.c.bf16 %v293_v8, %v285_v7  ;;  %v301_v20 = vld [vmem:[#allocation2 + $0x810] sm:$0xff] }
  0xb7   :  { %3556 = vmatpush1.bf16.msra.mxu0 %v3555_v37  ;;  %v254_v37 = vld [vmem:[#allocation2 + $0x698] sm:$0xff]  ;;  %v312_v16 = vld [vmem:[#allocation2 + $0x868] sm:$0xff]  ;;  %v309_v21 = vld [vmem:[#allocation2 + $0x850] sm:$0xff] }
  0xb8   :  { %3558 = vmatprep.subr.bf16.mxu0 %v3557_v43  ;;  %v3575_v43 = vpack.c.bf16 %v247_v36, %v239_v33  ;;  %v3321_v44 = vpack.c.bf16 %v262_v38, %v254_v37  ;;  %v303_v23 = vld [vmem:[#allocation2 + $0x820] sm:$0xff]  ;;  %v3589_v24 = vpack.c.bf16 %v312_v16, %v304_v15  ;;  %v320_v31 = vld [vmem:[#allocation2 + $0x8a8] sm:$0xff]  ;;  %v3335_v33 = vpack.c.bf16 %v309_v21, %v301_v20  ;;  %v317_v37 = vld [vmem:[#allocation2 + $0x890] sm:$0xff] }
  0xb9   :  { %3304 = vmatpush1.bf16.msra.mxu1 %v3303_v50  ;;  %v263_v50 = vld [vmem:[#allocation2 + $0x6e0] sm:$0xff]  ;;  %v328_v32 = vld [vmem:[#allocation2 + $0x8e8] sm:$0xff]  ;;  %v325_v38 = vld [vmem:[#allocation2 + $0x8d0] sm:$0xff] }
  0xba   :  { %3306 = vmatprep.subr.bf16.mxu1 %v3305_v52  ;;  %v278_v52 = vld [vmem:[#allocation2 + $0x758] sm:$0xff]  ;;  %v319_v40 = vld [vmem:[#allocation2 + $0x8a0] sm:$0xff]  ;;  %v3593_v41 = vpack.c.bf16 %v328_v32, %v320_v31  ;;  %v336_v45 = vld [vmem:[#allocation2 + $0x928] sm:$0xff] }
  0xbb   :  { %3560 = vmatpush1.bf16.msra.mxu0 %v3559_v51  ;;  %v270_v51 = vld [vmem:[#allocation2 + $0x718] sm:$0xff]  ;;  %v344_v11 = vld [vmem:[#allocation2 + $0x968] sm:$0xff]  ;;  %v335_v53 = vld [vmem:[#allocation2 + $0x920] sm:$0xff] }
  0xbc   :  { %3562 = vmatprep.subr.bf16.mxu0 %v3561_v56  ;;  %v3579_v56 = vpack.c.bf16 %v263_v50, %v255_v47  ;;  %v3325_v57 = vpack.c.bf16 %v278_v52, %v270_v51  ;;  %v3339_v47 = vpack.c.bf16 %v325_v38, %v317_v37  ;;  %v333_v51 = vld [vmem:[#allocation2 + $0x910] sm:$0xff]  ;;  %v3597_v54 = vpack.c.bf16 %v344_v11, %v336_v45  ;;  %v352_v58 = vld [vmem:[#allocation2 + $0x9a8] sm:$0xff]  ;;  %v351_v2 = vld [vmem:[#allocation2 + $0x9a0] sm:$0xff] }
  0xbd   :  { %3308 = vmatpush1.bf16.msra.mxu1 %v3307_v63  ;;  %v279_v63 = vld [vmem:[#allocation2 + $0x760] sm:$0xff]  ;;  %v341_v52 = vld [vmem:[#allocation2 + $0x950] sm:$0xff]  ;;  %v360_v59 = vld [vmem:[#allocation2 + $0x9e8] sm:$0xff] }
  0xbe   :  { %3310 = vmatprep.subr.bf16.mxu1 %v3309_v1  ;;  %v294_v1 = vld [vmem:[#allocation2 + $0x7d8] sm:$0xff]  ;;  %v3601_v3 = vpack.c.bf16 %v360_v59, %v352_v58  ;;  %v368_v7 = vld [vmem:[#allocation2 + $0xa28] sm:$0xff]  ;;  %v367_v15 = vld [vmem:[#allocation2 + $0xa20] sm:$0xff] }
  0xbf   :  { %3564 = vmatpush1.bf16.msra.mxu0 %v3563_v0  ;;  %v286_v0 = vld [vmem:[#allocation2 + $0x798] sm:$0xff]  ;;  %v376_v8 = vld [vmem:[#allocation2 + $0xa68] sm:$0xff]  ;;  %v383_v31 = vld [vmem:[#allocation2 + $0xaa0] sm:$0xff] }
  0xc0   :  { %3566 = vmatprep.subr.bf16.mxu0 %v3565_v5  ;;  %v3583_v5 = vpack.c.bf16 %v279_v63, %v271_v60  ;;  %v3329_v6 = vpack.c.bf16 %v294_v1, %v286_v0  ;;  %v3343_v60 = vpack.c.bf16 %v341_v52, %v333_v51  ;;  %v349_v0 = vld [vmem:[#allocation2 + $0x990] sm:$0xff]  ;;  %v3605_v16 = vpack.c.bf16 %v376_v8, %v368_v7  ;;  %v384_v20 = vld [vmem:[#allocation2 + $0xaa8] sm:$0xff]  ;;  %v399_v45 = vld [vmem:[#allocation2 + $0xb20] sm:$0xff] }
  0xc1   :  { %3312 = vmatpush1.bf16.msra.mxu1 %v3311_v12  ;;  %v295_v12 = vld [vmem:[#allocation2 + $0x7e0] sm:$0xff]  ;;  %v357_v1 = vld [vmem:[#allocation2 + $0x9d0] sm:$0xff]  ;;  %v392_v21 = vld [vmem:[#allocation2 + $0xae8] sm:$0xff] }
  0xc2   :  { %3314 = vmatprep.subr.bf16.mxu1 %v3313_v14  ;;  %v310_v14 = vld [vmem:[#allocation2 + $0x858] sm:$0xff]  ;;  %v3609_v32 = vpack.c.bf16 %v392_v21, %v384_v20  ;;  %v400_v37 = vld [vmem:[#allocation2 + $0xb28] sm:$0xff]  ;;  %v415_v58 = vld [vmem:[#allocation2 + $0xba0] sm:$0xff] }
  0xc3   :  { %3568 = vmatpush1.bf16.msra.mxu0 %v3567_v13  ;;  %v302_v13 = vld [vmem:[#allocation2 + $0x818] sm:$0xff]  ;;  %v408_v38 = vld [vmem:[#allocation2 + $0xb68] sm:$0xff]  ;;  %v431_v7 = vld [vmem:[#allocation2 + $0xc20] sm:$0xff] }
  0xc4   :  { %3570 = vmatprep.subr.bf16.mxu0 %v3569_v18  ;;  %v3587_v18 = vpack.c.bf16 %v295_v12, %v287_v9  ;;  %v3333_v19 = vpack.c.bf16 %v310_v14, %v302_v13  ;;  %v3347_v9 = vpack.c.bf16 %v357_v1, %v349_v0  ;;  %v365_v13 = vld [vmem:[#allocation2 + $0xa10] sm:$0xff]  ;;  %v3613_v11 = vpack.c.bf16 %v408_v38, %v400_v37  ;;  %v416_v51 = vld [vmem:[#allocation2 + $0xba8] sm:$0xff]  ;;  %v447_v20 = vld [vmem:[#allocation2 + $0xca0] sm:$0xff] }
  0xc5   :  { %3316 = vmatpush1.bf16.msra.mxu1 %v3315_v27  ;;  %v311_v27 = vld [vmem:[#allocation2 + $0x860] sm:$0xff]  ;;  %v373_v14 = vld [vmem:[#allocation2 + $0xa50] sm:$0xff]  ;;  %v424_v52 = vld [vmem:[#allocation2 + $0xbe8] sm:$0xff] }
  0xc6   :  { %3318 = vmatprep.subr.bf16.mxu1 %v3317_v30  ;;  %v326_v30 = vld [vmem:[#allocation2 + $0x8d8] sm:$0xff]  ;;  %v3617_v59 = vpack.c.bf16 %v424_v52, %v416_v51  ;;  %v432_v0 = vld [vmem:[#allocation2 + $0xc28] sm:$0xff]  ;;  %v463_v37 = vld [vmem:[#allocation2 + $0xd20] sm:$0xff] }
  0xc7   :  { %3572 = vmatpush1.bf16.msra.mxu0 %v3571_v29  ;;  %v318_v29 = vld [vmem:[#allocation2 + $0x898] sm:$0xff]  ;;  %v440_v1 = vld [vmem:[#allocation2 + $0xc68] sm:$0xff]  ;;  %v479_v51 = vld [vmem:[#allocation2 + $0xda0] sm:$0xff] }
  0xc8   :  { %3574 = vmatprep.subr.bf16.mxu0 %v3573_v35  ;;  %v3591_v35 = vpack.c.bf16 %v311_v27, %v303_v23  ;;  %v3337_v36 = vpack.c.bf16 %v326_v30, %v318_v29  ;;  %v3351_v23 = vpack.c.bf16 %v373_v14, %v365_v13  ;;  %v381_v29 = vld [vmem:[#allocation2 + $0xa90] sm:$0xff]  ;;  %v3621_v8 = vpack.c.bf16 %v440_v1, %v432_v0  ;;  %v448_v13 = vld [vmem:[#allocation2 + $0xca8] sm:$0xff]  ;;  %v495_v0 = vld [vmem:[#allocation2 + $0xe20] sm:$0xff] }
  0xc9   :  { %3320 = vmatpush1.bf16.msra.mxu1 %v3319_v42  ;;  %v327_v42 = vld [vmem:[#allocation2 + $0x8e0] sm:$0xff]  ;;  %v389_v30 = vld [vmem:[#allocation2 + $0xad0] sm:$0xff]  ;;  %v456_v14 = vld [vmem:[#allocation2 + $0xce8] sm:$0xff] }
  0xca   :  { %3322 = vmatprep.subr.bf16.mxu1 %v3321_v44  ;;  %v342_v44 = vld [vmem:[#allocation2 + $0x958] sm:$0xff]  ;;  %v3625_v21 = vpack.c.bf16 %v456_v14, %v448_v13  ;;  %v511_v13 = vld [vmem:[#allocation2 + $0xea0] sm:$0xff] }
  0xcb   :  { %3576 = vmatpush1.bf16.msra.mxu0 %v3575_v43  ;;  %v334_v43 = vld [vmem:[#allocation2 + $0x918] sm:$0xff] }
  0xcc   :  { %3578 = vmatprep.subr.bf16.mxu0 %v3577_v49  ;;  %v3595_v49 = vpack.c.bf16 %v327_v42, %v319_v40  ;;  %v3341_v50 = vpack.c.bf16 %v342_v44, %v334_v43  ;;  %v3355_v40 = vpack.c.bf16 %v389_v30, %v381_v29  ;;  %v397_v43 = vld [vmem:[#allocation2 + $0xb10] sm:$0xff]  ;;  %v464_v29 = vld [vmem:[#allocation2 + $0xd28] sm:$0xff] }
  0xcd   :  { %3324 = vmatpush1.bf16.msra.mxu1 %v3323_v55  ;;  %v343_v55 = vld [vmem:[#allocation2 + $0x960] sm:$0xff]  ;;  %v405_v44 = vld [vmem:[#allocation2 + $0xb50] sm:$0xff]  ;;  %v472_v30 = vld [vmem:[#allocation2 + $0xd68] sm:$0xff] }
  0xce   :  { %3326 = vmatprep.subr.bf16.mxu1 %v3325_v57  ;;  %v358_v57 = vld [vmem:[#allocation2 + $0x9d8] sm:$0xff]  ;;  %v3629_v38 = vpack.c.bf16 %v472_v30, %v464_v29  ;;  %v527_v29 = vld [vmem:[#allocation2 + $0xf20] sm:$0xff] }
  0xcf   :  { %3580 = vmatpush1.bf16.msra.mxu0 %v3579_v56  ;;  %v350_v56 = vld [vmem:[#allocation2 + $0x998] sm:$0xff] }
  0xd0   :  { %3582 = vmatprep.subr.bf16.mxu0 %v3581_v62  ;;  %v3599_v62 = vpack.c.bf16 %v343_v55, %v335_v53  ;;  %v3345_v63 = vpack.c.bf16 %v358_v57, %v350_v56  ;;  %v3359_v53 = vpack.c.bf16 %v405_v44, %v397_v43  ;;  %v413_v56 = vld [vmem:[#allocation2 + $0xb90] sm:$0xff]  ;;  %v480_v43 = vld [vmem:[#allocation2 + $0xda8] sm:$0xff] }
  0xd1   :  { %3328 = vmatpush1.bf16.msra.mxu1 %v3327_v4  ;;  %v359_v4 = vld [vmem:[#allocation2 + $0x9e0] sm:$0xff]  ;;  %v421_v57 = vld [vmem:[#allocation2 + $0xbd0] sm:$0xff]  ;;  %v488_v44 = vld [vmem:[#allocation2 + $0xde8] sm:$0xff] }
  0xd2   :  { %3330 = vmatprep.subr.bf16.mxu1 %v3329_v6  ;;  %v374_v6 = vld [vmem:[#allocation2 + $0xa58] sm:$0xff]  ;;  %v3633_v52 = vpack.c.bf16 %v488_v44, %v480_v43  ;;  %v543_v43 = vld [vmem:[#allocation2 + $0xfa0] sm:$0xff] }
  0xd3   :  { %3584 = vmatpush1.bf16.msra.mxu0 %v3583_v5  ;;  %v366_v5 = vld [vmem:[#allocation2 + $0xa18] sm:$0xff] }
  0xd4   :  { %3586 = vmatprep.subr.bf16.mxu0 %v3585_v10  ;;  %v3603_v10 = vpack.c.bf16 %v359_v4, %v351_v2  ;;  %v3349_v12 = vpack.c.bf16 %v374_v6, %v366_v5  ;;  %v3363_v2 = vpack.c.bf16 %v421_v57, %v413_v56  ;;  %v429_v5 = vld [vmem:[#allocation2 + $0xc10] sm:$0xff]  ;;  %v496_v56 = vld [vmem:[#allocation2 + $0xe28] sm:$0xff] }
  0xd5   :  { %3332 = vmatpush1.bf16.msra.mxu1 %v3331_v17  ;;  %v375_v17 = vld [vmem:[#allocation2 + $0xa60] sm:$0xff]  ;;  %v437_v6 = vld [vmem:[#allocation2 + $0xc50] sm:$0xff]  ;;  %v504_v57 = vld [vmem:[#allocation2 + $0xe68] sm:$0xff] }
  0xd6   :  { %3334 = vmatprep.subr.bf16.mxu1 %v3333_v19  ;;  %v390_v19 = vld [vmem:[#allocation2 + $0xad8] sm:$0xff]  ;;  %v3637_v1 = vpack.c.bf16 %v504_v57, %v496_v56  ;;  %v559_v56 = vld [vmem:[#allocation2 + $0x1020] sm:$0xff] }
  0xd7   :  { %3588 = vmatpush1.bf16.msra.mxu0 %v3587_v18  ;;  %v382_v18 = vld [vmem:[#allocation2 + $0xa98] sm:$0xff] }
  0xd8   :  { %3590 = vmatprep.subr.bf16.mxu0 %v3589_v24  ;;  %1502 = vmatmul.mubr.f32.vlgmr.msra.gmra.mrb[2].mxu1 %v4490_v25  ;;  %v3607_v24 = vpack.c.bf16 %v375_v17, %v367_v15  ;;  %v3353_v27 = vpack.c.bf16 %v390_v19, %v382_v18  ;;  %v3367_v15 = vpack.c.bf16 %v437_v6, %v429_v5  ;;  %v445_v18 = vld [vmem:[#allocation2 + $0xc90] sm:$0xff]  ;;  %v512_v5 = vld [vmem:[#allocation2 + $0xea8] sm:$0xff] }
  0xd9   :  { %3336 = vmatpush1.bf16.msra.mxu1 %v3335_v33  ;;  %1572 = vmatprep.mubr.f32.mxu1 %v4523_v46  ;;  %v391_v33 = vld [vmem:[#allocation2 + $0xae0] sm:$0xff]  ;;  %v453_v19 = vld [vmem:[#allocation2 + $0xcd0] sm:$0xff]  ;;  %v520_v6 = vld [vmem:[#allocation2 + $0xee8] sm:$0xff] }
  0xda   :  { %1786 = vmatmul.mubr.f32.vlgmr.msra.gmra.mrb[2].mxu0 %v4490_v25  ;;  %3338 = vmatprep.subr.bf16.mxu1 %v3337_v36  ;;  %v406_v36 = vld [vmem:[#allocation2 + $0xb58] sm:$0xff]  ;;  %v3641_v14 = vpack.c.bf16 %v520_v6, %v512_v5  ;;  %v575_v5 = vld [vmem:[#allocation2 + $0x10a0] sm:$0xff] }
  0xdb   :  { %3592 = vmatpush1.bf16.msra.mxu0 %v3591_v35  ;;  %1856 = vmatprep.mubr.f32.mxu0 %v4523_v46  ;;  %v398_v35 = vld [vmem:[#allocation2 + $0xb18] sm:$0xff] }
  0xdc   :  { %3594 = vmatprep.subr.bf16.mxu0 %v3593_v41  ;;  %v3611_v41 = vpack.c.bf16 %v391_v33, %v383_v31  ;;  %v3357_v42 = vpack.c.bf16 %v406_v36, %v398_v35  ;;  %v3371_v31 = vpack.c.bf16 %v453_v19, %v445_v18  ;;  %v461_v35 = vld [vmem:[#allocation2 + $0xd10] sm:$0xff]  ;;  %v528_v18 = vld [vmem:[#allocation2 + $0xf28] sm:$0xff] }
  0xdd   :  { %3340 = vmatpush1.bf16.msra.mxu1 %v3339_v47  ;;  %v407_v47 = vld [vmem:[#allocation2 + $0xb60] sm:$0xff]  ;;  %v469_v36 = vld [vmem:[#allocation2 + $0xd50] sm:$0xff]  ;;  %v536_v19 = vld [vmem:[#allocation2 + $0xf68] sm:$0xff] }
  0xde   :  { %3342 = vmatprep.subr.bf16.mxu1 %v3341_v50  ;;  %v422_v50 = vld [vmem:[#allocation2 + $0xbd8] sm:$0xff]  ;;  %v3645_v30 = vpack.c.bf16 %v536_v19, %v528_v18  ;;  %v591_v18 = vld [vmem:[#allocation2 + $0x1120] sm:$0xff] }
  0xdf   :  { %3596 = vmatpush1.bf16.msra.mxu0 %v3595_v49  ;;  %v414_v49 = vld [vmem:[#allocation2 + $0xb98] sm:$0xff] }
  0xe0   :  { %3598 = vmatprep.subr.bf16.mxu0 %v3597_v54  ;;  %v3615_v54 = vpack.c.bf16 %v407_v47, %v399_v45  ;;  %v3361_v55 = vpack.c.bf16 %v422_v50, %v414_v49  ;;  %v3375_v45 = vpack.c.bf16 %v469_v36, %v461_v35  ;;  %v477_v49 = vld [vmem:[#allocation2 + $0xd90] sm:$0xff]  ;;  %v544_v35 = vld [vmem:[#allocation2 + $0xfa8] sm:$0xff] }
  0xe1   :  { %3344 = vmatpush1.bf16.msra.mxu1 %v3343_v60  ;;  %v423_v60 = vld [vmem:[#allocation2 + $0xbe0] sm:$0xff]  ;;  %v485_v50 = vld [vmem:[#allocation2 + $0xdd0] sm:$0xff]  ;;  %v552_v36 = vld [vmem:[#allocation2 + $0xfe8] sm:$0xff] }
  0xe2   :  { %3346 = vmatprep.subr.bf16.mxu1 %v3345_v63  ;;  %v438_v63 = vld [vmem:[#allocation2 + $0xc58] sm:$0xff]  ;;  %v3649_v44 = vpack.c.bf16 %v552_v36, %v544_v35  ;;  %v607_v35 = vld [vmem:[#allocation2 + $0x11a0] sm:$0xff] }
  0xe3   :  { %3600 = vmatpush1.bf16.msra.mxu0 %v3599_v62  ;;  %v430_v62 = vld [vmem:[#allocation2 + $0xc18] sm:$0xff] }
  0xe4   :  { %3602 = vmatprep.subr.bf16.mxu0 %v3601_v3  ;;  %v3619_v3 = vpack.c.bf16 %v423_v60, %v415_v58  ;;  %v3365_v4 = vpack.c.bf16 %v438_v63, %v430_v62  ;;  %v3379_v58 = vpack.c.bf16 %v485_v50, %v477_v49  ;;  %v493_v62 = vld [vmem:[#allocation2 + $0xe10] sm:$0xff]  ;;  %v560_v49 = vld [vmem:[#allocation2 + $0x1028] sm:$0xff] }
  0xe5   :  { %3348 = vmatpush1.bf16.msra.mxu1 %v3347_v9  ;;  %v439_v9 = vld [vmem:[#allocation2 + $0xc60] sm:$0xff]  ;;  %v501_v63 = vld [vmem:[#allocation2 + $0xe50] sm:$0xff]  ;;  %v568_v50 = vld [vmem:[#allocation2 + $0x1068] sm:$0xff] }
  0xe6   :  { %3350 = vmatprep.subr.bf16.mxu1 %v3349_v12  ;;  %v454_v12 = vld [vmem:[#allocation2 + $0xcd8] sm:$0xff]  ;;  %v3653_v57 = vpack.c.bf16 %v568_v50, %v560_v49  ;;  %v623_v49 = vld [vmem:[#allocation2 + $0x1220] sm:$0xff] }
  0xe7   :  { %3604 = vmatpush1.bf16.msra.mxu0 %v3603_v10  ;;  %v446_v10 = vld [vmem:[#allocation2 + $0xc98] sm:$0xff] }
  0xe8   :  { %3606 = vmatprep.subr.bf16.mxu0 %v3605_v16  ;;  %v3623_v16 = vpack.c.bf16 %v439_v9, %v431_v7  ;;  %v3369_v17 = vpack.c.bf16 %v454_v12, %v446_v10  ;;  %v3383_v7 = vpack.c.bf16 %v501_v63, %v493_v62  ;;  %v509_v10 = vld [vmem:[#allocation2 + $0xe90] sm:$0xff]  ;;  %v576_v62 = vld [vmem:[#allocation2 + $0x10a8] sm:$0xff] }
  0xe9   :  { %3352 = vmatpush1.bf16.msra.mxu1 %v3351_v23  ;;  %v455_v23 = vld [vmem:[#allocation2 + $0xce0] sm:$0xff]  ;;  %v517_v12 = vld [vmem:[#allocation2 + $0xed0] sm:$0xff]  ;;  %v584_v63 = vld [vmem:[#allocation2 + $0x10e8] sm:$0xff] }
  0xea   :  { %3354 = vmatprep.subr.bf16.mxu1 %v3353_v27  ;;  %v470_v27 = vld [vmem:[#allocation2 + $0xd58] sm:$0xff]  ;;  %v3657_v6 = vpack.c.bf16 %v584_v63, %v576_v62  ;;  %v639_v62 = vld [vmem:[#allocation2 + $0x12a0] sm:$0xff] }
  0xeb   :  { %3608 = vmatpush1.bf16.msra.mxu0 %v3607_v24  ;;  %v462_v24 = vld [vmem:[#allocation2 + $0xd18] sm:$0xff] }
  0xec   :  { %3610 = vmatprep.subr.bf16.mxu0 %v3609_v32  ;;  %v3627_v32 = vpack.c.bf16 %v455_v23, %v447_v20  ;;  %v3373_v33 = vpack.c.bf16 %v470_v27, %v462_v24  ;;  %v3387_v20 = vpack.c.bf16 %v517_v12, %v509_v10  ;;  %v525_v24 = vld [vmem:[#allocation2 + $0xf10] sm:$0xff]  ;;  %v592_v10 = vld [vmem:[#allocation2 + $0x1128] sm:$0xff] }
  0xed   :  { %3356 = vmatpush1.bf16.msra.mxu1 %v3355_v40  ;;  %v471_v40 = vld [vmem:[#allocation2 + $0xd60] sm:$0xff]  ;;  %v533_v27 = vld [vmem:[#allocation2 + $0xf50] sm:$0xff]  ;;  %v600_v12 = vld [vmem:[#allocation2 + $0x1168] sm:$0xff] }
  0xee   :  { %3358 = vmatprep.subr.bf16.mxu1 %v3357_v42  ;;  %v486_v42 = vld [vmem:[#allocation2 + $0xdd8] sm:$0xff]  ;;  %v3661_v19 = vpack.c.bf16 %v600_v12, %v592_v10  ;;  %v655_v10 = vld [vmem:[#allocation2 + $0x1320] sm:$0xff] }
  0xef   :  { %3612 = vmatpush1.bf16.msra.mxu0 %v3611_v41  ;;  %v478_v41 = vld [vmem:[#allocation2 + $0xd98] sm:$0xff] }
  0xf0   :  { %3614 = vmatprep.subr.bf16.mxu0 %v3613_v11  ;;  %v3631_v11 = vpack.c.bf16 %v471_v40, %v463_v37  ;;  %v3377_v47 = vpack.c.bf16 %v486_v42, %v478_v41  ;;  %v3391_v37 = vpack.c.bf16 %v533_v27, %v525_v24  ;;  %v541_v41 = vld [vmem:[#allocation2 + $0xf90] sm:$0xff]  ;;  %v608_v24 = vld [vmem:[#allocation2 + $0x11a8] sm:$0xff] }
  0xf1   :  { %3360 = vmatpush1.bf16.msra.mxu1 %v3359_v53  ;;  %v487_v53 = vld [vmem:[#allocation2 + $0xde0] sm:$0xff]  ;;  %v549_v42 = vld [vmem:[#allocation2 + $0xfd0] sm:$0xff]  ;;  %v616_v27 = vld [vmem:[#allocation2 + $0x11e8] sm:$0xff] }
  0xf2   :  { %3362 = vmatprep.subr.bf16.mxu1 %v3361_v55  ;;  %v502_v55 = vld [vmem:[#allocation2 + $0xe58] sm:$0xff]  ;;  %v3665_v36 = vpack.c.bf16 %v616_v27, %v608_v24  ;;  %v671_v24 = vld [vmem:[#allocation2 + $0x13a0] sm:$0xff] }
  0xf3   :  { %3616 = vmatpush1.bf16.msra.mxu0 %v3615_v54  ;;  %v494_v54 = vld [vmem:[#allocation2 + $0xe18] sm:$0xff] }
  0xf4   :  { %3618 = vmatprep.subr.bf16.mxu0 %v3617_v59  ;;  %v3635_v59 = vpack.c.bf16 %v487_v53, %v479_v51  ;;  %v3381_v60 = vpack.c.bf16 %v502_v55, %v494_v54  ;;  %v3395_v51 = vpack.c.bf16 %v549_v42, %v541_v41  ;;  %v557_v54 = vld [vmem:[#allocation2 + $0x1010] sm:$0xff]  ;;  %v624_v41 = vld [vmem:[#allocation2 + $0x1228] sm:$0xff] }
  0xf5   :  { %3364 = vmatpush1.bf16.msra.mxu1 %v3363_v2  ;;  %v503_v2 = vld [vmem:[#allocation2 + $0xe60] sm:$0xff]  ;;  %v565_v55 = vld [vmem:[#allocation2 + $0x1050] sm:$0xff]  ;;  %v632_v42 = vld [vmem:[#allocation2 + $0x1268] sm:$0xff] }
  0xf6   :  { %3366 = vmatprep.subr.bf16.mxu1 %v3365_v4  ;;  %v518_v4 = vld [vmem:[#allocation2 + $0xed8] sm:$0xff]  ;;  %v3669_v50 = vpack.c.bf16 %v632_v42, %v624_v41  ;;  %v687_v41 = vld [vmem:[#allocation2 + $0x1420] sm:$0xff] }
  0xf7   :  { %3620 = vmatpush1.bf16.msra.mxu0 %v3619_v3  ;;  %v510_v3 = vld [vmem:[#allocation2 + $0xe98] sm:$0xff] }
  0xf8   :  { %3622 = vmatprep.subr.bf16.mxu0 %v3621_v8  ;;  %v3639_v8 = vpack.c.bf16 %v503_v2, %v495_v0  ;;  %v3385_v9 = vpack.c.bf16 %v518_v4, %v510_v3  ;;  %v3399_v0 = vpack.c.bf16 %v565_v55, %v557_v54  ;;  %v573_v3 = vld [vmem:[#allocation2 + $0x1090] sm:$0xff]  ;;  %v640_v54 = vld [vmem:[#allocation2 + $0x12a8] sm:$0xff] }
  0xf9   :  { %3368 = vmatpush1.bf16.msra.mxu1 %v3367_v15  ;;  %v519_v15 = vld [vmem:[#allocation2 + $0xee0] sm:$0xff]  ;;  %v581_v4 = vld [vmem:[#allocation2 + $0x10d0] sm:$0xff]  ;;  %v648_v55 = vld [vmem:[#allocation2 + $0x12e8] sm:$0xff] }
  0xfa   :  { %3370 = vmatprep.subr.bf16.mxu1 %v3369_v17  ;;  %v534_v17 = vld [vmem:[#allocation2 + $0xf58] sm:$0xff]  ;;  %v3673_v63 = vpack.c.bf16 %v648_v55, %v640_v54  ;;  %v703_v54 = vld [vmem:[#allocation2 + $0x14a0] sm:$0xff] }
  0xfb   :  { %3624 = vmatpush1.bf16.msra.mxu0 %v3623_v16  ;;  %v526_v16 = vld [vmem:[#allocation2 + $0xf18] sm:$0xff] }
  0xfc   :  { %3626 = vmatprep.subr.bf16.mxu0 %v3625_v21  ;;  %v3643_v21 = vpack.c.bf16 %v519_v15, %v511_v13  ;;  %v3389_v23 = vpack.c.bf16 %v534_v17, %v526_v16  ;;  %v3403_v13 = vpack.c.bf16 %v581_v4, %v573_v3  ;;  %v589_v16 = vld [vmem:[#allocation2 + $0x1110] sm:$0xff]  ;;  %v656_v3 = vld [vmem:[#allocation2 + $0x1328] sm:$0xff] }
  0xfd   :  { %3372 = vmatpush1.bf16.msra.mxu1 %v3371_v31  ;;  %v535_v31 = vld [vmem:[#allocation2 + $0xf60] sm:$0xff]  ;;  %v597_v17 = vld [vmem:[#allocation2 + $0x1150] sm:$0xff]  ;;  %v664_v4 = vld [vmem:[#allocation2 + $0x1368] sm:$0xff] }
  0xfe   :  { %3374 = vmatprep.subr.bf16.mxu1 %v3373_v33  ;;  %v550_v33 = vld [vmem:[#allocation2 + $0xfd8] sm:$0xff]  ;;  %v3677_v12 = vpack.c.bf16 %v664_v4, %v656_v3  ;;  %v719_v3 = vld [vmem:[#allocation2 + $0x1520] sm:$0xff] }
  0xff   :  { %3628 = vmatpush1.bf16.msra.mxu0 %v3627_v32  ;;  %v542_v32 = vld [vmem:[#allocation2 + $0xf98] sm:$0xff] }
 0x100   :  { %3630 = vmatprep.subr.bf16.mxu0 %v3629_v38  ;;  %v3647_v38 = vpack.c.bf16 %v535_v31, %v527_v29  ;;  %v3393_v40 = vpack.c.bf16 %v550_v33, %v542_v32  ;;  %v3407_v29 = vpack.c.bf16 %v597_v17, %v589_v16  ;;  %v605_v32 = vld [vmem:[#allocation2 + $0x1190] sm:$0xff]  ;;  %v672_v16 = vld [vmem:[#allocation2 + $0x13a8] sm:$0xff] }
 0x101   :  { %3376 = vmatpush1.bf16.msra.mxu1 %v3375_v45  ;;  %v551_v45 = vld [vmem:[#allocation2 + $0xfe0] sm:$0xff]  ;;  %v613_v33 = vld [vmem:[#allocation2 + $0x11d0] sm:$0xff]  ;;  %v680_v17 = vld [vmem:[#allocation2 + $0x13e8] sm:$0xff] }
 0x102   :  { %3378 = vmatprep.subr.bf16.mxu1 %v3377_v47  ;;  %v566_v47 = vld [vmem:[#allocation2 + $0x1058] sm:$0xff]  ;;  %v3681_v27 = vpack.c.bf16 %v680_v17, %v672_v16  ;;  %v735_v16 = vld [vmem:[#allocation2 + $0x15a0] sm:$0xff] }
 0x103   :  { %3632 = vmatpush1.bf16.msra.mxu0 %v3631_v11  ;;  %v558_v11 = vld [vmem:[#allocation2 + $0x1018] sm:$0xff] }
 0x104   :  { %3634 = vmatprep.subr.bf16.mxu0 %v3633_v52  ;;  %v3651_v52 = vpack.c.bf16 %v551_v45, %v543_v43  ;;  %v3397_v53 = vpack.c.bf16 %v566_v47, %v558_v11  ;;  %v3411_v43 = vpack.c.bf16 %v613_v33, %v605_v32  ;;  %v621_v11 = vld [vmem:[#allocation2 + $0x1210] sm:$0xff]  ;;  %v688_v32 = vld [vmem:[#allocation2 + $0x1428] sm:$0xff] }
 0x105   :  { %3380 = vmatpush1.bf16.msra.mxu1 %v3379_v58  ;;  %v567_v58 = vld [vmem:[#allocation2 + $0x1060] sm:$0xff]  ;;  %v629_v47 = vld [vmem:[#allocation2 + $0x1250] sm:$0xff]  ;;  %v696_v33 = vld [vmem:[#allocation2 + $0x1468] sm:$0xff] }
 0x106   :  { %3382 = vmatprep.subr.bf16.mxu1 %v3381_v60  ;;  %v582_v60 = vld [vmem:[#allocation2 + $0x10d8] sm:$0xff]  ;;  %v3685_v42 = vpack.c.bf16 %v696_v33, %v688_v32  ;;  %v751_v32 = vld [vmem:[#allocation2 + $0x1620] sm:$0xff] }
 0x107   :  { %3636 = vmatpush1.bf16.msra.mxu0 %v3635_v59  ;;  %v574_v59 = vld [vmem:[#allocation2 + $0x1098] sm:$0xff] }
 0x108   :  { %3638 = vmatprep.subr.bf16.mxu0 %v3637_v1  ;;  %v3655_v1 = vpack.c.bf16 %v567_v58, %v559_v56  ;;  %v3401_v2 = vpack.c.bf16 %v582_v60, %v574_v59  ;;  %v3415_v56 = vpack.c.bf16 %v629_v47, %v621_v11  ;;  %v637_v59 = vld [vmem:[#allocation2 + $0x1290] sm:$0xff]  ;;  %v704_v11 = vld [vmem:[#allocation2 + $0x14a8] sm:$0xff] }
 0x109   :  { %3384 = vmatpush1.bf16.msra.mxu1 %v3383_v7  ;;  %v583_v7 = vld [vmem:[#allocation2 + $0x10e0] sm:$0xff]  ;;  %v645_v60 = vld [vmem:[#allocation2 + $0x12d0] sm:$0xff]  ;;  %v712_v47 = vld [vmem:[#allocation2 + $0x14e8] sm:$0xff] }
 0x10a   :  { %3386 = vmatprep.subr.bf16.mxu1 %v3385_v9  ;;  %v598_v9 = vld [vmem:[#allocation2 + $0x1158] sm:$0xff]  ;;  %v3689_v55 = vpack.c.bf16 %v712_v47, %v704_v11  ;;  %v767_v11 = vld [vmem:[#allocation2 + $0x16a0] sm:$0xff] }
 0x10b   :  { %3640 = vmatpush1.bf16.msra.mxu0 %v3639_v8  ;;  %v590_v8 = vld [vmem:[#allocation2 + $0x1118] sm:$0xff] }
 0x10c   :  { %3642 = vmatprep.subr.bf16.mxu0 %v3641_v14  ;;  %v3659_v14 = vpack.c.bf16 %v583_v7, %v575_v5  ;;  %v3405_v15 = vpack.c.bf16 %v598_v9, %v590_v8  ;;  %v3419_v5 = vpack.c.bf16 %v645_v60, %v637_v59  ;;  %v653_v8 = vld [vmem:[#allocation2 + $0x1310] sm:$0xff]  ;;  %v720_v59 = vld [vmem:[#allocation2 + $0x1528] sm:$0xff] }
 0x10d   :  { %3388 = vmatpush1.bf16.msra.mxu1 %v3387_v20  ;;  %v599_v20 = vld [vmem:[#allocation2 + $0x1160] sm:$0xff]  ;;  %v661_v9 = vld [vmem:[#allocation2 + $0x1350] sm:$0xff]  ;;  %v728_v60 = vld [vmem:[#allocation2 + $0x1568] sm:$0xff] }
 0x10e   :  { %3390 = vmatprep.subr.bf16.mxu1 %v3389_v23  ;;  %v614_v23 = vld [vmem:[#allocation2 + $0x11d8] sm:$0xff]  ;;  %v3693_v4 = vpack.c.bf16 %v728_v60, %v720_v59  ;;  %v783_v59 = vld [vmem:[#allocation2 + $0x1720] sm:$0xff] }
 0x10f   :  { %3644 = vmatpush1.bf16.msra.mxu0 %v3643_v21  ;;  %v606_v21 = vld [vmem:[#allocation2 + $0x1198] sm:$0xff] }
 0x110   :  { %3646 = vmatprep.subr.bf16.mxu0 %v3645_v30  ;;  %v3663_v30 = vpack.c.bf16 %v599_v20, %v591_v18  ;;  %v3409_v31 = vpack.c.bf16 %v614_v23, %v606_v21  ;;  %v3423_v18 = vpack.c.bf16 %v661_v9, %v653_v8  ;;  %v669_v21 = vld [vmem:[#allocation2 + $0x1390] sm:$0xff]  ;;  %v736_v8 = vld [vmem:[#allocation2 + $0x15a8] sm:$0xff] }
 0x111   :  { %3392 = vmatpush1.bf16.msra.mxu1 %v3391_v37  ;;  %v615_v37 = vld [vmem:[#allocation2 + $0x11e0] sm:$0xff]  ;;  %v677_v23 = vld [vmem:[#allocation2 + $0x13d0] sm:$0xff]  ;;  %v744_v9 = vld [vmem:[#allocation2 + $0x15e8] sm:$0xff] }
 0x112   :  { %3394 = vmatprep.subr.bf16.mxu1 %v3393_v40  ;;  %v630_v40 = vld [vmem:[#allocation2 + $0x1258] sm:$0xff]  ;;  %v3697_v17 = vpack.c.bf16 %v744_v9, %v736_v8  ;;  %v799_v8 = vld [vmem:[#allocation2 + $0x17a0] sm:$0xff] }
 0x113   :  { %3648 = vmatpush1.bf16.msra.mxu0 %v3647_v38  ;;  %v622_v38 = vld [vmem:[#allocation2 + $0x1218] sm:$0xff] }
 0x114   :  { %3650 = vmatprep.subr.bf16.mxu0 %v3649_v44  ;;  %v3667_v44 = vpack.c.bf16 %v615_v37, %v607_v35  ;;  %v3413_v45 = vpack.c.bf16 %v630_v40, %v622_v38  ;;  %v3427_v35 = vpack.c.bf16 %v677_v23, %v669_v21  ;;  %v685_v38 = vld [vmem:[#allocation2 + $0x1410] sm:$0xff]  ;;  %v752_v21 = vld [vmem:[#allocation2 + $0x1628] sm:$0xff] }
 0x115   :  { %3396 = vmatpush1.bf16.msra.mxu1 %v3395_v51  ;;  %v631_v51 = vld [vmem:[#allocation2 + $0x1260] sm:$0xff]  ;;  %v693_v40 = vld [vmem:[#allocation2 + $0x1450] sm:$0xff]  ;;  %v760_v23 = vld [vmem:[#allocation2 + $0x1668] sm:$0xff] }
 0x116   :  { %3398 = vmatprep.subr.bf16.mxu1 %v3397_v53  ;;  %v646_v53 = vld [vmem:[#allocation2 + $0x12d8] sm:$0xff]  ;;  %v3701_v33 = vpack.c.bf16 %v760_v23, %v752_v21  ;;  %v815_v21 = vld [vmem:[#allocation2 + $0x1820] sm:$0xff] }
 0x117   :  { %3652 = vmatpush1.bf16.msra.mxu0 %v3651_v52  ;;  %v638_v52 = vld [vmem:[#allocation2 + $0x1298] sm:$0xff] }
 0x118   :  { %3654 = vmatprep.subr.bf16.mxu0 %v3653_v57  ;;  %1573 = vmatmul.mubr.f32.vlgmr.msra.gmra.mrb[2].mxu1 %v4516_v22  ;;  %v3671_v57 = vpack.c.bf16 %v631_v51, %v623_v49  ;;  %v3417_v58 = vpack.c.bf16 %v646_v53, %v638_v52  ;;  %v3431_v49 = vpack.c.bf16 %v693_v40, %v685_v38  ;;  %v701_v52 = vld [vmem:[#allocation2 + $0x1490] sm:$0xff]  ;;  %v768_v38 = vld [vmem:[#allocation2 + $0x16a8] sm:$0xff] }
 0x119   :  { %3400 = vmatpush1.bf16.msra.mxu1 %v3399_v0  ;;  %1643 = vmatprep.mubr.f32.mxu1 %v4507_v39  ;;  %v647_v0 = vld [vmem:[#allocation2 + $0x12e0] sm:$0xff]  ;;  %v709_v53 = vld [vmem:[#allocation2 + $0x14d0] sm:$0xff]  ;;  %v776_v40 = vld [vmem:[#allocation2 + $0x16e8] sm:$0xff] }
 0x11a   :  { %1857 = vmatmul.mubr.f32.vlgmr.msra.gmra.mrb[2].mxu0 %v4516_v22  ;;  %3402 = vmatprep.subr.bf16.mxu1 %v3401_v2  ;;  %v662_v2 = vld [vmem:[#allocation2 + $0x1358] sm:$0xff]  ;;  %v3705_v47 = vpack.c.bf16 %v776_v40, %v768_v38  ;;  %v831_v38 = vld [vmem:[#allocation2 + $0x18a0] sm:$0xff] }
 0x11b   :  { %3656 = vmatpush1.bf16.msra.mxu0 %v3655_v1  ;;  %1927 = vmatprep.mubr.f32.mxu0 %v4507_v39  ;;  %v654_v1 = vld [vmem:[#allocation2 + $0x1318] sm:$0xff] }
 0x11c   :  { %3658 = vmatprep.subr.bf16.mxu0 %v3657_v6  ;;  %v3675_v6 = vpack.c.bf16 %v647_v0, %v639_v62  ;;  %v3421_v7 = vpack.c.bf16 %v662_v2, %v654_v1  ;;  %v3435_v62 = vpack.c.bf16 %v709_v53, %v701_v52  ;;  %v717_v1 = vld [vmem:[#allocation2 + $0x1510] sm:$0xff]  ;;  %v784_v52 = vld [vmem:[#allocation2 + $0x1728] sm:$0xff] }
 0x11d   :  { %3404 = vmatpush1.bf16.msra.mxu1 %v3403_v13  ;;  %v663_v13 = vld [vmem:[#allocation2 + $0x1360] sm:$0xff]  ;;  %v725_v2 = vld [vmem:[#allocation2 + $0x1550] sm:$0xff]  ;;  %v792_v53 = vld [vmem:[#allocation2 + $0x1768] sm:$0xff] }
 0x11e   :  { %3406 = vmatprep.subr.bf16.mxu1 %v3405_v15  ;;  %v678_v15 = vld [vmem:[#allocation2 + $0x13d8] sm:$0xff]  ;;  %v3709_v60 = vpack.c.bf16 %v792_v53, %v784_v52  ;;  %v847_v52 = vld [vmem:[#allocation2 + $0x1920] sm:$0xff] }
 0x11f   :  { %3660 = vmatpush1.bf16.msra.mxu0 %v3659_v14  ;;  %v670_v14 = vld [vmem:[#allocation2 + $0x1398] sm:$0xff] }
 0x120   :  { %3662 = vmatprep.subr.bf16.mxu0 %v3661_v19  ;;  %v3679_v19 = vpack.c.bf16 %v663_v13, %v655_v10  ;;  %v3425_v20 = vpack.c.bf16 %v678_v15, %v670_v14  ;;  %v3439_v10 = vpack.c.bf16 %v725_v2, %v717_v1  ;;  %v733_v14 = vld [vmem:[#allocation2 + $0x1590] sm:$0xff]  ;;  %v800_v1 = vld [vmem:[#allocation2 + $0x17a8] sm:$0xff] }
 0x121   :  { %3408 = vmatpush1.bf16.msra.mxu1 %v3407_v29  ;;  %v679_v29 = vld [vmem:[#allocation2 + $0x13e0] sm:$0xff]  ;;  %v741_v15 = vld [vmem:[#allocation2 + $0x15d0] sm:$0xff]  ;;  %v808_v2 = vld [vmem:[#allocation2 + $0x17e8] sm:$0xff] }
 0x122   :  { %3410 = vmatprep.subr.bf16.mxu1 %v3409_v31  ;;  %v694_v31 = vld [vmem:[#allocation2 + $0x1458] sm:$0xff]  ;;  %v3713_v9 = vpack.c.bf16 %v808_v2, %v800_v1  ;;  %v863_v1 = vld [vmem:[#allocation2 + $0x19a0] sm:$0xff] }
 0x123   :  { %3664 = vmatpush1.bf16.msra.mxu0 %v3663_v30  ;;  %v686_v30 = vld [vmem:[#allocation2 + $0x1418] sm:$0xff] }
 0x124   :  { %3666 = vmatprep.subr.bf16.mxu0 %v3665_v36  ;;  %v3683_v36 = vpack.c.bf16 %v679_v29, %v671_v24  ;;  %v3429_v37 = vpack.c.bf16 %v694_v31, %v686_v30  ;;  %v3443_v24 = vpack.c.bf16 %v741_v15, %v733_v14  ;;  %v749_v30 = vld [vmem:[#allocation2 + $0x1610] sm:$0xff]  ;;  %v816_v14 = vld [vmem:[#allocation2 + $0x1828] sm:$0xff] }
 0x125   :  { %3412 = vmatpush1.bf16.msra.mxu1 %v3411_v43  ;;  %v695_v43 = vld [vmem:[#allocation2 + $0x1460] sm:$0xff]  ;;  %v757_v31 = vld [vmem:[#allocation2 + $0x1650] sm:$0xff]  ;;  %v824_v15 = vld [vmem:[#allocation2 + $0x1868] sm:$0xff] }
 0x126   :  { %3414 = vmatprep.subr.bf16.mxu1 %v3413_v45  ;;  %v710_v45 = vld [vmem:[#allocation2 + $0x14d8] sm:$0xff]  ;;  %v3717_v23 = vpack.c.bf16 %v824_v15, %v816_v14  ;;  %v879_v14 = vld [vmem:[#allocation2 + $0x1a20] sm:$0xff] }
 0x127   :  { %3668 = vmatpush1.bf16.msra.mxu0 %v3667_v44  ;;  %v702_v44 = vld [vmem:[#allocation2 + $0x1498] sm:$0xff] }
 0x128   :  { %3670 = vmatprep.subr.bf16.mxu0 %v3669_v50  ;;  %v3687_v50 = vpack.c.bf16 %v695_v43, %v687_v41  ;;  %v3433_v51 = vpack.c.bf16 %v710_v45, %v702_v44  ;;  %v3447_v41 = vpack.c.bf16 %v757_v31, %v749_v30  ;;  %v765_v44 = vld [vmem:[#allocation2 + $0x1690] sm:$0xff]  ;;  %v832_v30 = vld [vmem:[#allocation2 + $0x18a8] sm:$0xff] }
 0x129   :  { %3416 = vmatpush1.bf16.msra.mxu1 %v3415_v56  ;;  %v711_v56 = vld [vmem:[#allocation2 + $0x14e0] sm:$0xff]  ;;  %v773_v45 = vld [vmem:[#allocation2 + $0x16d0] sm:$0xff]  ;;  %v840_v31 = vld [vmem:[#allocation2 + $0x18e8] sm:$0xff] }
 0x12a   :  { %3418 = vmatprep.subr.bf16.mxu1 %v3417_v58  ;;  %v726_v58 = vld [vmem:[#allocation2 + $0x1558] sm:$0xff]  ;;  %v3721_v40 = vpack.c.bf16 %v840_v31, %v832_v30  ;;  %v893_v31 = vld [vmem:[#allocation2 + $0x1a90] sm:$0xff] }
 0x12b   :  { %3672 = vmatpush1.bf16.msra.mxu0 %v3671_v57  ;;  %v718_v57 = vld [vmem:[#allocation2 + $0x1518] sm:$0xff] }
 0x12c   :  { %3674 = vmatprep.subr.bf16.mxu0 %v3673_v63  ;;  %v3691_v63 = vpack.c.bf16 %v711_v56, %v703_v54  ;;  %v3437_v0 = vpack.c.bf16 %v726_v58, %v718_v57  ;;  %v3451_v54 = vpack.c.bf16 %v773_v45, %v765_v44  ;;  %v781_v57 = vld [vmem:[#allocation2 + $0x1710] sm:$0xff]  ;;  %v848_v44 = vld [vmem:[#allocation2 + $0x1928] sm:$0xff] }
 0x12d   :  { %3420 = vmatpush1.bf16.msra.mxu1 %v3419_v5  ;;  %v727_v5 = vld [vmem:[#allocation2 + $0x1560] sm:$0xff]  ;;  %v789_v58 = vld [vmem:[#allocation2 + $0x1750] sm:$0xff]  ;;  %v856_v45 = vld [vmem:[#allocation2 + $0x1968] sm:$0xff] }
 0x12e   :  { %3422 = vmatprep.subr.bf16.mxu1 %v3421_v7  ;;  %v742_v7 = vld [vmem:[#allocation2 + $0x15d8] sm:$0xff]  ;;  %v3725_v53 = vpack.c.bf16 %v856_v45, %v848_v44 }
 0x12f   :  { %3676 = vmatpush1.bf16.msra.mxu0 %v3675_v6  ;;  %v734_v6 = vld [vmem:[#allocation2 + $0x1598] sm:$0xff] }
 0x130   :  { %3678 = vmatprep.subr.bf16.mxu0 %v3677_v12  ;;  %v3695_v12 = vpack.c.bf16 %v727_v5, %v719_v3  ;;  %v3441_v13 = vpack.c.bf16 %v742_v7, %v734_v6  ;;  %v3455_v3 = vpack.c.bf16 %v789_v58, %v781_v57  ;;  %v797_v6 = vld [vmem:[#allocation2 + $0x1790] sm:$0xff]  ;;  %v864_v57 = vld [vmem:[#allocation2 + $0x19a8] sm:$0xff] }
 0x131   :  { %3424 = vmatpush1.bf16.msra.mxu1 %v3423_v18  ;;  %v743_v18 = vld [vmem:[#allocation2 + $0x15e0] sm:$0xff]  ;;  %v805_v7 = vld [vmem:[#allocation2 + $0x17d0] sm:$0xff]  ;;  %v872_v58 = vld [vmem:[#allocation2 + $0x19e8] sm:$0xff] }
 0x132   :  { %3426 = vmatprep.subr.bf16.mxu1 %v3425_v20  ;;  %v758_v20 = vld [vmem:[#allocation2 + $0x1658] sm:$0xff]  ;;  %v3729_v2 = vpack.c.bf16 %v872_v58, %v864_v57 }
 0x133   :  { %3680 = vmatpush1.bf16.msra.mxu0 %v3679_v19  ;;  %v750_v19 = vld [vmem:[#allocation2 + $0x1618] sm:$0xff] }
 0x134   :  { %3682 = vmatprep.subr.bf16.mxu0 %v3681_v27  ;;  %v3699_v27 = vpack.c.bf16 %v743_v18, %v735_v16  ;;  %v3445_v29 = vpack.c.bf16 %v758_v20, %v750_v19  ;;  %v3459_v16 = vpack.c.bf16 %v805_v7, %v797_v6  ;;  %v813_v19 = vld [vmem:[#allocation2 + $0x1810] sm:$0xff]  ;;  %v880_v6 = vld [vmem:[#allocation2 + $0x1a28] sm:$0xff] }
 0x135   :  { %3428 = vmatpush1.bf16.msra.mxu1 %v3427_v35  ;;  %v759_v35 = vld [vmem:[#allocation2 + $0x1660] sm:$0xff]  ;;  %v821_v20 = vld [vmem:[#allocation2 + $0x1850] sm:$0xff]  ;;  %v888_v7 = vld [vmem:[#allocation2 + $0x1a68] sm:$0xff] }
 0x136   :  { %3430 = vmatprep.subr.bf16.mxu1 %v3429_v37  ;;  %v774_v37 = vld [vmem:[#allocation2 + $0x16d8] sm:$0xff]  ;;  %v3733_v15 = vpack.c.bf16 %v888_v7, %v880_v6  ;;  %v927_v6 = vld [vmem:[#allocation2 + $0x1ba0] sm:$0xff] }
 0x137   :  { %3684 = vmatpush1.bf16.msra.mxu0 %v3683_v36  ;;  %v766_v36 = vld [vmem:[#allocation2 + $0x1698] sm:$0xff] }
 0x138   :  { %3686 = vmatprep.subr.bf16.mxu0 %v3685_v42  ;;  %v3703_v42 = vpack.c.bf16 %v759_v35, %v751_v32  ;;  %v3449_v43 = vpack.c.bf16 %v774_v37, %v766_v36  ;;  %v3463_v32 = vpack.c.bf16 %v821_v20, %v813_v19  ;;  %v829_v36 = vld [vmem:[#allocation2 + $0x1890] sm:$0xff]  ;;  %v1071_v19 = vsub.s32 0, %v4478_v61  ;;  %v896_v20 = vld [vmem:[#allocation2 + $0x1aa8] sm:$0xff] }
 0x139   :  { %3432 = vmatpush1.bf16.msra.mxu1 %v3431_v49  ;;  %v775_v49 = vld [vmem:[#allocation2 + $0x16e0] sm:$0xff]  ;;  %v837_v37 = vld [vmem:[#allocation2 + $0x18d0] sm:$0xff] }
 0x13a   :  { %3434 = vmatprep.subr.bf16.mxu1 %v3433_v51  ;;  %v790_v51 = vld [vmem:[#allocation2 + $0x1758] sm:$0xff] }
 0x13b   :  { %3688 = vmatpush1.bf16.msra.mxu0 %v3687_v50  ;;  %v782_v50 = vld [vmem:[#allocation2 + $0x1718] sm:$0xff] }
 0x13c   :  { %3690 = vmatprep.subr.bf16.mxu0 %v3689_v55  ;;  %v3707_v55 = vpack.c.bf16 %v775_v49, %v767_v11  ;;  %v3453_v56 = vpack.c.bf16 %v790_v51, %v782_v50  ;;  %v3467_v11 = vpack.c.bf16 %v837_v37, %v829_v36  ;;  %v845_v50 = vld [vmem:[#allocation2 + $0x1910] sm:$0xff]  ;;  %v903_v36 = vld [vmem:[#allocation2 + $0x1ae0] sm:$0xff]  ;;  %v910_v37 = vld [vmem:[#allocation2 + $0x1b18] sm:$0xff] }
 0x13d   :  { %3436 = vmatpush1.bf16.msra.mxu1 %v3435_v62  ;;  %v791_v62 = vld [vmem:[#allocation2 + $0x1760] sm:$0xff]  ;;  %v853_v51 = vld [vmem:[#allocation2 + $0x1950] sm:$0xff] }
 0x13e   :  { %3438 = vmatprep.subr.bf16.mxu1 %v3437_v0  ;;  %v806_v0 = vld [vmem:[#allocation2 + $0x17d8] sm:$0xff] }
 0x13f   :  { %3692 = vmatpush1.bf16.msra.mxu0 %v3691_v63  ;;  %v798_v63 = vld [vmem:[#allocation2 + $0x1798] sm:$0xff] }
 0x140   :  { %3694 = vmatprep.subr.bf16.mxu0 %v3693_v4  ;;  %v3711_v4 = vpack.c.bf16 %v791_v62, %v783_v59  ;;  %v3457_v5 = vpack.c.bf16 %v806_v0, %v798_v63  ;;  %v3471_v59 = vpack.c.bf16 %v853_v51, %v845_v50  ;;  %v861_v63 = vld [vmem:[#allocation2 + $0x1990] sm:$0xff]  ;;  %v911_v50 = vld [vmem:[#allocation2 + $0x1b20] sm:$0xff] }
 0x141   :  { %3440 = vmatpush1.bf16.msra.mxu1 %v3439_v10  ;;  %v807_v10 = vld [vmem:[#allocation2 + $0x17e0] sm:$0xff]  ;;  %v869_v0 = vld [vmem:[#allocation2 + $0x19d0] sm:$0xff] }
 0x142   :  { %3442 = vmatprep.subr.bf16.mxu1 %v3441_v13  ;;  %v822_v13 = vld [vmem:[#allocation2 + $0x1858] sm:$0xff] }
 0x143   :  { %3696 = vmatpush1.bf16.msra.mxu0 %v3695_v12  ;;  %v814_v12 = vld [vmem:[#allocation2 + $0x1818] sm:$0xff] }
 0x144   :  { %3698 = vmatprep.subr.bf16.mxu0 %v3697_v17  ;;  %v3715_v17 = vpack.c.bf16 %v807_v10, %v799_v8  ;;  %v3461_v18 = vpack.c.bf16 %v822_v13, %v814_v12  ;;  %v3475_v8 = vpack.c.bf16 %v869_v0, %v861_v63  ;;  %v877_v12 = vld [vmem:[#allocation2 + $0x1a10] sm:$0xff] }
 0x145   :  { %3444 = vmatpush1.bf16.msra.mxu1 %v3443_v24  ;;  %v823_v24 = vld [vmem:[#allocation2 + $0x1860] sm:$0xff]  ;;  %v885_v13 = vld [vmem:[#allocation2 + $0x1a50] sm:$0xff] }
 0x146   :  { %3446 = vmatprep.subr.bf16.mxu1 %v3445_v29  ;;  %v838_v29 = vld [vmem:[#allocation2 + $0x18d8] sm:$0xff] }
 0x147   :  { %3700 = vmatpush1.bf16.msra.mxu0 %v3699_v27  ;;  %v830_v27 = vld [vmem:[#allocation2 + $0x1898] sm:$0xff] }
 0x148   :  { %3702 = vmatprep.subr.bf16.mxu0 %v3701_v33  ;;  %v3719_v33 = vpack.c.bf16 %v823_v24, %v815_v21  ;;  %v3465_v35 = vpack.c.bf16 %v838_v29, %v830_v27  ;;  %v904_v21 = vld [vmem:[#allocation2 + $0x1ae8] sm:$0xff]  ;;  %v1067_v24 = vld [vmem:[%s5482_s2] sm:$0xff]  ;;  %v1075_v27 = vsub.s32 1, %v4478_v61 }
 0x149   :  { %3448 = vmatpush1.bf16.msra.mxu1 %v3447_v41  ;;  %v839_v41 = vld [vmem:[#allocation2 + $0x18e0] sm:$0xff] }
 0x14a   :  { %3450 = vmatprep.subr.bf16.mxu1 %v3449_v43  ;;  %v854_v43 = vld [vmem:[#allocation2 + $0x1958] sm:$0xff] }
 0x14b   :  { %3704 = vmatpush1.bf16.msra.mxu0 %v3703_v42  ;;  %v846_v42 = vld [vmem:[#allocation2 + $0x1918] sm:$0xff] }
 0x14c   :  { %3706 = vmatprep.subr.bf16.mxu0 %v3705_v47  ;;  %v3723_v47 = vpack.c.bf16 %v839_v41, %v831_v38  ;;  %v3469_v49 = vpack.c.bf16 %v854_v43, %v846_v42  ;;  %v918_v38 = vld [vmem:[#allocation2 + $0x1b58] sm:$0xff]  ;;  %v912_v41 = vld [vmem:[#allocation2 + $0x1b28] sm:$0xff]  ;;  %v1076_v43 = vrot.slane %v1067_v24, %v1075_v27 }
 0x14d   :  { %3452 = vmatpush1.bf16.msra.mxu1 %v3451_v54  ;;  %v855_v54 = vld [vmem:[#allocation2 + $0x1960] sm:$0xff]  ;;  %v920_v42 = vld [vmem:[#allocation2 + $0x1b68] sm:$0xff] }
 0x14e   :  { %3454 = vmatprep.subr.bf16.mxu1 %v3453_v56  ;;  %v870_v56 = vld [vmem:[#allocation2 + $0x19d8] sm:$0xff] }
 0x14f   :  { %3708 = vmatpush1.bf16.msra.mxu0 %v3707_v55  ;;  %v862_v55 = vld [vmem:[#allocation2 + $0x1998] sm:$0xff] }
 0x150   :  { %3710 = vmatprep.subr.bf16.mxu0 %v3709_v60  ;;  %v3727_v60 = vpack.c.bf16 %v855_v54, %v847_v52  ;;  %v3473_v62 = vpack.c.bf16 %v870_v56, %v862_v55  ;;  %v3741_v52 = vpack.c.bf16 %v920_v42, %v912_v41  ;;  %v926_v54 = vld [vmem:[#allocation2 + $0x1b98] sm:$0xff]  ;;  %v967_v42 = vld [vmem:[#allocation2 + $0x1ce0] sm:$0xff] }
 0x151   :  { %3456 = vmatpush1.bf16.msra.mxu1 %v3455_v3  ;;  %v871_v3 = vld [vmem:[#allocation2 + $0x19e0] sm:$0xff]  ;;  %v934_v55 = vld [vmem:[#allocation2 + $0x1bd8] sm:$0xff] }
 0x152   :  { %3458 = vmatprep.subr.bf16.mxu1 %v3457_v5  ;;  %v886_v5 = vld [vmem:[#allocation2 + $0x1a58] sm:$0xff] }
 0x153   :  { %3712 = vmatpush1.bf16.msra.mxu0 %v3711_v4  ;;  %v878_v4 = vld [vmem:[#allocation2 + $0x1a18] sm:$0xff] }
 0x154   :  { %3714 = vmatprep.subr.bf16.mxu0 %v3713_v9  ;;  %v3731_v9 = vpack.c.bf16 %v871_v3, %v863_v1  ;;  %v3477_v10 = vpack.c.bf16 %v886_v5, %v878_v4  ;;  %v3489_v3 = vpack.c.bf16 %v934_v55, %v926_v54  ;;  %v925_v4 = vld [vmem:[#allocation2 + $0x1b90] sm:$0xff]  ;;  %v983_v55 = vld [vmem:[#allocation2 + $0x1d60] sm:$0xff] }
 0x155   :  { %3460 = vmatpush1.bf16.msra.mxu1 %v3459_v16  ;;  %v887_v16 = vld [vmem:[#allocation2 + $0x1a60] sm:$0xff]  ;;  %v933_v5 = vld [vmem:[#allocation2 + $0x1bd0] sm:$0xff] }
 0x156   :  { %3462 = vmatprep.subr.bf16.mxu1 %v3461_v18  ;;  %v902_v18 = vld [vmem:[#allocation2 + $0x1ad8] sm:$0xff]  ;;  %v3735_v29 = vpack.c.bf16 %v887_v16, %v879_v14  ;;  %v952_v14 = vld [vmem:[#allocation2 + $0x1c68] sm:$0xff] }
 0x157   :  { %3716 = vmatpush1.bf16.msra.mxu0 %v3715_v17  ;;  %v894_v17 = vld [vmem:[#allocation2 + $0x1a98] sm:$0xff] }
 0x158   :  { %3718 = vmatprep.subr.bf16.mxu0 %v3717_v23  ;;  %1644 = vmatmul.mubr.f32.vlgmr.msra.gmra.mrb[2].mxu1 %v4499_v28  ;;  %v3479_v23 = vpack.c.bf16 %v885_v13, %v877_v12  ;;  %v3481_v30 = vpack.c.bf16 %v902_v18, %v894_v17  ;;  %v950_v12 = vld [vmem:[#allocation2 + $0x1c58] sm:$0xff]  ;;  %v944_v13 = vld [vmem:[#allocation2 + $0x1c28] sm:$0xff]  ;;  %v941_v18 = vld [vmem:[#allocation2 + $0x1c10] sm:$0xff] }
 0x159   :  { %3464 = vmatpush1.bf16.msra.mxu1 %v3463_v32  ;;  %1714 = vmatprep.mubr.f32.mxu1 %v4528_v48  ;;  %v901_v32 = vld [vmem:[#allocation2 + $0x1ad0] sm:$0xff] }
 0x15a   :  { %1928 = vmatmul.mubr.f32.vlgmr.msra.gmra.mrb[2].mxu0 %v4499_v28  ;;  %3466 = vmatprep.subr.bf16.mxu1 %v3465_v35  ;;  %v3737_v35 = vpack.c.bf16 %v904_v21, %v896_v20  ;;  %v3483_v44 = vpack.c.bf16 %v901_v32, %v893_v31  ;;  %v949_v20 = vld [vmem:[#allocation2 + $0x1c50] sm:$0xff]  ;;  %v943_v21 = vld [vmem:[#allocation2 + $0x1c20] sm:$0xff]  ;;  %v960_v31 = vld [vmem:[#allocation2 + $0x1ca8] sm:$0xff] }
 0x15b   :  { %3720 = vmatpush1.bf16.msra.mxu0 %v3719_v33  ;;  %1998 = vmatprep.mubr.f32.mxu0 %v4528_v48  ;;  %v895_v33 = vld [vmem:[#allocation2 + $0x1aa0] sm:$0xff]  ;;  %v968_v32 = vld [vmem:[#allocation2 + $0x1ce8] sm:$0xff] }
 0x15c   :  { %3722 = vmatprep.subr.bf16.mxu0 %v3721_v40  ;;  %v1072_v40 = vrot.slane %v1067_v24, %v1071_v19  ;;  %v3739_v45 = vpack.c.bf16 %v903_v36, %v895_v33  ;;  %v951_v24 = vld [vmem:[#allocation2 + $0x1c60] sm:$0xff]  ;;  %v3495_v33 = vpack.c.bf16 %v949_v20, %v941_v18  ;;  %v3753_v41 = vpack.c.bf16 %v968_v32, %v960_v31 }
 0x15d   :  { %3468 = vmatpush1.bf16.msra.mxu1 %v3467_v11  ;;  %v3485_v11 = vpack.c.bf16 %v918_v38, %v910_v37  ;;  %v957_v37 = vld [vmem:[#allocation2 + $0x1c90] sm:$0xff]  ;;  %v1015_v20 = vld [vmem:[#allocation2 + $0x1e60] sm:$0xff] }
 0x15e   :  { %3470 = vmatprep.subr.bf16.mxu1 %v3469_v49  ;;  %v917_v49 = vld [vmem:[#allocation2 + $0x1b50] sm:$0xff] }
 0x15f   :  { %3724 = vmatpush1.bf16.msra.mxu0 %v3723_v47  ;;  %v909_v47 = vld [vmem:[#allocation2 + $0x1b10] sm:$0xff] }
 0x160   :  { %3726 = vmatprep.subr.bf16.mxu0 %v3725_v53  ;;  %v919_v53 = vld [vmem:[#allocation2 + $0x1b60] sm:$0xff]  ;;  %v3487_v0 = vpack.c.bf16 %v917_v49, %v909_v47  ;;  %v965_v38 = vld [vmem:[#allocation2 + $0x1cd0] sm:$0xff] }
 0x161   :  { %3472 = vmatpush1.bf16.msra.mxu1 %v3471_v59  ;;  %v928_v59 = vld [vmem:[#allocation2 + $0x1ba8] sm:$0xff]  ;;  %v3499_v47 = vpack.c.bf16 %v965_v38, %v957_v37  ;;  %v1031_v38 = vld [vmem:[#allocation2 + $0x1ee0] sm:$0xff] }
 0x162   :  { %3474 = vmatprep.subr.bf16.mxu1 %v3473_v62 }
 0x163   :  { %3728 = vmatpush1.bf16.msra.mxu0 %v3727_v60  ;;  %v936_v60 = vld [vmem:[#allocation2 + $0x1be8] sm:$0xff] }
 0x164   :  { %3730 = vmatprep.subr.bf16.mxu0 %v3729_v2  ;;  %v3743_v2 = vpack.c.bf16 %v919_v53, %v911_v50  ;;  %v975_v53 = vld [vmem:[#allocation2 + $0x1d20] sm:$0xff] }
 0x165   :  { %3476 = vmatpush1.bf16.msra.mxu1 %v3475_v8  ;;  %v3745_v8 = vpack.c.bf16 %v936_v60, %v928_v59  ;;  %v1000_v59 = vld [vmem:[#allocation2 + $0x1de8] sm:$0xff] }
 0x166   :  { %3478 = vmatprep.subr.bf16.mxu1 %v3477_v10  ;;  %v942_v10 = vld [vmem:[#allocation2 + $0x1c18] sm:$0xff] }
 0x167   :  { %3732 = vmatpush1.bf16.msra.mxu0 %v3731_v9  ;;  %v935_v9 = vld [vmem:[#allocation2 + $0x1be0] sm:$0xff]  ;;  %v3493_v17 = vpack.c.bf16 %v950_v12, %v942_v10  ;;  %v1016_v10 = vld [vmem:[#allocation2 + $0x1e68] sm:$0xff] }
 0x168   :  { %3734 = vmatprep.subr.bf16.mxu0 %v3733_v15  ;;  %v3491_v15 = vpack.c.bf16 %v933_v5, %v925_v4  ;;  %v3747_v16 = vpack.c.bf16 %v935_v9, %v927_v6  ;;  %v999_v5 = vld [vmem:[#allocation2 + $0x1de0] sm:$0xff]  ;;  %v1006_v6 = vld [vmem:[#allocation2 + $0x1e18] sm:$0xff]  ;;  %v1008_v9 = vld [vmem:[#allocation2 + $0x1e28] sm:$0xff] }
 0x169   :  { %3480 = vmatpush1.bf16.msra.mxu1 %v3479_v23  ;;  %v3749_v23 = vpack.c.bf16 %v952_v14, %v944_v13  ;;  %v3765_v18 = vpack.c.bf16 %v1016_v10, %v1008_v9 }
 0x16a   :  { %3482 = vmatprep.subr.bf16.mxu1 %v3481_v30  ;;  %v966_v30 = vld [vmem:[#allocation2 + $0x1cd8] sm:$0xff] }
 0x16b   :  { %3736 = vmatpush1.bf16.msra.mxu0 %v3735_v29  ;;  %v1290_v51 = vpop.f32.mrb[0].mxu1  ;;  %v958_v29 = vld [vmem:[#allocation2 + $0x1c98] sm:$0xff] }
 0x16c   :  { %3738 = vmatprep.subr.bf16.mxu0 %v3737_v35  ;;  %v4325_v56 = vadd.f32 %v1290_v51, %v1072_v40  ;;  %v1292_v57 = vpop.f32.mrb[1].mxu1  ;;  %v3751_v35 = vpack.c.bf16 %v951_v24, %v943_v21  ;;  %v3497_v36 = vpack.c.bf16 %v966_v30, %v958_v29  ;;  %v959_v40 = vld [vmem:[#allocation2 + $0x1ca0] sm:$0xff]  ;;  %v973_v51 = vld [vmem:[#allocation2 + $0x1d10] sm:$0xff]  ;;  %v1022_v21 = vld [vmem:[#allocation2 + $0x1e98] sm:$0xff] }
 0x16d   :  { %v1432_v58 = vpop.f32.mrb[0].mxu0  ;;  %v4327_v62 = vadd.f32 %v1292_v57, %v1076_v43  ;;  %3484 = vmatpush1.bf16.msra.mxu1 %v3483_v44  ;;  %v974_v43 = vld [vmem:[#allocation2 + $0x1d18] sm:$0xff]  ;;  %v3755_v49 = vpack.c.bf16 %v967_v42, %v959_v40  ;;  %v1024_v24 = vld [vmem:[#allocation2 + $0x1ea8] sm:$0xff] }
 0x16e   :  { %v1434_v63 = vpop.f32.mrb[1].mxu0  ;;  %v4558_v1 = vadd.f32 %v4325_v56, %v1432_v58  ;;  %3486 = vmatprep.subr.bf16.mxu1 %v3485_v11  ;;  %v982_v44 = vld [vmem:[#allocation2 + $0x1d58] sm:$0xff]  ;;  %v984_v11 = vld [vmem:[#allocation2 + $0x1d68] sm:$0xff] }
 0x16f   :  { %3740 = vmatpush1.bf16.msra.mxu0 %v3739_v45  ;;  %v4560_v7 = vadd.f32 %v4327_v62, %v1434_v63  ;;  %v976_v45 = vld [vmem:[#allocation2 + $0x1d28] sm:$0xff]  ;;  %v3501_v50 = vpack.c.bf16 %v982_v44, %v974_v43  ;;  %v990_v56 = vld [vmem:[#allocation2 + $0x1d98] sm:$0xff]  ;;  %v3759_v62 = vpack.c.bf16 %v983_v55, %v975_v53 }
 0x170   :  { %3742 = vmatprep.subr.bf16.mxu0 %v3741_v52  ;;  %v981_v52 = vld [vmem:[#allocation2 + $0x1d50] sm:$0xff]  ;;  %v3757_v54 = vpack.c.bf16 %v984_v11, %v976_v45  ;;  %v998_v57 = vld [vmem:[#allocation2 + $0x1dd8] sm:$0xff]  ;;  %v992_v58 = vld [vmem:[#allocation2 + $0x1da8] sm:$0xff] }
 0x171   :  { %3488 = vmatpush1.bf16.msra.mxu1 %v3487_v0  ;;  %v3503_v60 = vpack.c.bf16 %v981_v52, %v973_v51  ;;  %v3505_v63 = vpack.c.bf16 %v998_v57, %v990_v56  ;;  %v989_v0 = vld [vmem:[#allocation2 + $0x1d90] sm:$0xff]  ;;  %v3761_v4 = vpack.c.bf16 %v1000_v59, %v992_v58  ;;  %v1032_v29 = vld [vmem:[#allocation2 + $0x1ee8] sm:$0xff]  ;;  %v1038_v40 = vld [vmem:[#allocation2 + $0x1f18] sm:$0xff] }
 0x172   :  { %3490 = vmatprep.subr.bf16.mxu1 %v3489_v3  ;;  %v991_v3 = vld [vmem:[#allocation2 + $0x1da0] sm:$0xff]  ;;  %v3769_v37 = vpack.c.bf16 %v1032_v29, %v1024_v24  ;;  %v1040_v42 = vld [vmem:[#allocation2 + $0x1f28] sm:$0xff]  ;;  %v1054_v53 = vld [vmem:[#allocation2 + $0x1f98] sm:$0xff] }
 0x173   :  { %3744 = vmatpush1.bf16.msra.mxu0 %v3743_v2  ;;  %v997_v2 = vld [vmem:[#allocation2 + $0x1dd0] sm:$0xff]  ;;  %v3763_v13 = vpack.c.bf16 %v999_v5, %v991_v3  ;;  %v1048_v43 = vld [vmem:[#allocation2 + $0x1f68] sm:$0xff]  ;;  %v1047_v52 = vld [vmem:[#allocation2 + $0x1f60] sm:$0xff] }
 0x174   :  { %3746 = vmatprep.subr.bf16.mxu0 %v3745_v8  ;;  %v1014_v8 = vld [vmem:[#allocation2 + $0x1e58] sm:$0xff]  ;;  %v3507_v12 = vpack.c.bf16 %v997_v2, %v989_v0  ;;  %v3773_v51 = vpack.c.bf16 %v1048_v43, %v1040_v42  ;;  %v1056_v55 = vld [vmem:[#allocation2 + $0x1fa8] sm:$0xff]  ;;  %v1063_v2 = vld [vmem:[#allocation2 + $0x1fe0] sm:$0xff] }
 0x175   :  { %3492 = vmatpush1.bf16.msra.mxu1 %v3491_v15  ;;  %v3509_v14 = vpack.c.bf16 %v1014_v8, %v1006_v6  ;;  %v1005_v15 = vld [vmem:[#allocation2 + $0x1e10] sm:$0xff]  ;;  %v1064_v56 = vld [vmem:[#allocation2 + $0x1fe8] sm:$0xff]  ;;  %v50_v3 = vld [vmem:[#allocation2 + $0x38] sm:$0xff] }
 0x176   :  { %3494 = vmatprep.subr.bf16.mxu1 %v3493_v17  ;;  %v1007_v17 = vld [vmem:[#allocation2 + $0x1e20] sm:$0xff]  ;;  %v3777_v0 = vpack.c.bf16 %v1064_v56, %v1056_v55  ;;  %v2298_v5 = vld [vmem:[%s5483_s3 + $0x8] sm:$0xff]  ;;  %v2300_v6 = vld [vmem:[%s5483_s3 + $0x18] sm:$0xff] }
 0x177   :  { %3748 = vmatpush1.bf16.msra.mxu0 %v3747_v16  ;;  %v1013_v16 = vld [vmem:[#allocation2 + $0x1e50] sm:$0xff]  ;;  %v3767_v31 = vpack.c.bf16 %v1015_v20, %v1007_v17  ;;  %v66_v17 = vld [vmem:[#allocation2 + $0xb8] sm:$0xff]  ;;  %v2302_v20 = vld [vmem:[%s5483_s3 + $0x28] sm:$0xff] }
 0x178   :  { %3750 = vmatprep.subr.bf16.mxu0 %v3749_v23  ;;  %v1030_v23 = vld [vmem:[#allocation2 + $0x1ed8] sm:$0xff]  ;;  %v3511_v30 = vpack.c.bf16 %v1013_v16, %v1005_v15  ;;  %v2297_v15 = vld [vmem:[%s5483_s3] sm:$0xff]  ;;  %v2299_v16 = vld [vmem:[%s5483_s3 + $0x10] sm:$0xff] }
 0x179   :  { %3496 = vmatpush1.bf16.msra.mxu1 %v3495_v33  ;;  %v3513_v32 = vpack.c.bf16 %v1030_v23, %v1022_v21  ;;  %v1021_v33 = vld [vmem:[#allocation2 + $0x1e90] sm:$0xff]  ;;  %v2304_v21 = vld [vmem:[%s5483_s3 + $0x38] sm:$0xff]  ;;  %v4039_v24 = vpack.c.bf16 %v2299_v16, %v2297_v15  ;;  %v2318_v15 = vld [vmem:[%s5483_s3 + $0xa8] sm:$0xff] }
 0x17a   :  { %3498 = vmatprep.subr.bf16.mxu1 %v3497_v36  ;;  %v1023_v36 = vld [vmem:[#allocation2 + $0x1ea0] sm:$0xff]  ;;  %v65_v29 = vld [vmem:[#allocation2 + $0xb0] sm:$0xff]  ;;  %v2320_v16 = vld [vmem:[%s5483_s3 + $0xb8] sm:$0xff] }
 0x17b   :  { %3752 = vmatpush1.bf16.msra.mxu0 %v3751_v35  ;;  %v1029_v35 = vld [vmem:[#allocation2 + $0x1ed0] sm:$0xff]  ;;  %v3771_v45 = vpack.c.bf16 %v1031_v38, %v1023_v36  ;;  %v82_v36 = vld [vmem:[#allocation2 + $0x138] sm:$0xff]  ;;  %v2290_v38 = vmax.f32 %v4560_v7, 0.0 }
 0x17c   :  { %3754 = vmatprep.subr.bf16.mxu0 %v3753_v41  ;;  %v1046_v41 = vld [vmem:[#allocation2 + $0x1f58] sm:$0xff]  ;;  %v3515_v44 = vpack.c.bf16 %v1029_v35, %v1021_v33  ;;  %v4041_v33 = vpack.c.bf16 %v2304_v21, %v2302_v20  ;;  %v2303_v35 = vld [vmem:[%s5483_s3 + $0x30] sm:$0xff] }
 0x17d   :  { %3500 = vmatpush1.bf16.msra.mxu1 %v3499_v47  ;;  %v3517_v11 = vpack.c.bf16 %v1046_v41, %v1038_v40  ;;  %v1037_v47 = vld [vmem:[#allocation2 + $0x1f10] sm:$0xff]  ;;  %v2306_v40 = vld [vmem:[%s5483_s3 + $0x48] sm:$0xff]  ;;  %v2308_v41 = vld [vmem:[%s5483_s3 + $0x58] sm:$0xff] }
 0x17e   :  { %3502 = vmatprep.subr.bf16.mxu1 %v3501_v50  ;;  %v1039_v50 = vld [vmem:[#allocation2 + $0x1f20] sm:$0xff]  ;;  %v89_v7 = vld [vmem:[#allocation2 + $0x170] sm:$0xff] }
 0x17f   :  { %3756 = vmatpush1.bf16.msra.mxu0 %v3755_v49  ;;  %v1045_v49 = vld [vmem:[#allocation2 + $0x1f50] sm:$0xff]  ;;  %v3775_v58 = vpack.c.bf16 %v1047_v52, %v1039_v50  ;;  %v98_v50 = vld [vmem:[#allocation2 + $0x1b8] sm:$0xff]  ;;  %v2310_v52 = vld [vmem:[%s5483_s3 + $0x68] sm:$0xff] }
 0x180   :  { %3758 = vmatprep.subr.bf16.mxu0 %v3757_v54  ;;  %v1062_v54 = vld [vmem:[#allocation2 + $0x1fd8] sm:$0xff]  ;;  %v3519_v57 = vpack.c.bf16 %v1045_v49, %v1037_v47  ;;  %v4045_v47 = vpack.c.bf16 %v2308_v41, %v2306_v40  ;;  %v2307_v49 = vld [vmem:[%s5483_s3 + $0x50] sm:$0xff] }
 0x181   :  { %3504 = vmatpush1.bf16.msra.mxu1 %v3503_v60  ;;  %v3521_v59 = vpack.c.bf16 %v1062_v54, %v1054_v53  ;;  %v1053_v60 = vld [vmem:[#allocation2 + $0x1f90] sm:$0xff]  ;;  %v2312_v53 = vld [vmem:[%s5483_s3 + $0x78] sm:$0xff] }
 0x182   :  { %3506 = vmatprep.subr.bf16.mxu1 %v3505_v63  ;;  %v1055_v63 = vld [vmem:[#allocation2 + $0x1fa0] sm:$0xff]  ;;  %v129_v21 = vld [vmem:[#allocation2 + $0x2b0] sm:$0xff] }
 0x183   :  { %3760 = vmatpush1.bf16.msra.mxu0 %v3759_v62  ;;  %v1061_v62 = vld [vmem:[#allocation2 + $0x1fd0] sm:$0xff]  ;;  %v3779_v9 = vpack.c.bf16 %v1063_v2, %v1055_v63  ;;  %v114_v63 = vld [vmem:[#allocation2 + $0x238] sm:$0xff] }
 0x184   :  { %3762 = vmatprep.subr.bf16.mxu0 %v3761_v4  ;;  %v58_v4 = vld [vmem:[#allocation2 + $0x78] sm:$0xff]  ;;  %v3523_v8 = vpack.c.bf16 %v1061_v62, %v1053_v60  ;;  %v4049_v60 = vpack.c.bf16 %v2312_v53, %v2310_v52  ;;  %v2311_v62 = vld [vmem:[%s5483_s3 + $0x70] sm:$0xff] }
 0x185   :  { %3508 = vmatpush1.bf16.msra.mxu1 %v3507_v12  ;;  %v3781_v10 = vpack.c.bf16 %v58_v4, %v50_v3  ;;  %v49_v12 = vld [vmem:[#allocation2 + $0x30] sm:$0xff]  ;;  %v2316_v2 = vld [vmem:[%s5483_s3 + $0x98] sm:$0xff] }
 0x186   :  { %3510 = vmatprep.subr.bf16.mxu1 %v3509_v14  ;;  %v4037_v14 = vpack.c.bf16 %v2300_v6, %v2298_v5  ;;  %v113_v6 = vld [vmem:[#allocation2 + $0x230] sm:$0xff] }
 0x187   :  { %3764 = vmatpush1.bf16.msra.mxu0 %v3763_v13  ;;  %v57_v13 = vld [vmem:[#allocation2 + $0x70] sm:$0xff] }
 0x188   :  { %3766 = vmatprep.subr.bf16.mxu0 %v3765_v18  ;;  %v74_v18 = vld [vmem:[#allocation2 + $0xf8] sm:$0xff]  ;;  %v3783_v23 = vpack.c.bf16 %v57_v13, %v49_v12  ;;  %v2315_v12 = vld [vmem:[%s5483_s3 + $0x90] sm:$0xff] }
 0x189   :  { %3512 = vmatpush1.bf16.msra.mxu1 %v3511_v30  ;;  %v73_v30 = vld [vmem:[#allocation2 + $0xf0] sm:$0xff]  ;;  %v130_v13 = vld [vmem:[#allocation2 + $0x2b8] sm:$0xff] }
 0x18a   :  { %3514 = vmatprep.subr.bf16.mxu1 %v3513_v32  ;;  %v3785_v32 = vpack.c.bf16 %v74_v18, %v66_v17  ;;  %v3787_v42 = vpack.c.bf16 %v73_v30, %v65_v29  ;;  %v4057_v29 = vpack.c.bf16 %v2320_v16, %v2318_v15  ;;  %v2319_v30 = vld [vmem:[%s5483_s3 + $0xb0] sm:$0xff] }
 0x18b   :  { %3768 = vmatpush1.bf16.msra.mxu0 %v3767_v31  ;;  %v2301_v31 = vld [vmem:[%s5483_s3 + $0x20] sm:$0xff]  ;;  %v145_v40 = vld [vmem:[#allocation2 + $0x330] sm:$0xff] }
 0x18c   :  { %3770 = vmatprep.subr.bf16.mxu0 %v3769_v37  ;;  %v90_v37 = vld [vmem:[#allocation2 + $0x178] sm:$0xff]  ;;  %v4043_v43 = vpack.c.bf16 %v2303_v35, %v2301_v31  ;;  %v153_v41 = vld [vmem:[#allocation2 + $0x370] sm:$0xff] }
 0x18d   :  { %3516 = vmatpush1.bf16.msra.mxu1 %v3515_v44  ;;  %v3789_v44 = vpack.c.bf16 %v90_v37, %v82_v36  ;;  %v146_v31 = vld [vmem:[#allocation2 + $0x338] sm:$0xff]  ;;  %v161_v52 = vld [vmem:[#allocation2 + $0x3b0] sm:$0xff] }
 0x18e   :  { %3518 = vmatprep.subr.bf16.mxu1 %v3517_v11  ;;  %v2305_v11 = vld [vmem:[%s5483_s3 + $0x40] sm:$0xff]  ;;  %v2324_v35 = vld [vmem:[%s5483_s3 + $0xd8] sm:$0xff]  ;;  %v169_v53 = vld [vmem:[#allocation2 + $0x3f0] sm:$0xff] }
 0x18f   :  { %3772 = vmatpush1.bf16.msra.mxu0 %v3771_v45  ;;  %v81_v45 = vld [vmem:[#allocation2 + $0x130] sm:$0xff]  ;;  %v4047_v55 = vpack.c.bf16 %v2307_v49, %v2305_v11  ;;  %v2326_v11 = vld [vmem:[%s5483_s3 + $0xe8] sm:$0xff]  ;;  %v3807_v49 = vpack.c.bf16 %v153_v41, %v145_v40  ;;  %v226_v40 = vld [vmem:[#allocation2 + $0x5b8] sm:$0xff] }
 0x190   :  { %3774 = vmatprep.subr.bf16.mxu0 %v3773_v51  ;;  %v106_v51 = vld [vmem:[#allocation2 + $0x1f8] sm:$0xff]  ;;  %v3791_v54 = vpack.c.bf16 %v89_v7, %v81_v45  ;;  %v193_v15 = vld [vmem:[#allocation2 + $0x4b0] sm:$0xff] }
 0x191   :  { %3520 = vmatpush1.bf16.msra.mxu1 %v3519_v57  ;;  %v3793_v56 = vpack.c.bf16 %v106_v51, %v98_v50  ;;  %v97_v57 = vld [vmem:[#allocation2 + $0x1b0] sm:$0xff]  ;;  %v162_v45 = vld [vmem:[#allocation2 + $0x3b8] sm:$0xff] }
 0x192   :  { %3522 = vmatprep.subr.bf16.mxu1 %v3521_v59  ;;  %v2309_v59 = vld [vmem:[%s5483_s3 + $0x60] sm:$0xff]  ;;  %v170_v7 = vld [vmem:[#allocation2 + $0x3f8] sm:$0xff]  ;;  %v201_v16 = vld [vmem:[#allocation2 + $0x4f0] sm:$0xff] }
 0x193   :  { %3776 = vmatpush1.bf16.msra.mxu0 %v3775_v58  ;;  %v105_v58 = vld [vmem:[#allocation2 + $0x1f0] sm:$0xff]  ;;  %v4051_v4 = vpack.c.bf16 %v2311_v62, %v2309_v59  ;;  %v3809_v51 = vpack.c.bf16 %v170_v7, %v162_v45  ;;  %v2330_v59 = vld [vmem:[%s5483_s3 + $0x108] sm:$0xff]  ;;  %v3811_v62 = vpack.c.bf16 %v169_v53, %v161_v52  ;;  %v234_v41 = vld [vmem:[#allocation2 + $0x5f8] sm:$0xff] }
 0x194   :  { %3778 = vmatprep.subr.bf16.mxu0 %v3777_v0  ;;  %v2314_v0 = vld [vmem:[%s5483_s3 + $0x88] sm:$0xff]  ;;  %v3795_v3 = vpack.c.bf16 %v105_v58, %v97_v57  ;;  %v178_v57 = vld [vmem:[#allocation2 + $0x438] sm:$0xff]  ;;  %v3825_v7 = vpack.c.bf16 %v234_v41, %v226_v40 }
 0x195   :  { %3524 = vmatpush1.bf16.msra.mxu1 %v3523_v8  ;;  %v121_v8 = vld [vmem:[#allocation2 + $0x270] sm:$0xff]  ;;  %v186_v58 = vld [vmem:[#allocation2 + $0x478] sm:$0xff] }
 0x196   :  { %3782 = vmatprep.subr.bf16.mxu1 %v3781_v10  ;;  %v4053_v10 = vpack.c.bf16 %v2316_v2, %v2314_v0  ;;  %v3799_v17 = vpack.c.bf16 %v121_v8, %v113_v6  ;;  %v177_v0 = vld [vmem:[#allocation2 + $0x430] sm:$0xff]  ;;  %v194_v6 = vld [vmem:[#allocation2 + $0x4b8] sm:$0xff] }
 0x197   :  { %3780 = vmatpush1.bf16.msra.mxu0 %v3779_v9  ;;  %v2313_v9 = vld [vmem:[%s5483_s3 + $0x80] sm:$0xff]  ;;  %v185_v2 = vld [vmem:[#allocation2 + $0x470] sm:$0xff]  ;;  %v202_v8 = vld [vmem:[#allocation2 + $0x4f8] sm:$0xff] }
 0x198   :  { %4038 = vmatprep.subr.bf16.mxu0 %v4037_v14  ;;  %1715 = vmatmul.mubr.f32.vlgmr.msra.gmra.mrb[2].mxu1 %v4519_v26  ;;  %v138_v14 = vld [vmem:[#allocation2 + $0x2f8] sm:$0xff]  ;;  %v4055_v18 = vpack.c.bf16 %v2315_v12, %v2313_v9  ;;  %v2334_v9 = vld [vmem:[%s5483_s3 + $0x128] sm:$0xff]  ;;  %v3815_v12 = vpack.c.bf16 %v185_v2, %v177_v0 }
 0x199   :  { %3784 = vmatpush1.bf16.msra.mxu1 %v3783_v23  ;;  %2069 = vmatprep.mubr.f32.mxu1 %v4503_v34  ;;  %v122_v34 = vld [vmem:[#allocation2 + $0x278] sm:$0xff]  ;;  %v3801_v20 = vpack.c.bf16 %v138_v14, %v130_v13  ;;  %v137_v23 = vld [vmem:[#allocation2 + $0x2f0] sm:$0xff]  ;;  %v3817_v14 = vpack.c.bf16 %v202_v8, %v194_v6 }
 0x19a   :  { %1999 = vmatmul.mubr.f32.vlgmr.msra.gmra.mrb[2].mxu0 %v4519_v26  ;;  %3786 = vmatprep.subr.bf16.mxu1 %v3785_v32  ;;  %v3797_v5 = vpack.c.bf16 %v122_v34, %v114_v63  ;;  %v154_v32 = vld [vmem:[#allocation2 + $0x378] sm:$0xff]  ;;  %v3803_v36 = vpack.c.bf16 %v137_v23, %v129_v21  ;;  %v3813_v34 = vpack.c.bf16 %v186_v58, %v178_v57 }
 0x19b   :  { %4040 = vmatpush1.bf16.msra.mxu0 %v4039_v24  ;;  %2629 = vmatprep.mubr.f32.mxu0 %v2290_v38  ;;  %v2317_v24 = vld [vmem:[%s5483_s3 + $0xa0] sm:$0xff]  ;;  %v3805_v38 = vpack.c.bf16 %v154_v32, %v146_v31  ;;  %v210_v21 = vld [vmem:[#allocation2 + $0x538] sm:$0xff] }
 0x19c   :  { %4042 = vmatprep.subr.bf16.mxu0 %v4041_v33  ;;  %v2322_v33 = vld [vmem:[%s5483_s3 + $0xc8] sm:$0xff]  ;;  %v4059_v37 = vpack.c.bf16 %v2319_v30, %v2317_v24  ;;  %v218_v23 = vld [vmem:[#allocation2 + $0x578] sm:$0xff]  ;;  %v3819_v30 = vpack.c.bf16 %v201_v16, %v193_v15 }
 0x19d   :  { %3788 = vmatpush1.bf16.msra.mxu1 %v3787_v42  ;;  %v2321_v42 = vld [vmem:[%s5483_s3 + $0xc0] sm:$0xff]  ;;  %v2338_v24 = vld [vmem:[%s5483_s3 + $0x148] sm:$0xff]  ;;  %v3821_v32 = vpack.c.bf16 %v218_v23, %v210_v21  ;;  %v242_v52 = vld [vmem:[#allocation2 + $0x638] sm:$0xff] }
 0x19e   :  { %3790 = vmatprep.subr.bf16.mxu1 %v3789_v44  ;;  %v2323_v44 = vld [vmem:[%s5483_s3 + $0xd0] sm:$0xff]  ;;  %v250_v53 = vld [vmem:[#allocation2 + $0x678] sm:$0xff] }
 0x19f   :  { %4044 = vmatpush1.bf16.msra.mxu0 %v4043_v43  ;;  %v4061_v43 = vpack.c.bf16 %v2324_v35, %v2322_v33  ;;  %v4063_v50 = vpack.c.bf16 %v2323_v44, %v2321_v42  ;;  %v209_v33 = vld [vmem:[#allocation2 + $0x530] sm:$0xff]  ;;  %v2342_v42 = vld [vmem:[%s5483_s3 + $0x168] sm:$0xff]  ;;  %v3829_v58 = vpack.c.bf16 %v250_v53, %v242_v52  ;;  %v258_v0 = vld [vmem:[#allocation2 + $0x6b8] sm:$0xff] }
 0x1a0   :  { %4046 = vmatprep.subr.bf16.mxu0 %v4045_v47  ;;  %v2328_v47 = vld [vmem:[%s5483_s3 + $0xf8] sm:$0xff]  ;;  %v217_v35 = vld [vmem:[#allocation2 + $0x570] sm:$0xff] }
 0x1a1   :  { %3792 = vmatpush1.bf16.msra.mxu1 %v3791_v54  ;;  %v2325_v54 = vld [vmem:[%s5483_s3 + $0xe0] sm:$0xff]  ;;  %v3823_v44 = vpack.c.bf16 %v217_v35, %v209_v33  ;;  %v266_v2 = vld [vmem:[#allocation2 + $0x6f8] sm:$0xff] }
 0x1a2   :  { %3794 = vmatprep.subr.bf16.mxu1 %v3793_v56  ;;  %v2327_v56 = vld [vmem:[%s5483_s3 + $0xf0] sm:$0xff]  ;;  %v3833_v8 = vpack.c.bf16 %v266_v2, %v258_v0  ;;  %v274_v15 = vld [vmem:[#allocation2 + $0x738] sm:$0xff] }
 0x1a3   :  { %4048 = vmatpush1.bf16.msra.mxu0 %v4047_v55  ;;  %v4065_v55 = vpack.c.bf16 %v2328_v47, %v2326_v11  ;;  %v4067_v63 = vpack.c.bf16 %v2327_v56, %v2325_v54  ;;  %v225_v11 = vld [vmem:[#allocation2 + $0x5b0] sm:$0xff]  ;;  %v2346_v54 = vld [vmem:[%s5483_s3 + $0x188] sm:$0xff]  ;;  %v282_v16 = vld [vmem:[#allocation2 + $0x778] sm:$0xff] }
 0x1a4   :  { %4050 = vmatprep.subr.bf16.mxu0 %v4049_v60  ;;  %v2332_v60 = vld [vmem:[%s5483_s3 + $0x118] sm:$0xff]  ;;  %v233_v47 = vld [vmem:[#allocation2 + $0x5f0] sm:$0xff]  ;;  %v3837_v23 = vpack.c.bf16 %v282_v16, %v274_v15 }
 0x1a5   :  { %3796 = vmatpush1.bf16.msra.mxu1 %v3795_v3  ;;  %v2329_v3 = vld [vmem:[%s5483_s3 + $0x100] sm:$0xff]  ;;  %v3827_v56 = vpack.c.bf16 %v233_v47, %v225_v11  ;;  %v290_v33 = vld [vmem:[#allocation2 + $0x7b8] sm:$0xff]  ;;  %v321_v2 = vld [vmem:[#allocation2 + $0x8b0] sm:$0xff] }
 0x1a6   :  { %3798 = vmatprep.subr.bf16.mxu1 %v3797_v5  ;;  %v2331_v5 = vld [vmem:[%s5483_s3 + $0x110] sm:$0xff]  ;;  %v298_v35 = vld [vmem:[#allocation2 + $0x7f8] sm:$0xff] }
 0x1a7   :  { %4052 = vmatpush1.bf16.msra.mxu0 %v4051_v4  ;;  %v4069_v4 = vpack.c.bf16 %v2332_v60, %v2330_v59  ;;  %v4071_v13 = vpack.c.bf16 %v2331_v5, %v2329_v3  ;;  %v241_v59 = vld [vmem:[#allocation2 + $0x630] sm:$0xff]  ;;  %v2350_v3 = vld [vmem:[%s5483_s3 + $0x1a8] sm:$0xff]  ;;  %v3841_v41 = vpack.c.bf16 %v298_v35, %v290_v33  ;;  %v306_v11 = vld [vmem:[#allocation2 + $0x838] sm:$0xff] }
 0x1a8   :  { %4054 = vmatprep.subr.bf16.mxu0 %v4053_v10  ;;  %v2336_v10 = vld [vmem:[%s5483_s3 + $0x138] sm:$0xff]  ;;  %v249_v60 = vld [vmem:[#allocation2 + $0x670] sm:$0xff] }
 0x1a9   :  { %3800 = vmatpush1.bf16.msra.mxu1 %v3799_v17  ;;  %v2333_v17 = vld [vmem:[%s5483_s3 + $0x120] sm:$0xff]  ;;  %v3831_v5 = vpack.c.bf16 %v249_v60, %v241_v59  ;;  %v314_v47 = vld [vmem:[#allocation2 + $0x878] sm:$0xff]  ;;  %v2363_v60 = vld [vmem:[%s5483_s3 + $0x210] sm:$0xff] }
 0x1aa   :  { %3802 = vmatprep.subr.bf16.mxu1 %v3801_v20  ;;  %v2335_v20 = vld [vmem:[%s5483_s3 + $0x130] sm:$0xff]  ;;  %v3845_v53 = vpack.c.bf16 %v314_v47, %v306_v11  ;;  %v2361_v59 = vld [vmem:[%s5483_s3 + $0x200] sm:$0xff]  ;;  %v370_v35 = vld [vmem:[#allocation2 + $0xa38] sm:$0xff] }
 0x1ab   :  { %4056 = vmatpush1.bf16.msra.mxu0 %v4055_v18  ;;  %v4073_v18 = vpack.c.bf16 %v2336_v10, %v2334_v9  ;;  %v4075_v31 = vpack.c.bf16 %v2335_v20, %v2333_v17  ;;  %v257_v9 = vld [vmem:[#allocation2 + $0x6b0] sm:$0xff]  ;;  %v2354_v17 = vld [vmem:[%s5483_s3 + $0x1c8] sm:$0xff]  ;;  %v386_v47 = vld [vmem:[#allocation2 + $0xab8] sm:$0xff] }
 0x1ac   :  { %4058 = vmatprep.subr.bf16.mxu0 %v4057_v29  ;;  %v2340_v29 = vld [vmem:[%s5483_s3 + $0x158] sm:$0xff]  ;;  %v265_v10 = vld [vmem:[#allocation2 + $0x6f0] sm:$0xff] }
 0x1ad   :  { %3804 = vmatpush1.bf16.msra.mxu1 %v3803_v36  ;;  %v2337_v36 = vld [vmem:[%s5483_s3 + $0x140] sm:$0xff]  ;;  %v3835_v20 = vpack.c.bf16 %v265_v10, %v257_v9  ;;  %v337_v15 = vld [vmem:[#allocation2 + $0x930] sm:$0xff] }
 0x1ae   :  { %3806 = vmatprep.subr.bf16.mxu1 %v3805_v38  ;;  %v2339_v38 = vld [vmem:[%s5483_s3 + $0x150] sm:$0xff]  ;;  %v2365_v10 = vld [vmem:[%s5483_s3 + $0x220] sm:$0xff] }
 0x1af   :  { %4060 = vmatpush1.bf16.msra.mxu0 %v4059_v37  ;;  %v4077_v37 = vpack.c.bf16 %v2340_v29, %v2338_v24  ;;  %v4079_v45 = vpack.c.bf16 %v2339_v38, %v2337_v36  ;;  %v273_v24 = vld [vmem:[#allocation2 + $0x730] sm:$0xff]  ;;  %v2358_v36 = vld [vmem:[%s5483_s3 + $0x1e8] sm:$0xff] }
 0x1b0   :  { %4062 = vmatprep.subr.bf16.mxu0 %v4061_v43  ;;  %v2344_v43 = vld [vmem:[%s5483_s3 + $0x178] sm:$0xff]  ;;  %v281_v29 = vld [vmem:[#allocation2 + $0x770] sm:$0xff] }
 0x1b1   :  { %3808 = vmatpush1.bf16.msra.mxu1 %v3807_v49  ;;  %v2341_v49 = vld [vmem:[%s5483_s3 + $0x160] sm:$0xff]  ;;  %v3839_v38 = vpack.c.bf16 %v281_v29, %v273_v24  ;;  %v345_v16 = vld [vmem:[#allocation2 + $0x970] sm:$0xff] }
 0x1b2   :  { %3810 = vmatprep.subr.bf16.mxu1 %v3809_v51  ;;  %v2343_v51 = vld [vmem:[%s5483_s3 + $0x170] sm:$0xff]  ;;  %v3855_v29 = vpack.c.bf16 %v345_v16, %v337_v15  ;;  %v2390_v16 = vld [vmem:[%s5483_s3 + $0x2e8] sm:$0xff] }
 0x1b3   :  { %4064 = vmatpush1.bf16.msra.mxu0 %v4063_v50  ;;  %v4081_v50 = vpack.c.bf16 %v2344_v43, %v2342_v42  ;;  %v4083_v57 = vpack.c.bf16 %v2343_v51, %v2341_v49  ;;  %v289_v42 = vld [vmem:[#allocation2 + $0x7b0] sm:$0xff]  ;;  %v2362_v49 = vld [vmem:[%s5483_s3 + $0x208] sm:$0xff] }
 0x1b4   :  { %4066 = vmatprep.subr.bf16.mxu0 %v4065_v55  ;;  %v2348_v55 = vld [vmem:[%s5483_s3 + $0x198] sm:$0xff]  ;;  %v297_v43 = vld [vmem:[#allocation2 + $0x7f0] sm:$0xff] }
 0x1b5   :  { %3812 = vmatpush1.bf16.msra.mxu1 %v3811_v62  ;;  %v2345_v62 = vld [vmem:[%s5483_s3 + $0x180] sm:$0xff]  ;;  %v3843_v51 = vpack.c.bf16 %v297_v43, %v289_v42  ;;  %v2371_v24 = vld [vmem:[%s5483_s3 + $0x250] sm:$0xff]  ;;  %v2378_v43 = vld [vmem:[%s5483_s3 + $0x288] sm:$0xff] }
 0x1b6   :  { %3814 = vmatprep.subr.bf16.mxu1 %v3813_v34  ;;  %v2347_v34 = vld [vmem:[%s5483_s3 + $0x190] sm:$0xff] }
 0x1b7   :  { %4068 = vmatpush1.bf16.msra.mxu0 %v4067_v63  ;;  %v4085_v63 = vpack.c.bf16 %v2348_v55, %v2346_v54  ;;  %v4087_v6 = vpack.c.bf16 %v2347_v34, %v2345_v62  ;;  %v305_v54 = vld [vmem:[#allocation2 + $0x830] sm:$0xff]  ;;  %v2368_v34 = vld [vmem:[%s5483_s3 + $0x238] sm:$0xff] }
 0x1b8   :  { %4070 = vmatprep.subr.bf16.mxu0 %v4069_v4  ;;  %v2352_v4 = vld [vmem:[%s5483_s3 + $0x1b8] sm:$0xff]  ;;  %v313_v55 = vld [vmem:[#allocation2 + $0x870] sm:$0xff] }
 0x1b9   :  { %3816 = vmatpush1.bf16.msra.mxu1 %v3815_v12  ;;  %v2349_v12 = vld [vmem:[%s5483_s3 + $0x1a0] sm:$0xff]  ;;  %v3847_v62 = vpack.c.bf16 %v313_v55, %v305_v54  ;;  %v361_v33 = vld [vmem:[#allocation2 + $0x9f0] sm:$0xff]  ;;  %v2382_v55 = vld [vmem:[%s5483_s3 + $0x2a8] sm:$0xff] }
 0x1ba   :  { %3818 = vmatprep.subr.bf16.mxu1 %v3817_v14  ;;  %v2351_v14 = vld [vmem:[%s5483_s3 + $0x1b0] sm:$0xff] }
 0x1bb   :  { %4072 = vmatpush1.bf16.msra.mxu0 %v4071_v13  ;;  %v4089_v13 = vpack.c.bf16 %v2352_v4, %v2350_v3  ;;  %v4091_v21 = vpack.c.bf16 %v2351_v14, %v2349_v12  ;;  %v329_v3 = vld [vmem:[#allocation2 + $0x8f0] sm:$0xff]  ;;  %v2289_v4 = vmax.f32 %v4558_v1, 0.0  ;;  %v2370_v1 = vld [vmem:[%s5483_s3 + $0x248] sm:$0xff] }
 0x1bc   :  { %4074 = vmatprep.subr.bf16.mxu0 %v4073_v18  ;;  %v2356_v18 = vld [vmem:[%s5483_s3 + $0x1d8] sm:$0xff]  ;;  %v2367_v12 = vld [vmem:[%s5483_s3 + $0x230] sm:$0xff] }
 0x1bd   :  { %3820 = vmatpush1.bf16.msra.mxu1 %v3819_v30  ;;  %v2353_v30 = vld [vmem:[%s5483_s3 + $0x1c0] sm:$0xff]  ;;  %v377_v11 = vld [vmem:[#allocation2 + $0xa70] sm:$0xff] }
 0x1be   :  { %3822 = vmatprep.subr.bf16.mxu1 %v3821_v32  ;;  %v2355_v32 = vld [vmem:[%s5483_s3 + $0x1d0] sm:$0xff] }
 0x1bf   :  { %4076 = vmatpush1.bf16.msra.mxu0 %v4075_v31  ;;  %v4093_v31 = vpack.c.bf16 %v2356_v18, %v2354_v17  ;;  %v4095_v40 = vpack.c.bf16 %v2355_v32, %v2353_v30  ;;  %v354_v17 = vld [vmem:[#allocation2 + $0x9b8] sm:$0xff]  ;;  %v353_v32 = vld [vmem:[#allocation2 + $0x9b0] sm:$0xff] }
 0x1c0   :  { %4078 = vmatprep.subr.bf16.mxu0 %v4077_v37  ;;  %v2360_v37 = vld [vmem:[%s5483_s3 + $0x1f8] sm:$0xff]  ;;  %v3859_v42 = vpack.c.bf16 %v361_v33, %v353_v32  ;;  %v2394_v33 = vld [vmem:[%s5483_s3 + $0x308] sm:$0xff] }
 0x1c1   :  { %3824 = vmatpush1.bf16.msra.mxu1 %v3823_v44  ;;  %v2357_v44 = vld [vmem:[%s5483_s3 + $0x1e0] sm:$0xff]  ;;  %v362_v18 = vld [vmem:[#allocation2 + $0x9f8] sm:$0xff] }
 0x1c2   :  { %3826 = vmatprep.subr.bf16.mxu1 %v3825_v7  ;;  %v2359_v7 = vld [vmem:[%s5483_s3 + $0x1f0] sm:$0xff]  ;;  %v2376_v30 = vld [vmem:[%s5483_s3 + $0x278] sm:$0xff] }
 0x1c3   :  { %4080 = vmatpush1.bf16.msra.mxu0 %v4079_v45  ;;  %v4097_v45 = vpack.c.bf16 %v2360_v37, %v2358_v36  ;;  %v4099_v52 = vpack.c.bf16 %v2359_v7, %v2357_v44  ;;  %v378_v36 = vld [vmem:[#allocation2 + $0xa78] sm:$0xff]  ;;  %v369_v7 = vld [vmem:[#allocation2 + $0xa30] sm:$0xff] }
 0x1c4   :  { %4082 = vmatprep.subr.bf16.mxu0 %v4081_v50  ;;  %v2364_v50 = vld [vmem:[%s5483_s3 + $0x218] sm:$0xff]  ;;  %v3863_v54 = vpack.c.bf16 %v377_v11, %v369_v7  ;;  %v2398_v11 = vld [vmem:[%s5483_s3 + $0x328] sm:$0xff] }
 0x1c5   :  { %3828 = vmatpush1.bf16.msra.mxu1 %v3827_v56  ;;  %v322_v56 = vld [vmem:[#allocation2 + $0x8b8] sm:$0xff] }
 0x1c6   :  { %3830 = vmatprep.subr.bf16.mxu1 %v3829_v58  ;;  %v4101_v58 = vpack.c.bf16 %v2364_v50, %v2362_v49  ;;  %v2380_v44 = vld [vmem:[%s5483_s3 + $0x298] sm:$0xff] }
 0x1c7   :  { %4084 = vmatpush1.bf16.msra.mxu0 %v4083_v57  ;;  %v330_v57 = vld [vmem:[#allocation2 + $0x8f8] sm:$0xff] }
 0x1c8   :  { %4086 = vmatprep.subr.bf16.mxu0 %v4085_v63  ;;  %v2366_v63 = vld [vmem:[%s5483_s3 + $0x228] sm:$0xff]  ;;  %v3849_v0 = vpack.c.bf16 %v330_v57, %v322_v56  ;;  %v394_v49 = vld [vmem:[#allocation2 + $0xaf8] sm:$0xff] }
 0x1c9   :  { %3832 = vmatpush1.bf16.msra.mxu1 %v3831_v5  ;;  %v338_v5 = vld [vmem:[#allocation2 + $0x938] sm:$0xff]  ;;  %v4105_v9 = vpack.c.bf16 %v2368_v34, %v2366_v63  ;;  %v3865_v57 = vpack.c.bf16 %v394_v49, %v386_v47 }
 0x1ca   :  { %3834 = vmatprep.subr.bf16.mxu1 %v3833_v8  ;;  %v4103_v8 = vpack.c.bf16 %v2363_v60, %v2361_v59  ;;  %v2384_v56 = vld [vmem:[%s5483_s3 + $0x2b8] sm:$0xff]  ;;  %v393_v59 = vld [vmem:[#allocation2 + $0xaf0] sm:$0xff] }
 0x1cb   :  { %4088 = vmatpush1.bf16.msra.mxu0 %v4087_v6  ;;  %v346_v6 = vld [vmem:[#allocation2 + $0x978] sm:$0xff]  ;;  %v4121_v34 = vpack.c.bf16 %v2384_v56, %v2382_v55  ;;  %v2397_v56 = vld [vmem:[%s5483_s3 + $0x320] sm:$0xff] }
 0x1cc   :  { %4090 = vmatprep.subr.bf16.mxu0 %v4089_v13  ;;  %v3851_v13 = vpack.c.bf16 %v329_v3, %v321_v2  ;;  %v3853_v14 = vpack.c.bf16 %v346_v6, %v338_v5  ;;  %v402_v60 = vld [vmem:[#allocation2 + $0xb38] sm:$0xff]  ;;  %v2383_v2 = vld [vmem:[%s5483_s3 + $0x2b0] sm:$0xff] }
 0x1cd   :  { %3836 = vmatpush1.bf16.msra.mxu1 %v3835_v20  ;;  %v4107_v20 = vpack.c.bf16 %v2367_v12, %v2365_v10  ;;  %v2388_v5 = vld [vmem:[%s5483_s3 + $0x2d8] sm:$0xff] }
 0x1ce   :  { %3838 = vmatprep.subr.bf16.mxu1 %v3837_v23  ;;  %v2369_v23 = vld [vmem:[%s5483_s3 + $0x240] sm:$0xff]  ;;  %v418_v10 = vld [vmem:[#allocation2 + $0xbb8] sm:$0xff] }
 0x1cf   :  { %4092 = vmatpush1.bf16.msra.mxu0 %v4091_v21  ;;  %v4111_v37 = vpack.c.bf16 %v2371_v24, %v2369_v23  ;;  %v426_v12 = vld [vmem:[#allocation2 + $0xbf8] sm:$0xff] }
 0x1d0   :  { %4094 = vmatprep.subr.bf16.mxu0 %v4093_v31  ;;  %v3857_v31 = vpack.c.bf16 %v362_v18, %v354_v17  ;;  %v2392_v17 = vld [vmem:[%s5483_s3 + $0x2f8] sm:$0xff]  ;;  %v3873_v18 = vpack.c.bf16 %v426_v12, %v418_v10 }
 0x1d1   :  { %3840 = vmatpush1.bf16.msra.mxu1 %v3839_v38  ;;  %v434_v23 = vld [vmem:[#allocation2 + $0xc38] sm:$0xff] }
 0x1d2   :  { %3842 = vmatprep.subr.bf16.mxu1 %v3841_v41  ;;  %v2375_v41 = vld [vmem:[%s5483_s3 + $0x270] sm:$0xff]  ;;  %v442_v24 = vld [vmem:[#allocation2 + $0xc78] sm:$0xff] }
 0x1d3   :  { %4096 = vmatpush1.bf16.msra.mxu0 %v4095_v40  ;;  %v2373_v40 = vld [vmem:[%s5483_s3 + $0x260] sm:$0xff]  ;;  %v2400_v47 = vld [vmem:[%s5483_s3 + $0x338] sm:$0xff] }
 0x1d4   :  { %4098 = vmatprep.subr.bf16.mxu0 %v4097_v45  ;;  %v3861_v45 = vpack.c.bf16 %v378_v36, %v370_v35  ;;  %v4115_v50 = vpack.c.bf16 %v2375_v41, %v2373_v40  ;;  %v2396_v35 = vld [vmem:[%s5483_s3 + $0x318] sm:$0xff]  ;;  %v3877_v36 = vpack.c.bf16 %v442_v24, %v434_v23  ;;  %v4137_v55 = vpack.c.bf16 %v2400_v47, %v2398_v11  ;;  %v2413_v47 = vld [vmem:[%s5483_s3 + $0x3a0] sm:$0xff] }
 0x1d5   :  { %3844 = vmatpush1.bf16.msra.mxu1 %v3843_v51  ;;  %v4117_v51 = vpack.c.bf16 %v2380_v44, %v2378_v43  ;;  %v450_v40 = vld [vmem:[#allocation2 + $0xcb8] sm:$0xff]  ;;  %v4133_v43 = vpack.c.bf16 %v2396_v35, %v2394_v33  ;;  %v2393_v44 = vld [vmem:[%s5483_s3 + $0x300] sm:$0xff] }
 0x1d6   :  { %3846 = vmatprep.subr.bf16.mxu1 %v3845_v53  ;;  %v2379_v53 = vld [vmem:[%s5483_s3 + $0x290] sm:$0xff]  ;;  %v458_v41 = vld [vmem:[#allocation2 + $0xcf8] sm:$0xff]  ;;  %v2409_v35 = vld [vmem:[%s5483_s3 + $0x380] sm:$0xff] }
 0x1d7   :  { %4100 = vmatpush1.bf16.msra.mxu0 %v4099_v52  ;;  %v2377_v52 = vld [vmem:[%s5483_s3 + $0x280] sm:$0xff]  ;;  %v3881_v49 = vpack.c.bf16 %v458_v41, %v450_v40  ;;  %v2408_v10 = vld [vmem:[%s5483_s3 + $0x378] sm:$0xff] }
 0x1d8   :  { %4102 = vmatprep.subr.bf16.mxu0 %v4101_v58  ;;  %2070 = vmatmul.mubr.f32.vlgmr.msra.gmra.mrb[4].mxu1 %v4490_v25  ;;  %v2372_v25 = vld [vmem:[%s5483_s3 + $0x258] sm:$0xff]  ;;  %v385_v58 = vld [vmem:[#allocation2 + $0xab0] sm:$0xff]  ;;  %v4119_v63 = vpack.c.bf16 %v2379_v53, %v2377_v52 }
 0x1d9   :  { %3848 = vmatpush1.bf16.msra.mxu1 %v3847_v62  ;;  %2140 = vmatprep.mubr.f32.mxu1 %v4523_v46  ;;  %v4109_v21 = vpack.c.bf16 %v2372_v25, %v2370_v1  ;;  %v2374_v46 = vld [vmem:[%s5483_s3 + $0x268] sm:$0xff]  ;;  %v410_v62 = vld [vmem:[#allocation2 + $0xb78] sm:$0xff]  ;;  %v3867_v3 = vpack.c.bf16 %v393_v59, %v385_v58  ;;  %v2385_v25 = vld [vmem:[%s5483_s3 + $0x2c0] sm:$0xff] }
 0x1da   :  { %2630 = vmatmul.mubr.f32.vlgmr.msra.gmra.mrb[4].mxu0 %v2289_v4  ;;  %3850 = vmatprep.subr.bf16.mxu1 %v3849_v0  ;;  %v4113_v38 = vpack.c.bf16 %v2376_v30, %v2374_v46  ;;  %v2381_v0 = vld [vmem:[%s5483_s3 + $0x2a0] sm:$0xff]  ;;  %v2386_v4 = vld [vmem:[%s5483_s3 + $0x2c8] sm:$0xff]  ;;  %v3869_v6 = vpack.c.bf16 %v410_v62, %v402_v60  ;;  %v4129_v46 = vpack.c.bf16 %v2392_v17, %v2390_v16  ;;  %v466_v52 = vld [vmem:[#allocation2 + $0xd38] sm:$0xff] }
 0x1db   :  { %4104 = vmatpush1.bf16.msra.mxu0 %v4103_v8  ;;  %v401_v8 = vld [vmem:[#allocation2 + $0xb30] sm:$0xff]  ;;  %v4125_v1 = vpack.c.bf16 %v2388_v5, %v2386_v4  ;;  %v2389_v30 = vld [vmem:[%s5483_s3 + $0x2e0] sm:$0xff]  ;;  %v474_v53 = vld [vmem:[#allocation2 + $0xd78] sm:$0xff] }
 0x1dc   :  { %4106 = vmatprep.subr.bf16.mxu0 %v4105_v9  ;;  %v409_v9 = vld [vmem:[#allocation2 + $0xb70] sm:$0xff]  ;;  %v2402_v59 = vld [vmem:[%s5483_s3 + $0x348] sm:$0xff]  ;;  %v2404_v60 = vld [vmem:[%s5483_s3 + $0x358] sm:$0xff]  ;;  %v3885_v62 = vpack.c.bf16 %v474_v53, %v466_v52 }
 0x1dd   :  { %3852 = vmatpush1.bf16.msra.mxu1 %v3851_v13  ;;  %v4123_v13 = vpack.c.bf16 %v2383_v2, %v2381_v0  ;;  %v3871_v15 = vpack.c.bf16 %v409_v9, %v401_v8  ;;  %v482_v0 = vld [vmem:[#allocation2 + $0xdb8] sm:$0xff]  ;;  %v4141_v4 = vpack.c.bf16 %v2404_v60, %v2402_v59  ;;  %v2401_v5 = vld [vmem:[%s5483_s3 + $0x340] sm:$0xff]  ;;  %v2406_v9 = vld [vmem:[%s5483_s3 + $0x368] sm:$0xff] }
 0x1de   :  { %3854 = vmatprep.subr.bf16.mxu1 %v3853_v14  ;;  %v2387_v14 = vld [vmem:[%s5483_s3 + $0x2d0] sm:$0xff]  ;;  %v490_v2 = vld [vmem:[#allocation2 + $0xdf8] sm:$0xff]  ;;  %v4145_v16 = vpack.c.bf16 %v2408_v10, %v2406_v9  ;;  %v2405_v17 = vld [vmem:[%s5483_s3 + $0x360] sm:$0xff] }
 0x1df   :  { %4108 = vmatpush1.bf16.msra.mxu0 %v4107_v20  ;;  %v417_v20 = vld [vmem:[#allocation2 + $0xbb0] sm:$0xff]  ;;  %v3889_v12 = vpack.c.bf16 %v490_v2, %v482_v0  ;;  %v2412_v23 = vld [vmem:[%s5483_s3 + $0x398] sm:$0xff]  ;;  %v2417_v60 = vld [vmem:[%s5483_s3 + $0x3c0] sm:$0xff] }
 0x1e0   :  { %4110 = vmatprep.subr.bf16.mxu0 %v4109_v21  ;;  %v425_v21 = vld [vmem:[#allocation2 + $0xbf0] sm:$0xff]  ;;  %v2416_v40 = vld [vmem:[%s5483_s3 + $0x3b8] sm:$0xff]  ;;  %v2421_v10 = vld [vmem:[%s5483_s3 + $0x3e0] sm:$0xff] }
 0x1e1   :  { %3856 = vmatpush1.bf16.msra.mxu1 %v3855_v29  ;;  %v4127_v29 = vpack.c.bf16 %v2387_v14, %v2385_v25  ;;  %v3875_v32 = vpack.c.bf16 %v425_v21, %v417_v20  ;;  %v498_v25 = vld [vmem:[#allocation2 + $0xe38] sm:$0xff]  ;;  %v2410_v21 = vld [vmem:[%s5483_s3 + $0x388] sm:$0xff] }
 0x1e2   :  { %3858 = vmatprep.subr.bf16.mxu1 %v3857_v31  ;;  %v2391_v31 = vld [vmem:[%s5483_s3 + $0x2f0] sm:$0xff]  ;;  %v506_v14 = vld [vmem:[#allocation2 + $0xe78] sm:$0xff]  ;;  %v4149_v33 = vpack.c.bf16 %v2412_v23, %v2410_v21 }
 0x1e3   :  { %4112 = vmatpush1.bf16.msra.mxu0 %v4111_v37  ;;  %v433_v37 = vld [vmem:[#allocation2 + $0xc30] sm:$0xff]  ;;  %v3893_v24 = vpack.c.bf16 %v506_v14, %v498_v25  ;;  %v2420_v52 = vld [vmem:[%s5483_s3 + $0x3d8] sm:$0xff] }
 0x1e4   :  { %4114 = vmatprep.subr.bf16.mxu0 %v4113_v38  ;;  %v441_v38 = vld [vmem:[#allocation2 + $0xc70] sm:$0xff]  ;;  %v2424_v0 = vld [vmem:[%s5483_s3 + $0x3f8] sm:$0xff] }
 0x1e5   :  { %3860 = vmatpush1.bf16.msra.mxu1 %v3859_v42  ;;  %v4131_v42 = vpack.c.bf16 %v2391_v31, %v2389_v30  ;;  %v3879_v7 = vpack.c.bf16 %v441_v38, %v433_v37  ;;  %v514_v30 = vld [vmem:[#allocation2 + $0xeb8] sm:$0xff]  ;;  %v2414_v38 = vld [vmem:[%s5483_s3 + $0x3a8] sm:$0xff] }
 0x1e6   :  { %3862 = vmatprep.subr.bf16.mxu1 %v3861_v45  ;;  %v2395_v45 = vld [vmem:[%s5483_s3 + $0x310] sm:$0xff]  ;;  %v522_v31 = vld [vmem:[#allocation2 + $0xef8] sm:$0xff]  ;;  %v4153_v11 = vpack.c.bf16 %v2416_v40, %v2414_v38 }
 0x1e7   :  { %4116 = vmatpush1.bf16.msra.mxu0 %v4115_v50  ;;  %v449_v50 = vld [vmem:[#allocation2 + $0xcb0] sm:$0xff]  ;;  %v3897_v41 = vpack.c.bf16 %v522_v31, %v514_v30  ;;  %v2428_v25 = vld [vmem:[%s5483_s3 + $0x418] sm:$0xff] }
 0x1e8   :  { %4118 = vmatprep.subr.bf16.mxu0 %v4117_v51  ;;  %v457_v51 = vld [vmem:[#allocation2 + $0xcf0] sm:$0xff]  ;;  %v594_v30 = vld [vmem:[#allocation2 + $0x1138] sm:$0xff] }
 0x1e9   :  { %3864 = vmatpush1.bf16.msra.mxu1 %v3863_v54  ;;  %v4135_v54 = vpack.c.bf16 %v2395_v45, %v2393_v44  ;;  %v3883_v58 = vpack.c.bf16 %v457_v51, %v449_v50  ;;  %v530_v44 = vld [vmem:[#allocation2 + $0xf38] sm:$0xff]  ;;  %v2418_v51 = vld [vmem:[%s5483_s3 + $0x3c8] sm:$0xff] }
 0x1ea   :  { %3866 = vmatprep.subr.bf16.mxu1 %v3865_v57  ;;  %v2399_v57 = vld [vmem:[%s5483_s3 + $0x330] sm:$0xff]  ;;  %v538_v45 = vld [vmem:[#allocation2 + $0xf78] sm:$0xff]  ;;  %v4157_v59 = vpack.c.bf16 %v2420_v52, %v2418_v51 }
 0x1eb   :  { %4120 = vmatpush1.bf16.msra.mxu0 %v4119_v63  ;;  %v465_v63 = vld [vmem:[#allocation2 + $0xd30] sm:$0xff]  ;;  %v3901_v53 = vpack.c.bf16 %v538_v45, %v530_v44  ;;  %v602_v31 = vld [vmem:[#allocation2 + $0x1178] sm:$0xff] }
 0x1ec   :  { %4122 = vmatprep.subr.bf16.mxu0 %v4121_v34  ;;  %v473_v34 = vld [vmem:[#allocation2 + $0xd70] sm:$0xff]  ;;  %v618_v38 = vld [vmem:[#allocation2 + $0x11f8] sm:$0xff] }
 0x1ed   :  { %3868 = vmatpush1.bf16.msra.mxu1 %v3867_v3  ;;  %v4139_v3 = vpack.c.bf16 %v2399_v57, %v2397_v56  ;;  %v3887_v8 = vpack.c.bf16 %v473_v34, %v465_v63  ;;  %v546_v56 = vld [vmem:[#allocation2 + $0xfb8] sm:$0xff]  ;;  %v2422_v34 = vld [vmem:[%s5483_s3 + $0x3e8] sm:$0xff]  ;;  %v641_v52 = vld [vmem:[#allocation2 + $0x12b0] sm:$0xff] }
 0x1ee   :  { %3870 = vmatprep.subr.bf16.mxu1 %v3869_v6  ;;  %v2403_v6 = vld [vmem:[%s5483_s3 + $0x350] sm:$0xff]  ;;  %v554_v57 = vld [vmem:[#allocation2 + $0xff8] sm:$0xff]  ;;  %v4161_v9 = vpack.c.bf16 %v2424_v0, %v2422_v34 }
 0x1ef   :  { %4124 = vmatpush1.bf16.msra.mxu0 %v4123_v13  ;;  %v481_v13 = vld [vmem:[#allocation2 + $0xdb0] sm:$0xff]  ;;  %v3905_v2 = vpack.c.bf16 %v554_v57, %v546_v56  ;;  %v626_v44 = vld [vmem:[#allocation2 + $0x1238] sm:$0xff] }
 0x1f0   :  { %4126 = vmatprep.subr.bf16.mxu0 %v4125_v1  ;;  %v489_v1 = vld [vmem:[#allocation2 + $0xdf0] sm:$0xff]  ;;  %v634_v45 = vld [vmem:[#allocation2 + $0x1278] sm:$0xff] }
 0x1f1   :  { %3872 = vmatpush1.bf16.msra.mxu1 %v3871_v15  ;;  %v4143_v15 = vpack.c.bf16 %v2403_v6, %v2401_v5  ;;  %v3891_v20 = vpack.c.bf16 %v489_v1, %v481_v13  ;;  %v562_v5 = vld [vmem:[#allocation2 + $0x1038] sm:$0xff]  ;;  %v2426_v1 = vld [vmem:[%s5483_s3 + $0x408] sm:$0xff]  ;;  %v673_v0 = vld [vmem:[#allocation2 + $0x13b0] sm:$0xff] }
 0x1f2   :  { %3874 = vmatprep.subr.bf16.mxu1 %v3873_v18  ;;  %v2407_v18 = vld [vmem:[%s5483_s3 + $0x370] sm:$0xff]  ;;  %v570_v6 = vld [vmem:[#allocation2 + $0x1078] sm:$0xff]  ;;  %v4165_v21 = vpack.c.bf16 %v2428_v25, %v2426_v1 }
 0x1f3   :  { %4128 = vmatpush1.bf16.msra.mxu0 %v4127_v29  ;;  %v497_v29 = vld [vmem:[#allocation2 + $0xe30] sm:$0xff]  ;;  %v3909_v14 = vpack.c.bf16 %v570_v6, %v562_v5 }
 0x1f4   :  { %4130 = vmatprep.subr.bf16.mxu0 %v4129_v46  ;;  %v505_v46 = vld [vmem:[#allocation2 + $0xe70] sm:$0xff] }
 0x1f5   :  { %3876 = vmatpush1.bf16.msra.mxu1 %v3875_v32  ;;  %v4147_v32 = vpack.c.bf16 %v2407_v18, %v2405_v17  ;;  %v3895_v37 = vpack.c.bf16 %v505_v46, %v497_v29  ;;  %v578_v17 = vld [vmem:[#allocation2 + $0x10b8] sm:$0xff]  ;;  %v577_v29 = vld [vmem:[#allocation2 + $0x10b0] sm:$0xff] }
 0x1f6   :  { %3878 = vmatprep.subr.bf16.mxu1 %v3877_v36  ;;  %v2411_v36 = vld [vmem:[%s5483_s3 + $0x390] sm:$0xff]  ;;  %v586_v18 = vld [vmem:[#allocation2 + $0x10f8] sm:$0xff] }
 0x1f7   :  { %4132 = vmatpush1.bf16.msra.mxu0 %v4131_v42  ;;  %v513_v42 = vld [vmem:[#allocation2 + $0xeb0] sm:$0xff] }
 0x1f8   :  { %4134 = vmatprep.subr.bf16.mxu0 %v4133_v43  ;;  %v521_v43 = vld [vmem:[#allocation2 + $0xef0] sm:$0xff] }
 0x1f9   :  { %3880 = vmatpush1.bf16.msra.mxu1 %v3879_v7  ;;  %v4151_v7 = vpack.c.bf16 %v2411_v36, %v2409_v35  ;;  %v3899_v50 = vpack.c.bf16 %v521_v43, %v513_v42  ;;  %v585_v46 = vld [vmem:[#allocation2 + $0x10f0] sm:$0xff] }
 0x1fa   :  { %3882 = vmatprep.subr.bf16.mxu1 %v3881_v49  ;;  %v2415_v49 = vld [vmem:[%s5483_s3 + $0x3b0] sm:$0xff] }
 0x1fb   :  { %4136 = vmatpush1.bf16.msra.mxu0 %v4135_v54  ;;  %v529_v54 = vld [vmem:[#allocation2 + $0xf30] sm:$0xff] }
 0x1fc   :  { %4138 = vmatprep.subr.bf16.mxu0 %v4137_v55  ;;  %v537_v55 = vld [vmem:[#allocation2 + $0xf70] sm:$0xff] }
 0x1fd   :  { %3884 = vmatpush1.bf16.msra.mxu1 %v3883_v58  ;;  %v4155_v58 = vpack.c.bf16 %v2415_v49, %v2413_v47  ;;  %v3903_v63 = vpack.c.bf16 %v537_v55, %v529_v54  ;;  %v593_v35 = vld [vmem:[#allocation2 + $0x1130] sm:$0xff]  ;;  %v642_v47 = vld [vmem:[#allocation2 + $0x12b8] sm:$0xff] }
 0x1fe   :  { %3886 = vmatprep.subr.bf16.mxu1 %v3885_v62  ;;  %v2419_v62 = vld [vmem:[%s5483_s3 + $0x3d0] sm:$0xff]  ;;  %v650_v49 = vld [vmem:[#allocation2 + $0x12f8] sm:$0xff] }
 0x1ff   :  { %4140 = vmatpush1.bf16.msra.mxu0 %v4139_v3  ;;  %v545_v3 = vld [vmem:[#allocation2 + $0xfb0] sm:$0xff]  ;;  %v3929_v51 = vpack.c.bf16 %v650_v49, %v642_v47  ;;  %v658_v54 = vld [vmem:[#allocation2 + $0x1338] sm:$0xff] }
 0x200   :  { %4142 = vmatprep.subr.bf16.mxu0 %v4141_v4  ;;  %v553_v4 = vld [vmem:[#allocation2 + $0xff0] sm:$0xff]  ;;  %v666_v55 = vld [vmem:[#allocation2 + $0x1378] sm:$0xff] }
 0x201   :  { %3888 = vmatpush1.bf16.msra.mxu1 %v3887_v8  ;;  %v4159_v8 = vpack.c.bf16 %v2419_v62, %v2417_v60  ;;  %v3907_v13 = vpack.c.bf16 %v553_v4, %v545_v3  ;;  %v601_v36 = vld [vmem:[#allocation2 + $0x1170] sm:$0xff]  ;;  %v3933_v57 = vpack.c.bf16 %v666_v55, %v658_v54  ;;  %v674_v60 = vld [vmem:[#allocation2 + $0x13b8] sm:$0xff] }
 0x202   :  { %3890 = vmatprep.subr.bf16.mxu1 %v3889_v12  ;;  %v2423_v12 = vld [vmem:[%s5483_s3 + $0x3f0] sm:$0xff]  ;;  %v3919_v40 = vpack.c.bf16 %v601_v36, %v593_v35  ;;  %v682_v62 = vld [vmem:[#allocation2 + $0x13f8] sm:$0xff] }
 0x203   :  { %4144 = vmatpush1.bf16.msra.mxu0 %v4143_v15  ;;  %v561_v15 = vld [vmem:[#allocation2 + $0x1030] sm:$0xff]  ;;  %v3937_v34 = vpack.c.bf16 %v682_v62, %v674_v60  ;;  %v690_v3 = vld [vmem:[#allocation2 + $0x1438] sm:$0xff] }
 0x204   :  { %4146 = vmatprep.subr.bf16.mxu0 %v4145_v16  ;;  %v569_v16 = vld [vmem:[#allocation2 + $0x1070] sm:$0xff]  ;;  %v698_v4 = vld [vmem:[#allocation2 + $0x1478] sm:$0xff] }
 0x205   :  { %3892 = vmatpush1.bf16.msra.mxu1 %v3891_v20  ;;  %v4163_v20 = vpack.c.bf16 %v2423_v12, %v2421_v10  ;;  %v3911_v23 = vpack.c.bf16 %v569_v16, %v561_v15  ;;  %v609_v42 = vld [vmem:[#allocation2 + $0x11b0] sm:$0xff]  ;;  %v3941_v6 = vpack.c.bf16 %v698_v4, %v690_v3  ;;  %v706_v10 = vld [vmem:[#allocation2 + $0x14b8] sm:$0xff] }
 0x206   :  { %3894 = vmatprep.subr.bf16.mxu1 %v3893_v24  ;;  %v3913_v24 = vpack.c.bf16 %v586_v18, %v578_v17  ;;  %v617_v43 = vld [vmem:[#allocation2 + $0x11f0] sm:$0xff]  ;;  %v714_v12 = vld [vmem:[#allocation2 + $0x14f8] sm:$0xff] }
 0x207   :  { %4148 = vmatpush1.bf16.msra.mxu0 %v4147_v32  ;;  %v3915_v32 = vpack.c.bf16 %v585_v46, %v577_v29  ;;  %v3945_v1 = vpack.c.bf16 %v714_v12, %v706_v10  ;;  %v705_v25 = vld [vmem:[#allocation2 + $0x14b0] sm:$0xff]  ;;  %v722_v15 = vld [vmem:[#allocation2 + $0x1538] sm:$0xff] }
 0x208   :  { %4150 = vmatprep.subr.bf16.mxu0 %v4149_v33  ;;  %v3917_v33 = vpack.c.bf16 %v602_v31, %v594_v30  ;;  %v730_v16 = vld [vmem:[#allocation2 + $0x1578] sm:$0xff]  ;;  %v737_v30 = vld [vmem:[#allocation2 + $0x15b0] sm:$0xff] }
 0x209   :  { %3896 = vmatpush1.bf16.msra.mxu1 %v3895_v37  ;;  %v610_v37 = vld [vmem:[#allocation2 + $0x11b8] sm:$0xff]  ;;  %v3949_v18 = vpack.c.bf16 %v730_v16, %v722_v15  ;;  %v745_v31 = vld [vmem:[#allocation2 + $0x15f0] sm:$0xff] }
 0x20a   :  { %3898 = vmatprep.subr.bf16.mxu1 %v3897_v41  ;;  %v3921_v41 = vpack.c.bf16 %v618_v38, %v610_v37  ;;  %v3955_v35 = vpack.c.bf16 %v745_v31, %v737_v30  ;;  %v753_v37 = vld [vmem:[#allocation2 + $0x1630] sm:$0xff]  ;;  %v1083_v30 = vsub.s32 3, %v4478_v61 }
 0x20b   :  { %4152 = vmatpush1.bf16.msra.mxu0 %v4151_v7  ;;  %v3925_v7 = vpack.c.bf16 %v634_v45, %v626_v44  ;;  %v761_v38 = vld [vmem:[#allocation2 + $0x1670] sm:$0xff] }
 0x20c   :  { %4154 = vmatprep.subr.bf16.mxu0 %v4153_v11  ;;  %v625_v11 = vld [vmem:[#allocation2 + $0x1230] sm:$0xff] }
 0x20d   :  { %3900 = vmatpush1.bf16.msra.mxu1 %v3899_v50  ;;  %v769_v44 = vld [vmem:[#allocation2 + $0x16b0] sm:$0xff] }
 0x20e   :  { %3902 = vmatprep.subr.bf16.mxu1 %v3901_v53  ;;  %v649_v53 = vld [vmem:[#allocation2 + $0x12f0] sm:$0xff] }
 0x20f   :  { %4156 = vmatpush1.bf16.msra.mxu0 %v4155_v58  ;;  %v3931_v56 = vpack.c.bf16 %v649_v53, %v641_v52  ;;  %v657_v58 = vld [vmem:[#allocation2 + $0x1330] sm:$0xff] }
 0x210   :  { %4158 = vmatprep.subr.bf16.mxu0 %v4157_v59  ;;  %v665_v59 = vld [vmem:[#allocation2 + $0x1370] sm:$0xff] }
 0x211   :  { %3904 = vmatpush1.bf16.msra.mxu1 %v3903_v63  ;;  %v3935_v63 = vpack.c.bf16 %v665_v59, %v657_v58  ;;  %v777_v45 = vld [vmem:[#allocation2 + $0x16f0] sm:$0xff] }
 0x212   :  { %3906 = vmatprep.subr.bf16.mxu1 %v3905_v2  ;;  %v681_v2 = vld [vmem:[#allocation2 + $0x13f0] sm:$0xff] }
 0x213   :  { %4160 = vmatpush1.bf16.msra.mxu0 %v4159_v8  ;;  %v3939_v5 = vpack.c.bf16 %v681_v2, %v673_v0  ;;  %v689_v8 = vld [vmem:[#allocation2 + $0x1430] sm:$0xff] }
 0x214   :  { %4162 = vmatprep.subr.bf16.mxu0 %v4161_v9  ;;  %v697_v9 = vld [vmem:[#allocation2 + $0x1470] sm:$0xff] }
 0x215   :  { %3908 = vmatpush1.bf16.msra.mxu1 %v3907_v13  ;;  %v3943_v13 = vpack.c.bf16 %v697_v9, %v689_v8  ;;  %v785_v47 = vld [vmem:[#allocation2 + $0x1730] sm:$0xff] }
 0x216   :  { %3910 = vmatprep.subr.bf16.mxu1 %v3909_v14  ;;  %v713_v14 = vld [vmem:[#allocation2 + $0x14f0] sm:$0xff] }
 0x217   :  { %4164 = vmatpush1.bf16.msra.mxu0 %v4163_v20  ;;  %v3947_v17 = vpack.c.bf16 %v713_v14, %v705_v25  ;;  %v721_v20 = vld [vmem:[#allocation2 + $0x1530] sm:$0xff] }
 0x218   :  { %2141 = vmatmul.mubr.f32.vlgmr.msra.gmra.mrb[4].mxu1 %v4516_v22  ;;  %4166 = vmatprep.subr.bf16.mxu0 %v4165_v21  ;;  %v3923_v22 = vpack.c.bf16 %v617_v43, %v609_v42  ;;  %v729_v21 = vld [vmem:[#allocation2 + $0x1570] sm:$0xff]  ;;  %v3959_v42 = vpack.c.bf16 %v761_v38, %v753_v37  ;;  %v922_v37 = vld [vmem:[#allocation2 + $0x1b78] sm:$0xff]  ;;  %v4969_v38 = vld [vmem:[%s5482_s2] sm:$0xff] }
 0x219   :  { %3912 = vmatpush1.bf16.msra.mxu1 %v3911_v23  ;;  %2211 = vmatprep.mubr.f32.mxu1 %v4507_v39  ;;  %v633_v39 = vld [vmem:[#allocation2 + $0x1270] sm:$0xff]  ;;  %v738_v23 = vld [vmem:[#allocation2 + $0x15b8] sm:$0xff]  ;;  %v3951_v29 = vpack.c.bf16 %v729_v21, %v721_v20 }
 0x21a   :  { %3914 = vmatprep.subr.bf16.mxu1 %v3913_v24  ;;  %v3927_v50 = vpack.c.bf16 %v633_v39, %v625_v11  ;;  %v746_v24 = vld [vmem:[#allocation2 + $0x15f8] sm:$0xff]  ;;  %v3963_v11 = vpack.c.bf16 %v777_v45, %v769_v44  ;;  %v793_v49 = vld [vmem:[#allocation2 + $0x1770] sm:$0xff] }
 0x21b   :  { %v3953_v46 = vpack.c.bf16 %v746_v24, %v738_v23  ;;  %v3967_v52 = vpack.c.bf16 %v793_v49, %v785_v47  ;;  %v801_v54 = vld [vmem:[#allocation2 + $0x17b0] sm:$0xff]  ;;  %v898_v23 = vld [vmem:[#allocation2 + $0x1ab8] sm:$0xff] }
 0x21c   :  { %v809_v55 = vld [vmem:[#allocation2 + $0x17f0] sm:$0xff]  ;;  %v906_v24 = vld [vmem:[#allocation2 + $0x1af8] sm:$0xff] }
 0x21d   :  { %3916 = vmatpush1.bf16.msra.mxu1 %v3915_v32  ;;  %v754_v32 = vld [vmem:[#allocation2 + $0x1638] sm:$0xff]  ;;  %v3971_v58 = vpack.c.bf16 %v809_v55, %v801_v54  ;;  %v817_v60 = vld [vmem:[#allocation2 + $0x1830] sm:$0xff]  ;;  %v3993_v31 = vpack.c.bf16 %v906_v24, %v898_v23 }
 0x21e   :  { %3918 = vmatprep.subr.bf16.mxu1 %v3917_v33  ;;  %v762_v33 = vld [vmem:[#allocation2 + $0x1678] sm:$0xff]  ;;  %v825_v62 = vld [vmem:[#allocation2 + $0x1870] sm:$0xff] }
 0x21f   :  { %v3957_v36 = vpack.c.bf16 %v762_v33, %v754_v32  ;;  %v3975_v0 = vpack.c.bf16 %v825_v62, %v817_v60  ;;  %v833_v3 = vld [vmem:[#allocation2 + $0x18b0] sm:$0xff]  ;;  %v1091_v32 = vsub.s32 5, %v4478_v61 }
 0x220   :  { %v841_v4 = vld [vmem:[#allocation2 + $0x18f0] sm:$0xff] }
 0x221   :  { %3920 = vmatpush1.bf16.msra.mxu1 %v3919_v40  ;;  %v770_v40 = vld [vmem:[#allocation2 + $0x16b8] sm:$0xff]  ;;  %v3979_v8 = vpack.c.bf16 %v841_v4, %v833_v3  ;;  %v849_v10 = vld [vmem:[#allocation2 + $0x1930] sm:$0xff] }
 0x222   :  { %3922 = vmatprep.subr.bf16.mxu1 %v3921_v41  ;;  %v778_v41 = vld [vmem:[#allocation2 + $0x16f8] sm:$0xff]  ;;  %v857_v12 = vld [vmem:[#allocation2 + $0x1970] sm:$0xff] }
 0x223   :  { %v3961_v43 = vpack.c.bf16 %v778_v41, %v770_v40  ;;  %v3983_v25 = vpack.c.bf16 %v857_v12, %v849_v10  ;;  %v865_v15 = vld [vmem:[#allocation2 + $0x19b0] sm:$0xff]  ;;  %v1084_v41 = vrot.slane %v4969_v38, %v1083_v30  ;;  %v2434_v10 = vld [vmem:[%s5483_s3 + $0x448] sm:$0xff]  ;;  %v2436_v12 = vld [vmem:[%s5483_s3 + $0x458] sm:$0xff] }
 0x224   :  { %v873_v16 = vld [vmem:[#allocation2 + $0x19f0] sm:$0xff]  ;;  %v978_v30 = vld [vmem:[#allocation2 + $0x1d38] sm:$0xff] }
 0x225   :  { %3924 = vmatpush1.bf16.msra.mxu1 %v3923_v22  ;;  %v786_v22 = vld [vmem:[#allocation2 + $0x1738] sm:$0xff]  ;;  %v881_v21 = vld [vmem:[#allocation2 + $0x1a30] sm:$0xff] }
 0x226   :  { %3926 = vmatprep.subr.bf16.mxu1 %v3925_v7  ;;  %v794_v7 = vld [vmem:[#allocation2 + $0x1778] sm:$0xff]  ;;  %v897_v33 = vld [vmem:[#allocation2 + $0x1ab0] sm:$0xff] }
 0x227   :  { %v3965_v39 = vpack.c.bf16 %v794_v7, %v786_v22  ;;  %v913_v45 = vld [vmem:[#allocation2 + $0x1b30] sm:$0xff] }
 0x228   :  { %v921_v22 = vld [vmem:[#allocation2 + $0x1b70] sm:$0xff] }
 0x229   :  { %3928 = vmatpush1.bf16.msra.mxu1 %v3927_v50  ;;  %v802_v50 = vld [vmem:[#allocation2 + $0x17b8] sm:$0xff]  ;;  %v3999_v55 = vpack.c.bf16 %v921_v22, %v913_v45  ;;  %v929_v60 = vld [vmem:[#allocation2 + $0x1bb0] sm:$0xff] }
 0x22a   :  { %3930 = vmatprep.subr.bf16.mxu1 %v3929_v51  ;;  %v810_v51 = vld [vmem:[#allocation2 + $0x17f8] sm:$0xff]  ;;  %v937_v62 = vld [vmem:[#allocation2 + $0x1bf0] sm:$0xff] }
 0x22b   :  { %v3969_v53 = vpack.c.bf16 %v810_v51, %v802_v50  ;;  %v2425_v51 = vld [vmem:[%s5483_s3 + $0x400] sm:$0xff]  ;;  %v961_v24 = vld [vmem:[#allocation2 + $0x1cb0] sm:$0xff]  ;;  %v994_v45 = vld [vmem:[#allocation2 + $0x1db8] sm:$0xff] }
 0x22c   :  { %v1002_v22 = vld [vmem:[#allocation2 + $0x1df8] sm:$0xff] }
 0x22d   :  { %3932 = vmatpush1.bf16.msra.mxu1 %v3931_v56  ;;  %v818_v56 = vld [vmem:[#allocation2 + $0x1838] sm:$0xff] }
 0x22e   :  { %3934 = vmatprep.subr.bf16.mxu1 %v3933_v57  ;;  %v826_v57 = vld [vmem:[#allocation2 + $0x1878] sm:$0xff] }
 0x22f   :  { %v3973_v59 = vpack.c.bf16 %v826_v57, %v818_v56  ;;  %v2430_v56 = vld [vmem:[%s5483_s3 + $0x428] sm:$0xff]  ;;  %v2432_v57 = vld [vmem:[%s5483_s3 + $0x438] sm:$0xff] }
 0x231   :  { %3936 = vmatpush1.bf16.msra.mxu1 %v3935_v63  ;;  %v834_v63 = vld [vmem:[#allocation2 + $0x18b8] sm:$0xff] }
 0x232   :  { %3938 = vmatprep.subr.bf16.mxu1 %v3937_v34  ;;  %v842_v34 = vld [vmem:[#allocation2 + $0x18f8] sm:$0xff] }
 0x233   :  { %v3977_v2 = vpack.c.bf16 %v842_v34, %v834_v63 }
 0x235   :  { %3940 = vmatpush1.bf16.msra.mxu1 %v3939_v5  ;;  %v850_v5 = vld [vmem:[#allocation2 + $0x1938] sm:$0xff] }
 0x236   :  { %3942 = vmatprep.subr.bf16.mxu1 %v3941_v6  ;;  %v858_v6 = vld [vmem:[#allocation2 + $0x1978] sm:$0xff] }
 0x237   :  { %v3981_v9 = vpack.c.bf16 %v858_v6, %v850_v5  ;;  %v4169_v5 = vpack.c.bf16 %v2432_v57, %v2430_v56  ;;  %v2429_v6 = vld [vmem:[%s5483_s3 + $0x420] sm:$0xff]  ;;  %v1010_v56 = vld [vmem:[#allocation2 + $0x1e38] sm:$0xff] }
 0x238   :  { %v1018_v57 = vld [vmem:[#allocation2 + $0x1e78] sm:$0xff] }
 0x239   :  { %3944 = vmatpush1.bf16.msra.mxu1 %v3943_v13  ;;  %v866_v13 = vld [vmem:[#allocation2 + $0x19b8] sm:$0xff] }
 0x23a   :  { %3946 = vmatprep.subr.bf16.mxu1 %v3945_v1  ;;  %v874_v1 = vld [vmem:[#allocation2 + $0x19f8] sm:$0xff] }
 0x23b   :  { %v3985_v14 = vpack.c.bf16 %v874_v1, %v866_v13  ;;  %v945_v1 = vld [vmem:[#allocation2 + $0x1c30] sm:$0xff] }
 0x23d   :  { %3948 = vmatpush1.bf16.msra.mxu1 %v3947_v17  ;;  %v882_v17 = vld [vmem:[#allocation2 + $0x1a38] sm:$0xff] }
 0x23e   :  { %3950 = vmatprep.subr.bf16.mxu1 %v3949_v18  ;;  %v890_v18 = vld [vmem:[#allocation2 + $0x1a78] sm:$0xff] }
 0x23f   :  { %v3989_v20 = vpack.c.bf16 %v890_v18, %v882_v17  ;;  %v4173_v17 = vpack.c.bf16 %v2436_v12, %v2434_v10  ;;  %v2433_v18 = vld [vmem:[%s5483_s3 + $0x440] sm:$0xff]  ;;  %v2451_v10 = vld [vmem:[%s5483_s3 + $0x4d0] sm:$0xff] }
 0x241   :  { %3952 = vmatpush1.bf16.msra.mxu1 %v3951_v29  ;;  %v1079_v29 = vsub.s32 2, %v4478_v61 }
 0x242   :  { %3954 = vmatprep.subr.bf16.mxu1 %v3953_v46 }
 0x243   :  { %v1080_v40 = vrot.slane %v4969_v38, %v1079_v29  ;;  %v969_v29 = vld [vmem:[#allocation2 + $0x1cf0] sm:$0xff] }
 0x245   :  { %3956 = vmatpush1.bf16.msra.mxu1 %v3955_v35  ;;  %v905_v35 = vld [vmem:[#allocation2 + $0x1af0] sm:$0xff] }
 0x246   :  { %3958 = vmatprep.subr.bf16.mxu1 %v3957_v36  ;;  %v914_v36 = vld [vmem:[#allocation2 + $0x1b38] sm:$0xff] }
 0x247   :  { %v3997_v44 = vpack.c.bf16 %v922_v37, %v914_v36  ;;  %v4011_v36 = vpack.c.bf16 %v969_v29, %v961_v24  ;;  %v2442_v37 = vld [vmem:[%s5483_s3 + $0x488] sm:$0xff]  ;;  %v2460_v24 = vld [vmem:[%s5483_s3 + $0x518] sm:$0xff] }
 0x249   :  { %3960 = vmatpush1.bf16.msra.mxu1 %v3959_v42  ;;  %v3995_v42 = vpack.c.bf16 %v905_v35, %v897_v33  ;;  %v2437_v33 = vld [vmem:[%s5483_s3 + $0x460] sm:$0xff]  ;;  %v2439_v35 = vld [vmem:[%s5483_s3 + $0x470] sm:$0xff] }
 0x24a   :  { %3962 = vmatprep.subr.bf16.mxu1 %v3961_v43  ;;  %v1092_v43 = vrot.slane %v4969_v38, %v1091_v32 }
 0x24d   :  { %3964 = vmatpush1.bf16.msra.mxu1 %v3963_v11  ;;  %v930_v11 = vld [vmem:[#allocation2 + $0x1bb8] sm:$0xff] }
 0x24e   :  { %3966 = vmatprep.subr.bf16.mxu1 %v3965_v39  ;;  %v938_v39 = vld [vmem:[#allocation2 + $0x1bf8] sm:$0xff] }
 0x251   :  { %3968 = vmatpush1.bf16.msra.mxu1 %v3967_v52  ;;  %v2427_v52 = vld [vmem:[%s5483_s3 + $0x410] sm:$0xff] }
 0x252   :  { %3970 = vmatprep.subr.bf16.mxu1 %v3969_v53  ;;  %v4167_v34 = vpack.c.bf16 %v2427_v52, %v2425_v51  ;;  %v2448_v51 = vld [vmem:[%s5483_s3 + $0x4b8] sm:$0xff]  ;;  %v4017_v52 = vpack.c.bf16 %v1002_v22, %v994_v45  ;;  %v1065_v45 = vld [vmem:[#allocation2 + $0x1ff0] sm:$0xff] }
 0x255   :  { %3972 = vmatpush1.bf16.msra.mxu1 %v3971_v58 }
 0x256   :  { %3974 = vmatprep.subr.bf16.mxu1 %v3973_v59  ;;  %v4001_v59 = vpack.c.bf16 %v938_v39, %v930_v11  ;;  %v2441_v11 = vld [vmem:[%s5483_s3 + $0x480] sm:$0xff]  ;;  %v2443_v39 = vld [vmem:[%s5483_s3 + $0x490] sm:$0xff] }
 0x258   :  { %2212 = vmatmul.mubr.f32.vlgmr.msra.gmra.mrb[4].mxu1 %v4499_v28  ;;  %v3987_v28 = vpack.c.bf16 %v873_v16, %v865_v15  ;;  %v962_v15 = vld [vmem:[#allocation2 + $0x1cb8] sm:$0xff] }
 0x259   :  { %3976 = vmatpush1.bf16.msra.mxu1 %v3975_v0  ;;  %2282 = vmatprep.mubr.f32.mxu1 %v4528_v48  ;;  %v889_v48 = vld [vmem:[#allocation2 + $0x1a70] sm:$0xff]  ;;  %v946_v0 = vld [vmem:[#allocation2 + $0x1c38] sm:$0xff] }
 0x25a   :  { %3978 = vmatprep.subr.bf16.mxu1 %v3977_v2  ;;  %v3991_v46 = vpack.c.bf16 %v889_v48, %v881_v21  ;;  %v954_v2 = vld [vmem:[#allocation2 + $0x1c78] sm:$0xff]  ;;  %v2438_v21 = vld [vmem:[%s5483_s3 + $0x468] sm:$0xff] }
 0x25b   :  { %v4005_v13 = vpack.c.bf16 %v954_v2, %v946_v0  ;;  %v970_v16 = vld [vmem:[#allocation2 + $0x1cf8] sm:$0xff]  ;;  %v4021_v0 = vpack.c.bf16 %v1018_v57, %v1010_v56  ;;  %v1009_v2 = vld [vmem:[#allocation2 + $0x1e30] sm:$0xff]  ;;  %v2470_v56 = vld [vmem:[%s5483_s3 + $0x568] sm:$0xff] }
 0x25c   :  { %v2440_v48 = vld [vmem:[%s5483_s3 + $0x478] sm:$0xff]  ;;  %v4009_v23 = vpack.c.bf16 %v970_v16, %v962_v15  ;;  %v1033_v15 = vld [vmem:[#allocation2 + $0x1ef0] sm:$0xff] }
 0x25d   :  { %3980 = vmatpush1.bf16.msra.mxu1 %v3979_v8  ;;  %v2431_v8 = vld [vmem:[%s5483_s3 + $0x430] sm:$0xff]  ;;  %v4177_v32 = vpack.c.bf16 %v2440_v48, %v2438_v21  ;;  %v2472_v57 = vld [vmem:[%s5483_s3 + $0x578] sm:$0xff] }
 0x25e   :  { %3982 = vmatprep.subr.bf16.mxu1 %v3981_v9  ;;  %v4003_v9 = vpack.c.bf16 %v937_v62, %v929_v60  ;;  %v2447_v60 = vld [vmem:[%s5483_s3 + $0x4b0] sm:$0xff] }
 0x25f   :  { %v2455_v21 = vld [vmem:[%s5483_s3 + $0x4f0] sm:$0xff] }
 0x261   :  { %3984 = vmatpush1.bf16.msra.mxu1 %v3983_v25  ;;  %v953_v25 = vld [vmem:[#allocation2 + $0x1c70] sm:$0xff] }
 0x262   :  { %3986 = vmatprep.subr.bf16.mxu1 %v3985_v14  ;;  %v4171_v14 = vpack.c.bf16 %v2431_v8, %v2429_v6  ;;  %v1034_v6 = vld [vmem:[#allocation2 + $0x1ef8] sm:$0xff] }
 0x265   :  { %3988 = vmatpush1.bf16.msra.mxu1 %v3987_v28  ;;  %v2435_v28 = vld [vmem:[%s5483_s3 + $0x450] sm:$0xff] }
 0x266   :  { %3990 = vmatprep.subr.bf16.mxu1 %v3989_v20  ;;  %v4007_v20 = vpack.c.bf16 %v953_v25, %v945_v1  ;;  %v2456_v1 = vld [vmem:[%s5483_s3 + $0x4f8] sm:$0xff] }
 0x269   :  { %3992 = vmatpush1.bf16.msra.mxu1 %v3991_v46  ;;  %v4175_v46 = vpack.c.bf16 %v2435_v28, %v2433_v18  ;;  %v1050_v18 = vld [vmem:[#allocation2 + $0x1f78] sm:$0xff] }
 0x26a   :  { %3994 = vmatprep.subr.bf16.mxu1 %v3993_v31  ;;  %v986_v31 = vld [vmem:[#allocation2 + $0x1d78] sm:$0xff] }
 0x26b   :  { %v1716_v7 = vpop.f32.mrb[2].mxu1 }
 0x26c   :  { %v4329_v47 = vadd.f32 %v1716_v7, %v1080_v40  ;;  %v1718_v49 = vpop.f32.mrb[3].mxu1  ;;  %v2444_v40 = vld [vmem:[%s5483_s3 + $0x498] sm:$0xff] }
 0x26d   :  { %v4974_v50 = vpop.f32.mrb[2].mxu0  ;;  %v4330_v53 = vadd.f32 %v1718_v49, %v1084_v41  ;;  %3996 = vmatpush1.bf16.msra.mxu1 %v3995_v42  ;;  %v4013_v41 = vpack.c.bf16 %v986_v31, %v978_v30  ;;  %v977_v42 = vld [vmem:[#allocation2 + $0x1d30] sm:$0xff]  ;;  %v4181_v7 = vpack.c.bf16 %v2444_v40, %v2442_v37  ;;  %v2446_v49 = vld [vmem:[%s5483_s3 + $0x4a8] sm:$0xff] }
 0x26e   :  { %v2002_v54 = vpop.f32.mrb[3].mxu0  ;;  %3998 = vmatprep.subr.bf16.mxu1 %v3997_v44  ;;  %v2291_v3 = vmax.f32 %v4329_v47, 0.0  ;;  %v4179_v44 = vpack.c.bf16 %v2439_v35, %v2437_v33  ;;  %v1049_v30 = vld [vmem:[#allocation2 + $0x1f70] sm:$0xff]  ;;  %v1066_v33 = vld [vmem:[#allocation2 + $0x1ff8] sm:$0xff] }
 0x26f   :  { %v4332_v58 = vadd.f32 %v2002_v54, %v1092_v43  ;;  %v2292_v63 = vmax.f32 %v4330_v53, 0.0  ;;  %v985_v43 = vld [vmem:[#allocation2 + $0x1d70] sm:$0xff] }
 0x270   :  { %v4015_v47 = vpack.c.bf16 %v985_v43, %v977_v42  ;;  %v993_v53 = vld [vmem:[#allocation2 + $0x1db0] sm:$0xff]  ;;  %v2464_v42 = vld [vmem:[%s5483_s3 + $0x538] sm:$0xff] }
 0x271   :  { %v2294_v4 = vmax.f32 %v4332_v58, 0.0  ;;  %4000 = vmatpush1.bf16.msra.mxu1 %v3999_v55  ;;  %2700 = vmatprep.mubr.f32.mxu0 %v2292_v63  ;;  %v1001_v54 = vld [vmem:[#allocation2 + $0x1df0] sm:$0xff]  ;;  %v4183_v55 = vpack.c.bf16 %v2443_v39, %v2441_v11  ;;  %v4185_v58 = vpack.c.bf16 %v2448_v51, %v2446_v49  ;;  %v2450_v63 = vld [vmem:[%s5483_s3 + $0x4c8] sm:$0xff]  ;;  %v2461_v11 = vld [vmem:[%s5483_s3 + $0x520] sm:$0xff] }
 0x272   :  { %2701 = vmatmul.mubr.f32.vlgmr.msra.gmra.mrb[4].mxu0 %v2291_v3  ;;  %4002 = vmatprep.subr.bf16.mxu1 %v4001_v59  ;;  %v2445_v59 = vld [vmem:[%s5483_s3 + $0x4a0] sm:$0xff]  ;;  %v4019_v62 = vpack.c.bf16 %v1001_v54, %v993_v53  ;;  %v1017_v3 = vld [vmem:[#allocation2 + $0x1e70] sm:$0xff]  ;;  %v2466_v49 = vld [vmem:[%s5483_s3 + $0x548] sm:$0xff] }
 0x273   :  { %4168 = vmatpush1.bf16.msra.mxu0 %v4167_v34  ;;  %2771 = vmatprep.mubr.f32.mxu0 %v2294_v4  ;;  %v2452_v34 = vld [vmem:[%s5483_s3 + $0x4d8] sm:$0xff]  ;;  %v4187_v4 = vpack.c.bf16 %v2447_v60, %v2445_v59  ;;  %v4023_v12 = vpack.c.bf16 %v1017_v3, %v1009_v2  ;;  %v2459_v37 = vld [vmem:[%s5483_s3 + $0x510] sm:$0xff]  ;;  %v2465_v54 = vld [vmem:[%s5483_s3 + $0x540] sm:$0xff]  ;;  %v4209_v59 = vpack.c.bf16 %v2472_v57, %v2470_v56 }
 0x274   :  { %4170 = vmatprep.subr.bf16.mxu0 %v4169_v5  ;;  %v1026_v5 = vld [vmem:[#allocation2 + $0x1eb8] sm:$0xff]  ;;  %v4189_v8 = vpack.c.bf16 %v2452_v34, %v2450_v63  ;;  %v2463_v39 = vld [vmem:[%s5483_s3 + $0x530] sm:$0xff]  ;;  %v2469_v60 = vld [vmem:[%s5483_s3 + $0x560] sm:$0xff] }
 0x275   :  { %4004 = vmatpush1.bf16.msra.mxu1 %v4003_v9  ;;  %v2449_v9 = vld [vmem:[%s5483_s3 + $0x4c0] sm:$0xff]  ;;  %v4025_v25 = vpack.c.bf16 %v1034_v6, %v1026_v5  ;;  %v2468_v51 = vld [vmem:[%s5483_s3 + $0x558] sm:$0xff]  ;;  %v2474_v63 = vld [vmem:[%s5483_s3 + $0x588] sm:$0xff] }
 0x276   :  { %4006 = vmatprep.subr.bf16.mxu1 %v4005_v13  ;;  %v2454_v13 = vld [vmem:[%s5483_s3 + $0x4e8] sm:$0xff]  ;;  %v4191_v16 = vpack.c.bf16 %v2451_v10, %v2449_v9  ;;  %v4205_v53 = vpack.c.bf16 %v2468_v51, %v2466_v49  ;;  %v2476_v34 = vld [vmem:[%s5483_s3 + $0x598] sm:$0xff]  ;;  %v2473_v2 = vld [vmem:[%s5483_s3 + $0x580] sm:$0xff] }
 0x277   :  { %4172 = vmatpush1.bf16.msra.mxu0 %v4171_v14  ;;  %v1025_v14 = vld [vmem:[#allocation2 + $0x1eb0] sm:$0xff]  ;;  %v4193_v28 = vpack.c.bf16 %v2456_v1, %v2454_v13  ;;  %v2480_v5 = vld [vmem:[%s5483_s3 + $0x5b8] sm:$0xff]  ;;  %v2477_v9 = vld [vmem:[%s5483_s3 + $0x5a0] sm:$0xff] }
 0x278   :  { %4174 = vmatprep.subr.bf16.mxu0 %v4173_v17  ;;  %v1042_v17 = vld [vmem:[#allocation2 + $0x1f38] sm:$0xff]  ;;  %v4027_v48 = vpack.c.bf16 %v1033_v15, %v1025_v14  ;;  %v2475_v3 = vld [vmem:[%s5483_s3 + $0x590] sm:$0xff]  ;;  %v2481_v15 = vld [vmem:[%s5483_s3 + $0x5c0] sm:$0xff] }
 0x279   :  { %4008 = vmatpush1.bf16.msra.mxu1 %v4007_v20  ;;  %v2453_v20 = vld [vmem:[%s5483_s3 + $0x4e0] sm:$0xff]  ;;  %v4029_v29 = vpack.c.bf16 %v1050_v18, %v1042_v17  ;;  %v4215_v6 = vpack.c.bf16 %v2475_v3, %v2473_v2  ;;  %v2479_v10 = vld [vmem:[%s5483_s3 + $0x5b0] sm:$0xff]  ;;  %v2484_v13 = vld [vmem:[%s5483_s3 + $0x5d8] sm:$0xff] }
 0x27a   :  { %4010 = vmatprep.subr.bf16.mxu1 %v4009_v23  ;;  %v2458_v23 = vld [vmem:[%s5483_s3 + $0x508] sm:$0xff]  ;;  %v4195_v31 = vpack.c.bf16 %v2455_v21, %v2453_v20  ;;  %v4219_v1 = vpack.c.bf16 %v2479_v10, %v2477_v9  ;;  %v2488_v18 = vld [vmem:[%s5483_s3 + $0x5f8] sm:$0xff] }
 0x27b   :  { %4176 = vmatpush1.bf16.msra.mxu0 %v4175_v46  ;;  %v1041_v46 = vld [vmem:[#allocation2 + $0x1f30] sm:$0xff]  ;;  %v4197_v35 = vpack.c.bf16 %v2460_v24, %v2458_v23  ;;  %v2486_v17 = vld [vmem:[%s5483_s3 + $0x5e8] sm:$0xff]  ;;  %v2516_v3 = vld [vmem:[%s5483_s3 + $0x6d8] sm:$0xff] }
 0x27c   :  { %4178 = vmatprep.subr.bf16.mxu0 %v4177_v32  ;;  %v1058_v32 = vld [vmem:[#allocation2 + $0x1fb8] sm:$0xff]  ;;  %v4031_v40 = vpack.c.bf16 %v1049_v30, %v1041_v46  ;;  %v4225_v21 = vpack.c.bf16 %v2488_v18, %v2486_v17  ;;  %v2487_v23 = vld [vmem:[%s5483_s3 + $0x5f0] sm:$0xff]  ;;  %v2490_v24 = vld [vmem:[%s5483_s3 + $0x608] sm:$0xff] }
 0x27d   :  { %4012 = vmatpush1.bf16.msra.mxu1 %v4011_v36  ;;  %v2457_v36 = vld [vmem:[%s5483_s3 + $0x500] sm:$0xff]  ;;  %v4033_v43 = vpack.c.bf16 %v1066_v33, %v1058_v32  ;;  %v2491_v33 = vld [vmem:[%s5483_s3 + $0x610] sm:$0xff]  ;;  %v2514_v2 = vld [vmem:[%s5483_s3 + $0x6c8] sm:$0xff] }
 0x27e   :  { %4014 = vmatprep.subr.bf16.mxu1 %v4013_v41  ;;  %v2462_v41 = vld [vmem:[%s5483_s3 + $0x528] sm:$0xff]  ;;  %v4199_v22 = vpack.c.bf16 %v2459_v37, %v2457_v36  ;;  %v2489_v32 = vld [vmem:[%s5483_s3 + $0x600] sm:$0xff]  ;;  %v2496_v36 = vld [vmem:[%s5483_s3 + $0x638] sm:$0xff] }
 0x27f   :  { %4180 = vmatpush1.bf16.msra.mxu0 %v4179_v44  ;;  %v1057_v44 = vld [vmem:[#allocation2 + $0x1fb0] sm:$0xff]  ;;  %v2518_v9 = vld [vmem:[%s5483_s3 + $0x6e8] sm:$0xff]  ;;  %v2520_v10 = vld [vmem:[%s5483_s3 + $0x6f8] sm:$0xff] }
 0x280   :  { %4182 = vmatprep.subr.bf16.mxu0 %v4181_v7  ;;  %v4201_v7 = vpack.c.bf16 %v2464_v42, %v2462_v41  ;;  %v2493_v41 = vld [vmem:[%s5483_s3 + $0x620] sm:$0xff]  ;;  %v2495_v42 = vld [vmem:[%s5483_s3 + $0x630] sm:$0xff] }
 0x281   :  { %4016 = vmatpush1.bf16.msra.mxu1 %v4015_v47  ;;  %v4035_v47 = vpack.c.bf16 %v1065_v45, %v1057_v44  ;;  %v2500_v44 = vld [vmem:[%s5483_s3 + $0x658] sm:$0xff]  ;;  %v4235_v45 = vpack.c.bf16 %v2495_v42, %v2493_v41  ;;  %v2521_v18 = vld [vmem:[%s5483_s3 + $0x700] sm:$0xff]  ;;  %v2535_v42 = vld [vmem:[%s5483_s3 + $0x770] sm:$0xff] }
 0x282   :  { %4018 = vmatprep.subr.bf16.mxu1 %v4017_v52  ;;  %v4203_v52 = vpack.c.bf16 %v2463_v39, %v2461_v11  ;;  %v2499_v11 = vld [vmem:[%s5483_s3 + $0x650] sm:$0xff]  ;;  %v2502_v39 = vld [vmem:[%s5483_s3 + $0x668] sm:$0xff]  ;;  %v2533_v41 = vld [vmem:[%s5483_s3 + $0x760] sm:$0xff] }
 0x283   :  { %4184 = vmatpush1.bf16.msra.mxu0 %v4183_v55  ;;  %v2467_v55 = vld [vmem:[%s5483_s3 + $0x550] sm:$0xff] }
 0x284   :  { %4186 = vmatprep.subr.bf16.mxu0 %v4185_v58  ;;  %v4207_v58 = vpack.c.bf16 %v2467_v55, %v2465_v54  ;;  %v2506_v54 = vld [vmem:[%s5483_s3 + $0x688] sm:$0xff]  ;;  %v2508_v55 = vld [vmem:[%s5483_s3 + $0x698] sm:$0xff] }
 0x285   :  { %4020 = vmatpush1.bf16.msra.mxu1 %v4019_v62  ;;  %v2471_v62 = vld [vmem:[%s5483_s3 + $0x570] sm:$0xff]  ;;  %v4245_v57 = vpack.c.bf16 %v2508_v55, %v2506_v54  ;;  %v2546_v54 = vld [vmem:[%s5483_s3 + $0x7c8] sm:$0xff]  ;;  %v2548_v55 = vld [vmem:[%s5483_s3 + $0x7d8] sm:$0xff] }
 0x286   :  { %4022 = vmatprep.subr.bf16.mxu1 %v4021_v0  ;;  %v4213_v0 = vpack.c.bf16 %v2476_v34, %v2474_v63 }
 0x287   :  { %4188 = vmatpush1.bf16.msra.mxu0 %v4187_v4  ;;  %v2478_v4 = vld [vmem:[%s5483_s3 + $0x5a8] sm:$0xff] }
 0x288   :  { %4190 = vmatprep.subr.bf16.mxu0 %v4189_v8  ;;  %v4217_v8 = vpack.c.bf16 %v2480_v5, %v2478_v4  ;;  %v4253_v5 = vpack.c.bf16 %v2516_v3, %v2514_v2  ;;  %v2867_v3 = vld [vmem:[%s5485_s5 + $0x80] sm:$0xff] }
 0x289   :  { %4024 = vmatpush1.bf16.msra.mxu1 %v4023_v12  ;;  %v2482_v12 = vld [vmem:[%s5483_s3 + $0x5c8] sm:$0xff] }
 0x28a   :  { %4026 = vmatprep.subr.bf16.mxu1 %v4025_v25  ;;  %v1087_v25 = vsub.s32 4, %v4478_v61  ;;  %v4221_v14 = vpack.c.bf16 %v2484_v13, %v2482_v12  ;;  %v4257_v13 = vpack.c.bf16 %v2520_v10, %v2518_v9  ;;  %v2869_v9 = vld [vmem:[%s5485_s5 + $0x90] sm:$0xff]  ;;  %v2870_v10 = vld [vmem:[%s5485_s5 + $0x98] sm:$0xff] }
 0x28b   :  { %4192 = vmatpush1.bf16.msra.mxu0 %v4191_v16  ;;  %v2483_v16 = vld [vmem:[%s5483_s3 + $0x5d0] sm:$0xff] }
 0x28c   :  { %4194 = vmatprep.subr.bf16.mxu0 %v4193_v28  ;;  %v4223_v28 = vpack.c.bf16 %v2483_v16, %v2481_v15  ;;  %v1088_v20 = vrot.slane %v4969_v38, %v1087_v25  ;;  %v2519_v25 = vld [vmem:[%s5483_s3 + $0x6f0] sm:$0xff]  ;;  %v2524_v15 = vld [vmem:[%s5483_s3 + $0x718] sm:$0xff] }
 0x28d   :  { %4028 = vmatpush1.bf16.msra.mxu1 %v4027_v48  ;;  %v2485_v48 = vld [vmem:[%s5483_s3 + $0x5e0] sm:$0xff] }
 0x28e   :  { %4030 = vmatprep.subr.bf16.mxu1 %v4029_v29  ;;  %v2492_v29 = vld [vmem:[%s5483_s3 + $0x618] sm:$0xff]  ;;  %v4227_v46 = vpack.c.bf16 %v2487_v23, %v2485_v48  ;;  %v4331_v30 = vadd.f32 %v4974_v50, %v1088_v20  ;;  %v4231_v50 = vpack.c.bf16 %v2491_v33, %v2489_v32  ;;  %v2526_v20 = vld [vmem:[%s5483_s3 + $0x728] sm:$0xff]  ;;  %v2529_v33 = vld [vmem:[%s5483_s3 + $0x740] sm:$0xff] }
 0x28f   :  { %4196 = vmatpush1.bf16.msra.mxu0 %v4195_v31  ;;  %v4229_v31 = vpack.c.bf16 %v2492_v29, %v2490_v24  ;;  %v2525_v24 = vld [vmem:[%s5483_s3 + $0x720] sm:$0xff]  ;;  %v2527_v29 = vld [vmem:[%s5483_s3 + $0x730] sm:$0xff] }
 0x290   :  { %4198 = vmatprep.subr.bf16.mxu0 %v4197_v35  ;;  %v2494_v35 = vld [vmem:[%s5483_s3 + $0x628] sm:$0xff]  ;;  %v2293_v37 = vmax.f32 %v4331_v30, 0.0  ;;  %v2532_v30 = vld [vmem:[%s5483_s3 + $0x758] sm:$0xff] }
 0x291   :  { %4032 = vmatpush1.bf16.msra.mxu1 %v4031_v40  ;;  %v4233_v40 = vpack.c.bf16 %v2496_v36, %v2494_v35  ;;  %v2531_v35 = vld [vmem:[%s5483_s3 + $0x750] sm:$0xff]  ;;  %v2534_v36 = vld [vmem:[%s5483_s3 + $0x768] sm:$0xff] }
 0x292   :  { %4034 = vmatprep.subr.bf16.mxu1 %v4033_v43  ;;  %v2498_v43 = vld [vmem:[%s5483_s3 + $0x648] sm:$0xff] }
 0x293   :  { %4200 = vmatpush1.bf16.msra.mxu0 %v4199_v22  ;;  %v4237_v22 = vpack.c.bf16 %v2500_v44, %v2498_v43  ;;  %v2538_v43 = vld [vmem:[%s5483_s3 + $0x788] sm:$0xff]  ;;  %v2540_v44 = vld [vmem:[%s5483_s3 + $0x798] sm:$0xff] }
 0x294   :  { %4202 = vmatprep.subr.bf16.mxu0 %v4201_v7  ;;  %v2497_v7 = vld [vmem:[%s5483_s3 + $0x640] sm:$0xff] }
 0x295   :  { %4036 = vmatpush1.bf16.msra.mxu1 %v4035_v47  ;;  %v2504_v47 = vld [vmem:[%s5483_s3 + $0x678] sm:$0xff]  ;;  %v4239_v49 = vpack.c.bf16 %v2499_v11, %v2497_v7  ;;  %v2537_v7 = vld [vmem:[%s5483_s3 + $0x780] sm:$0xff]  ;;  %v2539_v11 = vld [vmem:[%s5483_s3 + $0x790] sm:$0xff] }
 0x296   :  { %v4241_v51 = vpack.c.bf16 %v2504_v47, %v2502_v39  ;;  %v2542_v39 = vld [vmem:[%s5483_s3 + $0x7a8] sm:$0xff]  ;;  %v2544_v47 = vld [vmem:[%s5483_s3 + $0x7b8] sm:$0xff] }
 0x297   :  { %4204 = vmatpush1.bf16.msra.mxu0 %v4203_v52  ;;  %v2501_v52 = vld [vmem:[%s5483_s3 + $0x660] sm:$0xff] }
 0x298   :  { %2283 = vmatmul.mubr.f32.vlgmr.msra.gmra.mrb[4].mxu1 %v4519_v26  ;;  %4206 = vmatprep.subr.bf16.mxu0 %v4205_v53  ;;  %v4211_v26 = vpack.c.bf16 %v2471_v62, %v2469_v60  ;;  %v2503_v53 = vld [vmem:[%s5483_s3 + $0x670] sm:$0xff]  ;;  %v2510_v60 = vld [vmem:[%s5483_s3 + $0x6a8] sm:$0xff]  ;;  %v2512_v62 = vld [vmem:[%s5483_s3 + $0x6b8] sm:$0xff] }
 0x299   :  { %v4243_v56 = vpack.c.bf16 %v2503_v53, %v2501_v52  ;;  %v4249_v34 = vpack.c.bf16 %v2512_v62, %v2510_v60  ;;  %v2541_v52 = vld [vmem:[%s5483_s3 + $0x7a0] sm:$0xff]  ;;  %v2543_v53 = vld [vmem:[%s5483_s3 + $0x7b0] sm:$0xff]  ;;  %v2550_v62 = vld [vmem:[%s5483_s3 + $0x7e8] sm:$0xff] }
 0x29b   :  { %4208 = vmatpush1.bf16.msra.mxu0 %v4207_v58  ;;  %v2505_v58 = vld [vmem:[%s5483_s3 + $0x680] sm:$0xff] }
 0x29c   :  { %4210 = vmatprep.subr.bf16.mxu0 %v4209_v59  ;;  %v2507_v59 = vld [vmem:[%s5483_s3 + $0x690] sm:$0xff] }
 0x29d   :  { %v4247_v63 = vpack.c.bf16 %v2507_v59, %v2505_v58  ;;  %v2545_v58 = vld [vmem:[%s5483_s3 + $0x7c0] sm:$0xff]  ;;  %v2547_v59 = vld [vmem:[%s5483_s3 + $0x7d0] sm:$0xff] }
 0x29e   :  { %v4287_v60 = vpack.c.bf16 %v2547_v59, %v2545_v58  ;;  %v2882_v59 = vld [vmem:[%s5485_s5 + $0xf8] sm:$0xff] }
 0x29f   :  { %4212 = vmatpush1.bf16.msra.mxu0 %v4211_v26  ;;  %v2509_v26 = vld [vmem:[%s5483_s3 + $0x6a0] sm:$0xff] }
 0x2a0   :  { %4214 = vmatprep.subr.bf16.mxu0 %v4213_v0  ;;  %v2511_v0 = vld [vmem:[%s5483_s3 + $0x6b0] sm:$0xff] }
 0x2a1   :  { %v4251_v4 = vpack.c.bf16 %v2511_v0, %v2509_v26  ;;  %v2549_v26 = vld [vmem:[%s5483_s3 + $0x7e0] sm:$0xff]  ;;  %v2551_v0 = vld [vmem:[%s5483_s3 + $0x7f0] sm:$0xff] }
 0x2a2   :  { %v4291_v2 = vpack.c.bf16 %v2551_v0, %v2549_v26  ;;  %v2553_v26 = vld [vmem:[%s5484_s4] sm:$0x3]  ;;  %s4425_s4 = smov [#allocation5]  }
 0x2a3   :  { %4216 = vmatpush1.bf16.msra.mxu0 %v4215_v6  ;;  %v2513_v6 = vld [vmem:[%s5483_s3 + $0x6c0] sm:$0xff]  ;;  %v2558_v0 = vrot.slane %v2553_v26, %v1071_v19  ;;  %s2968_s11 = sshll.u32 %s4425_s4, 4  ;;  %s2969_s11 = int_to_ptr.vmem [resolvable:$true] %s2968_s11 }
 0x2a4   :  { %4218 = vmatprep.subr.bf16.mxu0 %v4217_v8  ;;  %v2515_v8 = vld [vmem:[%s5483_s3 + $0x6d0] sm:$0xff]  ;;  %s4395_s12 = scalar_lea.vmem %s2969_s11, 32  ;;  %p4400_p9 = scmp.lt.s32.totalorder %s2969_s11, %s2969_s11 }
 0x2a5   :  { %v4255_v12 = vpack.c.bf16 %v2515_v8, %v2513_v6  ;;  %v2852_v8 = vld [vmem:[%s5485_s5 + $0x8] sm:$0xff]  ;;  %p4396_p8 = scmp.ne.s32.totalorder %s2969_s11, %s4395_s12  ;;  %p4401_p10 = scmp.lt.s32.totalorder %s4395_s12, %s4395_s12 }
 0x2a7   :  { %4220 = vmatpush1.bf16.msra.mxu0 %v4219_v1  ;;  %v2517_v1 = vld [vmem:[%s5483_s3 + $0x6e0] sm:$0xff]  ;;  %p4402_p11 = por %p4401_p10, %p4400_p9 }
 0x2a8   :  { %4222 = vmatprep.subr.bf16.mxu0 %v4221_v14  ;;  %v2522_v14 = vld [vmem:[%s5483_s3 + $0x708] sm:$0xff]  ;;  %v4259_v16 = vpack.c.bf16 %v2519_v25, %v2517_v1  ;;  %v2853_v1 = vld [vmem:[%s5485_s5 + $0x10] sm:$0xff]  ;;  %v2854_v25 = vld [vmem:[%s5485_s5 + $0x18] sm:$0xff] }
 0x2a9   :  { %v4261_v17 = vpack.c.bf16 %v2524_v15, %v2522_v14  ;;  %v2871_v14 = vld [vmem:[%s5485_s5 + $0xa0] sm:$0xff]  ;;  %v2872_v15 = vld [vmem:[%s5485_s5 + $0xa8] sm:$0xff]  ;;  %p4403_p12 = pnand %p4402_p11, %p4396_p8 }
 0x2ab   :  { %4224 = vmatpush1.bf16.msra.mxu0 %v4223_v28  ;;  %v2523_v28 = vld [vmem:[%s5483_s3 + $0x710] sm:$0xff] }
 0x2ac   :  { %4226 = vmatprep.subr.bf16.mxu0 %v4225_v21  ;;  %v2528_v21 = vld [vmem:[%s5483_s3 + $0x738] sm:$0xff]  ;;  %v4263_v48 = vpack.c.bf16 %v2523_v28, %v2521_v18  ;;  %v2855_v18 = vld [vmem:[%s5485_s5 + $0x20] sm:$0xff]  ;;  %v2856_v28 = vld [vmem:[%s5485_s5 + $0x28] sm:$0xff] }
 0x2ad   :  { %v4265_v23 = vpack.c.bf16 %v2528_v21, %v2526_v20  ;;  %v2873_v20 = vld [vmem:[%s5485_s5 + $0xb0] sm:$0xff]  ;;  %v2874_v21 = vld [vmem:[%s5485_s5 + $0xb8] sm:$0xff] }
 0x2af   :  { %4228 = vmatpush1.bf16.msra.mxu0 %v4227_v46  ;;  %v2530_v46 = vld [vmem:[%s5483_s3 + $0x748] sm:$0xff] }
 0x2b0   :  { %4230 = vmatprep.subr.bf16.mxu0 %v4229_v31  ;;  %v4267_v31 = vpack.c.bf16 %v2527_v29, %v2525_v24  ;;  %v4269_v32 = vpack.c.bf16 %v2532_v30, %v2530_v46  ;;  %v2857_v24 = vld [vmem:[%s5485_s5 + $0x30] sm:$0xff]  ;;  %v2858_v29 = vld [vmem:[%s5485_s5 + $0x38] sm:$0xff]  ;;  %v2875_v46 = vld [vmem:[%s5485_s5 + $0xc0] sm:$0xff] }
 0x2b1   :  { %v2876_v30 = vld [vmem:[%s5485_s5 + $0xc8] sm:$0xff] }
 0x2b2   :  { %2772 = vmatmul.mubr.f32.vlgmr.msra.gmra.mrb[4].mxu0 %v2293_v37  ;;  %v4271_v37 = vpack.c.bf16 %v2531_v35, %v2529_v33  ;;  %v2859_v33 = vld [vmem:[%s5485_s5 + $0x40] sm:$0xff]  ;;  %v2860_v35 = vld [vmem:[%s5485_s5 + $0x48] sm:$0xff] }
 0x2b3   :  { %4232 = vmatpush1.bf16.msra.mxu0 %v4231_v50  ;;  %v2536_v50 = vld [vmem:[%s5483_s3 + $0x778] sm:$0xff] }
 0x2b4   :  { %4234 = vmatprep.subr.bf16.mxu0 %v4233_v40  ;;  %v4273_v40 = vpack.c.bf16 %v2536_v50, %v2534_v36  ;;  %v2877_v36 = vld [vmem:[%s5485_s5 + $0xd0] sm:$0xff]  ;;  %v2878_v50 = vld [vmem:[%s5485_s5 + $0xd8] sm:$0xff] }
 0x2b7   :  { %4236 = vmatpush1.bf16.msra.mxu0 %v4235_v45  ;;  %v4275_v45 = vpack.c.bf16 %v2535_v42, %v2533_v41  ;;  %v2861_v41 = vld [vmem:[%s5485_s5 + $0x50] sm:$0xff]  ;;  %v2862_v42 = vld [vmem:[%s5485_s5 + $0x58] sm:$0xff] }
 0x2b8   :  { %4238 = vmatprep.subr.bf16.mxu0 %v4237_v22  ;;  %v4277_v22 = vpack.c.bf16 %v2540_v44, %v2538_v43  ;;  %v2879_v43 = vld [vmem:[%s5485_s5 + $0xe0] sm:$0xff]  ;;  %v2880_v44 = vld [vmem:[%s5485_s5 + $0xe8] sm:$0xff] }
 0x2bb   :  { %4240 = vmatpush1.bf16.msra.mxu0 %v4239_v49  ;;  %v4279_v49 = vpack.c.bf16 %v2539_v11, %v2537_v7  ;;  %v1095_v7 = vsub.s32 6, %v4478_v61  ;;  %v1099_v11 = vsub.s32 7, %v4478_v61 }
 0x2bc   :  { %4242 = vmatprep.subr.bf16.mxu0 %v4241_v51  ;;  %v4281_v51 = vpack.c.bf16 %v2544_v47, %v2542_v39 }
 0x2bd   :  { %v1096_v39 = vrot.slane %v4969_v38, %v1095_v7  ;;  %v1100_v47 = vrot.slane %v4969_v38, %v1099_v11  ;;  %v2881_v38 = vld [vmem:[%s5485_s5 + $0xf0] sm:$0xff] }
 0x2bf   :  { %4244 = vmatpush1.bf16.msra.mxu0 %v4243_v56  ;;  %v4283_v56 = vpack.c.bf16 %v2543_v53, %v2541_v52 }
 0x2c0   :  { %4246 = vmatprep.subr.bf16.mxu0 %v4245_v57  ;;  %v4285_v57 = vpack.c.bf16 %v2548_v55, %v2546_v54 }
 0x2c3   :  { %4248 = vmatpush1.bf16.msra.mxu0 %v4247_v63  ;;  %v2552_v63 = vld [vmem:[%s5483_s3 + $0x7f8] sm:$0xff] }
 0x2c4   :  { %4250 = vmatprep.subr.bf16.mxu0 %v4249_v34  ;;  %v4289_v34 = vpack.c.bf16 %v2552_v63, %v2550_v62  ;;  %v2865_v62 = vld [vmem:[%s5485_s5 + $0x70] sm:$0xff]  ;;  %v2866_v63 = vld [vmem:[%s5485_s5 + $0x78] sm:$0xff] }
 0x2c7   :  { %4252 = vmatpush1.bf16.msra.mxu0 %v4251_v4  ;;  %v2868_v4 = vld [vmem:[%s5485_s5 + $0x88] sm:$0xff] }
 0x2c8   :  { %4254 = vmatprep.subr.bf16.mxu0 %v4253_v5  ;;  %v2851_v5 = vld [vmem:[%s5485_s5] sm:$0xff]  ;;  %v4293_v6 = vpack.c.bf16 %v2868_v4, %v2867_v3 }
 0x2ca   :  { %4294 = vmatprep.subr.bf16.mxu1 %v4293_v6 }
 0x2cb   :  { %4256 = vmatpush1.bf16.msra.mxu0 %v4255_v12  ;;  %v4295_v12 = vpack.c.bf16 %v2852_v8, %v2851_v5 }
 0x2cc   :  { %4258 = vmatprep.subr.bf16.mxu0 %v4257_v13  ;;  %v4297_v13 = vpack.c.bf16 %v2870_v10, %v2869_v9 }
 0x2cd   :  { %4296 = vmatpush3.bf16.msra.mxu1 %v4295_v12  ;;  %v2977_v12 = vld [vmem:[%s5486_s6] ss:$0 sm:$0xff] }
 0x2ce   :  { %4298 = vmatprep.subr.bf16.mxu1 %v4297_v13 }
 0x2cf   :  { %4260 = vmatpush1.bf16.msra.mxu0 %v4259_v16  ;;  %v4299_v16 = vpack.c.bf16 %v2854_v25, %v2853_v1 }
 0x2d0   :  { %4262 = vmatprep.subr.bf16.mxu0 %v4261_v17  ;;  %v4301_v17 = vpack.c.bf16 %v2872_v15, %v2871_v14 }
 0x2d1   :  { %4300 = vmatpush3.bf16.msra.mxu1 %v4299_v16 }
 0x2d2   :  { %4302 = vmatprep.subr.bf16.mxu1 %v4301_v17 }
 0x2d3   :  { %4264 = vmatpush1.bf16.msra.mxu0 %v4263_v48  ;;  %v4303_v48 = vpack.c.bf16 %v2856_v28, %v2855_v18 }
 0x2d4   :  { %4266 = vmatprep.subr.bf16.mxu0 %v4265_v23  ;;  %v4305_v23 = vpack.c.bf16 %v2874_v21, %v2873_v20 }
 0x2d5   :  { %4304 = vmatpush3.bf16.msra.mxu1 %v4303_v48 }
 0x2d6   :  { %4306 = vmatprep.subr.bf16.mxu1 %v4305_v23 }
 0x2d7   :  { %4268 = vmatpush1.bf16.msra.mxu0 %v4267_v31  ;;  %v4307_v31 = vpack.c.bf16 %v2858_v29, %v2857_v24 }
 0x2d8   :  { %4270 = vmatprep.subr.bf16.mxu0 %v4269_v32  ;;  %v4309_v32 = vpack.c.bf16 %v2876_v30, %v2875_v46 }
 0x2d9   :  { %4308 = vmatpush3.bf16.msra.mxu1 %v4307_v31 }
 0x2da   :  { %4310 = vmatprep.subr.bf16.mxu1 %v4309_v32 }
 0x2db   :  { %4272 = vmatpush1.bf16.msra.mxu0 %v4271_v37  ;;  %v4311_v37 = vpack.c.bf16 %v2860_v35, %v2859_v33 }
 0x2dc   :  { %4274 = vmatprep.subr.bf16.mxu0 %v4273_v40  ;;  %v4313_v40 = vpack.c.bf16 %v2878_v50, %v2877_v36 }
 0x2dd   :  { %4312 = vmatpush3.bf16.msra.mxu1 %v4311_v37 }
 0x2de   :  { %4314 = vmatprep.subr.bf16.mxu1 %v4313_v40 }
 0x2df   :  { %4276 = vmatpush1.bf16.msra.mxu0 %v4275_v45  ;;  %v4315_v45 = vpack.c.bf16 %v2862_v42, %v2861_v41 }
 0x2e0   :  { %4278 = vmatprep.subr.bf16.mxu0 %v4277_v22  ;;  %v4317_v22 = vpack.c.bf16 %v2880_v44, %v2879_v43 }
 0x2e1   :  { %4316 = vmatpush3.bf16.msra.mxu1 %v4315_v45 }
 0x2e2   :  { %4318 = vmatprep.subr.bf16.mxu1 %v4317_v22 }
 0x2e3   :  { %4280 = vmatpush1.bf16.msra.mxu0 %v4279_v49 }
 0x2e4   :  { %4282 = vmatprep.subr.bf16.mxu0 %v4281_v51 }
 0x2e7   :  { %4284 = vmatpush1.bf16.msra.mxu0 %v4283_v56  ;;  %v2863_v56 = vld [vmem:[%s5485_s5 + $0x60] sm:$0xff] }
 0x2e8   :  { %4286 = vmatprep.subr.bf16.mxu0 %v4285_v57  ;;  %v2864_v57 = vld [vmem:[%s5485_s5 + $0x68] sm:$0xff] }
 0x2e9   :  { %v4319_v58 = vpack.c.bf16 %v2864_v57, %v2863_v56 }
 0x2eb   :  { %4288 = vmatpush1.bf16.msra.mxu0 %v4287_v60  ;;  %4320 = vmatpush3.bf16.msra.mxu1 %v4319_v58  ;;  %v4321_v60 = vpack.c.bf16 %v2882_v59, %v2881_v38 }
 0x2ec   :  { %4290 = vmatprep.subr.bf16.mxu0 %v4289_v34  ;;  %v4323_v34 = vpack.c.bf16 %v2866_v63, %v2865_v62 }
 0x2ed   :  { %4322 = vmatprep.subr.bf16.mxu1 %v4321_v60 }
 0x2ef   :  { %4292 = vmatpush1.bf16.msra.mxu0 %v4291_v2  ;;  %4324 = vmatpush3.bf16.msra.mxu1 %v4323_v34  ;;  %v2562_v2 = vrot.slane %v2553_v26, %v1075_v27 }
 0x36b   :  { %v2284_v49 = vpop.f32.mrb[4].mxu1 }
 0x36c   :  { %v4333_v51 = vadd.f32 %v2284_v49, %v1096_v39  ;;  %v2286_v52 = vpop.f32.mrb[5].mxu1 }
 0x36d   :  { %v4334_v53 = vadd.f32 %v2286_v52, %v1100_v47 }
 0x36e   :  { %v2295_v55 = vmax.f32 %v4333_v51, 0.0 }
 0x36f   :  { %v2296_v54 = vmax.f32 %v4334_v53, 0.0 }
 0x371   :  { %2842 = vmatprep.mubr.f32.mxu0 %v2296_v54 }
 0x372   :  { %2843 = vmatmul.mubr.f32.vlgmr.msra.gmra.mrb[4].mxu0 %v2295_v55 }
 0x445   :  { %v2844_v3 = vpop.f32.mrb[4].mxu0 }
 0x446   :  { %v4335_v4 = vadd.f32 %v2844_v3, %v2558_v0  ;;  %v2846_v5 = vpop.f32.mrb[5].mxu0 }
 0x447   :  { %v4336_v6 = vadd.f32 %v2846_v5, %v2562_v2 }
 0x448   :  { %v2849_v9 = vmax.f32 %v4335_v4, 0.0 }
 0x449   :  { %v2850_v8 = vmax.f32 %v4336_v6, 0.0 }
 0x44b   :  { %2954 = vmatprep.mubr.f32.mxu1 %v2850_v8 }
 0x44c   :  { %2955 = vmatmul.mubr.f32.vlgmr.msra.gmra.mrb[6].mxu1 %v2849_v9 }
 0x51f   :  { %v3010_v10 = vpop.f32.mrb[6].mxu1 }
 0x520   :  { %v3011_v13 = vpop.f32.mrb[7].mxu1 }
 0x521   :  { %v3012_v19 = vadd.f32 %v3011_v13, %v3010_v10 }
 0x523   :  { %v2957_v61 = vadd.f32 %v3012_v19, %v2977_v12 }
 0x525   :  { %2961 = vst.msk [vmem:[#allocation5] sm:$0x3] %vm2960_vm0, %v2957_v61 }
 0x526   :  { %4406 = shalt.err (!%p4403_p12)
}
 0x527   :  { %s4407_s1 = scalar_lea.hbm %s5487_s7, 32 }
 0x528   :  { %p4408_p13 = scmp.ne.s32.totalorder %s5487_s7, %s4407_s1  ;;  %p4411_p0 = scmp.lt.u32.totalorder %s4407_s1, %s5487_s7 }
 0x52a   :  { %p4413_p1 = pnand %p4411_p0, %p4408_p13 }
 0x52c   :  { %4416 = shalt.err (!%p4413_p1)
}
 0x52d   :  { %2971 = dma.vmem_to_hbm [thread:$0]  %s2969_s11, 32, %s5487_s7, [#allocation4]  }
 0x52e   :  { %4419 = dma.done.wait [#allocation4], 32  }
 0x52f   :  { %4420 = vsyncadd [#allocation4], 4294967264 }
 0x530   :  { %2975 = vsyncpa [#allocation3], 1 }
 0x531   :  { %2976 = vsyncpa [#allocation4], 1 }

// kernel: mlp_forward.2
= control target key start
LH: loop header
LB: loop body
LE: loop exit
PB: predicated region body
PF: predicated region fallthrough
CT: control target
= control target key end

     0   :  { %9 = vsyncpa [#allocation4], 0  ;;  %s12546_s0 = inlined_call_operand.vmem [shape: f32[2,262144], index: 0, kind: input, shape index: {}]   ;;  %s12547_s1 = inlined_call_operand.vmem [shape: f32[2,262144], index: 1, kind: input, shape index: {}]   ;;  %s12548_s2 = inlined_call_operand.hbm [shape: bf16[262144,1024], index: 2, kind: input, shape index: {}]   ;;  %s12549_s3 = inlined_call_operand.vmem [shape: f32[1,1024], index: 3, kind: input, shape index: {}]   ;;  %s12550_s4 = inlined_call_operand.vmem [shape: f32[2,1024], index: 4, kind: output, shape index: {}]  }
   0x1   :  { %11 = vsyncpa [#allocation4 + $0x1], 0  ;;  %s11174_s15 = smov 0   ;;  %s11176_s16 = smov 0  }
   0x2   :  { %s11178_s17 = smov 0   ;;  %s11180_s18 = smov 0  }
   0x3   :  { %s11182_s19 = smov 0   ;;  %s11184_s20 = smov 0  }
   0x4   :  { %s11186_s21 = smov 0   ;;  %s11188_s22 = smov 0  }
   0x5 LB: > { %s8250_s23 = sadd.s32 4294967295, %s11141_s22   ;;  %s26_s24 = sadd.s32 1, %s11133_s20  ;;  %s11141_s22 = sphi %s11188_s22, %s17_s22   ;;  %s11137_s21 = sphi %s11186_s21, %s12563_s21   ;;  %s11133_s20 = sphi %s11184_s20, %s12562_s20   ;;  %s11129_s19 = sphi %s11182_s19, %s12561_s19   ;;  %s11125_s18 = sphi %s11180_s18, %s12560_s18   ;;  %s11121_s17 = sphi %s11178_s17, %s12559_s17   ;;  %s11117_s16 = sphi %s11176_s16, %s12558_s16   ;;  %s11113_s15 = sphi %s11174_s15, %s12557_s15  }
   0x6   : > { %p27_p0 = scmp.ge.s32.totalorder %s26_s24, 64  ;;  %s29_s25 = sadd.s32 1, %s11137_s21 }
   0x7   : > { %s90_s26 = sadd.s32 1, %s11121_s17  ;;  %p97_p1 = scmp.ne.s32.totalorder %s11121_s17, %s11117_s16 }
   0x8   : > { %s12565_s24 = smov (%p27_p0, %s26_s24), 0  ;;  %s12567_s25 = smov (!%p27_p0, %s29_s25), %s11137_s21 }
   0x9   : > { %12552 = sst [smem:[#allocation6_spill]] %s12565_s24  ;;  %s85_s27 = ssub.s32 %s11133_s20, %s12565_s24 }
   0xa   : > { %p98_p2 = scmp.eq.s32.totalorder %s11141_s22, 0  ;;  %p31_p3 = scmp.ge.s32.totalorder %s12567_s25, 2 }
   0xb   : > { %p103_p4 = scmp.ne.s32.totalorder %s11117_s16, %s11113_s15  ;;  %p104_p6 = scmp.eq.s32.totalorder %s8250_s23, 0 }
   0xc   : > { %p11225_p5 = por %p98_p2, %p97_p1  ;;  %s12569_s25 = smov (%p31_p3, %s12567_s25), 0 }
   0xd   : > { %p11231_p7 = por %p104_p6, %p103_p4  ;;  %s86_s30 = ssub.s32 %s11137_s21, %s12569_s25 }
   0xe   : > { %p9423_p8 = scmp.lt.s32.totalorder %s11141_s22, 128  ;;  %s87_s5 = sor.u32 %s86_s30, %s85_s27 }
   0xf   : > { %s197_s6 = sand.u32 1, %s11121_s17   ;;  %p88_p9 = scmp.eq.s32.totalorder %s87_s5, 0 }
  0x10   : > { %s8254_s7 = sshll.u32 %s197_s6, 13  ;;  %s8256_s8 = sshll.u32 %s11137_s21, 2 }
  0x11   : > { %s11241_s9 = scalar_select %p88_p9, %s11121_s17, %s90_s26  }
  0x12   : > { %s9296_s10 = sshll.u32 %s11133_s20, 12  ;;  %s201_s12 = scalar_lea.vmem [#allocation3], %s8254_s7 }
  0x13   : > { %s208_s11 = sadd.s32 %s9296_s10, %s8256_s8  ;;  %s211_s13 = sshll.u32 %s201_s12, 4  ;;  %s11244_s13 = int_to_ptr.vmem [resolvable:$true] %s211_s13 }
  0x14   : > { %s8258_s14 = sshll.u32 %s208_s11, 6  ;;  %p11255_p10 = pnand %p9423_p8, %p11225_p5 }
  0x15   : > { %s11249_s24 = scalar_lea.hbm %s12548_s2, %s8258_s14  ;;  %s11259_s27 = scalar_lea.sflag [#allocation4], %s197_s6 }
  0x16   : > { %s11045_s30 = scalar_lea.hbm %s11249_s24, 131072  ;;  %p11047_p12 = pneg %p11255_p10 }
  0x17   : > { %p11046_p11 = scmp.ne.s32.totalorder %s11249_s24, %s11045_s30  ;;  %s11050_s7 = scalar_lea.hbm %s12548_s2, 16777216 }
  0x18   : > { %p11051_p1 = scmp.lt.u32.totalorder %s11249_s24, %s12548_s2  ;;  %p11052_p2 = scmp.lt.u32.totalorder %s11050_s7, %s11045_s30 }
  0x19   : > { %p11048_p13 = pnand %p11047_p12, %p11046_p11  ;;  %p11054_p4 = scmp.lt.u32.totalorder %s11045_s30, %s11249_s24 }
  0x1a   : > { %p11053_p3 = por %p11052_p2, %p11051_p1 }
  0x1b   : > { %p11049_p0 = pneg %p11048_p13 }
  0x1c   : > { %p11055_p5 = por %p11054_p4, %p11053_p3 }
  0x1e   : > { %p11056_p6 = pnand %p11055_p5, %p11049_p0 }
  0x20   : > { %11059 = shalt.err (!%p11056_p6)
}
  0x21   : > { %s11060_s6 = scalar_lea.vmem %s11244_s13, 131072  ;;  %s11143_s11 = smov [#allocation3]  }
  0x22   : > { %p11061_p8 = scmp.ne.s32.totalorder %s11244_s13, %s11060_s6  ;;  %s11065_s12 = sshll.u32 %s11143_s11, 4  ;;  %s11066_s12 = int_to_ptr.vmem [resolvable:$false] %s11065_s12 }
  0x23   : > { %s11067_s14 = scalar_lea.vmem %s11066_s12, 262144  ;;  %p11068_p13 = scmp.lt.s32.totalorder %s11244_s13, %s11066_s12 }
  0x24   : > { %p11063_p9 = pnand %p11061_p8, %p11047_p12  ;;  %p11069_p1 = scmp.lt.s32.totalorder %s11067_s14, %s11060_s6 }
  0x26   : > { %p11064_p11 = pneg %p11063_p9  ;;  %p11070_p2 = por %p11069_p1, %p11068_p13 }
  0x28   : > { %p11071_p3 = pnand %p11070_p2, %p11064_p11 }
  0x2a   : > { %11074 = shalt.err (!%p11071_p3)
}
  0x2b   : > { %s11144_s15 = smov 512   ;;  %s11145_s23 = smov 256  }
  0x2c   : > { %s11146_s30 = smov 16   ;;  %p8259_p12 = scmp.ge.s32.totalorder %s11141_s22, 1 }
  0x2d   : > { %9422 = dma.hbm_to_vmem [thread:$0]  (!%p11255_p10), %s11249_s24, 131072, %s11244_s13, %s11259_s27, %s11144_s15, %s11145_s23, %s11146_s30  }
  0x2e   : > { %p227_p0 = scmp.lt.s32.totalorder %s11141_s22, 129 }
  0x30   : > { %p228_p4 = pnand %p8259_p12, %p227_p0 }
  0x31   : > { %s233_s28 = sand.u32 (!%p228_p4), 1, %s11117_s16  }
  0x32   : > { %231 = sbr.rel (%p228_p4) target bundleno = 1330 (0x532), region = 36  ;;  %s8260_s5 = sshll.u32 (!%p228_p4), %s233_s28, 13 }
  0x33   : > { %s234_s7 = scalar_lea.sflag (!%p228_p4), [#allocation4], %s233_s28  ;;  %s11290_s8 = scalar_lea.vmem (!%p228_p4), [#allocation3], %s8260_s5 }
  0x39   : > { %11108 = dma.done.wait (%p11231_p7), %s234_s7, 131072  }
  0x3a   : > { %11110 = vsyncadd (%p11231_p7), %s234_s7, 4294836224  ;;  %s8261_s26 = sshll.u32 %s11125_s18, 5  ;;  %s8265_s24 = sshll.u32 %s11129_s19, 2 }
  0x3b   : > { %p277_p10 = scmp.lt.s32.totalorder %s8261_s26, 2047  ;;  %p291_p5 = scmp.lt.s32.totalorder %s8265_s24, 7 }
  0x3c   : > { %p8268_p7 = scmp.ne.s32.totalorder %s11125_s18, 0 }
  0x3d   : > { %s12571_s26 = smov (!%p277_p10, %s8261_s26), 2047  ;;  %s12573_s24 = smov (!%p291_p5, %s8265_s24), 7 }
  0x3e   : > { %s8262_s13 = sshll.u32 %s12571_s26, 1  ;;  %s293_s15 = scalar_lea.vmem %s12549_s3, %s12573_s24  ;;  %v11147_v0 = vmov (!%p8268_p7), 0.0  }
  0x3f   : > { %s11303_s6 = scalar_lea.vmem %s12546_s0, %s8262_s13  ;;  %s11308_s12 = scalar_lea.vmem %s12547_s1, %s8262_s13  ;;  %305 = vst [vmem:[#allocation2] sm:$0xff] (!%p8268_p7), %v11147_v0 }
  0x40   : > { %s8267_s23 = sshll.u32 %s12573_s24, 1  ;;  %304 = sbr.rel (%p8268_p7) target bundleno = 71 (0x47), region = 44 }
  0x41   : > { %s11318_s5 = scalar_lea.vmem %s12550_s4, %s8267_s23 }
  0x47 PF: > { %v9493_v1 = vld [vmem:[%s11290_s8 + $0x4] ss:$16 sps:$4 sm:$0xff]   ;;  %v9495_v2 = vld [vmem:[%s11290_s8 + $0xc] ss:$16 sps:$4 sm:$0xff]   ;;  %v9497_v3 = vld [vmem:[%s11290_s8] ss:$16 sps:$4 sm:$0xff]   ;;  %v414_v63 = vlaneseq }
  0x48   : > { %6755 = vmatprep.subr.bf16.mxu0 %v9493_v1  ;;  %v9498_v4 = vld [vmem:[%s11290_s8 + $0x8] ss:$16 sps:$4 sm:$0xff]   ;;  %7411 = vmatprep.subr.bf16.mxu1 %v9495_v2  ;;  %v9499_v5 = vld [vmem:[%s11290_s8 + $0x24] ss:$16 sps:$4 sm:$0xff]   ;;  %v9501_v6 = vld [vmem:[%s11290_s8 + $0x2c] ss:$16 sps:$4 sm:$0xff]  }
  0x49   : > { %6756 = vmatpush1.bf16.msra.mxu0 %v9497_v3  ;;  %7412 = vmatpush1.bf16.msra.mxu1 %v9498_v4  ;;  %v9503_v7 = vld [vmem:[%s11290_s8 + $0x20] ss:$16 sps:$4 sm:$0xff]   ;;  %v9504_v8 = vld [vmem:[%s11290_s8 + $0x28] ss:$16 sps:$4 sm:$0xff]   ;;  %v9505_v9 = vld [vmem:[%s11290_s8 + $0x44] ss:$16 sps:$4 sm:$0xff]  }
  0x4a   : > { %6757 = vmatprep.subr.bf16.mxu0 %v9499_v5  ;;  %7413 = vmatprep.subr.bf16.mxu1 %v9501_v6  ;;  %v9507_v10 = vld [vmem:[%s11290_s8 + $0x4c] ss:$16 sps:$4 sm:$0xff]   ;;  %v9509_v11 = vld [vmem:[%s11290_s8 + $0x40] ss:$16 sps:$4 sm:$0xff]   ;;  %v9510_v12 = vld [vmem:[%s11290_s8 + $0x48] ss:$16 sps:$4 sm:$0xff]  }
  0x4b   : > { %v9511_v13 = vld [vmem:[%s11290_s8 + $0x64] ss:$16 sps:$4 sm:$0xff]   ;;  %v9513_v14 = vld [vmem:[%s11290_s8 + $0x6c] ss:$16 sps:$4 sm:$0xff]   ;;  %v9515_v15 = vld [vmem:[%s11290_s8 + $0x60] ss:$16 sps:$4 sm:$0xff]  }
  0x4c   : > { %v9516_v16 = vld [vmem:[%s11290_s8 + $0x68] ss:$16 sps:$4 sm:$0xff]   ;;  %v9517_v17 = vld [vmem:[%s11290_s8 + $0x84] ss:$16 sps:$4 sm:$0xff]   ;;  %v9519_v18 = vld [vmem:[%s11290_s8 + $0x8c] ss:$16 sps:$4 sm:$0xff]  }
  0x4d   : > { %6758 = vmatpush1.bf16.msra.mxu0 %v9503_v7  ;;  %7414 = vmatpush1.bf16.msra.mxu1 %v9504_v8  ;;  %v9521_v19 = vld [vmem:[%s11290_s8 + $0x80] ss:$16 sps:$4 sm:$0xff]   ;;  %v9522_v20 = vld [vmem:[%s11290_s8 + $0x88] ss:$16 sps:$4 sm:$0xff]   ;;  %v9523_v21 = vld [vmem:[%s11290_s8 + $0xa4] ss:$16 sps:$4 sm:$0xff]  }
  0x4e   : > { %6759 = vmatprep.subr.bf16.mxu0 %v9505_v9  ;;  %7415 = vmatprep.subr.bf16.mxu1 %v9507_v10  ;;  %v9525_v22 = vld [vmem:[%s11290_s8 + $0xac] ss:$16 sps:$4 sm:$0xff]   ;;  %v9527_v23 = vld [vmem:[%s11290_s8 + $0xa0] ss:$16 sps:$4 sm:$0xff]   ;;  %v9528_v24 = vld [vmem:[%s11290_s8 + $0xa8] ss:$16 sps:$4 sm:$0xff]  }
  0x4f   : > { %v9529_v25 = vld [vmem:[%s11290_s8 + $0xc4] ss:$16 sps:$4 sm:$0xff]   ;;  %v9531_v26 = vld [vmem:[%s11290_s8 + $0xcc] ss:$16 sps:$4 sm:$0xff]   ;;  %v9533_v27 = vld [vmem:[%s11290_s8 + $0xc0] ss:$16 sps:$4 sm:$0xff]  }
  0x50   : > { %v9534_v28 = vld [vmem:[%s11290_s8 + $0xc8] ss:$16 sps:$4 sm:$0xff]   ;;  %v9535_v29 = vld [vmem:[%s11290_s8 + $0xe4] ss:$16 sps:$4 sm:$0xff]   ;;  %v9537_v30 = vld [vmem:[%s11290_s8 + $0xec] ss:$16 sps:$4 sm:$0xff]  }
  0x51   : > { %6760 = vmatpush1.bf16.msra.mxu0 %v9509_v11  ;;  %7416 = vmatpush1.bf16.msra.mxu1 %v9510_v12  ;;  %v9539_v31 = vld [vmem:[%s11290_s8 + $0xe0] ss:$16 sps:$4 sm:$0xff]   ;;  %v9540_v32 = vld [vmem:[%s11290_s8 + $0xe8] ss:$16 sps:$4 sm:$0xff]   ;;  %v9541_v33 = vld [vmem:[%s11290_s8 + $0x104] ss:$16 sps:$4 sm:$0xff]  }
  0x52   : > { %6761 = vmatprep.subr.bf16.mxu0 %v9511_v13  ;;  %7417 = vmatprep.subr.bf16.mxu1 %v9513_v14  ;;  %v9543_v34 = vld [vmem:[%s11290_s8 + $0x10c] ss:$16 sps:$4 sm:$0xff]   ;;  %v9545_v35 = vld [vmem:[%s11290_s8 + $0x100] ss:$16 sps:$4 sm:$0xff]   ;;  %v9546_v36 = vld [vmem:[%s11290_s8 + $0x108] ss:$16 sps:$4 sm:$0xff]  }
  0x53   : > { %v9547_v37 = vld [vmem:[%s11290_s8 + $0x124] ss:$16 sps:$4 sm:$0xff]   ;;  %v9549_v38 = vld [vmem:[%s11290_s8 + $0x12c] ss:$16 sps:$4 sm:$0xff]   ;;  %v9551_v39 = vld [vmem:[%s11290_s8 + $0x120] ss:$16 sps:$4 sm:$0xff]  }
  0x54   : > { %v9552_v40 = vld [vmem:[%s11290_s8 + $0x128] ss:$16 sps:$4 sm:$0xff]   ;;  %v9553_v41 = vld [vmem:[%s11290_s8 + $0x144] ss:$16 sps:$4 sm:$0xff]   ;;  %v9555_v42 = vld [vmem:[%s11290_s8 + $0x14c] ss:$16 sps:$4 sm:$0xff]  }
  0x55   : > { %6762 = vmatpush1.bf16.msra.mxu0 %v9515_v15  ;;  %7418 = vmatpush1.bf16.msra.mxu1 %v9516_v16  ;;  %v9557_v43 = vld [vmem:[%s11290_s8 + $0x140] ss:$16 sps:$4 sm:$0xff]   ;;  %v9558_v44 = vld [vmem:[%s11290_s8 + $0x148] ss:$16 sps:$4 sm:$0xff]   ;;  %v9559_v45 = vld [vmem:[%s11290_s8 + $0x164] ss:$16 sps:$4 sm:$0xff]  }
  0x56   : > { %6763 = vmatprep.subr.bf16.mxu0 %v9517_v17  ;;  %7419 = vmatprep.subr.bf16.mxu1 %v9519_v18  ;;  %v9561_v46 = vld [vmem:[%s11290_s8 + $0x16c] ss:$16 sps:$4 sm:$0xff]   ;;  %v9563_v50 = vld [vmem:[%s11290_s8 + $0x160] ss:$16 sps:$4 sm:$0xff]   ;;  %v9564_v51 = vld [vmem:[%s11290_s8 + $0x168] ss:$16 sps:$4 sm:$0xff]  }
  0x57   : > { %v306_v47 = vld [vmem:[%s11303_s6] sm:$0xff]  ;;  %v9565_v53 = vld [vmem:[%s11290_s8 + $0x184] ss:$16 sps:$4 sm:$0xff]   ;;  %v9569_v56 = vld [vmem:[%s11290_s8 + $0x180] ss:$16 sps:$4 sm:$0xff]   ;;  %v11382_v5 = vshrl.u32 %v414_v63, 7 }
  0x58   : > { %v314_v48 = vld [vmem:[%s11308_s12] sm:$0xff]  ;;  %v322_v49 = vmul.f32 %v306_v47, %v306_v47  ;;  %v9571_v58 = vld [vmem:[%s11290_s8 + $0x1a4] ss:$16 sps:$4 sm:$0xff]   ;;  %v9575_v60 = vld [vmem:[%s11290_s8 + $0x1a0] ss:$16 sps:$4 sm:$0xff]   ;;  %p9293_p6 = scmp.ne.s32.totalorder %s11125_s18, 63 }
  0x59   : > { %6764 = vmatpush1.bf16.msra.mxu0 %v9521_v19  ;;  %7420 = vmatpush1.bf16.msra.mxu1 %v9522_v20  ;;  %v330_v52 = vmul.f32 %v314_v48, %v314_v48  ;;  %v9567_v54 = vld [vmem:[%s11290_s8 + $0x18c] ss:$16 sps:$4 sm:$0xff]   ;;  %v9570_v57 = vld [vmem:[%s11290_s8 + $0x188] ss:$16 sps:$4 sm:$0xff]   ;;  %v11148_v61 = vmov 1983009808  }
  0x5a   : > { %6765 = vmatprep.subr.bf16.mxu0 %v9523_v21  ;;  %7421 = vmatprep.subr.bf16.mxu1 %v9525_v22  ;;  %v9573_v59 = vld [vmem:[%s11290_s8 + $0x1ac] ss:$16 sps:$4 sm:$0xff]   ;;  %v412_v62 = vunpack.c.l.s4 %v11148_v61  ;;  %v9576_v0 = vld [vmem:[%s11290_s8 + $0x1a8] ss:$16 sps:$4 sm:$0xff]   ;;  %v9577_v1 = vld [vmem:[%s11290_s8 + $0x1c4] ss:$16 sps:$4 sm:$0xff]  }
  0x5b   : > { %v338_v55 = vadd.f32 %v330_v52, %v322_v49  ;;  %v9579_v2 = vld [vmem:[%s11290_s8 + $0x1cc] ss:$16 sps:$4 sm:$0xff]   ;;  %v9581_v3 = vld [vmem:[%s11290_s8 + $0x1c0] ss:$16 sps:$4 sm:$0xff]   ;;  %v9582_v6 = vld [vmem:[%s11290_s8 + $0x1c8] ss:$16 sps:$4 sm:$0xff]  }
  0x5c   : > { %v413_v4 = vunpack.c.0.s8 %v412_v62  ;;  %v9583_v7 = vld [vmem:[%s11290_s8 + $0x1e4] ss:$16 sps:$4 sm:$0xff]   ;;  %v9585_v8 = vld [vmem:[%s11290_s8 + $0x1ec] ss:$16 sps:$4 sm:$0xff]   ;;  %v9587_v11 = vld [vmem:[%s11290_s8 + $0x1e0] ss:$16 sps:$4 sm:$0xff]  }
  0x5d   : > { %6766 = vmatpush1.bf16.msra.mxu0 %v9527_v23  ;;  %7422 = vmatpush1.bf16.msra.mxu1 %v9528_v24  ;;  %11029 = vrsqrt.f32 %v338_v55  ;;  %vm348_vm0 = vcmp.eq.f32.partialorder %v338_v55, inf  ;;  %v351_v10 = vand.u32 2147483648, %v338_v55  ;;  %vm350_vm1 = vcmp.eq.f32.partialorder %v338_v55, 0.0  ;;  %v9588_v14 = vld [vmem:[%s11290_s8 + $0x1e8] ss:$16 sps:$4 sm:$0xff]  }
  0x5e   : > { %6767 = vmatprep.subr.bf16.mxu0 %v9529_v25  ;;  %7423 = vmatprep.subr.bf16.mxu1 %v9531_v26  ;;  %v11389_v13 = vsub.s32 %v413_v4, %v11382_v5  ;;  %v9591_v15 = vld [vmem:[%s11290_s8 + $0x204] ss:$16 sps:$4 sm:$0xff]   ;;  %v9594_v17 = vld [vmem:[%s11290_s8 + $0x20c] ss:$16 sps:$4 sm:$0xff]   ;;  %v9589_v25 = vld [vmem:[%s11290_s8 + $0x200] ss:$16 sps:$4 sm:$0xff]  }
  0x5f   : > { %v9592_v26 = vld [vmem:[%s11290_s8 + $0x208] ss:$16 sps:$4 sm:$0xff]   ;;  %v9619_v47 = vld [vmem:[%s11290_s8 + $0x2a0] ss:$16 sps:$4 sm:$0xff]   ;;  %v9627_v49 = vld [vmem:[%s11290_s8 + $0x2c4] ss:$16 sps:$4 sm:$0xff]  }
  0x60   : > { %v9622_v48 = vld [vmem:[%s11290_s8 + $0x2a8] ss:$16 sps:$4 sm:$0xff]   ;;  %v9645_v61 = vld [vmem:[%s11290_s8 + $0x324] ss:$16 sps:$4 sm:$0xff]   ;;  %v9648_v62 = vld [vmem:[%s11290_s8 + $0x32c] ss:$16 sps:$4 sm:$0xff]  }
  0x61   : > { %6768 = vmatpush1.bf16.msra.mxu0 %v9533_v27  ;;  %7424 = vmatpush1.bf16.msra.mxu1 %v9534_v28  ;;  %v9597_v28 = vld [vmem:[%s11290_s8 + $0x224] ss:$16 sps:$4 sm:$0xff]   ;;  %v9628_v52 = vld [vmem:[%s11290_s8 + $0x2c8] ss:$16 sps:$4 sm:$0xff]   ;;  %v9643_v63 = vld [vmem:[%s11290_s8 + $0x320] ss:$16 sps:$4 sm:$0xff]  }
  0x62   : > { %6769 = vmatprep.subr.bf16.mxu0 %v9535_v29  ;;  %7425 = vmatprep.subr.bf16.mxu1 %v9537_v30  ;;  %v9600_v29 = vld [vmem:[%s11290_s8 + $0x22c] ss:$16 sps:$4 sm:$0xff]   ;;  %v9652_v4 = vld [vmem:[%s11290_s8 + $0x348] ss:$16 sps:$4 sm:$0xff]  }
  0x65   : > { %6770 = vmatpush1.bf16.msra.mxu0 %v9539_v31  ;;  %7426 = vmatpush1.bf16.msra.mxu1 %v9540_v32  ;;  %v9595_v31 = vld [vmem:[%s11290_s8 + $0x220] ss:$16 sps:$4 sm:$0xff]   ;;  %v9598_v32 = vld [vmem:[%s11290_s8 + $0x228] ss:$16 sps:$4 sm:$0xff]  }
  0x66   : > { %6771 = vmatprep.subr.bf16.mxu0 %v9541_v33  ;;  %7427 = vmatprep.subr.bf16.mxu1 %v9543_v34  ;;  %v9603_v33 = vld [vmem:[%s11290_s8 + $0x244] ss:$16 sps:$4 sm:$0xff]   ;;  %v9606_v34 = vld [vmem:[%s11290_s8 + $0x24c] ss:$16 sps:$4 sm:$0xff]  }
  0x67   : > { %v11030_v9 = vpop.eup %11029 }
  0x68   : > { %v347_v12 = vmul.f32 %v11030_v9, %v338_v55  ;;  %v9658_v9 = vld [vmem:[%s11290_s8 + $0x368] ss:$16 sps:$4 sm:$0xff]  }
  0x69   : > { %6772 = vmatpush1.bf16.msra.mxu0 %v9545_v35  ;;  %7428 = vmatpush1.bf16.msra.mxu1 %v9546_v36  ;;  %v9601_v35 = vld [vmem:[%s11290_s8 + $0x240] ss:$16 sps:$4 sm:$0xff]   ;;  %v9604_v36 = vld [vmem:[%s11290_s8 + $0x248] ss:$16 sps:$4 sm:$0xff]  }
  0x6a   : > { %6773 = vmatprep.subr.bf16.mxu0 %v9547_v37  ;;  %7429 = vmatprep.subr.bf16.mxu1 %v9549_v38  ;;  %v349_v16 = vsel %vm348_vm0, %v338_v55, %v347_v12  ;;  %v9609_v37 = vld [vmem:[%s11290_s8 + $0x264] ss:$16 sps:$4 sm:$0xff]   ;;  %v9612_v38 = vld [vmem:[%s11290_s8 + $0x26c] ss:$16 sps:$4 sm:$0xff]   ;;  %v9631_v55 = vld [vmem:[%s11290_s8 + $0x2e0] ss:$16 sps:$4 sm:$0xff]  }
  0x6b   : > { %v352_v18 = vsel %vm350_vm1, %v351_v10, %v349_v16  ;;  %v9663_v10 = vld [vmem:[%s11290_s8 + $0x384] ss:$16 sps:$4 sm:$0xff]   ;;  %v9661_v12 = vld [vmem:[%s11290_s8 + $0x380] ss:$16 sps:$4 sm:$0xff]   ;;  %v9672_v16 = vld [vmem:[%s11290_s8 + $0x3ac] ss:$16 sps:$4 sm:$0xff]  }
  0x6c   : > { %v410_v19 = vcombine.high %v352_v18, %v352_v18  ;;  %v417_v20 = vrot.slane %v352_v18, %v11389_v13  ;;  %v9670_v18 = vld [vmem:[%s11290_s8 + $0x3a8] ss:$16 sps:$4 sm:$0xff]  }
  0x6d   : > { %6774 = vmatpush1.bf16.msra.mxu0 %v9551_v39  ;;  %7430 = vmatpush1.bf16.msra.mxu1 %v9552_v40  ;;  %v9607_v39 = vld [vmem:[%s11290_s8 + $0x260] ss:$16 sps:$4 sm:$0xff]   ;;  %v9610_v40 = vld [vmem:[%s11290_s8 + $0x268] ss:$16 sps:$4 sm:$0xff]  }
  0x6e   : > { %6775 = vmatprep.subr.bf16.mxu0 %v9553_v41  ;;  %7431 = vmatprep.subr.bf16.mxu1 %v9555_v42  ;;  %v425_v21 = vcombine.high %v417_v20, %v417_v20  ;;  %v11396_v22 = vrot.slane %v410_v19, %v11389_v13  ;;  %v578_v23 = vpack.c.bf16 %v417_v20, %v417_v20  ;;  %v9615_v41 = vld [vmem:[%s11290_s8 + $0x284] ss:$16 sps:$4 sm:$0xff]   ;;  %v9618_v42 = vld [vmem:[%s11290_s8 + $0x28c] ss:$16 sps:$4 sm:$0xff]  }
  0x6f   : > { %v9675_v19 = vld [vmem:[%s11290_s8 + $0x3c4] ss:$16 sps:$4 sm:$0xff]   ;;  %v9678_v20 = vld [vmem:[%s11290_s8 + $0x3cc] ss:$16 sps:$4 sm:$0xff]  }
  0x70   : > { %v579_v24 = vpack.c.bf16 %v425_v21, %v425_v21  ;;  %v426_v27 = vcombine.high %v11396_v22, %v11396_v22  ;;  %v9673_v21 = vld [vmem:[%s11290_s8 + $0x3c0] ss:$16 sps:$4 sm:$0xff]  }
  0x71   : > { %6776 = vmatpush1.bf16.msra.mxu0 %v9557_v43  ;;  %7432 = vmatpush1.bf16.msra.mxu1 %v9558_v44  ;;  %v9613_v43 = vld [vmem:[%s11290_s8 + $0x280] ss:$16 sps:$4 sm:$0xff]   ;;  %v9616_v44 = vld [vmem:[%s11290_s8 + $0x288] ss:$16 sps:$4 sm:$0xff]  }
  0x72   : > { %6777 = vmatprep.subr.bf16.mxu0 %v9559_v45  ;;  %7433 = vmatprep.subr.bf16.mxu1 %v9561_v46  ;;  %v581_v30 = vpack.c.bf16 %v426_v27, %v426_v27  ;;  %v9621_v45 = vld [vmem:[%s11290_s8 + $0x2a4] ss:$16 sps:$4 sm:$0xff]   ;;  %v9624_v46 = vld [vmem:[%s11290_s8 + $0x2ac] ss:$16 sps:$4 sm:$0xff]   ;;  %v9682_v27 = vld [vmem:[%s11290_s8 + $0x3e8] ss:$16 sps:$4 sm:$0xff]  }
  0x73   : > { %6787 = vmatprep.mubr.bf16.mxu0 %v579_v24  ;;  %7443 = vmatprep.mubr.bf16.mxu1 %v579_v24  ;;  %v9681_v24 = vld [vmem:[%s11290_s8 + $0x3e4] ss:$16 sps:$4 sm:$0xff]  }
  0x75   : > { %6778 = vmatpush1.bf16.msra.mxu0 %v9563_v50  ;;  %7434 = vmatpush1.bf16.msra.mxu1 %v9564_v51  ;;  %v9630_v50 = vld [vmem:[%s11290_s8 + $0x2cc] ss:$16 sps:$4 sm:$0xff]   ;;  %v9625_v51 = vld [vmem:[%s11290_s8 + $0x2c0] ss:$16 sps:$4 sm:$0xff]  }
  0x76   : > { %6779 = vmatprep.subr.bf16.mxu0 %v9565_v53  ;;  %7435 = vmatprep.subr.bf16.mxu1 %v9567_v54  ;;  %v9633_v53 = vld [vmem:[%s11290_s8 + $0x2e4] ss:$16 sps:$4 sm:$0xff]   ;;  %v9636_v54 = vld [vmem:[%s11290_s8 + $0x2ec] ss:$16 sps:$4 sm:$0xff]  }
  0x79   : > { %6780 = vmatpush1.bf16.msra.mxu0 %v9569_v56  ;;  %7436 = vmatpush1.bf16.msra.mxu1 %v9570_v57  ;;  %v9634_v56 = vld [vmem:[%s11290_s8 + $0x2e8] ss:$16 sps:$4 sm:$0xff]   ;;  %v9639_v57 = vld [vmem:[%s11290_s8 + $0x304] ss:$16 sps:$4 sm:$0xff]  }
  0x7a   : > { %6781 = vmatprep.subr.bf16.mxu0 %v9571_v58  ;;  %7437 = vmatprep.subr.bf16.mxu1 %v9573_v59  ;;  %v9642_v58 = vld [vmem:[%s11290_s8 + $0x30c] ss:$16 sps:$4 sm:$0xff]   ;;  %v9637_v59 = vld [vmem:[%s11290_s8 + $0x300] ss:$16 sps:$4 sm:$0xff]  }
  0x7d   : > { %6782 = vmatpush1.bf16.msra.mxu0 %v9575_v60  ;;  %7438 = vmatpush1.bf16.msra.mxu1 %v9576_v0  ;;  %v9640_v60 = vld [vmem:[%s11290_s8 + $0x308] ss:$16 sps:$4 sm:$0xff]  }
  0x7e   : > { %6783 = vmatprep.subr.bf16.mxu0 %v9577_v1  ;;  %7439 = vmatprep.subr.bf16.mxu1 %v9579_v2  ;;  %v9646_v0 = vld [vmem:[%s11290_s8 + $0x328] ss:$16 sps:$4 sm:$0xff]   ;;  %v9651_v1 = vld [vmem:[%s11290_s8 + $0x344] ss:$16 sps:$4 sm:$0xff]   ;;  %v9654_v2 = vld [vmem:[%s11290_s8 + $0x34c] ss:$16 sps:$4 sm:$0xff]  }
  0x81   : > { %6784 = vmatpush1.bf16.msra.mxu0 %v9581_v3  ;;  %7440 = vmatpush1.bf16.msra.mxu1 %v9582_v6  ;;  %v9649_v3 = vld [vmem:[%s11290_s8 + $0x340] ss:$16 sps:$4 sm:$0xff]   ;;  %v9657_v6 = vld [vmem:[%s11290_s8 + $0x364] ss:$16 sps:$4 sm:$0xff]  }
  0x82   : > { %6785 = vmatprep.subr.bf16.mxu0 %v9583_v7  ;;  %7441 = vmatprep.subr.bf16.mxu1 %v9585_v8  ;;  %v9660_v7 = vld [vmem:[%s11290_s8 + $0x36c] ss:$16 sps:$4 sm:$0xff]   ;;  %v9655_v8 = vld [vmem:[%s11290_s8 + $0x360] ss:$16 sps:$4 sm:$0xff]  }
  0x85   : > { %6786 = vmatpush1.bf16.msra.mxu0 %v9587_v11  ;;  %7442 = vmatpush1.bf16.msra.mxu1 %v9588_v14  ;;  %v9666_v11 = vld [vmem:[%s11290_s8 + $0x38c] ss:$16 sps:$4 sm:$0xff]   ;;  %v9664_v14 = vld [vmem:[%s11290_s8 + $0x388] ss:$16 sps:$4 sm:$0xff]  }
  0x86   : > { %6796 = vmatprep.subr.bf16.mxu0 %v9591_v15  ;;  %7452 = vmatprep.subr.bf16.mxu1 %v9594_v17  ;;  %v9669_v15 = vld [vmem:[%s11290_s8 + $0x3a4] ss:$16 sps:$4 sm:$0xff]   ;;  %v9667_v17 = vld [vmem:[%s11290_s8 + $0x3a0] ss:$16 sps:$4 sm:$0xff]  }
  0x88   : > { %6788 = vmatmul.mubr.bf16.vlgmr.msra.gmra.mrb[0].mxu0 %v578_v23  ;;  %7444 = vmatmul.mubr.bf16.vlgmr.msra.gmra.mrb[0].mxu1 %v578_v23  ;;  %v9676_v23 = vld [vmem:[%s11290_s8 + $0x3c8] ss:$16 sps:$4 sm:$0xff]  }
  0x89   : > { %6797 = vmatpush1.bf16.msra.mxu0 %v9589_v25  ;;  %7453 = vmatpush1.bf16.msra.mxu1 %v9592_v26  ;;  %v9684_v25 = vld [vmem:[%s11290_s8 + $0x3ec] ss:$16 sps:$4 sm:$0xff]   ;;  %v9679_v26 = vld [vmem:[%s11290_s8 + $0x3e0] ss:$16 sps:$4 sm:$0xff]  }
  0x8a   : > { %6798 = vmatprep.subr.bf16.mxu0 %v9597_v28  ;;  %7454 = vmatprep.subr.bf16.mxu1 %v9600_v29  ;;  %v9687_v28 = vld [vmem:[%s11290_s8 + $0x404] ss:$16 sps:$4 sm:$0xff]   ;;  %v9690_v29 = vld [vmem:[%s11290_s8 + $0x40c] ss:$16 sps:$4 sm:$0xff]  }
  0x8b   : > { %6828 = vmatprep.mubr.bf16.mxu0 %v581_v30  ;;  %7484 = vmatprep.mubr.bf16.mxu1 %v581_v30  ;;  %v307_v30 = vld [vmem:[%s11303_s6 + $0x8] sm:$0xff] }
  0x8d   : > { %6799 = vmatpush1.bf16.msra.mxu0 %v9595_v31  ;;  %7455 = vmatpush1.bf16.msra.mxu1 %v9598_v32  ;;  %v315_v31 = vld [vmem:[%s11308_s12 + $0x8] sm:$0xff] }
  0x8e   : > { %6800 = vmatprep.subr.bf16.mxu0 %v9603_v33  ;;  %7456 = vmatprep.subr.bf16.mxu1 %v9606_v34  ;;  %v9685_v32 = vld [vmem:[%s11290_s8 + $0x400] ss:$16 sps:$4 sm:$0xff]   ;;  %v9688_v33 = vld [vmem:[%s11290_s8 + $0x408] ss:$16 sps:$4 sm:$0xff]   ;;  %v580_v34 = vpack.c.bf16 %v11396_v22, %v11396_v22 }
  0x8f   : > { %v9694_v22 = vld [vmem:[%s11290_s8 + $0x428] ss:$16 sps:$4 sm:$0xff]  }
  0x91   : > { %6801 = vmatpush1.bf16.msra.mxu0 %v9601_v35  ;;  %7457 = vmatpush1.bf16.msra.mxu1 %v9604_v36  ;;  %v323_v35 = vmul.f32 %v307_v30, %v307_v30  ;;  %v331_v36 = vmul.f32 %v315_v31, %v315_v31  ;;  %v9757_v30 = vld [vmem:[%s11290_s8 + $0x580] ss:$16 sps:$4 sm:$0xff]   ;;  %v9760_v31 = vld [vmem:[%s11290_s8 + $0x588] ss:$16 sps:$4 sm:$0xff]  }
  0x92   : > { %6802 = vmatprep.subr.bf16.mxu0 %v9609_v37  ;;  %7458 = vmatprep.subr.bf16.mxu1 %v9612_v38  ;;  %v9693_v37 = vld [vmem:[%s11290_s8 + $0x424] ss:$16 sps:$4 sm:$0xff]   ;;  %v9696_v38 = vld [vmem:[%s11290_s8 + $0x42c] ss:$16 sps:$4 sm:$0xff]  }
  0x95   : > { %6803 = vmatpush1.bf16.msra.mxu0 %v9607_v39  ;;  %7459 = vmatpush1.bf16.msra.mxu1 %v9610_v40  ;;  %v339_v39 = vadd.f32 %v331_v36, %v323_v35  ;;  %v9691_v40 = vld [vmem:[%s11290_s8 + $0x420] ss:$16 sps:$4 sm:$0xff]   ;;  %v9766_v35 = vld [vmem:[%s11290_s8 + $0x5a8] ss:$16 sps:$4 sm:$0xff]   ;;  %v9771_v36 = vld [vmem:[%s11290_s8 + $0x5c4] ss:$16 sps:$4 sm:$0xff]  }
  0x96   : > { %6804 = vmatprep.subr.bf16.mxu0 %v9615_v41  ;;  %7460 = vmatprep.subr.bf16.mxu1 %v9618_v42  ;;  %v9699_v41 = vld [vmem:[%s11290_s8 + $0x444] ss:$16 sps:$4 sm:$0xff]   ;;  %v9702_v42 = vld [vmem:[%s11290_s8 + $0x44c] ss:$16 sps:$4 sm:$0xff]  }
  0x97   : > { %11031 = vrsqrt.f32 %v339_v39  ;;  %vm355_vm2 = vcmp.eq.f32.partialorder %v339_v39, inf  ;;  %vm357_vm3 = vcmp.eq.f32.partialorder %v339_v39, 0.0 }
  0x99   : > { %6805 = vmatpush1.bf16.msra.mxu0 %v9613_v43  ;;  %7461 = vmatpush1.bf16.msra.mxu1 %v9616_v44  ;;  %v9697_v43 = vld [vmem:[%s11290_s8 + $0x440] ss:$16 sps:$4 sm:$0xff]   ;;  %v9700_v44 = vld [vmem:[%s11290_s8 + $0x448] ss:$16 sps:$4 sm:$0xff]  }
  0x9a   : > { %6806 = vmatprep.subr.bf16.mxu0 %v9621_v45  ;;  %7462 = vmatprep.subr.bf16.mxu1 %v9624_v46  ;;  %v9705_v45 = vld [vmem:[%s11290_s8 + $0x464] ss:$16 sps:$4 sm:$0xff]   ;;  %v9708_v46 = vld [vmem:[%s11290_s8 + $0x46c] ss:$16 sps:$4 sm:$0xff]  }
  0x9d   : > { %6807 = vmatpush1.bf16.msra.mxu0 %v9619_v47  ;;  %7463 = vmatpush1.bf16.msra.mxu1 %v9622_v48  ;;  %v9703_v47 = vld [vmem:[%s11290_s8 + $0x460] ss:$16 sps:$4 sm:$0xff]   ;;  %v9706_v48 = vld [vmem:[%s11290_s8 + $0x468] ss:$16 sps:$4 sm:$0xff]  }
  0x9e   : > { %6808 = vmatprep.subr.bf16.mxu0 %v9627_v49  ;;  %7464 = vmatprep.subr.bf16.mxu1 %v9630_v50  ;;  %v9711_v49 = vld [vmem:[%s11290_s8 + $0x484] ss:$16 sps:$4 sm:$0xff]  }
  0xa1   : > { %6809 = vmatpush1.bf16.msra.mxu0 %v9625_v51  ;;  %7465 = vmatpush1.bf16.msra.mxu1 %v9628_v52  ;;  %v11032_v50 = vpop.eup %11031  ;;  %v9714_v51 = vld [vmem:[%s11290_s8 + $0x48c] ss:$16 sps:$4 sm:$0xff]   ;;  %v358_v52 = vand.u32 2147483648, %v339_v39 }
  0xa2   : > { %6810 = vmatprep.subr.bf16.mxu0 %v9633_v53  ;;  %7466 = vmatprep.subr.bf16.mxu1 %v9636_v54  ;;  %v354_v53 = vmul.f32 %v11032_v50, %v339_v39  ;;  %v9709_v54 = vld [vmem:[%s11290_s8 + $0x480] ss:$16 sps:$4 sm:$0xff]   ;;  %v9784_v50 = vld [vmem:[%s11290_s8 + $0x608] ss:$16 sps:$4 sm:$0xff]  }
  0xa5   : > { %6811 = vmatpush1.bf16.msra.mxu0 %v9631_v55  ;;  %7467 = vmatpush1.bf16.msra.mxu1 %v9634_v56  ;;  %v9712_v55 = vld [vmem:[%s11290_s8 + $0x488] ss:$16 sps:$4 sm:$0xff]   ;;  %v356_v56 = vsel %vm355_vm2, %v339_v39, %v354_v53  ;;  %v9769_v39 = vld [vmem:[%s11290_s8 + $0x5c0] ss:$16 sps:$4 sm:$0xff]  }
  0xa6   : > { %6812 = vmatprep.subr.bf16.mxu0 %v9639_v57  ;;  %7468 = vmatprep.subr.bf16.mxu1 %v9642_v58  ;;  %v9717_v57 = vld [vmem:[%s11290_s8 + $0x4a4] ss:$16 sps:$4 sm:$0xff]   ;;  %v9720_v58 = vld [vmem:[%s11290_s8 + $0x4ac] ss:$16 sps:$4 sm:$0xff]  }
  0xa9   : > { %6813 = vmatpush1.bf16.msra.mxu0 %v9637_v59  ;;  %7469 = vmatpush1.bf16.msra.mxu1 %v9640_v60  ;;  %v11488_v59 = vsel %vm357_vm3, %v358_v52, %v356_v56  ;;  %v9792_v52 = vld [vmem:[%s11290_s8 + $0x62c] ss:$16 sps:$4 sm:$0xff]   ;;  %v9795_v56 = vld [vmem:[%s11290_s8 + $0x644] ss:$16 sps:$4 sm:$0xff]  }
  0xaa   : > { %6814 = vmatprep.subr.bf16.mxu0 %v9645_v61  ;;  %7470 = vmatprep.subr.bf16.mxu1 %v9648_v62  ;;  %v11492_v60 = vrot.slane %v11488_v59, %v11389_v13  ;;  %v9715_v61 = vld [vmem:[%s11290_s8 + $0x4a0] ss:$16 sps:$4 sm:$0xff]   ;;  %v9718_v62 = vld [vmem:[%s11290_s8 + $0x4a8] ss:$16 sps:$4 sm:$0xff]  }
  0xad   : > { %6815 = vmatpush1.bf16.msra.mxu0 %v9643_v63  ;;  %7471 = vmatpush1.bf16.msra.mxu1 %v9646_v0  ;;  %v442_v63 = vcombine.high %v11492_v60, %v11492_v60  ;;  %v9723_v0 = vld [vmem:[%s11290_s8 + $0x4c4] ss:$16 sps:$4 sm:$0xff]  }
  0xae   : > { %6816 = vmatprep.subr.bf16.mxu0 %v9651_v1  ;;  %7472 = vmatprep.subr.bf16.mxu1 %v9654_v2  ;;  %v9726_v1 = vld [vmem:[%s11290_s8 + $0x4cc] ss:$16 sps:$4 sm:$0xff]  }
  0xaf   : > { %v583_v2 = vpack.c.bf16 %v442_v63, %v442_v63  ;;  %v9802_v63 = vld [vmem:[%s11290_s8 + $0x668] ss:$16 sps:$4 sm:$0xff]  }
  0xb1   : > { %6817 = vmatpush1.bf16.msra.mxu0 %v9649_v3  ;;  %7473 = vmatpush1.bf16.msra.mxu1 %v9652_v4  ;;  %v9721_v3 = vld [vmem:[%s11290_s8 + $0x4c0] ss:$16 sps:$4 sm:$0xff]   ;;  %v9724_v4 = vld [vmem:[%s11290_s8 + $0x4c8] ss:$16 sps:$4 sm:$0xff]  }
  0xb2   : > { %6818 = vmatprep.subr.bf16.mxu0 %v9657_v6  ;;  %7474 = vmatprep.subr.bf16.mxu1 %v9660_v7  ;;  %v9729_v6 = vld [vmem:[%s11290_s8 + $0x4e4] ss:$16 sps:$4 sm:$0xff]   ;;  %v9732_v7 = vld [vmem:[%s11290_s8 + $0x4ec] ss:$16 sps:$4 sm:$0xff]  }
  0xb5   : > { %6819 = vmatpush1.bf16.msra.mxu0 %v9655_v8  ;;  %7475 = vmatpush1.bf16.msra.mxu1 %v9658_v9  ;;  %v9727_v8 = vld [vmem:[%s11290_s8 + $0x4e0] ss:$16 sps:$4 sm:$0xff]   ;;  %v9730_v9 = vld [vmem:[%s11290_s8 + $0x4e8] ss:$16 sps:$4 sm:$0xff]  }
  0xb6   : > { %6820 = vmatprep.subr.bf16.mxu0 %v9663_v10  ;;  %7476 = vmatprep.subr.bf16.mxu1 %v9666_v11  ;;  %v9735_v10 = vld [vmem:[%s11290_s8 + $0x504] ss:$16 sps:$4 sm:$0xff]   ;;  %v9738_v11 = vld [vmem:[%s11290_s8 + $0x50c] ss:$16 sps:$4 sm:$0xff]  }
  0xb9   : > { %6821 = vmatpush1.bf16.msra.mxu0 %v9661_v12  ;;  %7477 = vmatpush1.bf16.msra.mxu1 %v9664_v14  ;;  %v9733_v12 = vld [vmem:[%s11290_s8 + $0x500] ss:$16 sps:$4 sm:$0xff]   ;;  %v9736_v14 = vld [vmem:[%s11290_s8 + $0x508] ss:$16 sps:$4 sm:$0xff]  }
  0xba   : > { %6822 = vmatprep.subr.bf16.mxu0 %v9669_v15  ;;  %7478 = vmatprep.subr.bf16.mxu1 %v9672_v16  ;;  %v9741_v15 = vld [vmem:[%s11290_s8 + $0x524] ss:$16 sps:$4 sm:$0xff]   ;;  %v9744_v16 = vld [vmem:[%s11290_s8 + $0x52c] ss:$16 sps:$4 sm:$0xff]  }
  0xbd   : > { %6823 = vmatpush1.bf16.msra.mxu0 %v9667_v17  ;;  %7479 = vmatpush1.bf16.msra.mxu1 %v9670_v18  ;;  %v9739_v17 = vld [vmem:[%s11290_s8 + $0x520] ss:$16 sps:$4 sm:$0xff]   ;;  %v9742_v18 = vld [vmem:[%s11290_s8 + $0x528] ss:$16 sps:$4 sm:$0xff]  }
  0xbe   : > { %6824 = vmatprep.subr.bf16.mxu0 %v9675_v19  ;;  %7480 = vmatprep.subr.bf16.mxu1 %v9678_v20  ;;  %v9747_v19 = vld [vmem:[%s11290_s8 + $0x544] ss:$16 sps:$4 sm:$0xff]   ;;  %v9750_v20 = vld [vmem:[%s11290_s8 + $0x54c] ss:$16 sps:$4 sm:$0xff]  }
  0xc1   : > { %6825 = vmatpush1.bf16.msra.mxu0 %v9673_v21  ;;  %7481 = vmatpush1.bf16.msra.mxu1 %v9676_v23  ;;  %v9745_v21 = vld [vmem:[%s11290_s8 + $0x540] ss:$16 sps:$4 sm:$0xff]   ;;  %v9748_v23 = vld [vmem:[%s11290_s8 + $0x548] ss:$16 sps:$4 sm:$0xff]  }
  0xc2   : > { %6826 = vmatprep.subr.bf16.mxu0 %v9681_v24  ;;  %7482 = vmatprep.subr.bf16.mxu1 %v9684_v25  ;;  %v9753_v24 = vld [vmem:[%s11290_s8 + $0x564] ss:$16 sps:$4 sm:$0xff]   ;;  %v9756_v25 = vld [vmem:[%s11290_s8 + $0x56c] ss:$16 sps:$4 sm:$0xff]  }
  0xc5   : > { %6827 = vmatpush1.bf16.msra.mxu0 %v9679_v26  ;;  %7483 = vmatpush1.bf16.msra.mxu1 %v9682_v27  ;;  %v9751_v26 = vld [vmem:[%s11290_s8 + $0x560] ss:$16 sps:$4 sm:$0xff]   ;;  %v9754_v27 = vld [vmem:[%s11290_s8 + $0x568] ss:$16 sps:$4 sm:$0xff]  }
  0xc6   : > { %6837 = vmatprep.subr.bf16.mxu0 %v9687_v28  ;;  %7493 = vmatprep.subr.bf16.mxu1 %v9690_v29  ;;  %v9759_v28 = vld [vmem:[%s11290_s8 + $0x584] ss:$16 sps:$4 sm:$0xff]   ;;  %v9762_v29 = vld [vmem:[%s11290_s8 + $0x58c] ss:$16 sps:$4 sm:$0xff]  }
  0xc8   : > { %6829 = vmatmul.mubr.bf16.vlgmr.msra.gmra.mrb[0].mxu0 %v580_v34  ;;  %7485 = vmatmul.mubr.bf16.vlgmr.msra.gmra.mrb[0].mxu1 %v580_v34  ;;  %v9763_v34 = vld [vmem:[%s11290_s8 + $0x5a0] ss:$16 sps:$4 sm:$0xff]  }
  0xc9   : > { %6838 = vmatpush1.bf16.msra.mxu0 %v9685_v32  ;;  %7494 = vmatpush1.bf16.msra.mxu1 %v9688_v33  ;;  %v9765_v32 = vld [vmem:[%s11290_s8 + $0x5a4] ss:$16 sps:$4 sm:$0xff]   ;;  %v9768_v33 = vld [vmem:[%s11290_s8 + $0x5ac] ss:$16 sps:$4 sm:$0xff]  }
  0xca   : > { %6839 = vmatprep.subr.bf16.mxu0 %v9693_v37  ;;  %7495 = vmatprep.subr.bf16.mxu1 %v9696_v38  ;;  %v9774_v37 = vld [vmem:[%s11290_s8 + $0x5cc] ss:$16 sps:$4 sm:$0xff]   ;;  %v427_v38 = vcombine.high %v11488_v59, %v11488_v59  ;;  %v9796_v59 = vld [vmem:[%s11290_s8 + $0x648] ss:$16 sps:$4 sm:$0xff]  }
  0xcb   : > { %6869 = vmatprep.mubr.bf16.mxu0 %v583_v2  ;;  %7525 = vmatprep.mubr.bf16.mxu1 %v583_v2  ;;  %v9805_v2 = vld [vmem:[%s11290_s8 + $0x680] ss:$16 sps:$4 sm:$0xff]  }
  0xcd   : > { %6840 = vmatpush1.bf16.msra.mxu0 %v9691_v40  ;;  %7496 = vmatpush1.bf16.msra.mxu1 %v9694_v22  ;;  %v9772_v40 = vld [vmem:[%s11290_s8 + $0x5c8] ss:$16 sps:$4 sm:$0xff]   ;;  %v9777_v22 = vld [vmem:[%s11290_s8 + $0x5e4] ss:$16 sps:$4 sm:$0xff]  }
  0xce   : > { %6841 = vmatprep.subr.bf16.mxu0 %v9699_v41  ;;  %7497 = vmatprep.subr.bf16.mxu1 %v9702_v42  ;;  %v9780_v41 = vld [vmem:[%s11290_s8 + $0x5ec] ss:$16 sps:$4 sm:$0xff]   ;;  %v11539_v42 = vrot.slane %v427_v38, %v11389_v13  ;;  %v9847_v38 = vld [vmem:[%s11290_s8 + $0x760] ss:$16 sps:$4 sm:$0xff]  }
  0xd1   : > { %6842 = vmatpush1.bf16.msra.mxu0 %v9697_v43  ;;  %7498 = vmatpush1.bf16.msra.mxu1 %v9700_v44  ;;  %v9775_v43 = vld [vmem:[%s11290_s8 + $0x5e0] ss:$16 sps:$4 sm:$0xff]   ;;  %v9778_v44 = vld [vmem:[%s11290_s8 + $0x5e8] ss:$16 sps:$4 sm:$0xff]  }
  0xd2   : > { %6843 = vmatprep.subr.bf16.mxu0 %v9705_v45  ;;  %7499 = vmatprep.subr.bf16.mxu1 %v9708_v46  ;;  %v9783_v45 = vld [vmem:[%s11290_s8 + $0x604] ss:$16 sps:$4 sm:$0xff]   ;;  %v9786_v46 = vld [vmem:[%s11290_s8 + $0x60c] ss:$16 sps:$4 sm:$0xff]  }
  0xd5   : > { %6844 = vmatpush1.bf16.msra.mxu0 %v9703_v47  ;;  %7500 = vmatpush1.bf16.msra.mxu1 %v9706_v48  ;;  %v443_v47 = vcombine.high %v11539_v42, %v11539_v42  ;;  %v9781_v48 = vld [vmem:[%s11290_s8 + $0x600] ss:$16 sps:$4 sm:$0xff]  }
  0xd6   : > { %6845 = vmatprep.subr.bf16.mxu0 %v9711_v49  ;;  %7501 = vmatprep.subr.bf16.mxu1 %v9714_v51  ;;  %v582_v49 = vpack.c.bf16 %v11492_v60, %v11492_v60  ;;  %v9789_v51 = vld [vmem:[%s11290_s8 + $0x624] ss:$16 sps:$4 sm:$0xff]  }
  0xd7   : > { %v585_v53 = vpack.c.bf16 %v443_v47, %v443_v47  ;;  %v9801_v60 = vld [vmem:[%s11290_s8 + $0x664] ss:$16 sps:$4 sm:$0xff]   ;;  %v9864_v47 = vld [vmem:[%s11290_s8 + $0x7ac] ss:$16 sps:$4 sm:$0xff]  }
  0xd9   : > { %6846 = vmatpush1.bf16.msra.mxu0 %v9709_v54  ;;  %7502 = vmatpush1.bf16.msra.mxu1 %v9712_v55  ;;  %v9787_v54 = vld [vmem:[%s11290_s8 + $0x620] ss:$16 sps:$4 sm:$0xff]   ;;  %v9790_v55 = vld [vmem:[%s11290_s8 + $0x628] ss:$16 sps:$4 sm:$0xff]  }
  0xda   : > { %6847 = vmatprep.subr.bf16.mxu0 %v9717_v57  ;;  %7503 = vmatprep.subr.bf16.mxu1 %v9720_v58  ;;  %v9798_v57 = vld [vmem:[%s11290_s8 + $0x64c] ss:$16 sps:$4 sm:$0xff]   ;;  %v9793_v58 = vld [vmem:[%s11290_s8 + $0x640] ss:$16 sps:$4 sm:$0xff]  }
  0xdd   : > { %6848 = vmatpush1.bf16.msra.mxu0 %v9715_v61  ;;  %7504 = vmatpush1.bf16.msra.mxu1 %v9718_v62  ;;  %v9804_v61 = vld [vmem:[%s11290_s8 + $0x66c] ss:$16 sps:$4 sm:$0xff]   ;;  %v9799_v62 = vld [vmem:[%s11290_s8 + $0x660] ss:$16 sps:$4 sm:$0xff]  }
  0xde   : > { %6849 = vmatprep.subr.bf16.mxu0 %v9723_v0  ;;  %7505 = vmatprep.subr.bf16.mxu1 %v9726_v1  ;;  %v9807_v0 = vld [vmem:[%s11290_s8 + $0x684] ss:$16 sps:$4 sm:$0xff]   ;;  %v9810_v1 = vld [vmem:[%s11290_s8 + $0x68c] ss:$16 sps:$4 sm:$0xff]  }
  0xe1   : > { %6850 = vmatpush1.bf16.msra.mxu0 %v9721_v3  ;;  %7506 = vmatpush1.bf16.msra.mxu1 %v9724_v4  ;;  %v9808_v3 = vld [vmem:[%s11290_s8 + $0x688] ss:$16 sps:$4 sm:$0xff]   ;;  %v9813_v4 = vld [vmem:[%s11290_s8 + $0x6a4] ss:$16 sps:$4 sm:$0xff]  }
  0xe2   : > { %6851 = vmatprep.subr.bf16.mxu0 %v9729_v6  ;;  %7507 = vmatprep.subr.bf16.mxu1 %v9732_v7  ;;  %v9816_v6 = vld [vmem:[%s11290_s8 + $0x6ac] ss:$16 sps:$4 sm:$0xff]   ;;  %v9811_v7 = vld [vmem:[%s11290_s8 + $0x6a0] ss:$16 sps:$4 sm:$0xff]  }
  0xe5   : > { %6852 = vmatpush1.bf16.msra.mxu0 %v9727_v8  ;;  %7508 = vmatpush1.bf16.msra.mxu1 %v9730_v9  ;;  %v9814_v8 = vld [vmem:[%s11290_s8 + $0x6a8] ss:$16 sps:$4 sm:$0xff]   ;;  %v9819_v9 = vld [vmem:[%s11290_s8 + $0x6c4] ss:$16 sps:$4 sm:$0xff]  }
  0xe6   : > { %6853 = vmatprep.subr.bf16.mxu0 %v9735_v10  ;;  %7509 = vmatprep.subr.bf16.mxu1 %v9738_v11  ;;  %v9822_v10 = vld [vmem:[%s11290_s8 + $0x6cc] ss:$16 sps:$4 sm:$0xff]   ;;  %v9817_v11 = vld [vmem:[%s11290_s8 + $0x6c0] ss:$16 sps:$4 sm:$0xff]  }
  0xe9   : > { %6854 = vmatpush1.bf16.msra.mxu0 %v9733_v12  ;;  %7510 = vmatpush1.bf16.msra.mxu1 %v9736_v14  ;;  %v9820_v12 = vld [vmem:[%s11290_s8 + $0x6c8] ss:$16 sps:$4 sm:$0xff]   ;;  %v9825_v14 = vld [vmem:[%s11290_s8 + $0x6e4] ss:$16 sps:$4 sm:$0xff]  }
  0xea   : > { %6855 = vmatprep.subr.bf16.mxu0 %v9741_v15  ;;  %7511 = vmatprep.subr.bf16.mxu1 %v9744_v16  ;;  %v9828_v15 = vld [vmem:[%s11290_s8 + $0x6ec] ss:$16 sps:$4 sm:$0xff]  }
  0xeb   : > { %v308_v16 = vld [vmem:[%s11303_s6 + $0x10] sm:$0xff] }
  0xed   : > { %6856 = vmatpush1.bf16.msra.mxu0 %v9739_v17  ;;  %7512 = vmatpush1.bf16.msra.mxu1 %v9742_v18  ;;  %v316_v17 = vld [vmem:[%s11308_s12 + $0x10] sm:$0xff]  ;;  %v9823_v18 = vld [vmem:[%s11290_s8 + $0x6e0] ss:$16 sps:$4 sm:$0xff]  }
  0xee   : > { %6857 = vmatprep.subr.bf16.mxu0 %v9747_v19  ;;  %7513 = vmatprep.subr.bf16.mxu1 %v9750_v20  ;;  %v324_v19 = vmul.f32 %v308_v16, %v308_v16  ;;  %v332_v20 = vmul.f32 %v316_v17, %v316_v17  ;;  %v9895_v16 = vld [vmem:[%s11290_s8 + $0x860] ss:$16 sps:$4 sm:$0xff]   ;;  %v9898_v17 = vld [vmem:[%s11290_s8 + $0x868] ss:$16 sps:$4 sm:$0xff]  }
  0xf1   : > { %6858 = vmatpush1.bf16.msra.mxu0 %v9745_v21  ;;  %7514 = vmatpush1.bf16.msra.mxu1 %v9748_v23  ;;  %v9826_v21 = vld [vmem:[%s11290_s8 + $0x6e8] ss:$16 sps:$4 sm:$0xff]   ;;  %v9831_v23 = vld [vmem:[%s11290_s8 + $0x704] ss:$16 sps:$4 sm:$0xff]  }
  0xf2   : > { %6859 = vmatprep.subr.bf16.mxu0 %v9753_v24  ;;  %7515 = vmatprep.subr.bf16.mxu1 %v9756_v25  ;;  %v9834_v24 = vld [vmem:[%s11290_s8 + $0x70c] ss:$16 sps:$4 sm:$0xff]   ;;  %v9829_v25 = vld [vmem:[%s11290_s8 + $0x700] ss:$16 sps:$4 sm:$0xff]  }
  0xf5   : > { %6860 = vmatpush1.bf16.msra.mxu0 %v9751_v26  ;;  %7516 = vmatpush1.bf16.msra.mxu1 %v9754_v27  ;;  %v340_v26 = vadd.f32 %v332_v20, %v324_v19  ;;  %v9832_v27 = vld [vmem:[%s11290_s8 + $0x708] ss:$16 sps:$4 sm:$0xff]   ;;  %v9906_v19 = vld [vmem:[%s11290_s8 + $0x88c] ss:$16 sps:$4 sm:$0xff]   ;;  %v9901_v20 = vld [vmem:[%s11290_s8 + $0x880] ss:$16 sps:$4 sm:$0xff]  }
  0xf6   : > { %6861 = vmatprep.subr.bf16.mxu0 %v9759_v28  ;;  %7517 = vmatprep.subr.bf16.mxu1 %v9762_v29  ;;  %v9837_v28 = vld [vmem:[%s11290_s8 + $0x724] ss:$16 sps:$4 sm:$0xff]   ;;  %v9840_v29 = vld [vmem:[%s11290_s8 + $0x72c] ss:$16 sps:$4 sm:$0xff]  }
  0xf7   : > { %11033 = vrsqrt.f32 %v340_v26  ;;  %vm362_vm4 = vcmp.eq.f32.partialorder %v340_v26, inf  ;;  %vm364_vm5 = vcmp.eq.f32.partialorder %v340_v26, 0.0 }
  0xf9   : > { %6862 = vmatpush1.bf16.msra.mxu0 %v9757_v30  ;;  %7518 = vmatpush1.bf16.msra.mxu1 %v9760_v31  ;;  %v9835_v30 = vld [vmem:[%s11290_s8 + $0x720] ss:$16 sps:$4 sm:$0xff]   ;;  %v9838_v31 = vld [vmem:[%s11290_s8 + $0x728] ss:$16 sps:$4 sm:$0xff]  }
  0xfa   : > { %6863 = vmatprep.subr.bf16.mxu0 %v9765_v32  ;;  %7519 = vmatprep.subr.bf16.mxu1 %v9768_v33  ;;  %v9843_v32 = vld [vmem:[%s11290_s8 + $0x744] ss:$16 sps:$4 sm:$0xff]   ;;  %v9846_v33 = vld [vmem:[%s11290_s8 + $0x74c] ss:$16 sps:$4 sm:$0xff]  }
  0xfd   : > { %6864 = vmatpush1.bf16.msra.mxu0 %v9763_v34  ;;  %7520 = vmatpush1.bf16.msra.mxu1 %v9766_v35  ;;  %v9841_v34 = vld [vmem:[%s11290_s8 + $0x740] ss:$16 sps:$4 sm:$0xff]   ;;  %v9844_v35 = vld [vmem:[%s11290_s8 + $0x748] ss:$16 sps:$4 sm:$0xff]  }
  0xfe   : > { %6865 = vmatprep.subr.bf16.mxu0 %v9771_v36  ;;  %7521 = vmatprep.subr.bf16.mxu1 %v9774_v37  ;;  %v9849_v36 = vld [vmem:[%s11290_s8 + $0x764] ss:$16 sps:$4 sm:$0xff]   ;;  %v9852_v37 = vld [vmem:[%s11290_s8 + $0x76c] ss:$16 sps:$4 sm:$0xff]  }
 0x101   : > { %6866 = vmatpush1.bf16.msra.mxu0 %v9769_v39  ;;  %7522 = vmatpush1.bf16.msra.mxu1 %v9772_v40  ;;  %v9850_v39 = vld [vmem:[%s11290_s8 + $0x768] ss:$16 sps:$4 sm:$0xff]   ;;  %v9855_v40 = vld [vmem:[%s11290_s8 + $0x784] ss:$16 sps:$4 sm:$0xff]  }
 0x102   : > { %6867 = vmatprep.subr.bf16.mxu0 %v9777_v22  ;;  %7523 = vmatprep.subr.bf16.mxu1 %v9780_v41  ;;  %v11034_v22 = vpop.eup %11033  ;;  %v9858_v41 = vld [vmem:[%s11290_s8 + $0x78c] ss:$16 sps:$4 sm:$0xff]  }
 0x105   : > { %6868 = vmatpush1.bf16.msra.mxu0 %v9775_v43  ;;  %7524 = vmatpush1.bf16.msra.mxu1 %v9778_v44  ;;  %v9853_v43 = vld [vmem:[%s11290_s8 + $0x780] ss:$16 sps:$4 sm:$0xff]   ;;  %v9856_v44 = vld [vmem:[%s11290_s8 + $0x788] ss:$16 sps:$4 sm:$0xff]  }
 0x106   : > { %6878 = vmatprep.subr.bf16.mxu0 %v9783_v45  ;;  %7534 = vmatprep.subr.bf16.mxu1 %v9786_v46  ;;  %v9861_v45 = vld [vmem:[%s11290_s8 + $0x7a4] ss:$16 sps:$4 sm:$0xff]   ;;  %v361_v46 = vmul.f32 %v11034_v22, %v340_v26  ;;  %v9931_v22 = vld [vmem:[%s11290_s8 + $0x920] ss:$16 sps:$4 sm:$0xff]  }
 0x108   : > { %6870 = vmatmul.mubr.bf16.vlgmr.msra.gmra.mrb[0].mxu0 %v582_v49  ;;  %7526 = vmatmul.mubr.bf16.vlgmr.msra.gmra.mrb[0].mxu1 %v582_v49  ;;  %v365_v49 = vand.u32 2147483648, %v340_v26 }
 0x109   : > { %6879 = vmatpush1.bf16.msra.mxu0 %v9781_v48  ;;  %7535 = vmatpush1.bf16.msra.mxu1 %v9784_v50  ;;  %v9859_v48 = vld [vmem:[%s11290_s8 + $0x7a0] ss:$16 sps:$4 sm:$0xff]   ;;  %v9862_v50 = vld [vmem:[%s11290_s8 + $0x7a8] ss:$16 sps:$4 sm:$0xff]  }
 0x10a   : > { %6880 = vmatprep.subr.bf16.mxu0 %v9789_v51  ;;  %7536 = vmatprep.subr.bf16.mxu1 %v9792_v52  ;;  %v9867_v51 = vld [vmem:[%s11290_s8 + $0x7c4] ss:$16 sps:$4 sm:$0xff]   ;;  %v363_v52 = vsel %vm362_vm4, %v340_v26, %v361_v46  ;;  %v9910_v26 = vld [vmem:[%s11290_s8 + $0x8a8] ss:$16 sps:$4 sm:$0xff]  }
 0x10b   : > { %6910 = vmatprep.mubr.bf16.mxu0 %v585_v53  ;;  %7566 = vmatprep.mubr.bf16.mxu1 %v585_v53  ;;  %v9870_v53 = vld [vmem:[%s11290_s8 + $0x7cc] ss:$16 sps:$4 sm:$0xff]   ;;  %v9940_v46 = vld [vmem:[%s11290_s8 + $0x948] ss:$16 sps:$4 sm:$0xff]  }
 0x10d   : > { %6881 = vmatpush1.bf16.msra.mxu0 %v9787_v54  ;;  %7537 = vmatpush1.bf16.msra.mxu1 %v9790_v55  ;;  %v9865_v54 = vld [vmem:[%s11290_s8 + $0x7c0] ss:$16 sps:$4 sm:$0xff]   ;;  %v11608_v55 = vsel %vm364_vm5, %v365_v49, %v363_v52  ;;  %v9954_v52 = vld [vmem:[%s11290_s8 + $0x98c] ss:$16 sps:$4 sm:$0xff]  }
 0x10e   : > { %6882 = vmatprep.subr.bf16.mxu0 %v9795_v56  ;;  %7538 = vmatprep.subr.bf16.mxu1 %v9798_v57  ;;  %v9868_v56 = vld [vmem:[%s11290_s8 + $0x7c8] ss:$16 sps:$4 sm:$0xff]   ;;  %v9873_v57 = vld [vmem:[%s11290_s8 + $0x7e4] ss:$16 sps:$4 sm:$0xff]   ;;  %v9943_v49 = vld [vmem:[%s11290_s8 + $0x960] ss:$16 sps:$4 sm:$0xff]  }
 0x111   : > { %6883 = vmatpush1.bf16.msra.mxu0 %v9793_v58  ;;  %7539 = vmatpush1.bf16.msra.mxu1 %v9796_v59  ;;  %v9876_v58 = vld [vmem:[%s11290_s8 + $0x7ec] ss:$16 sps:$4 sm:$0xff]   ;;  %v11615_v59 = vrot.slane %v11608_v55, %v11389_v13 }
 0x112   : > { %6884 = vmatprep.subr.bf16.mxu0 %v9801_v60  ;;  %7540 = vmatprep.subr.bf16.mxu1 %v9804_v61  ;;  %v9871_v60 = vld [vmem:[%s11290_s8 + $0x7e0] ss:$16 sps:$4 sm:$0xff]   ;;  %v9874_v61 = vld [vmem:[%s11290_s8 + $0x7e8] ss:$16 sps:$4 sm:$0xff]  }
 0x115   : > { %6885 = vmatpush1.bf16.msra.mxu0 %v9799_v62  ;;  %7541 = vmatpush1.bf16.msra.mxu1 %v9802_v63  ;;  %v9879_v62 = vld [vmem:[%s11290_s8 + $0x804] ss:$16 sps:$4 sm:$0xff]   ;;  %v9882_v63 = vld [vmem:[%s11290_s8 + $0x80c] ss:$16 sps:$4 sm:$0xff]  }
 0x116   : > { %6886 = vmatprep.subr.bf16.mxu0 %v9807_v0  ;;  %7542 = vmatprep.subr.bf16.mxu1 %v9810_v1  ;;  %v459_v0 = vcombine.high %v11615_v59, %v11615_v59  ;;  %v9877_v1 = vld [vmem:[%s11290_s8 + $0x800] ss:$16 sps:$4 sm:$0xff]  }
 0x119   : > { %6887 = vmatpush1.bf16.msra.mxu0 %v9805_v2  ;;  %7543 = vmatpush1.bf16.msra.mxu1 %v9808_v3  ;;  %v584_v2 = vpack.c.bf16 %v11539_v42, %v11539_v42  ;;  %v9880_v3 = vld [vmem:[%s11290_s8 + $0x808] ss:$16 sps:$4 sm:$0xff]  }
 0x11a   : > { %6888 = vmatprep.subr.bf16.mxu0 %v9813_v4  ;;  %7544 = vmatprep.subr.bf16.mxu1 %v9816_v6  ;;  %v9885_v4 = vld [vmem:[%s11290_s8 + $0x824] ss:$16 sps:$4 sm:$0xff]   ;;  %v9888_v6 = vld [vmem:[%s11290_s8 + $0x82c] ss:$16 sps:$4 sm:$0xff]   ;;  %v9886_v42 = vld [vmem:[%s11290_s8 + $0x828] ss:$16 sps:$4 sm:$0xff]  }
 0x11d   : > { %6889 = vmatpush1.bf16.msra.mxu0 %v9811_v7  ;;  %7545 = vmatpush1.bf16.msra.mxu1 %v9814_v8  ;;  %v587_v7 = vpack.c.bf16 %v459_v0, %v459_v0  ;;  %v9883_v8 = vld [vmem:[%s11290_s8 + $0x820] ss:$16 sps:$4 sm:$0xff]  }
 0x11e   : > { %6890 = vmatprep.subr.bf16.mxu0 %v9819_v9  ;;  %7546 = vmatprep.subr.bf16.mxu1 %v9822_v10  ;;  %v9891_v9 = vld [vmem:[%s11290_s8 + $0x844] ss:$16 sps:$4 sm:$0xff]   ;;  %v9894_v10 = vld [vmem:[%s11290_s8 + $0x84c] ss:$16 sps:$4 sm:$0xff]   ;;  %v9961_v0 = vld [vmem:[%s11290_s8 + $0x9c0] ss:$16 sps:$4 sm:$0xff]  }
 0x121   : > { %6891 = vmatpush1.bf16.msra.mxu0 %v9817_v11  ;;  %7547 = vmatpush1.bf16.msra.mxu1 %v9820_v12  ;;  %v9889_v11 = vld [vmem:[%s11290_s8 + $0x840] ss:$16 sps:$4 sm:$0xff]   ;;  %v9892_v12 = vld [vmem:[%s11290_s8 + $0x848] ss:$16 sps:$4 sm:$0xff]  }
 0x122   : > { %6892 = vmatprep.subr.bf16.mxu0 %v9825_v14  ;;  %7548 = vmatprep.subr.bf16.mxu1 %v9828_v15  ;;  %v9897_v14 = vld [vmem:[%s11290_s8 + $0x864] ss:$16 sps:$4 sm:$0xff]   ;;  %v9900_v15 = vld [vmem:[%s11290_s8 + $0x86c] ss:$16 sps:$4 sm:$0xff]  }
 0x125   : > { %6893 = vmatpush1.bf16.msra.mxu0 %v9823_v18  ;;  %7549 = vmatpush1.bf16.msra.mxu1 %v9826_v21  ;;  %v9903_v18 = vld [vmem:[%s11290_s8 + $0x884] ss:$16 sps:$4 sm:$0xff]   ;;  %v9904_v21 = vld [vmem:[%s11290_s8 + $0x888] ss:$16 sps:$4 sm:$0xff]  }
 0x126   : > { %6894 = vmatprep.subr.bf16.mxu0 %v9831_v23  ;;  %7550 = vmatprep.subr.bf16.mxu1 %v9834_v24  ;;  %v9909_v23 = vld [vmem:[%s11290_s8 + $0x8a4] ss:$16 sps:$4 sm:$0xff]   ;;  %v9912_v24 = vld [vmem:[%s11290_s8 + $0x8ac] ss:$16 sps:$4 sm:$0xff]  }
 0x129   : > { %6895 = vmatpush1.bf16.msra.mxu0 %v9829_v25  ;;  %7551 = vmatpush1.bf16.msra.mxu1 %v9832_v27  ;;  %v9907_v25 = vld [vmem:[%s11290_s8 + $0x8a0] ss:$16 sps:$4 sm:$0xff]   ;;  %v9915_v27 = vld [vmem:[%s11290_s8 + $0x8c4] ss:$16 sps:$4 sm:$0xff]  }
 0x12a   : > { %6896 = vmatprep.subr.bf16.mxu0 %v9837_v28  ;;  %7552 = vmatprep.subr.bf16.mxu1 %v9840_v29  ;;  %v9918_v28 = vld [vmem:[%s11290_s8 + $0x8cc] ss:$16 sps:$4 sm:$0xff]   ;;  %v9913_v29 = vld [vmem:[%s11290_s8 + $0x8c0] ss:$16 sps:$4 sm:$0xff]  }
 0x12d   : > { %6897 = vmatpush1.bf16.msra.mxu0 %v9835_v30  ;;  %7553 = vmatpush1.bf16.msra.mxu1 %v9838_v31  ;;  %v9916_v30 = vld [vmem:[%s11290_s8 + $0x8c8] ss:$16 sps:$4 sm:$0xff]   ;;  %v9921_v31 = vld [vmem:[%s11290_s8 + $0x8e4] ss:$16 sps:$4 sm:$0xff]  }
 0x12e   : > { %6898 = vmatprep.subr.bf16.mxu0 %v9843_v32  ;;  %7554 = vmatprep.subr.bf16.mxu1 %v9846_v33  ;;  %v9924_v32 = vld [vmem:[%s11290_s8 + $0x8ec] ss:$16 sps:$4 sm:$0xff]   ;;  %v9919_v33 = vld [vmem:[%s11290_s8 + $0x8e0] ss:$16 sps:$4 sm:$0xff]  }
 0x131   : > { %6899 = vmatpush1.bf16.msra.mxu0 %v9841_v34  ;;  %7555 = vmatpush1.bf16.msra.mxu1 %v9844_v35  ;;  %v9922_v34 = vld [vmem:[%s11290_s8 + $0x8e8] ss:$16 sps:$4 sm:$0xff]   ;;  %v9927_v35 = vld [vmem:[%s11290_s8 + $0x904] ss:$16 sps:$4 sm:$0xff]  }
 0x132   : > { %6900 = vmatprep.subr.bf16.mxu0 %v9849_v36  ;;  %7556 = vmatprep.subr.bf16.mxu1 %v9852_v37  ;;  %v9930_v36 = vld [vmem:[%s11290_s8 + $0x90c] ss:$16 sps:$4 sm:$0xff]   ;;  %v9925_v37 = vld [vmem:[%s11290_s8 + $0x900] ss:$16 sps:$4 sm:$0xff]  }
 0x135   : > { %6901 = vmatpush1.bf16.msra.mxu0 %v9847_v38  ;;  %7557 = vmatpush1.bf16.msra.mxu1 %v9850_v39  ;;  %v9928_v38 = vld [vmem:[%s11290_s8 + $0x908] ss:$16 sps:$4 sm:$0xff]   ;;  %v9933_v39 = vld [vmem:[%s11290_s8 + $0x924] ss:$16 sps:$4 sm:$0xff]  }
 0x136   : > { %6902 = vmatprep.subr.bf16.mxu0 %v9855_v40  ;;  %7558 = vmatprep.subr.bf16.mxu1 %v9858_v41  ;;  %v9936_v40 = vld [vmem:[%s11290_s8 + $0x92c] ss:$16 sps:$4 sm:$0xff]   ;;  %v9934_v41 = vld [vmem:[%s11290_s8 + $0x928] ss:$16 sps:$4 sm:$0xff]  }
 0x139   : > { %6903 = vmatpush1.bf16.msra.mxu0 %v9853_v43  ;;  %7559 = vmatpush1.bf16.msra.mxu1 %v9856_v44  ;;  %v9939_v43 = vld [vmem:[%s11290_s8 + $0x944] ss:$16 sps:$4 sm:$0xff]   ;;  %v9942_v44 = vld [vmem:[%s11290_s8 + $0x94c] ss:$16 sps:$4 sm:$0xff]  }
 0x13a   : > { %6904 = vmatprep.subr.bf16.mxu0 %v9861_v45  ;;  %7560 = vmatprep.subr.bf16.mxu1 %v9864_v47  ;;  %v9937_v45 = vld [vmem:[%s11290_s8 + $0x940] ss:$16 sps:$4 sm:$0xff]   ;;  %v9945_v47 = vld [vmem:[%s11290_s8 + $0x964] ss:$16 sps:$4 sm:$0xff]  }
 0x13d   : > { %6905 = vmatpush1.bf16.msra.mxu0 %v9859_v48  ;;  %7561 = vmatpush1.bf16.msra.mxu1 %v9862_v50  ;;  %v9948_v48 = vld [vmem:[%s11290_s8 + $0x96c] ss:$16 sps:$4 sm:$0xff]   ;;  %v9946_v50 = vld [vmem:[%s11290_s8 + $0x968] ss:$16 sps:$4 sm:$0xff]  }
 0x13e   : > { %6906 = vmatprep.subr.bf16.mxu0 %v9867_v51  ;;  %7562 = vmatprep.subr.bf16.mxu1 %v9870_v53  ;;  %v9951_v51 = vld [vmem:[%s11290_s8 + $0x984] ss:$16 sps:$4 sm:$0xff]   ;;  %v9949_v53 = vld [vmem:[%s11290_s8 + $0x980] ss:$16 sps:$4 sm:$0xff]  }
 0x141   : > { %6907 = vmatpush1.bf16.msra.mxu0 %v9865_v54  ;;  %7563 = vmatpush1.bf16.msra.mxu1 %v9868_v56  ;;  %v9952_v54 = vld [vmem:[%s11290_s8 + $0x988] ss:$16 sps:$4 sm:$0xff]   ;;  %v9957_v56 = vld [vmem:[%s11290_s8 + $0x9a4] ss:$16 sps:$4 sm:$0xff]  }
 0x142   : > { %6908 = vmatprep.subr.bf16.mxu0 %v9873_v57  ;;  %7564 = vmatprep.subr.bf16.mxu1 %v9876_v58  ;;  %v9960_v57 = vld [vmem:[%s11290_s8 + $0x9ac] ss:$16 sps:$4 sm:$0xff]   ;;  %v9955_v58 = vld [vmem:[%s11290_s8 + $0x9a0] ss:$16 sps:$4 sm:$0xff]  }
 0x145   : > { %6909 = vmatpush1.bf16.msra.mxu0 %v9871_v60  ;;  %7565 = vmatpush1.bf16.msra.mxu1 %v9874_v61  ;;  %v9958_v60 = vld [vmem:[%s11290_s8 + $0x9a8] ss:$16 sps:$4 sm:$0xff]   ;;  %v9963_v61 = vld [vmem:[%s11290_s8 + $0x9c4] ss:$16 sps:$4 sm:$0xff]  }
 0x146   : > { %6919 = vmatprep.subr.bf16.mxu0 %v9879_v62  ;;  %7575 = vmatprep.subr.bf16.mxu1 %v9882_v63  ;;  %v9966_v62 = vld [vmem:[%s11290_s8 + $0x9cc] ss:$16 sps:$4 sm:$0xff]   ;;  %v444_v63 = vcombine.high %v11608_v55, %v11608_v55  ;;  %v9967_v55 = vld [vmem:[%s11290_s8 + $0x9e0] ss:$16 sps:$4 sm:$0xff]  }
 0x148   : > { %6911 = vmatmul.mubr.bf16.vlgmr.msra.gmra.mrb[0].mxu0 %v584_v2  ;;  %7567 = vmatmul.mubr.bf16.vlgmr.msra.gmra.mrb[0].mxu1 %v584_v2  ;;  %v9969_v2 = vld [vmem:[%s11290_s8 + $0x9e4] ss:$16 sps:$4 sm:$0xff]  }
 0x149   : > { %6920 = vmatpush1.bf16.msra.mxu0 %v9877_v1  ;;  %7576 = vmatpush1.bf16.msra.mxu1 %v9880_v3  ;;  %v9964_v1 = vld [vmem:[%s11290_s8 + $0x9c8] ss:$16 sps:$4 sm:$0xff]   ;;  %v9972_v3 = vld [vmem:[%s11290_s8 + $0x9ec] ss:$16 sps:$4 sm:$0xff]  }
 0x14a   : > { %6921 = vmatprep.subr.bf16.mxu0 %v9885_v4  ;;  %7577 = vmatprep.subr.bf16.mxu1 %v9888_v6  ;;  %v11688_v4 = vrot.slane %v444_v63, %v11389_v13  ;;  %v9970_v6 = vld [vmem:[%s11290_s8 + $0x9e8] ss:$16 sps:$4 sm:$0xff]   ;;  %v10039_v63 = vld [vmem:[%s11290_s8 + $0xb60] ss:$16 sps:$4 sm:$0xff]  }
 0x14b   : > { %6951 = vmatprep.mubr.bf16.mxu0 %v587_v7  ;;  %7607 = vmatprep.mubr.bf16.mxu1 %v587_v7  ;;  %v9975_v7 = vld [vmem:[%s11290_s8 + $0xa04] ss:$16 sps:$4 sm:$0xff]  }
 0x14d   : > { %6922 = vmatpush1.bf16.msra.mxu0 %v9883_v8  ;;  %7578 = vmatpush1.bf16.msra.mxu1 %v9886_v42  ;;  %v9978_v8 = vld [vmem:[%s11290_s8 + $0xa0c] ss:$16 sps:$4 sm:$0xff]   ;;  %v460_v42 = vcombine.high %v11688_v4, %v11688_v4 }
 0x14e   : > { %6923 = vmatprep.subr.bf16.mxu0 %v9891_v9  ;;  %7579 = vmatprep.subr.bf16.mxu1 %v9894_v10  ;;  %v586_v9 = vpack.c.bf16 %v11615_v59, %v11615_v59  ;;  %v9973_v10 = vld [vmem:[%s11290_s8 + $0xa00] ss:$16 sps:$4 sm:$0xff]  }
 0x14f   : > { %v9979_v59 = vld [vmem:[%s11290_s8 + $0xa20] ss:$16 sps:$4 sm:$0xff]  }
 0x151   : > { %6924 = vmatpush1.bf16.msra.mxu0 %v9889_v11  ;;  %7580 = vmatpush1.bf16.msra.mxu1 %v9892_v12  ;;  %v9976_v11 = vld [vmem:[%s11290_s8 + $0xa08] ss:$16 sps:$4 sm:$0xff]   ;;  %v9981_v12 = vld [vmem:[%s11290_s8 + $0xa24] ss:$16 sps:$4 sm:$0xff]  }
 0x152   : > { %6925 = vmatprep.subr.bf16.mxu0 %v9897_v14  ;;  %7581 = vmatprep.subr.bf16.mxu1 %v9900_v15  ;;  %v9984_v14 = vld [vmem:[%s11290_s8 + $0xa2c] ss:$16 sps:$4 sm:$0xff]   ;;  %v589_v15 = vpack.c.bf16 %v460_v42, %v460_v42 }
 0x153   : > { %v10056_v42 = vld [vmem:[%s11290_s8 + $0xbac] ss:$16 sps:$4 sm:$0xff]  }
 0x155   : > { %6926 = vmatpush1.bf16.msra.mxu0 %v9895_v16  ;;  %7582 = vmatpush1.bf16.msra.mxu1 %v9898_v17  ;;  %v9982_v16 = vld [vmem:[%s11290_s8 + $0xa28] ss:$16 sps:$4 sm:$0xff]   ;;  %v9987_v17 = vld [vmem:[%s11290_s8 + $0xa44] ss:$16 sps:$4 sm:$0xff]  }
 0x156   : > { %6927 = vmatprep.subr.bf16.mxu0 %v9903_v18  ;;  %7583 = vmatprep.subr.bf16.mxu1 %v9906_v19  ;;  %v9990_v18 = vld [vmem:[%s11290_s8 + $0xa4c] ss:$16 sps:$4 sm:$0xff]   ;;  %v9985_v19 = vld [vmem:[%s11290_s8 + $0xa40] ss:$16 sps:$4 sm:$0xff]  }
 0x159   : > { %6928 = vmatpush1.bf16.msra.mxu0 %v9901_v20  ;;  %7584 = vmatpush1.bf16.msra.mxu1 %v9904_v21  ;;  %v9988_v20 = vld [vmem:[%s11290_s8 + $0xa48] ss:$16 sps:$4 sm:$0xff]   ;;  %v9993_v21 = vld [vmem:[%s11290_s8 + $0xa64] ss:$16 sps:$4 sm:$0xff]  }
 0x15a   : > { %6929 = vmatprep.subr.bf16.mxu0 %v9909_v23  ;;  %7585 = vmatprep.subr.bf16.mxu1 %v9912_v24  ;;  %v9996_v23 = vld [vmem:[%s11290_s8 + $0xa6c] ss:$16 sps:$4 sm:$0xff]   ;;  %v9991_v24 = vld [vmem:[%s11290_s8 + $0xa60] ss:$16 sps:$4 sm:$0xff]  }
 0x15d   : > { %6930 = vmatpush1.bf16.msra.mxu0 %v9907_v25  ;;  %7586 = vmatpush1.bf16.msra.mxu1 %v9910_v26  ;;  %v9994_v25 = vld [vmem:[%s11290_s8 + $0xa68] ss:$16 sps:$4 sm:$0xff]   ;;  %v9999_v26 = vld [vmem:[%s11290_s8 + $0xa84] ss:$16 sps:$4 sm:$0xff]  }
 0x15e   : > { %6931 = vmatprep.subr.bf16.mxu0 %v9915_v27  ;;  %7587 = vmatprep.subr.bf16.mxu1 %v9918_v28  ;;  %v10002_v27 = vld [vmem:[%s11290_s8 + $0xa8c] ss:$16 sps:$4 sm:$0xff]   ;;  %v9997_v28 = vld [vmem:[%s11290_s8 + $0xa80] ss:$16 sps:$4 sm:$0xff]  }
 0x161   : > { %6932 = vmatpush1.bf16.msra.mxu0 %v9913_v29  ;;  %7588 = vmatpush1.bf16.msra.mxu1 %v9916_v30  ;;  %v10000_v29 = vld [vmem:[%s11290_s8 + $0xa88] ss:$16 sps:$4 sm:$0xff]   ;;  %v10005_v30 = vld [vmem:[%s11290_s8 + $0xaa4] ss:$16 sps:$4 sm:$0xff]  }
 0x162   : > { %6933 = vmatprep.subr.bf16.mxu0 %v9921_v31  ;;  %7589 = vmatprep.subr.bf16.mxu1 %v9924_v32  ;;  %v10008_v31 = vld [vmem:[%s11290_s8 + $0xaac] ss:$16 sps:$4 sm:$0xff]   ;;  %v10003_v32 = vld [vmem:[%s11290_s8 + $0xaa0] ss:$16 sps:$4 sm:$0xff]  }
 0x165   : > { %6934 = vmatpush1.bf16.msra.mxu0 %v9919_v33  ;;  %7590 = vmatpush1.bf16.msra.mxu1 %v9922_v34  ;;  %v10006_v33 = vld [vmem:[%s11290_s8 + $0xaa8] ss:$16 sps:$4 sm:$0xff]   ;;  %v10011_v34 = vld [vmem:[%s11290_s8 + $0xac4] ss:$16 sps:$4 sm:$0xff]  }
 0x166   : > { %6935 = vmatprep.subr.bf16.mxu0 %v9927_v35  ;;  %7591 = vmatprep.subr.bf16.mxu1 %v9930_v36  ;;  %v10014_v35 = vld [vmem:[%s11290_s8 + $0xacc] ss:$16 sps:$4 sm:$0xff]   ;;  %v10009_v36 = vld [vmem:[%s11290_s8 + $0xac0] ss:$16 sps:$4 sm:$0xff]  }
 0x169   : > { %6936 = vmatpush1.bf16.msra.mxu0 %v9925_v37  ;;  %7592 = vmatpush1.bf16.msra.mxu1 %v9928_v38  ;;  %v10012_v37 = vld [vmem:[%s11290_s8 + $0xac8] ss:$16 sps:$4 sm:$0xff]   ;;  %v309_v38 = vld [vmem:[%s11303_s6 + $0x18] sm:$0xff] }
 0x16a   : > { %6937 = vmatprep.subr.bf16.mxu0 %v9933_v39  ;;  %7593 = vmatprep.subr.bf16.mxu1 %v9936_v40  ;;  %v317_v39 = vld [vmem:[%s11308_s12 + $0x18] sm:$0xff] }
 0x16b   : > { %v10017_v40 = vld [vmem:[%s11290_s8 + $0xae4] ss:$16 sps:$4 sm:$0xff]  }
 0x16d   : > { %6938 = vmatpush1.bf16.msra.mxu0 %v9931_v22  ;;  %7594 = vmatpush1.bf16.msra.mxu1 %v9934_v41  ;;  %v10020_v22 = vld [vmem:[%s11290_s8 + $0xaec] ss:$16 sps:$4 sm:$0xff]   ;;  %v325_v41 = vmul.f32 %v309_v38, %v309_v38  ;;  %v10089_v38 = vld [vmem:[%s11290_s8 + $0xc64] ss:$16 sps:$4 sm:$0xff]  }
 0x16e   : > { %6939 = vmatprep.subr.bf16.mxu0 %v9939_v43  ;;  %7595 = vmatprep.subr.bf16.mxu1 %v9942_v44  ;;  %v333_v43 = vmul.f32 %v317_v39, %v317_v39  ;;  %v10015_v44 = vld [vmem:[%s11290_s8 + $0xae0] ss:$16 sps:$4 sm:$0xff]   ;;  %v10092_v39 = vld [vmem:[%s11290_s8 + $0xc6c] ss:$16 sps:$4 sm:$0xff]  }
 0x171   : > { %6940 = vmatpush1.bf16.msra.mxu0 %v9937_v45  ;;  %7596 = vmatpush1.bf16.msra.mxu1 %v9940_v46  ;;  %v10018_v45 = vld [vmem:[%s11290_s8 + $0xae8] ss:$16 sps:$4 sm:$0xff]   ;;  %v10023_v46 = vld [vmem:[%s11290_s8 + $0xb04] ss:$16 sps:$4 sm:$0xff]  }
 0x172   : > { %6941 = vmatprep.subr.bf16.mxu0 %v9945_v47  ;;  %7597 = vmatprep.subr.bf16.mxu1 %v9948_v48  ;;  %v10026_v47 = vld [vmem:[%s11290_s8 + $0xb0c] ss:$16 sps:$4 sm:$0xff]   ;;  %v341_v48 = vadd.f32 %v333_v43, %v325_v41  ;;  %v10095_v41 = vld [vmem:[%s11290_s8 + $0xc84] ss:$16 sps:$4 sm:$0xff]  }
 0x173   : > { %v10098_v43 = vld [vmem:[%s11290_s8 + $0xc8c] ss:$16 sps:$4 sm:$0xff]  }
 0x174   : > { %11035 = vrsqrt.f32 %v341_v48  ;;  %vm369_vm6 = vcmp.eq.f32.partialorder %v341_v48, inf  ;;  %vm371_vm7 = vcmp.eq.f32.partialorder %v341_v48, 0.0 }
 0x175   : > { %6942 = vmatpush1.bf16.msra.mxu0 %v9943_v49  ;;  %7598 = vmatpush1.bf16.msra.mxu1 %v9946_v50  ;;  %v10021_v49 = vld [vmem:[%s11290_s8 + $0xb00] ss:$16 sps:$4 sm:$0xff]   ;;  %v10024_v50 = vld [vmem:[%s11290_s8 + $0xb08] ss:$16 sps:$4 sm:$0xff]  }
 0x176   : > { %6943 = vmatprep.subr.bf16.mxu0 %v9951_v51  ;;  %7599 = vmatprep.subr.bf16.mxu1 %v9954_v52  ;;  %v10029_v51 = vld [vmem:[%s11290_s8 + $0xb24] ss:$16 sps:$4 sm:$0xff]   ;;  %v10032_v52 = vld [vmem:[%s11290_s8 + $0xb2c] ss:$16 sps:$4 sm:$0xff]  }
 0x179   : > { %6944 = vmatpush1.bf16.msra.mxu0 %v9949_v53  ;;  %7600 = vmatpush1.bf16.msra.mxu1 %v9952_v54  ;;  %v10027_v53 = vld [vmem:[%s11290_s8 + $0xb20] ss:$16 sps:$4 sm:$0xff]   ;;  %v10030_v54 = vld [vmem:[%s11290_s8 + $0xb28] ss:$16 sps:$4 sm:$0xff]  }
 0x17a   : > { %6945 = vmatprep.subr.bf16.mxu0 %v9957_v56  ;;  %7601 = vmatprep.subr.bf16.mxu1 %v9960_v57  ;;  %v10035_v56 = vld [vmem:[%s11290_s8 + $0xb44] ss:$16 sps:$4 sm:$0xff]   ;;  %v10038_v57 = vld [vmem:[%s11290_s8 + $0xb4c] ss:$16 sps:$4 sm:$0xff]  }
 0x17d   : > { %6946 = vmatpush1.bf16.msra.mxu0 %v9955_v58  ;;  %7602 = vmatpush1.bf16.msra.mxu1 %v9958_v60  ;;  %v10033_v58 = vld [vmem:[%s11290_s8 + $0xb40] ss:$16 sps:$4 sm:$0xff]   ;;  %v10036_v60 = vld [vmem:[%s11290_s8 + $0xb48] ss:$16 sps:$4 sm:$0xff]  }
 0x17e   : > { %6947 = vmatprep.subr.bf16.mxu0 %v9963_v61  ;;  %7603 = vmatprep.subr.bf16.mxu1 %v9966_v62  ;;  %v10041_v61 = vld [vmem:[%s11290_s8 + $0xb64] ss:$16 sps:$4 sm:$0xff]   ;;  %v10044_v62 = vld [vmem:[%s11290_s8 + $0xb6c] ss:$16 sps:$4 sm:$0xff]  }
 0x181   : > { %6948 = vmatpush1.bf16.msra.mxu0 %v9961_v0  ;;  %7604 = vmatpush1.bf16.msra.mxu1 %v9964_v1  ;;  %v10042_v0 = vld [vmem:[%s11290_s8 + $0xb68] ss:$16 sps:$4 sm:$0xff]   ;;  %v11036_v1 = vpop.eup %11035 }
 0x182   : > { %6949 = vmatprep.subr.bf16.mxu0 %v9969_v2  ;;  %7605 = vmatprep.subr.bf16.mxu1 %v9972_v3  ;;  %v10047_v2 = vld [vmem:[%s11290_s8 + $0xb84] ss:$16 sps:$4 sm:$0xff]   ;;  %v10050_v3 = vld [vmem:[%s11290_s8 + $0xb8c] ss:$16 sps:$4 sm:$0xff]  }
 0x185   : > { %6950 = vmatpush1.bf16.msra.mxu0 %v9967_v55  ;;  %7606 = vmatpush1.bf16.msra.mxu1 %v9970_v6  ;;  %v10045_v55 = vld [vmem:[%s11290_s8 + $0xb80] ss:$16 sps:$4 sm:$0xff]   ;;  %v10048_v6 = vld [vmem:[%s11290_s8 + $0xb88] ss:$16 sps:$4 sm:$0xff]  }
 0x186   : > { %6960 = vmatprep.subr.bf16.mxu0 %v9975_v7  ;;  %7616 = vmatprep.subr.bf16.mxu1 %v9978_v8  ;;  %v368_v7 = vmul.f32 %v11036_v1, %v341_v48  ;;  %v10053_v8 = vld [vmem:[%s11290_s8 + $0xba4] ss:$16 sps:$4 sm:$0xff]   ;;  %v10128_v1 = vld [vmem:[%s11290_s8 + $0xd2c] ss:$16 sps:$4 sm:$0xff]  }
 0x188   : > { %6952 = vmatmul.mubr.bf16.vlgmr.msra.gmra.mrb[0].mxu0 %v586_v9  ;;  %7608 = vmatmul.mubr.bf16.vlgmr.msra.gmra.mrb[0].mxu1 %v586_v9  ;;  %v372_v9 = vand.u32 2147483648, %v341_v48 }
 0x189   : > { %6961 = vmatpush1.bf16.msra.mxu0 %v9973_v10  ;;  %7617 = vmatpush1.bf16.msra.mxu1 %v9976_v11  ;;  %v10051_v10 = vld [vmem:[%s11290_s8 + $0xba0] ss:$16 sps:$4 sm:$0xff]   ;;  %v10054_v11 = vld [vmem:[%s11290_s8 + $0xba8] ss:$16 sps:$4 sm:$0xff]  }
 0x18a   : > { %6962 = vmatprep.subr.bf16.mxu0 %v9981_v12  ;;  %7618 = vmatprep.subr.bf16.mxu1 %v9984_v14  ;;  %v370_v12 = vsel %vm369_vm6, %v341_v48, %v368_v7  ;;  %v10059_v14 = vld [vmem:[%s11290_s8 + $0xbc4] ss:$16 sps:$4 sm:$0xff]   ;;  %v10099_v48 = vld [vmem:[%s11290_s8 + $0xca0] ss:$16 sps:$4 sm:$0xff]  }
 0x18b   : > { %6992 = vmatprep.mubr.bf16.mxu0 %v589_v15  ;;  %7648 = vmatprep.mubr.bf16.mxu1 %v589_v15  ;;  %v10062_v15 = vld [vmem:[%s11290_s8 + $0xbcc] ss:$16 sps:$4 sm:$0xff]   ;;  %v10129_v7 = vld [vmem:[%s11290_s8 + $0xd40] ss:$16 sps:$4 sm:$0xff]  }
 0x18d   : > { %6963 = vmatpush1.bf16.msra.mxu0 %v9979_v59  ;;  %7619 = vmatpush1.bf16.msra.mxu1 %v9982_v16  ;;  %v11756_v59 = vsel %vm371_vm7, %v372_v9, %v370_v12  ;;  %v10057_v16 = vld [vmem:[%s11290_s8 + $0xbc0] ss:$16 sps:$4 sm:$0xff]   ;;  %v10140_v9 = vld [vmem:[%s11290_s8 + $0xd6c] ss:$16 sps:$4 sm:$0xff]   ;;  %v10143_v12 = vld [vmem:[%s11290_s8 + $0xd84] ss:$16 sps:$4 sm:$0xff]  }
 0x18e   : > { %6964 = vmatprep.subr.bf16.mxu0 %v9987_v17  ;;  %7620 = vmatprep.subr.bf16.mxu1 %v9990_v18  ;;  %v10060_v17 = vld [vmem:[%s11290_s8 + $0xbc8] ss:$16 sps:$4 sm:$0xff]   ;;  %v10065_v18 = vld [vmem:[%s11290_s8 + $0xbe4] ss:$16 sps:$4 sm:$0xff]  }
 0x191   : > { %6965 = vmatpush1.bf16.msra.mxu0 %v9985_v19  ;;  %7621 = vmatpush1.bf16.msra.mxu1 %v9988_v20  ;;  %v10068_v19 = vld [vmem:[%s11290_s8 + $0xbec] ss:$16 sps:$4 sm:$0xff]   ;;  %v11764_v20 = vrot.slane %v11756_v59, %v11389_v13 }
 0x192   : > { %6966 = vmatprep.subr.bf16.mxu0 %v9993_v21  ;;  %7622 = vmatprep.subr.bf16.mxu1 %v9996_v23  ;;  %v10063_v21 = vld [vmem:[%s11290_s8 + $0xbe0] ss:$16 sps:$4 sm:$0xff]   ;;  %v10066_v23 = vld [vmem:[%s11290_s8 + $0xbe8] ss:$16 sps:$4 sm:$0xff]  }
 0x195   : > { %6967 = vmatpush1.bf16.msra.mxu0 %v9991_v24  ;;  %7623 = vmatpush1.bf16.msra.mxu1 %v9994_v25  ;;  %v10071_v24 = vld [vmem:[%s11290_s8 + $0xc04] ss:$16 sps:$4 sm:$0xff]   ;;  %v10074_v25 = vld [vmem:[%s11290_s8 + $0xc0c] ss:$16 sps:$4 sm:$0xff]  }
 0x196   : > { %6968 = vmatprep.subr.bf16.mxu0 %v9999_v26  ;;  %7624 = vmatprep.subr.bf16.mxu1 %v10002_v27  ;;  %v476_v26 = vcombine.high %v11764_v20, %v11764_v20  ;;  %v588_v27 = vpack.c.bf16 %v11688_v4, %v11688_v4  ;;  %v10075_v4 = vld [vmem:[%s11290_s8 + $0xc20] ss:$16 sps:$4 sm:$0xff]  }
 0x199   : > { %6969 = vmatpush1.bf16.msra.mxu0 %v9997_v28  ;;  %7625 = vmatpush1.bf16.msra.mxu1 %v10000_v29  ;;  %v10069_v28 = vld [vmem:[%s11290_s8 + $0xc00] ss:$16 sps:$4 sm:$0xff]   ;;  %v10072_v29 = vld [vmem:[%s11290_s8 + $0xc08] ss:$16 sps:$4 sm:$0xff]  }
 0x19a   : > { %6970 = vmatprep.subr.bf16.mxu0 %v10005_v30  ;;  %7626 = vmatprep.subr.bf16.mxu1 %v10008_v31  ;;  %v10077_v30 = vld [vmem:[%s11290_s8 + $0xc24] ss:$16 sps:$4 sm:$0xff]   ;;  %v10080_v31 = vld [vmem:[%s11290_s8 + $0xc2c] ss:$16 sps:$4 sm:$0xff]  }
 0x19d   : > { %6971 = vmatpush1.bf16.msra.mxu0 %v10003_v32  ;;  %7627 = vmatpush1.bf16.msra.mxu1 %v10006_v33  ;;  %v591_v32 = vpack.c.bf16 %v476_v26, %v476_v26  ;;  %v10078_v33 = vld [vmem:[%s11290_s8 + $0xc28] ss:$16 sps:$4 sm:$0xff]   ;;  %v10153_v26 = vld [vmem:[%s11290_s8 + $0xdc0] ss:$16 sps:$4 sm:$0xff]  }
 0x19e   : > { %6972 = vmatprep.subr.bf16.mxu0 %v10011_v34  ;;  %7628 = vmatprep.subr.bf16.mxu1 %v10014_v35  ;;  %v10083_v34 = vld [vmem:[%s11290_s8 + $0xc44] ss:$16 sps:$4 sm:$0xff]   ;;  %v10086_v35 = vld [vmem:[%s11290_s8 + $0xc4c] ss:$16 sps:$4 sm:$0xff]  }
 0x1a1   : > { %6973 = vmatpush1.bf16.msra.mxu0 %v10009_v36  ;;  %7629 = vmatpush1.bf16.msra.mxu1 %v10012_v37  ;;  %v10081_v36 = vld [vmem:[%s11290_s8 + $0xc40] ss:$16 sps:$4 sm:$0xff]   ;;  %v10084_v37 = vld [vmem:[%s11290_s8 + $0xc48] ss:$16 sps:$4 sm:$0xff]  }
 0x1a2   : > { %6974 = vmatprep.subr.bf16.mxu0 %v10017_v40  ;;  %7630 = vmatprep.subr.bf16.mxu1 %v10020_v22  ;;  %v10087_v40 = vld [vmem:[%s11290_s8 + $0xc60] ss:$16 sps:$4 sm:$0xff]   ;;  %v10090_v22 = vld [vmem:[%s11290_s8 + $0xc68] ss:$16 sps:$4 sm:$0xff]  }
 0x1a5   : > { %6975 = vmatpush1.bf16.msra.mxu0 %v10015_v44  ;;  %7631 = vmatpush1.bf16.msra.mxu1 %v10018_v45  ;;  %v10093_v44 = vld [vmem:[%s11290_s8 + $0xc80] ss:$16 sps:$4 sm:$0xff]   ;;  %v10096_v45 = vld [vmem:[%s11290_s8 + $0xc88] ss:$16 sps:$4 sm:$0xff]  }
 0x1a6   : > { %6976 = vmatprep.subr.bf16.mxu0 %v10023_v46  ;;  %7632 = vmatprep.subr.bf16.mxu1 %v10026_v47  ;;  %v10101_v46 = vld [vmem:[%s11290_s8 + $0xca4] ss:$16 sps:$4 sm:$0xff]   ;;  %v10104_v47 = vld [vmem:[%s11290_s8 + $0xcac] ss:$16 sps:$4 sm:$0xff]  }
 0x1a9   : > { %6977 = vmatpush1.bf16.msra.mxu0 %v10021_v49  ;;  %7633 = vmatpush1.bf16.msra.mxu1 %v10024_v50  ;;  %v10102_v49 = vld [vmem:[%s11290_s8 + $0xca8] ss:$16 sps:$4 sm:$0xff]   ;;  %v10107_v50 = vld [vmem:[%s11290_s8 + $0xcc4] ss:$16 sps:$4 sm:$0xff]  }
 0x1aa   : > { %6978 = vmatprep.subr.bf16.mxu0 %v10029_v51  ;;  %7634 = vmatprep.subr.bf16.mxu1 %v10032_v52  ;;  %v10110_v51 = vld [vmem:[%s11290_s8 + $0xccc] ss:$16 sps:$4 sm:$0xff]   ;;  %v10105_v52 = vld [vmem:[%s11290_s8 + $0xcc0] ss:$16 sps:$4 sm:$0xff]  }
 0x1ad   : > { %6979 = vmatpush1.bf16.msra.mxu0 %v10027_v53  ;;  %7635 = vmatpush1.bf16.msra.mxu1 %v10030_v54  ;;  %v10108_v53 = vld [vmem:[%s11290_s8 + $0xcc8] ss:$16 sps:$4 sm:$0xff]   ;;  %v10113_v54 = vld [vmem:[%s11290_s8 + $0xce4] ss:$16 sps:$4 sm:$0xff]  }
 0x1ae   : > { %6980 = vmatprep.subr.bf16.mxu0 %v10035_v56  ;;  %7636 = vmatprep.subr.bf16.mxu1 %v10038_v57  ;;  %v10116_v56 = vld [vmem:[%s11290_s8 + $0xcec] ss:$16 sps:$4 sm:$0xff]   ;;  %v10111_v57 = vld [vmem:[%s11290_s8 + $0xce0] ss:$16 sps:$4 sm:$0xff]  }
 0x1b1   : > { %6981 = vmatpush1.bf16.msra.mxu0 %v10033_v58  ;;  %7637 = vmatpush1.bf16.msra.mxu1 %v10036_v60  ;;  %v10114_v58 = vld [vmem:[%s11290_s8 + $0xce8] ss:$16 sps:$4 sm:$0xff]   ;;  %v10119_v60 = vld [vmem:[%s11290_s8 + $0xd04] ss:$16 sps:$4 sm:$0xff]  }
 0x1b2   : > { %6982 = vmatprep.subr.bf16.mxu0 %v10041_v61  ;;  %7638 = vmatprep.subr.bf16.mxu1 %v10044_v62  ;;  %v10122_v61 = vld [vmem:[%s11290_s8 + $0xd0c] ss:$16 sps:$4 sm:$0xff]   ;;  %v10117_v62 = vld [vmem:[%s11290_s8 + $0xd00] ss:$16 sps:$4 sm:$0xff]  }
 0x1b5   : > { %6983 = vmatpush1.bf16.msra.mxu0 %v10039_v63  ;;  %7639 = vmatpush1.bf16.msra.mxu1 %v10042_v0  ;;  %v10120_v63 = vld [vmem:[%s11290_s8 + $0xd08] ss:$16 sps:$4 sm:$0xff]   ;;  %v10125_v0 = vld [vmem:[%s11290_s8 + $0xd24] ss:$16 sps:$4 sm:$0xff]  }
 0x1b6   : > { %6984 = vmatprep.subr.bf16.mxu0 %v10047_v2  ;;  %7640 = vmatprep.subr.bf16.mxu1 %v10050_v3  ;;  %v10123_v2 = vld [vmem:[%s11290_s8 + $0xd20] ss:$16 sps:$4 sm:$0xff]   ;;  %v10126_v3 = vld [vmem:[%s11290_s8 + $0xd28] ss:$16 sps:$4 sm:$0xff]  }
 0x1b9   : > { %6985 = vmatpush1.bf16.msra.mxu0 %v10045_v55  ;;  %7641 = vmatpush1.bf16.msra.mxu1 %v10048_v6  ;;  %v10131_v55 = vld [vmem:[%s11290_s8 + $0xd44] ss:$16 sps:$4 sm:$0xff]   ;;  %v10134_v6 = vld [vmem:[%s11290_s8 + $0xd4c] ss:$16 sps:$4 sm:$0xff]  }
 0x1ba   : > { %6986 = vmatprep.subr.bf16.mxu0 %v10053_v8  ;;  %7642 = vmatprep.subr.bf16.mxu1 %v10056_v42  ;;  %v10132_v8 = vld [vmem:[%s11290_s8 + $0xd48] ss:$16 sps:$4 sm:$0xff]   ;;  %v10137_v42 = vld [vmem:[%s11290_s8 + $0xd64] ss:$16 sps:$4 sm:$0xff]  }
 0x1bd   : > { %6987 = vmatpush1.bf16.msra.mxu0 %v10051_v10  ;;  %7643 = vmatpush1.bf16.msra.mxu1 %v10054_v11  ;;  %v10135_v10 = vld [vmem:[%s11290_s8 + $0xd60] ss:$16 sps:$4 sm:$0xff]   ;;  %v10138_v11 = vld [vmem:[%s11290_s8 + $0xd68] ss:$16 sps:$4 sm:$0xff]  }
 0x1be   : > { %6988 = vmatprep.subr.bf16.mxu0 %v10059_v14  ;;  %7644 = vmatprep.subr.bf16.mxu1 %v10062_v15  ;;  %v10146_v14 = vld [vmem:[%s11290_s8 + $0xd8c] ss:$16 sps:$4 sm:$0xff]   ;;  %v10141_v15 = vld [vmem:[%s11290_s8 + $0xd80] ss:$16 sps:$4 sm:$0xff]  }
 0x1c1   : > { %6989 = vmatpush1.bf16.msra.mxu0 %v10057_v16  ;;  %7645 = vmatpush1.bf16.msra.mxu1 %v10060_v17  ;;  %v10144_v16 = vld [vmem:[%s11290_s8 + $0xd88] ss:$16 sps:$4 sm:$0xff]   ;;  %v10149_v17 = vld [vmem:[%s11290_s8 + $0xda4] ss:$16 sps:$4 sm:$0xff]  }
 0x1c2   : > { %6990 = vmatprep.subr.bf16.mxu0 %v10065_v18  ;;  %7646 = vmatprep.subr.bf16.mxu1 %v10068_v19  ;;  %v10152_v18 = vld [vmem:[%s11290_s8 + $0xdac] ss:$16 sps:$4 sm:$0xff]   ;;  %v10147_v19 = vld [vmem:[%s11290_s8 + $0xda0] ss:$16 sps:$4 sm:$0xff]  }
 0x1c5   : > { %6991 = vmatpush1.bf16.msra.mxu0 %v10063_v21  ;;  %7647 = vmatpush1.bf16.msra.mxu1 %v10066_v23  ;;  %v10150_v21 = vld [vmem:[%s11290_s8 + $0xda8] ss:$16 sps:$4 sm:$0xff]   ;;  %v10155_v23 = vld [vmem:[%s11290_s8 + $0xdc4] ss:$16 sps:$4 sm:$0xff]  }
 0x1c6   : > { %7001 = vmatprep.subr.bf16.mxu0 %v10071_v24  ;;  %7657 = vmatprep.subr.bf16.mxu1 %v10074_v25  ;;  %v10158_v24 = vld [vmem:[%s11290_s8 + $0xdcc] ss:$16 sps:$4 sm:$0xff]   ;;  %v461_v25 = vcombine.high %v11756_v59, %v11756_v59  ;;  %v10159_v59 = vld [vmem:[%s11290_s8 + $0xde0] ss:$16 sps:$4 sm:$0xff]  }
 0x1c8   : > { %6993 = vmatmul.mubr.bf16.vlgmr.msra.gmra.mrb[0].mxu0 %v588_v27  ;;  %7649 = vmatmul.mubr.bf16.vlgmr.msra.gmra.mrb[0].mxu1 %v588_v27  ;;  %v10156_v27 = vld [vmem:[%s11290_s8 + $0xdc8] ss:$16 sps:$4 sm:$0xff]  }
 0x1c9   : > { %7002 = vmatpush1.bf16.msra.mxu0 %v10069_v28  ;;  %7658 = vmatpush1.bf16.msra.mxu1 %v10072_v29  ;;  %v10161_v28 = vld [vmem:[%s11290_s8 + $0xde4] ss:$16 sps:$4 sm:$0xff]   ;;  %v10164_v29 = vld [vmem:[%s11290_s8 + $0xdec] ss:$16 sps:$4 sm:$0xff]  }
 0x1ca   : > { %7003 = vmatprep.subr.bf16.mxu0 %v10077_v30  ;;  %7659 = vmatprep.subr.bf16.mxu1 %v10080_v31  ;;  %v11837_v30 = vrot.slane %v461_v25, %v11389_v13  ;;  %v10162_v31 = vld [vmem:[%s11290_s8 + $0xde8] ss:$16 sps:$4 sm:$0xff]   ;;  %v10231_v25 = vld [vmem:[%s11290_s8 + $0xf60] ss:$16 sps:$4 sm:$0xff]  }
 0x1cb   : > { %7033 = vmatprep.mubr.bf16.mxu0 %v591_v32  ;;  %7689 = vmatprep.mubr.bf16.mxu1 %v591_v32  ;;  %v10167_v32 = vld [vmem:[%s11290_s8 + $0xe04] ss:$16 sps:$4 sm:$0xff]  }
 0x1cd   : > { %7004 = vmatpush1.bf16.msra.mxu0 %v10075_v4  ;;  %7660 = vmatpush1.bf16.msra.mxu1 %v10078_v33  ;;  %v10170_v4 = vld [vmem:[%s11290_s8 + $0xe0c] ss:$16 sps:$4 sm:$0xff]   ;;  %v477_v33 = vcombine.high %v11837_v30, %v11837_v30 }
 0x1ce   : > { %7005 = vmatprep.subr.bf16.mxu0 %v10083_v34  ;;  %7661 = vmatprep.subr.bf16.mxu1 %v10086_v35  ;;  %v590_v34 = vpack.c.bf16 %v11764_v20, %v11764_v20  ;;  %v10165_v35 = vld [vmem:[%s11290_s8 + $0xe00] ss:$16 sps:$4 sm:$0xff]  }
 0x1cf   : > { %v10171_v20 = vld [vmem:[%s11290_s8 + $0xe20] ss:$16 sps:$4 sm:$0xff]  }
 0x1d1   : > { %7006 = vmatpush1.bf16.msra.mxu0 %v10081_v36  ;;  %7662 = vmatpush1.bf16.msra.mxu1 %v10084_v37  ;;  %v10168_v36 = vld [vmem:[%s11290_s8 + $0xe08] ss:$16 sps:$4 sm:$0xff]   ;;  %v10173_v37 = vld [vmem:[%s11290_s8 + $0xe24] ss:$16 sps:$4 sm:$0xff]  }
 0x1d2   : > { %7007 = vmatprep.subr.bf16.mxu0 %v10089_v38  ;;  %7663 = vmatprep.subr.bf16.mxu1 %v10092_v39  ;;  %v10176_v38 = vld [vmem:[%s11290_s8 + $0xe2c] ss:$16 sps:$4 sm:$0xff]   ;;  %v593_v39 = vpack.c.bf16 %v477_v33, %v477_v33 }
 0x1d3   : > { %v10248_v33 = vld [vmem:[%s11290_s8 + $0xfac] ss:$16 sps:$4 sm:$0xff]  }
 0x1d5   : > { %7008 = vmatpush1.bf16.msra.mxu0 %v10087_v40  ;;  %7664 = vmatpush1.bf16.msra.mxu1 %v10090_v22  ;;  %v10174_v40 = vld [vmem:[%s11290_s8 + $0xe28] ss:$16 sps:$4 sm:$0xff]   ;;  %v10179_v22 = vld [vmem:[%s11290_s8 + $0xe44] ss:$16 sps:$4 sm:$0xff]  }
 0x1d6   : > { %7009 = vmatprep.subr.bf16.mxu0 %v10095_v41  ;;  %7665 = vmatprep.subr.bf16.mxu1 %v10098_v43  ;;  %v10182_v41 = vld [vmem:[%s11290_s8 + $0xe4c] ss:$16 sps:$4 sm:$0xff]   ;;  %v10177_v43 = vld [vmem:[%s11290_s8 + $0xe40] ss:$16 sps:$4 sm:$0xff]  }
 0x1d9   : > { %7010 = vmatpush1.bf16.msra.mxu0 %v10093_v44  ;;  %7666 = vmatpush1.bf16.msra.mxu1 %v10096_v45  ;;  %v10180_v44 = vld [vmem:[%s11290_s8 + $0xe48] ss:$16 sps:$4 sm:$0xff]   ;;  %v10185_v45 = vld [vmem:[%s11290_s8 + $0xe64] ss:$16 sps:$4 sm:$0xff]  }
 0x1da   : > { %7011 = vmatprep.subr.bf16.mxu0 %v10101_v46  ;;  %7667 = vmatprep.subr.bf16.mxu1 %v10104_v47  ;;  %v10188_v46 = vld [vmem:[%s11290_s8 + $0xe6c] ss:$16 sps:$4 sm:$0xff]   ;;  %v10183_v47 = vld [vmem:[%s11290_s8 + $0xe60] ss:$16 sps:$4 sm:$0xff]  }
 0x1dd   : > { %7012 = vmatpush1.bf16.msra.mxu0 %v10099_v48  ;;  %7668 = vmatpush1.bf16.msra.mxu1 %v10102_v49  ;;  %v10186_v48 = vld [vmem:[%s11290_s8 + $0xe68] ss:$16 sps:$4 sm:$0xff]   ;;  %v10191_v49 = vld [vmem:[%s11290_s8 + $0xe84] ss:$16 sps:$4 sm:$0xff]  }
 0x1de   : > { %7013 = vmatprep.subr.bf16.mxu0 %v10107_v50  ;;  %7669 = vmatprep.subr.bf16.mxu1 %v10110_v51  ;;  %v10194_v50 = vld [vmem:[%s11290_s8 + $0xe8c] ss:$16 sps:$4 sm:$0xff]   ;;  %v10189_v51 = vld [vmem:[%s11290_s8 + $0xe80] ss:$16 sps:$4 sm:$0xff]  }
 0x1e1   : > { %7014 = vmatpush1.bf16.msra.mxu0 %v10105_v52  ;;  %7670 = vmatpush1.bf16.msra.mxu1 %v10108_v53  ;;  %v10192_v52 = vld [vmem:[%s11290_s8 + $0xe88] ss:$16 sps:$4 sm:$0xff]   ;;  %v10197_v53 = vld [vmem:[%s11290_s8 + $0xea4] ss:$16 sps:$4 sm:$0xff]  }
 0x1e2   : > { %7015 = vmatprep.subr.bf16.mxu0 %v10113_v54  ;;  %7671 = vmatprep.subr.bf16.mxu1 %v10116_v56  ;;  %v10200_v54 = vld [vmem:[%s11290_s8 + $0xeac] ss:$16 sps:$4 sm:$0xff]   ;;  %v10195_v56 = vld [vmem:[%s11290_s8 + $0xea0] ss:$16 sps:$4 sm:$0xff]  }
 0x1e5   : > { %7016 = vmatpush1.bf16.msra.mxu0 %v10111_v57  ;;  %7672 = vmatpush1.bf16.msra.mxu1 %v10114_v58  ;;  %v10198_v57 = vld [vmem:[%s11290_s8 + $0xea8] ss:$16 sps:$4 sm:$0xff]   ;;  %v10203_v58 = vld [vmem:[%s11290_s8 + $0xec4] ss:$16 sps:$4 sm:$0xff]  }
 0x1e6   : > { %7017 = vmatprep.subr.bf16.mxu0 %v10119_v60  ;;  %7673 = vmatprep.subr.bf16.mxu1 %v10122_v61  ;;  %v10206_v60 = vld [vmem:[%s11290_s8 + $0xecc] ss:$16 sps:$4 sm:$0xff]   ;;  %v10201_v61 = vld [vmem:[%s11290_s8 + $0xec0] ss:$16 sps:$4 sm:$0xff]  }
 0x1e9   : > { %7018 = vmatpush1.bf16.msra.mxu0 %v10117_v62  ;;  %7674 = vmatpush1.bf16.msra.mxu1 %v10120_v63  ;;  %v10204_v62 = vld [vmem:[%s11290_s8 + $0xec8] ss:$16 sps:$4 sm:$0xff]  }
 0x1ea   : > { %7019 = vmatprep.subr.bf16.mxu0 %v10125_v0  ;;  %7675 = vmatprep.subr.bf16.mxu1 %v10128_v1  ;;  %v310_v63 = vld [vmem:[%s11303_s6 + $0x20] sm:$0xff]  ;;  %v10209_v1 = vld [vmem:[%s11290_s8 + $0xee4] ss:$16 sps:$4 sm:$0xff]  }
 0x1eb   : > { %v318_v0 = vld [vmem:[%s11308_s12 + $0x20] sm:$0xff] }
 0x1ed   : > { %7020 = vmatpush1.bf16.msra.mxu0 %v10123_v2  ;;  %7676 = vmatpush1.bf16.msra.mxu1 %v10126_v3  ;;  %v10212_v2 = vld [vmem:[%s11290_s8 + $0xeec] ss:$16 sps:$4 sm:$0xff]   ;;  %v326_v3 = vmul.f32 %v310_v63, %v310_v63  ;;  %v10281_v63 = vld [vmem:[%s11290_s8 + $0x1064] ss:$16 sps:$4 sm:$0xff]  }
 0x1ee   : > { %7021 = vmatprep.subr.bf16.mxu0 %v10131_v55  ;;  %7677 = vmatprep.subr.bf16.mxu1 %v10134_v6  ;;  %v334_v55 = vmul.f32 %v318_v0, %v318_v0  ;;  %v10207_v6 = vld [vmem:[%s11290_s8 + $0xee0] ss:$16 sps:$4 sm:$0xff]   ;;  %v10284_v0 = vld [vmem:[%s11290_s8 + $0x106c] ss:$16 sps:$4 sm:$0xff]  }
 0x1f1   : > { %7022 = vmatpush1.bf16.msra.mxu0 %v10129_v7  ;;  %7678 = vmatpush1.bf16.msra.mxu1 %v10132_v8  ;;  %v10210_v7 = vld [vmem:[%s11290_s8 + $0xee8] ss:$16 sps:$4 sm:$0xff]   ;;  %v10215_v8 = vld [vmem:[%s11290_s8 + $0xf04] ss:$16 sps:$4 sm:$0xff]  }
 0x1f2   : > { %7023 = vmatprep.subr.bf16.mxu0 %v10137_v42  ;;  %7679 = vmatprep.subr.bf16.mxu1 %v10140_v9  ;;  %v10218_v42 = vld [vmem:[%s11290_s8 + $0xf0c] ss:$16 sps:$4 sm:$0xff]   ;;  %v342_v9 = vadd.f32 %v334_v55, %v326_v3  ;;  %v10287_v3 = vld [vmem:[%s11290_s8 + $0x1084] ss:$16 sps:$4 sm:$0xff]  }
 0x1f3   : > { %v10290_v55 = vld [vmem:[%s11290_s8 + $0x108c] ss:$16 sps:$4 sm:$0xff]  }
 0x1f4   : > { %11037 = vrsqrt.f32 %v342_v9  ;;  %vm376_vm8 = vcmp.eq.f32.partialorder %v342_v9, inf  ;;  %vm378_vm9 = vcmp.eq.f32.partialorder %v342_v9, 0.0 }
 0x1f5   : > { %7024 = vmatpush1.bf16.msra.mxu0 %v10135_v10  ;;  %7680 = vmatpush1.bf16.msra.mxu1 %v10138_v11  ;;  %v10213_v10 = vld [vmem:[%s11290_s8 + $0xf00] ss:$16 sps:$4 sm:$0xff]   ;;  %v10216_v11 = vld [vmem:[%s11290_s8 + $0xf08] ss:$16 sps:$4 sm:$0xff]  }
 0x1f6   : > { %7025 = vmatprep.subr.bf16.mxu0 %v10143_v12  ;;  %7681 = vmatprep.subr.bf16.mxu1 %v10146_v14  ;;  %v10221_v12 = vld [vmem:[%s11290_s8 + $0xf24] ss:$16 sps:$4 sm:$0xff]   ;;  %v10224_v14 = vld [vmem:[%s11290_s8 + $0xf2c] ss:$16 sps:$4 sm:$0xff]  }
 0x1f9   : > { %7026 = vmatpush1.bf16.msra.mxu0 %v10141_v15  ;;  %7682 = vmatpush1.bf16.msra.mxu1 %v10144_v16  ;;  %v10219_v15 = vld [vmem:[%s11290_s8 + $0xf20] ss:$16 sps:$4 sm:$0xff]   ;;  %v10222_v16 = vld [vmem:[%s11290_s8 + $0xf28] ss:$16 sps:$4 sm:$0xff]  }
 0x1fa   : > { %7027 = vmatprep.subr.bf16.mxu0 %v10149_v17  ;;  %7683 = vmatprep.subr.bf16.mxu1 %v10152_v18  ;;  %v10227_v17 = vld [vmem:[%s11290_s8 + $0xf44] ss:$16 sps:$4 sm:$0xff]   ;;  %v10230_v18 = vld [vmem:[%s11290_s8 + $0xf4c] ss:$16 sps:$4 sm:$0xff]  }
 0x1fd   : > { %7028 = vmatpush1.bf16.msra.mxu0 %v10147_v19  ;;  %7684 = vmatpush1.bf16.msra.mxu1 %v10150_v21  ;;  %v10225_v19 = vld [vmem:[%s11290_s8 + $0xf40] ss:$16 sps:$4 sm:$0xff]   ;;  %v10228_v21 = vld [vmem:[%s11290_s8 + $0xf48] ss:$16 sps:$4 sm:$0xff]  }
 0x1fe   : > { %7029 = vmatprep.subr.bf16.mxu0 %v10155_v23  ;;  %7685 = vmatprep.subr.bf16.mxu1 %v10158_v24  ;;  %v10233_v23 = vld [vmem:[%s11290_s8 + $0xf64] ss:$16 sps:$4 sm:$0xff]   ;;  %v10236_v24 = vld [vmem:[%s11290_s8 + $0xf6c] ss:$16 sps:$4 sm:$0xff]  }
 0x201   : > { %7030 = vmatpush1.bf16.msra.mxu0 %v10153_v26  ;;  %7686 = vmatpush1.bf16.msra.mxu1 %v10156_v27  ;;  %v10234_v26 = vld [vmem:[%s11290_s8 + $0xf68] ss:$16 sps:$4 sm:$0xff]   ;;  %v11038_v27 = vpop.eup %11037 }
 0x202   : > { %7031 = vmatprep.subr.bf16.mxu0 %v10161_v28  ;;  %7687 = vmatprep.subr.bf16.mxu1 %v10164_v29  ;;  %v10239_v28 = vld [vmem:[%s11290_s8 + $0xf84] ss:$16 sps:$4 sm:$0xff]   ;;  %v10242_v29 = vld [vmem:[%s11290_s8 + $0xf8c] ss:$16 sps:$4 sm:$0xff]  }
 0x205   : > { %7032 = vmatpush1.bf16.msra.mxu0 %v10159_v59  ;;  %7688 = vmatpush1.bf16.msra.mxu1 %v10162_v31  ;;  %v10237_v59 = vld [vmem:[%s11290_s8 + $0xf80] ss:$16 sps:$4 sm:$0xff]   ;;  %v10240_v31 = vld [vmem:[%s11290_s8 + $0xf88] ss:$16 sps:$4 sm:$0xff]  }
 0x206   : > { %7042 = vmatprep.subr.bf16.mxu0 %v10167_v32  ;;  %7698 = vmatprep.subr.bf16.mxu1 %v10170_v4  ;;  %v375_v32 = vmul.f32 %v11038_v27, %v342_v9  ;;  %v10245_v4 = vld [vmem:[%s11290_s8 + $0xfa4] ss:$16 sps:$4 sm:$0xff]   ;;  %v10320_v27 = vld [vmem:[%s11290_s8 + $0x112c] ss:$16 sps:$4 sm:$0xff]  }
 0x208   : > { %7034 = vmatmul.mubr.bf16.vlgmr.msra.gmra.mrb[0].mxu0 %v590_v34  ;;  %7690 = vmatmul.mubr.bf16.vlgmr.msra.gmra.mrb[0].mxu1 %v590_v34  ;;  %v379_v34 = vand.u32 2147483648, %v342_v9 }
 0x209   : > { %7043 = vmatpush1.bf16.msra.mxu0 %v10165_v35  ;;  %7699 = vmatpush1.bf16.msra.mxu1 %v10168_v36  ;;  %v10243_v35 = vld [vmem:[%s11290_s8 + $0xfa0] ss:$16 sps:$4 sm:$0xff]   ;;  %v10246_v36 = vld [vmem:[%s11290_s8 + $0xfa8] ss:$16 sps:$4 sm:$0xff]  }
 0x20a   : > { %7044 = vmatprep.subr.bf16.mxu0 %v10173_v37  ;;  %7700 = vmatprep.subr.bf16.mxu1 %v10176_v38  ;;  %v377_v37 = vsel %vm376_vm8, %v342_v9, %v375_v32  ;;  %v10251_v38 = vld [vmem:[%s11290_s8 + $0xfc4] ss:$16 sps:$4 sm:$0xff]   ;;  %v10291_v9 = vld [vmem:[%s11290_s8 + $0x10a0] ss:$16 sps:$4 sm:$0xff]  }
 0x20b   : > { %7074 = vmatprep.mubr.bf16.mxu0 %v593_v39  ;;  %7730 = vmatprep.mubr.bf16.mxu1 %v593_v39  ;;  %v10254_v39 = vld [vmem:[%s11290_s8 + $0xfcc] ss:$16 sps:$4 sm:$0xff]   ;;  %v10321_v32 = vld [vmem:[%s11290_s8 + $0x1140] ss:$16 sps:$4 sm:$0xff]  }
 0x20d   : > { %7045 = vmatpush1.bf16.msra.mxu0 %v10171_v20  ;;  %7701 = vmatpush1.bf16.msra.mxu1 %v10174_v40  ;;  %v11905_v20 = vsel %vm378_vm9, %v379_v34, %v377_v37  ;;  %v10249_v40 = vld [vmem:[%s11290_s8 + $0xfc0] ss:$16 sps:$4 sm:$0xff]   ;;  %v10332_v34 = vld [vmem:[%s11290_s8 + $0x116c] ss:$16 sps:$4 sm:$0xff]   ;;  %v10335_v37 = vld [vmem:[%s11290_s8 + $0x1184] ss:$16 sps:$4 sm:$0xff]  }
 0x20e   : > { %7046 = vmatprep.subr.bf16.mxu0 %v10179_v22  ;;  %7702 = vmatprep.subr.bf16.mxu1 %v10182_v41  ;;  %v10252_v22 = vld [vmem:[%s11290_s8 + $0xfc8] ss:$16 sps:$4 sm:$0xff]   ;;  %v10257_v41 = vld [vmem:[%s11290_s8 + $0xfe4] ss:$16 sps:$4 sm:$0xff]  }
 0x211   : > { %7047 = vmatpush1.bf16.msra.mxu0 %v10177_v43  ;;  %7703 = vmatpush1.bf16.msra.mxu1 %v10180_v44  ;;  %v10260_v43 = vld [vmem:[%s11290_s8 + $0xfec] ss:$16 sps:$4 sm:$0xff]   ;;  %v11913_v44 = vrot.slane %v11905_v20, %v11389_v13 }
 0x212   : > { %7048 = vmatprep.subr.bf16.mxu0 %v10185_v45  ;;  %7704 = vmatprep.subr.bf16.mxu1 %v10188_v46  ;;  %v10255_v45 = vld [vmem:[%s11290_s8 + $0xfe0] ss:$16 sps:$4 sm:$0xff]   ;;  %v10258_v46 = vld [vmem:[%s11290_s8 + $0xfe8] ss:$16 sps:$4 sm:$0xff]  }
 0x215   : > { %7049 = vmatpush1.bf16.msra.mxu0 %v10183_v47  ;;  %7705 = vmatpush1.bf16.msra.mxu1 %v10186_v48  ;;  %v10263_v47 = vld [vmem:[%s11290_s8 + $0x1004] ss:$16 sps:$4 sm:$0xff]   ;;  %v10266_v48 = vld [vmem:[%s11290_s8 + $0x100c] ss:$16 sps:$4 sm:$0xff]  }
 0x216   : > { %7050 = vmatprep.subr.bf16.mxu0 %v10191_v49  ;;  %7706 = vmatprep.subr.bf16.mxu1 %v10194_v50  ;;  %v493_v49 = vcombine.high %v11913_v44, %v11913_v44  ;;  %v592_v50 = vpack.c.bf16 %v11837_v30, %v11837_v30  ;;  %v10267_v30 = vld [vmem:[%s11290_s8 + $0x1020] ss:$16 sps:$4 sm:$0xff]  }
 0x219   : > { %7051 = vmatpush1.bf16.msra.mxu0 %v10189_v51  ;;  %7707 = vmatpush1.bf16.msra.mxu1 %v10192_v52  ;;  %v10261_v51 = vld [vmem:[%s11290_s8 + $0x1000] ss:$16 sps:$4 sm:$0xff]   ;;  %v10264_v52 = vld [vmem:[%s11290_s8 + $0x1008] ss:$16 sps:$4 sm:$0xff]  }
 0x21a   : > { %7052 = vmatprep.subr.bf16.mxu0 %v10197_v53  ;;  %7708 = vmatprep.subr.bf16.mxu1 %v10200_v54  ;;  %v10269_v53 = vld [vmem:[%s11290_s8 + $0x1024] ss:$16 sps:$4 sm:$0xff]   ;;  %v10272_v54 = vld [vmem:[%s11290_s8 + $0x102c] ss:$16 sps:$4 sm:$0xff]  }
 0x21d   : > { %7053 = vmatpush1.bf16.msra.mxu0 %v10195_v56  ;;  %7709 = vmatpush1.bf16.msra.mxu1 %v10198_v57  ;;  %v595_v56 = vpack.c.bf16 %v493_v49, %v493_v49  ;;  %v10270_v57 = vld [vmem:[%s11290_s8 + $0x1028] ss:$16 sps:$4 sm:$0xff]   ;;  %v10345_v49 = vld [vmem:[%s11290_s8 + $0x11c0] ss:$16 sps:$4 sm:$0xff]  }
 0x21e   : > { %7054 = vmatprep.subr.bf16.mxu0 %v10203_v58  ;;  %7710 = vmatprep.subr.bf16.mxu1 %v10206_v60  ;;  %v10275_v58 = vld [vmem:[%s11290_s8 + $0x1044] ss:$16 sps:$4 sm:$0xff]   ;;  %v10278_v60 = vld [vmem:[%s11290_s8 + $0x104c] ss:$16 sps:$4 sm:$0xff]  }
 0x221   : > { %7055 = vmatpush1.bf16.msra.mxu0 %v10201_v61  ;;  %7711 = vmatpush1.bf16.msra.mxu1 %v10204_v62  ;;  %v10273_v61 = vld [vmem:[%s11290_s8 + $0x1040] ss:$16 sps:$4 sm:$0xff]   ;;  %v10276_v62 = vld [vmem:[%s11290_s8 + $0x1048] ss:$16 sps:$4 sm:$0xff]  }
 0x222   : > { %7056 = vmatprep.subr.bf16.mxu0 %v10209_v1  ;;  %7712 = vmatprep.subr.bf16.mxu1 %v10212_v2  ;;  %v10279_v1 = vld [vmem:[%s11290_s8 + $0x1060] ss:$16 sps:$4 sm:$0xff]   ;;  %v10282_v2 = vld [vmem:[%s11290_s8 + $0x1068] ss:$16 sps:$4 sm:$0xff]  }
 0x225   : > { %7057 = vmatpush1.bf16.msra.mxu0 %v10207_v6  ;;  %7713 = vmatpush1.bf16.msra.mxu1 %v10210_v7  ;;  %v10285_v6 = vld [vmem:[%s11290_s8 + $0x1080] ss:$16 sps:$4 sm:$0xff]   ;;  %v10288_v7 = vld [vmem:[%s11290_s8 + $0x1088] ss:$16 sps:$4 sm:$0xff]  }
 0x226   : > { %7058 = vmatprep.subr.bf16.mxu0 %v10215_v8  ;;  %7714 = vmatprep.subr.bf16.mxu1 %v10218_v42  ;;  %v10293_v8 = vld [vmem:[%s11290_s8 + $0x10a4] ss:$16 sps:$4 sm:$0xff]   ;;  %v10296_v42 = vld [vmem:[%s11290_s8 + $0x10ac] ss:$16 sps:$4 sm:$0xff]  }
 0x229   : > { %7059 = vmatpush1.bf16.msra.mxu0 %v10213_v10  ;;  %7715 = vmatpush1.bf16.msra.mxu1 %v10216_v11  ;;  %v10294_v10 = vld [vmem:[%s11290_s8 + $0x10a8] ss:$16 sps:$4 sm:$0xff]   ;;  %v10299_v11 = vld [vmem:[%s11290_s8 + $0x10c4] ss:$16 sps:$4 sm:$0xff]  }
 0x22a   : > { %7060 = vmatprep.subr.bf16.mxu0 %v10221_v12  ;;  %7716 = vmatprep.subr.bf16.mxu1 %v10224_v14  ;;  %v10302_v12 = vld [vmem:[%s11290_s8 + $0x10cc] ss:$16 sps:$4 sm:$0xff]   ;;  %v10297_v14 = vld [vmem:[%s11290_s8 + $0x10c0] ss:$16 sps:$4 sm:$0xff]  }
 0x22d   : > { %7061 = vmatpush1.bf16.msra.mxu0 %v10219_v15  ;;  %7717 = vmatpush1.bf16.msra.mxu1 %v10222_v16  ;;  %v10300_v15 = vld [vmem:[%s11290_s8 + $0x10c8] ss:$16 sps:$4 sm:$0xff]   ;;  %v10305_v16 = vld [vmem:[%s11290_s8 + $0x10e4] ss:$16 sps:$4 sm:$0xff]  }
 0x22e   : > { %7062 = vmatprep.subr.bf16.mxu0 %v10227_v17  ;;  %7718 = vmatprep.subr.bf16.mxu1 %v10230_v18  ;;  %v10308_v17 = vld [vmem:[%s11290_s8 + $0x10ec] ss:$16 sps:$4 sm:$0xff]   ;;  %v10303_v18 = vld [vmem:[%s11290_s8 + $0x10e0] ss:$16 sps:$4 sm:$0xff]  }
 0x231   : > { %7063 = vmatpush1.bf16.msra.mxu0 %v10225_v19  ;;  %7719 = vmatpush1.bf16.msra.mxu1 %v10228_v21  ;;  %v10306_v19 = vld [vmem:[%s11290_s8 + $0x10e8] ss:$16 sps:$4 sm:$0xff]   ;;  %v10311_v21 = vld [vmem:[%s11290_s8 + $0x1104] ss:$16 sps:$4 sm:$0xff]  }
 0x232   : > { %7064 = vmatprep.subr.bf16.mxu0 %v10233_v23  ;;  %7720 = vmatprep.subr.bf16.mxu1 %v10236_v24  ;;  %v10314_v23 = vld [vmem:[%s11290_s8 + $0x110c] ss:$16 sps:$4 sm:$0xff]   ;;  %v10309_v24 = vld [vmem:[%s11290_s8 + $0x1100] ss:$16 sps:$4 sm:$0xff]  }
 0x235   : > { %7065 = vmatpush1.bf16.msra.mxu0 %v10231_v25  ;;  %7721 = vmatpush1.bf16.msra.mxu1 %v10234_v26  ;;  %v10312_v25 = vld [vmem:[%s11290_s8 + $0x1108] ss:$16 sps:$4 sm:$0xff]   ;;  %v10317_v26 = vld [vmem:[%s11290_s8 + $0x1124] ss:$16 sps:$4 sm:$0xff]  }
 0x236   : > { %7066 = vmatprep.subr.bf16.mxu0 %v10239_v28  ;;  %7722 = vmatprep.subr.bf16.mxu1 %v10242_v29  ;;  %v10315_v28 = vld [vmem:[%s11290_s8 + $0x1120] ss:$16 sps:$4 sm:$0xff]   ;;  %v10318_v29 = vld [vmem:[%s11290_s8 + $0x1128] ss:$16 sps:$4 sm:$0xff]  }
 0x239   : > { %7067 = vmatpush1.bf16.msra.mxu0 %v10237_v59  ;;  %7723 = vmatpush1.bf16.msra.mxu1 %v10240_v31  ;;  %v10323_v59 = vld [vmem:[%s11290_s8 + $0x1144] ss:$16 sps:$4 sm:$0xff]   ;;  %v10326_v31 = vld [vmem:[%s11290_s8 + $0x114c] ss:$16 sps:$4 sm:$0xff]  }
 0x23a   : > { %7068 = vmatprep.subr.bf16.mxu0 %v10245_v4  ;;  %7724 = vmatprep.subr.bf16.mxu1 %v10248_v33  ;;  %v10324_v4 = vld [vmem:[%s11290_s8 + $0x1148] ss:$16 sps:$4 sm:$0xff]   ;;  %v10329_v33 = vld [vmem:[%s11290_s8 + $0x1164] ss:$16 sps:$4 sm:$0xff]  }
 0x23d   : > { %7069 = vmatpush1.bf16.msra.mxu0 %v10243_v35  ;;  %7725 = vmatpush1.bf16.msra.mxu1 %v10246_v36  ;;  %v10327_v35 = vld [vmem:[%s11290_s8 + $0x1160] ss:$16 sps:$4 sm:$0xff]   ;;  %v10330_v36 = vld [vmem:[%s11290_s8 + $0x1168] ss:$16 sps:$4 sm:$0xff]  }
 0x23e   : > { %7070 = vmatprep.subr.bf16.mxu0 %v10251_v38  ;;  %7726 = vmatprep.subr.bf16.mxu1 %v10254_v39  ;;  %v10338_v38 = vld [vmem:[%s11290_s8 + $0x118c] ss:$16 sps:$4 sm:$0xff]   ;;  %v10333_v39 = vld [vmem:[%s11290_s8 + $0x1180] ss:$16 sps:$4 sm:$0xff]  }
 0x241   : > { %7071 = vmatpush1.bf16.msra.mxu0 %v10249_v40  ;;  %7727 = vmatpush1.bf16.msra.mxu1 %v10252_v22  ;;  %v10336_v40 = vld [vmem:[%s11290_s8 + $0x1188] ss:$16 sps:$4 sm:$0xff]   ;;  %v10341_v22 = vld [vmem:[%s11290_s8 + $0x11a4] ss:$16 sps:$4 sm:$0xff]  }
 0x242   : > { %7072 = vmatprep.subr.bf16.mxu0 %v10257_v41  ;;  %7728 = vmatprep.subr.bf16.mxu1 %v10260_v43  ;;  %v10344_v41 = vld [vmem:[%s11290_s8 + $0x11ac] ss:$16 sps:$4 sm:$0xff]   ;;  %v10339_v43 = vld [vmem:[%s11290_s8 + $0x11a0] ss:$16 sps:$4 sm:$0xff]  }
 0x245   : > { %7073 = vmatpush1.bf16.msra.mxu0 %v10255_v45  ;;  %7729 = vmatpush1.bf16.msra.mxu1 %v10258_v46  ;;  %v10342_v45 = vld [vmem:[%s11290_s8 + $0x11a8] ss:$16 sps:$4 sm:$0xff]   ;;  %v10347_v46 = vld [vmem:[%s11290_s8 + $0x11c4] ss:$16 sps:$4 sm:$0xff]  }
 0x246   : > { %7083 = vmatprep.subr.bf16.mxu0 %v10263_v47  ;;  %7739 = vmatprep.subr.bf16.mxu1 %v10266_v48  ;;  %v10350_v47 = vld [vmem:[%s11290_s8 + $0x11cc] ss:$16 sps:$4 sm:$0xff]   ;;  %v478_v48 = vcombine.high %v11905_v20, %v11905_v20  ;;  %v10351_v20 = vld [vmem:[%s11290_s8 + $0x11e0] ss:$16 sps:$4 sm:$0xff]  }
 0x248   : > { %7075 = vmatmul.mubr.bf16.vlgmr.msra.gmra.mrb[0].mxu0 %v592_v50  ;;  %7731 = vmatmul.mubr.bf16.vlgmr.msra.gmra.mrb[0].mxu1 %v592_v50  ;;  %v10348_v50 = vld [vmem:[%s11290_s8 + $0x11c8] ss:$16 sps:$4 sm:$0xff]  }
 0x249   : > { %7084 = vmatpush1.bf16.msra.mxu0 %v10261_v51  ;;  %7740 = vmatpush1.bf16.msra.mxu1 %v10264_v52  ;;  %v10353_v51 = vld [vmem:[%s11290_s8 + $0x11e4] ss:$16 sps:$4 sm:$0xff]   ;;  %v10356_v52 = vld [vmem:[%s11290_s8 + $0x11ec] ss:$16 sps:$4 sm:$0xff]  }
 0x24a   : > { %7085 = vmatprep.subr.bf16.mxu0 %v10269_v53  ;;  %7741 = vmatprep.subr.bf16.mxu1 %v10272_v54  ;;  %v11986_v53 = vrot.slane %v478_v48, %v11389_v13  ;;  %v10354_v54 = vld [vmem:[%s11290_s8 + $0x11e8] ss:$16 sps:$4 sm:$0xff]   ;;  %v10423_v48 = vld [vmem:[%s11290_s8 + $0x1360] ss:$16 sps:$4 sm:$0xff]  }
 0x24b   : > { %7115 = vmatprep.mubr.bf16.mxu0 %v595_v56  ;;  %7771 = vmatprep.mubr.bf16.mxu1 %v595_v56  ;;  %v10359_v56 = vld [vmem:[%s11290_s8 + $0x1204] ss:$16 sps:$4 sm:$0xff]  }
 0x24d   : > { %7086 = vmatpush1.bf16.msra.mxu0 %v10267_v30  ;;  %7742 = vmatpush1.bf16.msra.mxu1 %v10270_v57  ;;  %v10362_v30 = vld [vmem:[%s11290_s8 + $0x120c] ss:$16 sps:$4 sm:$0xff]   ;;  %v494_v57 = vcombine.high %v11986_v53, %v11986_v53 }
 0x24e   : > { %7087 = vmatprep.subr.bf16.mxu0 %v10275_v58  ;;  %7743 = vmatprep.subr.bf16.mxu1 %v10278_v60  ;;  %v594_v58 = vpack.c.bf16 %v11913_v44, %v11913_v44  ;;  %v10357_v60 = vld [vmem:[%s11290_s8 + $0x1200] ss:$16 sps:$4 sm:$0xff]  }
 0x24f   : > { %v10363_v44 = vld [vmem:[%s11290_s8 + $0x1220] ss:$16 sps:$4 sm:$0xff]  }
 0x251   : > { %7088 = vmatpush1.bf16.msra.mxu0 %v10273_v61  ;;  %7744 = vmatpush1.bf16.msra.mxu1 %v10276_v62  ;;  %v10360_v61 = vld [vmem:[%s11290_s8 + $0x1208] ss:$16 sps:$4 sm:$0xff]   ;;  %v10365_v62 = vld [vmem:[%s11290_s8 + $0x1224] ss:$16 sps:$4 sm:$0xff]  }
 0x252   : > { %7089 = vmatprep.subr.bf16.mxu0 %v10281_v63  ;;  %7745 = vmatprep.subr.bf16.mxu1 %v10284_v0  ;;  %v10368_v63 = vld [vmem:[%s11290_s8 + $0x122c] ss:$16 sps:$4 sm:$0xff]   ;;  %v597_v0 = vpack.c.bf16 %v494_v57, %v494_v57 }
 0x253   : > { %v10440_v57 = vld [vmem:[%s11290_s8 + $0x13ac] ss:$16 sps:$4 sm:$0xff]  }
 0x255   : > { %7090 = vmatpush1.bf16.msra.mxu0 %v10279_v1  ;;  %7746 = vmatpush1.bf16.msra.mxu1 %v10282_v2  ;;  %v10366_v1 = vld [vmem:[%s11290_s8 + $0x1228] ss:$16 sps:$4 sm:$0xff]   ;;  %v10371_v2 = vld [vmem:[%s11290_s8 + $0x1244] ss:$16 sps:$4 sm:$0xff]  }
 0x256   : > { %7091 = vmatprep.subr.bf16.mxu0 %v10287_v3  ;;  %7747 = vmatprep.subr.bf16.mxu1 %v10290_v55  ;;  %v10374_v3 = vld [vmem:[%s11290_s8 + $0x124c] ss:$16 sps:$4 sm:$0xff]   ;;  %v10369_v55 = vld [vmem:[%s11290_s8 + $0x1240] ss:$16 sps:$4 sm:$0xff]  }
 0x259   : > { %7092 = vmatpush1.bf16.msra.mxu0 %v10285_v6  ;;  %7748 = vmatpush1.bf16.msra.mxu1 %v10288_v7  ;;  %v10372_v6 = vld [vmem:[%s11290_s8 + $0x1248] ss:$16 sps:$4 sm:$0xff]   ;;  %v10377_v7 = vld [vmem:[%s11290_s8 + $0x1264] ss:$16 sps:$4 sm:$0xff]  }
 0x25a   : > { %7093 = vmatprep.subr.bf16.mxu0 %v10293_v8  ;;  %7749 = vmatprep.subr.bf16.mxu1 %v10296_v42  ;;  %v10380_v8 = vld [vmem:[%s11290_s8 + $0x126c] ss:$16 sps:$4 sm:$0xff]   ;;  %v10375_v42 = vld [vmem:[%s11290_s8 + $0x1260] ss:$16 sps:$4 sm:$0xff]  }
 0x25d   : > { %7094 = vmatpush1.bf16.msra.mxu0 %v10291_v9  ;;  %7750 = vmatpush1.bf16.msra.mxu1 %v10294_v10  ;;  %v10378_v9 = vld [vmem:[%s11290_s8 + $0x1268] ss:$16 sps:$4 sm:$0xff]   ;;  %v10383_v10 = vld [vmem:[%s11290_s8 + $0x1284] ss:$16 sps:$4 sm:$0xff]  }
 0x25e   : > { %7095 = vmatprep.subr.bf16.mxu0 %v10299_v11  ;;  %7751 = vmatprep.subr.bf16.mxu1 %v10302_v12  ;;  %v10386_v11 = vld [vmem:[%s11290_s8 + $0x128c] ss:$16 sps:$4 sm:$0xff]   ;;  %v10381_v12 = vld [vmem:[%s11290_s8 + $0x1280] ss:$16 sps:$4 sm:$0xff]  }
 0x261   : > { %7096 = vmatpush1.bf16.msra.mxu0 %v10297_v14  ;;  %7752 = vmatpush1.bf16.msra.mxu1 %v10300_v15  ;;  %v10384_v14 = vld [vmem:[%s11290_s8 + $0x1288] ss:$16 sps:$4 sm:$0xff]   ;;  %v10389_v15 = vld [vmem:[%s11290_s8 + $0x12a4] ss:$16 sps:$4 sm:$0xff]  }
 0x262   : > { %7097 = vmatprep.subr.bf16.mxu0 %v10305_v16  ;;  %7753 = vmatprep.subr.bf16.mxu1 %v10308_v17  ;;  %v10392_v16 = vld [vmem:[%s11290_s8 + $0x12ac] ss:$16 sps:$4 sm:$0xff]   ;;  %v10387_v17 = vld [vmem:[%s11290_s8 + $0x12a0] ss:$16 sps:$4 sm:$0xff]  }
 0x265   : > { %7098 = vmatpush1.bf16.msra.mxu0 %v10303_v18  ;;  %7754 = vmatpush1.bf16.msra.mxu1 %v10306_v19  ;;  %v10390_v18 = vld [vmem:[%s11290_s8 + $0x12a8] ss:$16 sps:$4 sm:$0xff]   ;;  %v10395_v19 = vld [vmem:[%s11290_s8 + $0x12c4] ss:$16 sps:$4 sm:$0xff]  }
 0x266   : > { %7099 = vmatprep.subr.bf16.mxu0 %v10311_v21  ;;  %7755 = vmatprep.subr.bf16.mxu1 %v10314_v23  ;;  %v10398_v21 = vld [vmem:[%s11290_s8 + $0x12cc] ss:$16 sps:$4 sm:$0xff]   ;;  %v10393_v23 = vld [vmem:[%s11290_s8 + $0x12c0] ss:$16 sps:$4 sm:$0xff]  }
 0x269   : > { %7100 = vmatpush1.bf16.msra.mxu0 %v10309_v24  ;;  %7756 = vmatpush1.bf16.msra.mxu1 %v10312_v25  ;;  %v10396_v24 = vld [vmem:[%s11290_s8 + $0x12c8] ss:$16 sps:$4 sm:$0xff]   ;;  %v311_v25 = vld [vmem:[%s11303_s6 + $0x28] sm:$0xff] }
 0x26a   : > { %7101 = vmatprep.subr.bf16.mxu0 %v10317_v26  ;;  %7757 = vmatprep.subr.bf16.mxu1 %v10320_v27  ;;  %v319_v26 = vld [vmem:[%s11308_s12 + $0x28] sm:$0xff] }
 0x26b   : > { %v10401_v27 = vld [vmem:[%s11290_s8 + $0x12e4] ss:$16 sps:$4 sm:$0xff]  }
 0x26d   : > { %7102 = vmatpush1.bf16.msra.mxu0 %v10315_v28  ;;  %7758 = vmatpush1.bf16.msra.mxu1 %v10318_v29  ;;  %v10404_v28 = vld [vmem:[%s11290_s8 + $0x12ec] ss:$16 sps:$4 sm:$0xff]   ;;  %v327_v29 = vmul.f32 %v311_v25, %v311_v25  ;;  %v10473_v25 = vld [vmem:[%s11290_s8 + $0x1464] ss:$16 sps:$4 sm:$0xff]  }
 0x26e   : > { %7103 = vmatprep.subr.bf16.mxu0 %v10323_v59  ;;  %7759 = vmatprep.subr.bf16.mxu1 %v10326_v31  ;;  %v335_v59 = vmul.f32 %v319_v26, %v319_v26  ;;  %v10399_v31 = vld [vmem:[%s11290_s8 + $0x12e0] ss:$16 sps:$4 sm:$0xff]   ;;  %v10476_v26 = vld [vmem:[%s11290_s8 + $0x146c] ss:$16 sps:$4 sm:$0xff]  }
 0x271   : > { %7104 = vmatpush1.bf16.msra.mxu0 %v10321_v32  ;;  %7760 = vmatpush1.bf16.msra.mxu1 %v10324_v4  ;;  %v10402_v32 = vld [vmem:[%s11290_s8 + $0x12e8] ss:$16 sps:$4 sm:$0xff]   ;;  %v10407_v4 = vld [vmem:[%s11290_s8 + $0x1304] ss:$16 sps:$4 sm:$0xff]  }
 0x272   : > { %7105 = vmatprep.subr.bf16.mxu0 %v10329_v33  ;;  %7761 = vmatprep.subr.bf16.mxu1 %v10332_v34  ;;  %v10410_v33 = vld [vmem:[%s11290_s8 + $0x130c] ss:$16 sps:$4 sm:$0xff]   ;;  %v343_v34 = vadd.f32 %v335_v59, %v327_v29  ;;  %v10479_v29 = vld [vmem:[%s11290_s8 + $0x1484] ss:$16 sps:$4 sm:$0xff]  }
 0x273   : > { %v10482_v59 = vld [vmem:[%s11290_s8 + $0x148c] ss:$16 sps:$4 sm:$0xff]  }
 0x274   : > { %11039 = vrsqrt.f32 %v343_v34  ;;  %vm383_vm10 = vcmp.eq.f32.partialorder %v343_v34, inf  ;;  %vm385_vm11 = vcmp.eq.f32.partialorder %v343_v34, 0.0 }
 0x275   : > { %7106 = vmatpush1.bf16.msra.mxu0 %v10327_v35  ;;  %7762 = vmatpush1.bf16.msra.mxu1 %v10330_v36  ;;  %v10405_v35 = vld [vmem:[%s11290_s8 + $0x1300] ss:$16 sps:$4 sm:$0xff]   ;;  %v10408_v36 = vld [vmem:[%s11290_s8 + $0x1308] ss:$16 sps:$4 sm:$0xff]  }
 0x276   : > { %7107 = vmatprep.subr.bf16.mxu0 %v10335_v37  ;;  %7763 = vmatprep.subr.bf16.mxu1 %v10338_v38  ;;  %v10413_v37 = vld [vmem:[%s11290_s8 + $0x1324] ss:$16 sps:$4 sm:$0xff]   ;;  %v10416_v38 = vld [vmem:[%s11290_s8 + $0x132c] ss:$16 sps:$4 sm:$0xff]  }
 0x279   : > { %7108 = vmatpush1.bf16.msra.mxu0 %v10333_v39  ;;  %7764 = vmatpush1.bf16.msra.mxu1 %v10336_v40  ;;  %v10411_v39 = vld [vmem:[%s11290_s8 + $0x1320] ss:$16 sps:$4 sm:$0xff]   ;;  %v10414_v40 = vld [vmem:[%s11290_s8 + $0x1328] ss:$16 sps:$4 sm:$0xff]  }
 0x27a   : > { %7109 = vmatprep.subr.bf16.mxu0 %v10341_v22  ;;  %7765 = vmatprep.subr.bf16.mxu1 %v10344_v41  ;;  %v10419_v22 = vld [vmem:[%s11290_s8 + $0x1344] ss:$16 sps:$4 sm:$0xff]   ;;  %v10422_v41 = vld [vmem:[%s11290_s8 + $0x134c] ss:$16 sps:$4 sm:$0xff]  }
 0x27d   : > { %7110 = vmatpush1.bf16.msra.mxu0 %v10339_v43  ;;  %7766 = vmatpush1.bf16.msra.mxu1 %v10342_v45  ;;  %v10417_v43 = vld [vmem:[%s11290_s8 + $0x1340] ss:$16 sps:$4 sm:$0xff]   ;;  %v10420_v45 = vld [vmem:[%s11290_s8 + $0x1348] ss:$16 sps:$4 sm:$0xff]  }
 0x27e   : > { %7111 = vmatprep.subr.bf16.mxu0 %v10347_v46  ;;  %7767 = vmatprep.subr.bf16.mxu1 %v10350_v47  ;;  %v10425_v46 = vld [vmem:[%s11290_s8 + $0x1364] ss:$16 sps:$4 sm:$0xff]   ;;  %v10428_v47 = vld [vmem:[%s11290_s8 + $0x136c] ss:$16 sps:$4 sm:$0xff]  }
 0x281   : > { %7112 = vmatpush1.bf16.msra.mxu0 %v10345_v49  ;;  %7768 = vmatpush1.bf16.msra.mxu1 %v10348_v50  ;;  %v10426_v49 = vld [vmem:[%s11290_s8 + $0x1368] ss:$16 sps:$4 sm:$0xff]   ;;  %v11040_v50 = vpop.eup %11039 }
 0x282   : > { %7113 = vmatprep.subr.bf16.mxu0 %v10353_v51  ;;  %7769 = vmatprep.subr.bf16.mxu1 %v10356_v52  ;;  %v10431_v51 = vld [vmem:[%s11290_s8 + $0x1384] ss:$16 sps:$4 sm:$0xff]   ;;  %v10434_v52 = vld [vmem:[%s11290_s8 + $0x138c] ss:$16 sps:$4 sm:$0xff]  }
 0x285   : > { %7114 = vmatpush1.bf16.msra.mxu0 %v10351_v20  ;;  %7770 = vmatpush1.bf16.msra.mxu1 %v10354_v54  ;;  %v10429_v20 = vld [vmem:[%s11290_s8 + $0x1380] ss:$16 sps:$4 sm:$0xff]   ;;  %v10432_v54 = vld [vmem:[%s11290_s8 + $0x1388] ss:$16 sps:$4 sm:$0xff]  }
 0x286   : > { %7124 = vmatprep.subr.bf16.mxu0 %v10359_v56  ;;  %7780 = vmatprep.subr.bf16.mxu1 %v10362_v30  ;;  %v382_v56 = vmul.f32 %v11040_v50, %v343_v34  ;;  %v10437_v30 = vld [vmem:[%s11290_s8 + $0x13a4] ss:$16 sps:$4 sm:$0xff]   ;;  %v10512_v50 = vld [vmem:[%s11290_s8 + $0x152c] ss:$16 sps:$4 sm:$0xff]  }
 0x288   : > { %7116 = vmatmul.mubr.bf16.vlgmr.msra.gmra.mrb[0].mxu0 %v594_v58  ;;  %7772 = vmatmul.mubr.bf16.vlgmr.msra.gmra.mrb[0].mxu1 %v594_v58  ;;  %v386_v58 = vand.u32 2147483648, %v343_v34 }
 0x289   : > { %7125 = vmatpush1.bf16.msra.mxu0 %v10357_v60  ;;  %7781 = vmatpush1.bf16.msra.mxu1 %v10360_v61  ;;  %v10435_v60 = vld [vmem:[%s11290_s8 + $0x13a0] ss:$16 sps:$4 sm:$0xff]   ;;  %v10438_v61 = vld [vmem:[%s11290_s8 + $0x13a8] ss:$16 sps:$4 sm:$0xff]  }
 0x28a   : > { %7126 = vmatprep.subr.bf16.mxu0 %v10365_v62  ;;  %7782 = vmatprep.subr.bf16.mxu1 %v10368_v63  ;;  %v384_v62 = vsel %vm383_vm10, %v343_v34, %v382_v56  ;;  %v10443_v63 = vld [vmem:[%s11290_s8 + $0x13c4] ss:$16 sps:$4 sm:$0xff]   ;;  %v10483_v34 = vld [vmem:[%s11290_s8 + $0x14a0] ss:$16 sps:$4 sm:$0xff]  }
 0x28b   : > { %7156 = vmatprep.mubr.bf16.mxu0 %v597_v0  ;;  %7812 = vmatprep.mubr.bf16.mxu1 %v597_v0  ;;  %v10446_v0 = vld [vmem:[%s11290_s8 + $0x13cc] ss:$16 sps:$4 sm:$0xff]   ;;  %v10513_v56 = vld [vmem:[%s11290_s8 + $0x1540] ss:$16 sps:$4 sm:$0xff]  }
 0x28d   : > { %7127 = vmatpush1.bf16.msra.mxu0 %v10363_v44  ;;  %7783 = vmatpush1.bf16.msra.mxu1 %v10366_v1  ;;  %v12054_v44 = vsel %vm385_vm11, %v386_v58, %v384_v62  ;;  %v10441_v1 = vld [vmem:[%s11290_s8 + $0x13c0] ss:$16 sps:$4 sm:$0xff]   ;;  %v10524_v58 = vld [vmem:[%s11290_s8 + $0x156c] ss:$16 sps:$4 sm:$0xff]   ;;  %v10527_v62 = vld [vmem:[%s11290_s8 + $0x1584] ss:$16 sps:$4 sm:$0xff]  }
 0x28e   : > { %7128 = vmatprep.subr.bf16.mxu0 %v10371_v2  ;;  %7784 = vmatprep.subr.bf16.mxu1 %v10374_v3  ;;  %v10444_v2 = vld [vmem:[%s11290_s8 + $0x13c8] ss:$16 sps:$4 sm:$0xff]   ;;  %v10449_v3 = vld [vmem:[%s11290_s8 + $0x13e4] ss:$16 sps:$4 sm:$0xff]  }
 0x291   : > { %7129 = vmatpush1.bf16.msra.mxu0 %v10369_v55  ;;  %7785 = vmatpush1.bf16.msra.mxu1 %v10372_v6  ;;  %v10452_v55 = vld [vmem:[%s11290_s8 + $0x13ec] ss:$16 sps:$4 sm:$0xff]   ;;  %v12062_v6 = vrot.slane %v12054_v44, %v11389_v13 }
 0x292   : > { %7130 = vmatprep.subr.bf16.mxu0 %v10377_v7  ;;  %7786 = vmatprep.subr.bf16.mxu1 %v10380_v8  ;;  %v10447_v7 = vld [vmem:[%s11290_s8 + $0x13e0] ss:$16 sps:$4 sm:$0xff]   ;;  %v10450_v8 = vld [vmem:[%s11290_s8 + $0x13e8] ss:$16 sps:$4 sm:$0xff]  }
 0x295   : > { %7131 = vmatpush1.bf16.msra.mxu0 %v10375_v42  ;;  %7787 = vmatpush1.bf16.msra.mxu1 %v10378_v9  ;;  %v10455_v42 = vld [vmem:[%s11290_s8 + $0x1404] ss:$16 sps:$4 sm:$0xff]   ;;  %v10458_v9 = vld [vmem:[%s11290_s8 + $0x140c] ss:$16 sps:$4 sm:$0xff]  }
 0x296   : > { %7132 = vmatprep.subr.bf16.mxu0 %v10383_v10  ;;  %7788 = vmatprep.subr.bf16.mxu1 %v10386_v11  ;;  %v510_v10 = vcombine.high %v12062_v6, %v12062_v6  ;;  %v596_v11 = vpack.c.bf16 %v11986_v53, %v11986_v53  ;;  %v10459_v53 = vld [vmem:[%s11290_s8 + $0x1420] ss:$16 sps:$4 sm:$0xff]  }
 0x299   : > { %7133 = vmatpush1.bf16.msra.mxu0 %v10381_v12  ;;  %7789 = vmatpush1.bf16.msra.mxu1 %v10384_v14  ;;  %v10453_v12 = vld [vmem:[%s11290_s8 + $0x1400] ss:$16 sps:$4 sm:$0xff]   ;;  %v10456_v14 = vld [vmem:[%s11290_s8 + $0x1408] ss:$16 sps:$4 sm:$0xff]  }
 0x29a   : > { %7134 = vmatprep.subr.bf16.mxu0 %v10389_v15  ;;  %7790 = vmatprep.subr.bf16.mxu1 %v10392_v16  ;;  %v10461_v15 = vld [vmem:[%s11290_s8 + $0x1424] ss:$16 sps:$4 sm:$0xff]   ;;  %v10464_v16 = vld [vmem:[%s11290_s8 + $0x142c] ss:$16 sps:$4 sm:$0xff]  }
 0x29d   : > { %7135 = vmatpush1.bf16.msra.mxu0 %v10387_v17  ;;  %7791 = vmatpush1.bf16.msra.mxu1 %v10390_v18  ;;  %v599_v17 = vpack.c.bf16 %v510_v10, %v510_v10  ;;  %v10462_v18 = vld [vmem:[%s11290_s8 + $0x1428] ss:$16 sps:$4 sm:$0xff]   ;;  %v10537_v10 = vld [vmem:[%s11290_s8 + $0x15c0] ss:$16 sps:$4 sm:$0xff]  }
 0x29e   : > { %7136 = vmatprep.subr.bf16.mxu0 %v10395_v19  ;;  %7792 = vmatprep.subr.bf16.mxu1 %v10398_v21  ;;  %v10467_v19 = vld [vmem:[%s11290_s8 + $0x1444] ss:$16 sps:$4 sm:$0xff]   ;;  %v10470_v21 = vld [vmem:[%s11290_s8 + $0x144c] ss:$16 sps:$4 sm:$0xff]  }
 0x2a1   : > { %7137 = vmatpush1.bf16.msra.mxu0 %v10393_v23  ;;  %7793 = vmatpush1.bf16.msra.mxu1 %v10396_v24  ;;  %v10465_v23 = vld [vmem:[%s11290_s8 + $0x1440] ss:$16 sps:$4 sm:$0xff]   ;;  %v10468_v24 = vld [vmem:[%s11290_s8 + $0x1448] ss:$16 sps:$4 sm:$0xff]  }
 0x2a2   : > { %7138 = vmatprep.subr.bf16.mxu0 %v10401_v27  ;;  %7794 = vmatprep.subr.bf16.mxu1 %v10404_v28  ;;  %v10471_v27 = vld [vmem:[%s11290_s8 + $0x1460] ss:$16 sps:$4 sm:$0xff]   ;;  %v10474_v28 = vld [vmem:[%s11290_s8 + $0x1468] ss:$16 sps:$4 sm:$0xff]  }
 0x2a5   : > { %7139 = vmatpush1.bf16.msra.mxu0 %v10399_v31  ;;  %7795 = vmatpush1.bf16.msra.mxu1 %v10402_v32  ;;  %v10477_v31 = vld [vmem:[%s11290_s8 + $0x1480] ss:$16 sps:$4 sm:$0xff]   ;;  %v10480_v32 = vld [vmem:[%s11290_s8 + $0x1488] ss:$16 sps:$4 sm:$0xff]  }
 0x2a6   : > { %7140 = vmatprep.subr.bf16.mxu0 %v10407_v4  ;;  %7796 = vmatprep.subr.bf16.mxu1 %v10410_v33  ;;  %v10485_v4 = vld [vmem:[%s11290_s8 + $0x14a4] ss:$16 sps:$4 sm:$0xff]   ;;  %v10488_v33 = vld [vmem:[%s11290_s8 + $0x14ac] ss:$16 sps:$4 sm:$0xff]  }
 0x2a9   : > { %7141 = vmatpush1.bf16.msra.mxu0 %v10405_v35  ;;  %7797 = vmatpush1.bf16.msra.mxu1 %v10408_v36  ;;  %v10486_v35 = vld [vmem:[%s11290_s8 + $0x14a8] ss:$16 sps:$4 sm:$0xff]   ;;  %v10491_v36 = vld [vmem:[%s11290_s8 + $0x14c4] ss:$16 sps:$4 sm:$0xff]  }
 0x2aa   : > { %7142 = vmatprep.subr.bf16.mxu0 %v10413_v37  ;;  %7798 = vmatprep.subr.bf16.mxu1 %v10416_v38  ;;  %v10494_v37 = vld [vmem:[%s11290_s8 + $0x14cc] ss:$16 sps:$4 sm:$0xff]   ;;  %v10489_v38 = vld [vmem:[%s11290_s8 + $0x14c0] ss:$16 sps:$4 sm:$0xff]  }
 0x2ad   : > { %7143 = vmatpush1.bf16.msra.mxu0 %v10411_v39  ;;  %7799 = vmatpush1.bf16.msra.mxu1 %v10414_v40  ;;  %v10492_v39 = vld [vmem:[%s11290_s8 + $0x14c8] ss:$16 sps:$4 sm:$0xff]   ;;  %v10497_v40 = vld [vmem:[%s11290_s8 + $0x14e4] ss:$16 sps:$4 sm:$0xff]  }
 0x2ae   : > { %7144 = vmatprep.subr.bf16.mxu0 %v10419_v22  ;;  %7800 = vmatprep.subr.bf16.mxu1 %v10422_v41  ;;  %v10500_v22 = vld [vmem:[%s11290_s8 + $0x14ec] ss:$16 sps:$4 sm:$0xff]   ;;  %v10495_v41 = vld [vmem:[%s11290_s8 + $0x14e0] ss:$16 sps:$4 sm:$0xff]  }
 0x2b1   : > { %7145 = vmatpush1.bf16.msra.mxu0 %v10417_v43  ;;  %7801 = vmatpush1.bf16.msra.mxu1 %v10420_v45  ;;  %v10498_v43 = vld [vmem:[%s11290_s8 + $0x14e8] ss:$16 sps:$4 sm:$0xff]   ;;  %v10503_v45 = vld [vmem:[%s11290_s8 + $0x1504] ss:$16 sps:$4 sm:$0xff]  }
 0x2b2   : > { %7146 = vmatprep.subr.bf16.mxu0 %v10425_v46  ;;  %7802 = vmatprep.subr.bf16.mxu1 %v10428_v47  ;;  %v10506_v46 = vld [vmem:[%s11290_s8 + $0x150c] ss:$16 sps:$4 sm:$0xff]   ;;  %v10501_v47 = vld [vmem:[%s11290_s8 + $0x1500] ss:$16 sps:$4 sm:$0xff]  }
 0x2b5   : > { %7147 = vmatpush1.bf16.msra.mxu0 %v10423_v48  ;;  %7803 = vmatpush1.bf16.msra.mxu1 %v10426_v49  ;;  %v10504_v48 = vld [vmem:[%s11290_s8 + $0x1508] ss:$16 sps:$4 sm:$0xff]   ;;  %v10509_v49 = vld [vmem:[%s11290_s8 + $0x1524] ss:$16 sps:$4 sm:$0xff]  }
 0x2b6   : > { %7148 = vmatprep.subr.bf16.mxu0 %v10431_v51  ;;  %7804 = vmatprep.subr.bf16.mxu1 %v10434_v52  ;;  %v10507_v51 = vld [vmem:[%s11290_s8 + $0x1520] ss:$16 sps:$4 sm:$0xff]   ;;  %v10510_v52 = vld [vmem:[%s11290_s8 + $0x1528] ss:$16 sps:$4 sm:$0xff]  }
 0x2b9   : > { %7149 = vmatpush1.bf16.msra.mxu0 %v10429_v20  ;;  %7805 = vmatpush1.bf16.msra.mxu1 %v10432_v54  ;;  %v10515_v20 = vld [vmem:[%s11290_s8 + $0x1544] ss:$16 sps:$4 sm:$0xff]   ;;  %v10518_v54 = vld [vmem:[%s11290_s8 + $0x154c] ss:$16 sps:$4 sm:$0xff]  }
 0x2ba   : > { %7150 = vmatprep.subr.bf16.mxu0 %v10437_v30  ;;  %7806 = vmatprep.subr.bf16.mxu1 %v10440_v57  ;;  %v10516_v30 = vld [vmem:[%s11290_s8 + $0x1548] ss:$16 sps:$4 sm:$0xff]   ;;  %v10521_v57 = vld [vmem:[%s11290_s8 + $0x1564] ss:$16 sps:$4 sm:$0xff]  }
 0x2bd   : > { %7151 = vmatpush1.bf16.msra.mxu0 %v10435_v60  ;;  %7807 = vmatpush1.bf16.msra.mxu1 %v10438_v61  ;;  %v10519_v60 = vld [vmem:[%s11290_s8 + $0x1560] ss:$16 sps:$4 sm:$0xff]   ;;  %v10522_v61 = vld [vmem:[%s11290_s8 + $0x1568] ss:$16 sps:$4 sm:$0xff]  }
 0x2be   : > { %7152 = vmatprep.subr.bf16.mxu0 %v10443_v63  ;;  %7808 = vmatprep.subr.bf16.mxu1 %v10446_v0  ;;  %v10530_v63 = vld [vmem:[%s11290_s8 + $0x158c] ss:$16 sps:$4 sm:$0xff]   ;;  %v10525_v0 = vld [vmem:[%s11290_s8 + $0x1580] ss:$16 sps:$4 sm:$0xff]  }
 0x2c1   : > { %7153 = vmatpush1.bf16.msra.mxu0 %v10441_v1  ;;  %7809 = vmatpush1.bf16.msra.mxu1 %v10444_v2  ;;  %v10528_v1 = vld [vmem:[%s11290_s8 + $0x1588] ss:$16 sps:$4 sm:$0xff]   ;;  %v10533_v2 = vld [vmem:[%s11290_s8 + $0x15a4] ss:$16 sps:$4 sm:$0xff]  }
 0x2c2   : > { %7154 = vmatprep.subr.bf16.mxu0 %v10449_v3  ;;  %7810 = vmatprep.subr.bf16.mxu1 %v10452_v55  ;;  %v10536_v3 = vld [vmem:[%s11290_s8 + $0x15ac] ss:$16 sps:$4 sm:$0xff]   ;;  %v10531_v55 = vld [vmem:[%s11290_s8 + $0x15a0] ss:$16 sps:$4 sm:$0xff]  }
 0x2c5   : > { %7155 = vmatpush1.bf16.msra.mxu0 %v10447_v7  ;;  %7811 = vmatpush1.bf16.msra.mxu1 %v10450_v8  ;;  %v10534_v7 = vld [vmem:[%s11290_s8 + $0x15a8] ss:$16 sps:$4 sm:$0xff]   ;;  %v10539_v8 = vld [vmem:[%s11290_s8 + $0x15c4] ss:$16 sps:$4 sm:$0xff]  }
 0x2c6   : > { %7165 = vmatprep.subr.bf16.mxu0 %v10455_v42  ;;  %7821 = vmatprep.subr.bf16.mxu1 %v10458_v9  ;;  %v10542_v42 = vld [vmem:[%s11290_s8 + $0x15cc] ss:$16 sps:$4 sm:$0xff]   ;;  %v495_v9 = vcombine.high %v12054_v44, %v12054_v44  ;;  %v10543_v44 = vld [vmem:[%s11290_s8 + $0x15e0] ss:$16 sps:$4 sm:$0xff]  }
 0x2c8   : > { %7157 = vmatmul.mubr.bf16.vlgmr.msra.gmra.mrb[0].mxu0 %v596_v11  ;;  %7813 = vmatmul.mubr.bf16.vlgmr.msra.gmra.mrb[0].mxu1 %v596_v11  ;;  %v10540_v11 = vld [vmem:[%s11290_s8 + $0x15c8] ss:$16 sps:$4 sm:$0xff]  }
 0x2c9   : > { %7166 = vmatpush1.bf16.msra.mxu0 %v10453_v12  ;;  %7822 = vmatpush1.bf16.msra.mxu1 %v10456_v14  ;;  %v10545_v12 = vld [vmem:[%s11290_s8 + $0x15e4] ss:$16 sps:$4 sm:$0xff]   ;;  %v10548_v14 = vld [vmem:[%s11290_s8 + $0x15ec] ss:$16 sps:$4 sm:$0xff]  }
 0x2ca   : > { %7167 = vmatprep.subr.bf16.mxu0 %v10461_v15  ;;  %7823 = vmatprep.subr.bf16.mxu1 %v10464_v16  ;;  %v12135_v15 = vrot.slane %v495_v9, %v11389_v13  ;;  %v10546_v16 = vld [vmem:[%s11290_s8 + $0x15e8] ss:$16 sps:$4 sm:$0xff]   ;;  %v10615_v9 = vld [vmem:[%s11290_s8 + $0x1760] ss:$16 sps:$4 sm:$0xff]  }
 0x2cb   : > { %7197 = vmatprep.mubr.bf16.mxu0 %v599_v17  ;;  %7853 = vmatprep.mubr.bf16.mxu1 %v599_v17  ;;  %v10551_v17 = vld [vmem:[%s11290_s8 + $0x1604] ss:$16 sps:$4 sm:$0xff]  }
 0x2cd   : > { %7168 = vmatpush1.bf16.msra.mxu0 %v10459_v53  ;;  %7824 = vmatpush1.bf16.msra.mxu1 %v10462_v18  ;;  %v10554_v53 = vld [vmem:[%s11290_s8 + $0x160c] ss:$16 sps:$4 sm:$0xff]   ;;  %v511_v18 = vcombine.high %v12135_v15, %v12135_v15 }
 0x2ce   : > { %7169 = vmatprep.subr.bf16.mxu0 %v10467_v19  ;;  %7825 = vmatprep.subr.bf16.mxu1 %v10470_v21  ;;  %v598_v19 = vpack.c.bf16 %v12062_v6, %v12062_v6  ;;  %v10549_v21 = vld [vmem:[%s11290_s8 + $0x1600] ss:$16 sps:$4 sm:$0xff]  }
 0x2cf   : > { %v10555_v6 = vld [vmem:[%s11290_s8 + $0x1620] ss:$16 sps:$4 sm:$0xff]  }
 0x2d1   : > { %7170 = vmatpush1.bf16.msra.mxu0 %v10465_v23  ;;  %7826 = vmatpush1.bf16.msra.mxu1 %v10468_v24  ;;  %v10552_v23 = vld [vmem:[%s11290_s8 + $0x1608] ss:$16 sps:$4 sm:$0xff]   ;;  %v10557_v24 = vld [vmem:[%s11290_s8 + $0x1624] ss:$16 sps:$4 sm:$0xff]  }
 0x2d2   : > { %7171 = vmatprep.subr.bf16.mxu0 %v10473_v25  ;;  %7827 = vmatprep.subr.bf16.mxu1 %v10476_v26  ;;  %v10560_v25 = vld [vmem:[%s11290_s8 + $0x162c] ss:$16 sps:$4 sm:$0xff]   ;;  %v601_v26 = vpack.c.bf16 %v511_v18, %v511_v18 }
 0x2d3   : > { %v10632_v18 = vld [vmem:[%s11290_s8 + $0x17ac] ss:$16 sps:$4 sm:$0xff]  }
 0x2d5   : > { %7172 = vmatpush1.bf16.msra.mxu0 %v10471_v27  ;;  %7828 = vmatpush1.bf16.msra.mxu1 %v10474_v28  ;;  %v10558_v27 = vld [vmem:[%s11290_s8 + $0x1628] ss:$16 sps:$4 sm:$0xff]   ;;  %v10563_v28 = vld [vmem:[%s11290_s8 + $0x1644] ss:$16 sps:$4 sm:$0xff]  }
 0x2d6   : > { %7173 = vmatprep.subr.bf16.mxu0 %v10479_v29  ;;  %7829 = vmatprep.subr.bf16.mxu1 %v10482_v59  ;;  %v10566_v29 = vld [vmem:[%s11290_s8 + $0x164c] ss:$16 sps:$4 sm:$0xff]   ;;  %v10561_v59 = vld [vmem:[%s11290_s8 + $0x1640] ss:$16 sps:$4 sm:$0xff]  }
 0x2d9   : > { %7174 = vmatpush1.bf16.msra.mxu0 %v10477_v31  ;;  %7830 = vmatpush1.bf16.msra.mxu1 %v10480_v32  ;;  %v10564_v31 = vld [vmem:[%s11290_s8 + $0x1648] ss:$16 sps:$4 sm:$0xff]   ;;  %v10569_v32 = vld [vmem:[%s11290_s8 + $0x1664] ss:$16 sps:$4 sm:$0xff]  }
 0x2da   : > { %7175 = vmatprep.subr.bf16.mxu0 %v10485_v4  ;;  %7831 = vmatprep.subr.bf16.mxu1 %v10488_v33  ;;  %v10572_v4 = vld [vmem:[%s11290_s8 + $0x166c] ss:$16 sps:$4 sm:$0xff]   ;;  %v10567_v33 = vld [vmem:[%s11290_s8 + $0x1660] ss:$16 sps:$4 sm:$0xff]  }
 0x2dd   : > { %7176 = vmatpush1.bf16.msra.mxu0 %v10483_v34  ;;  %7832 = vmatpush1.bf16.msra.mxu1 %v10486_v35  ;;  %v10570_v34 = vld [vmem:[%s11290_s8 + $0x1668] ss:$16 sps:$4 sm:$0xff]   ;;  %v10575_v35 = vld [vmem:[%s11290_s8 + $0x1684] ss:$16 sps:$4 sm:$0xff]  }
 0x2de   : > { %7177 = vmatprep.subr.bf16.mxu0 %v10491_v36  ;;  %7833 = vmatprep.subr.bf16.mxu1 %v10494_v37  ;;  %v10578_v36 = vld [vmem:[%s11290_s8 + $0x168c] ss:$16 sps:$4 sm:$0xff]   ;;  %v10573_v37 = vld [vmem:[%s11290_s8 + $0x1680] ss:$16 sps:$4 sm:$0xff]  }
 0x2e1   : > { %7178 = vmatpush1.bf16.msra.mxu0 %v10489_v38  ;;  %7834 = vmatpush1.bf16.msra.mxu1 %v10492_v39  ;;  %v10576_v38 = vld [vmem:[%s11290_s8 + $0x1688] ss:$16 sps:$4 sm:$0xff]   ;;  %v10581_v39 = vld [vmem:[%s11290_s8 + $0x16a4] ss:$16 sps:$4 sm:$0xff]  }
 0x2e2   : > { %7179 = vmatprep.subr.bf16.mxu0 %v10497_v40  ;;  %7835 = vmatprep.subr.bf16.mxu1 %v10500_v22  ;;  %v10584_v40 = vld [vmem:[%s11290_s8 + $0x16ac] ss:$16 sps:$4 sm:$0xff]   ;;  %v10579_v22 = vld [vmem:[%s11290_s8 + $0x16a0] ss:$16 sps:$4 sm:$0xff]  }
 0x2e5   : > { %7180 = vmatpush1.bf16.msra.mxu0 %v10495_v41  ;;  %7836 = vmatpush1.bf16.msra.mxu1 %v10498_v43  ;;  %v10582_v41 = vld [vmem:[%s11290_s8 + $0x16a8] ss:$16 sps:$4 sm:$0xff]   ;;  %v10587_v43 = vld [vmem:[%s11290_s8 + $0x16c4] ss:$16 sps:$4 sm:$0xff]  }
 0x2e6   : > { %7181 = vmatprep.subr.bf16.mxu0 %v10503_v45  ;;  %7837 = vmatprep.subr.bf16.mxu1 %v10506_v46  ;;  %v10590_v45 = vld [vmem:[%s11290_s8 + $0x16cc] ss:$16 sps:$4 sm:$0xff]   ;;  %v10585_v46 = vld [vmem:[%s11290_s8 + $0x16c0] ss:$16 sps:$4 sm:$0xff]  }
 0x2e9   : > { %7182 = vmatpush1.bf16.msra.mxu0 %v10501_v47  ;;  %7838 = vmatpush1.bf16.msra.mxu1 %v10504_v48  ;;  %v10588_v47 = vld [vmem:[%s11290_s8 + $0x16c8] ss:$16 sps:$4 sm:$0xff]  }
 0x2ea   : > { %7183 = vmatprep.subr.bf16.mxu0 %v10509_v49  ;;  %7839 = vmatprep.subr.bf16.mxu1 %v10512_v50  ;;  %v312_v48 = vld [vmem:[%s11303_s6 + $0x30] sm:$0xff]  ;;  %v10593_v50 = vld [vmem:[%s11290_s8 + $0x16e4] ss:$16 sps:$4 sm:$0xff]  }
 0x2eb   : > { %v320_v49 = vld [vmem:[%s11308_s12 + $0x30] sm:$0xff] }
 0x2ed   : > { %7184 = vmatpush1.bf16.msra.mxu0 %v10507_v51  ;;  %7840 = vmatpush1.bf16.msra.mxu1 %v10510_v52  ;;  %v10596_v51 = vld [vmem:[%s11290_s8 + $0x16ec] ss:$16 sps:$4 sm:$0xff]   ;;  %v328_v52 = vmul.f32 %v312_v48, %v312_v48  ;;  %v10665_v48 = vld [vmem:[%s11290_s8 + $0x1864] ss:$16 sps:$4 sm:$0xff]  }
 0x2ee   : > { %7185 = vmatprep.subr.bf16.mxu0 %v10515_v20  ;;  %7841 = vmatprep.subr.bf16.mxu1 %v10518_v54  ;;  %v336_v20 = vmul.f32 %v320_v49, %v320_v49  ;;  %v10591_v54 = vld [vmem:[%s11290_s8 + $0x16e0] ss:$16 sps:$4 sm:$0xff]   ;;  %v10668_v49 = vld [vmem:[%s11290_s8 + $0x186c] ss:$16 sps:$4 sm:$0xff]  }
 0x2f1   : > { %7186 = vmatpush1.bf16.msra.mxu0 %v10513_v56  ;;  %7842 = vmatpush1.bf16.msra.mxu1 %v10516_v30  ;;  %v10594_v56 = vld [vmem:[%s11290_s8 + $0x16e8] ss:$16 sps:$4 sm:$0xff]   ;;  %v10599_v30 = vld [vmem:[%s11290_s8 + $0x1704] ss:$16 sps:$4 sm:$0xff]  }
 0x2f2   : > { %7187 = vmatprep.subr.bf16.mxu0 %v10521_v57  ;;  %7843 = vmatprep.subr.bf16.mxu1 %v10524_v58  ;;  %v10602_v57 = vld [vmem:[%s11290_s8 + $0x170c] ss:$16 sps:$4 sm:$0xff]   ;;  %v344_v58 = vadd.f32 %v336_v20, %v328_v52  ;;  %v10671_v52 = vld [vmem:[%s11290_s8 + $0x1884] ss:$16 sps:$4 sm:$0xff]  }
 0x2f3   : > { %v10674_v20 = vld [vmem:[%s11290_s8 + $0x188c] ss:$16 sps:$4 sm:$0xff]  }
 0x2f4   : > { %11041 = vrsqrt.f32 %v344_v58  ;;  %vm390_vm12 = vcmp.eq.f32.partialorder %v344_v58, inf  ;;  %vm392_vm13 = vcmp.eq.f32.partialorder %v344_v58, 0.0 }
 0x2f5   : > { %7188 = vmatpush1.bf16.msra.mxu0 %v10519_v60  ;;  %7844 = vmatpush1.bf16.msra.mxu1 %v10522_v61  ;;  %v10597_v60 = vld [vmem:[%s11290_s8 + $0x1700] ss:$16 sps:$4 sm:$0xff]   ;;  %v10600_v61 = vld [vmem:[%s11290_s8 + $0x1708] ss:$16 sps:$4 sm:$0xff]  }
 0x2f6   : > { %7189 = vmatprep.subr.bf16.mxu0 %v10527_v62  ;;  %7845 = vmatprep.subr.bf16.mxu1 %v10530_v63  ;;  %v10605_v62 = vld [vmem:[%s11290_s8 + $0x1724] ss:$16 sps:$4 sm:$0xff]   ;;  %v10608_v63 = vld [vmem:[%s11290_s8 + $0x172c] ss:$16 sps:$4 sm:$0xff]  }
 0x2f9   : > { %7190 = vmatpush1.bf16.msra.mxu0 %v10525_v0  ;;  %7846 = vmatpush1.bf16.msra.mxu1 %v10528_v1  ;;  %v10603_v0 = vld [vmem:[%s11290_s8 + $0x1720] ss:$16 sps:$4 sm:$0xff]   ;;  %v10606_v1 = vld [vmem:[%s11290_s8 + $0x1728] ss:$16 sps:$4 sm:$0xff]  }
 0x2fa   : > { %7191 = vmatprep.subr.bf16.mxu0 %v10533_v2  ;;  %7847 = vmatprep.subr.bf16.mxu1 %v10536_v3  ;;  %v10611_v2 = vld [vmem:[%s11290_s8 + $0x1744] ss:$16 sps:$4 sm:$0xff]   ;;  %v10614_v3 = vld [vmem:[%s11290_s8 + $0x174c] ss:$16 sps:$4 sm:$0xff]  }
 0x2fd   : > { %7192 = vmatpush1.bf16.msra.mxu0 %v10531_v55  ;;  %7848 = vmatpush1.bf16.msra.mxu1 %v10534_v7  ;;  %v10609_v55 = vld [vmem:[%s11290_s8 + $0x1740] ss:$16 sps:$4 sm:$0xff]   ;;  %v10612_v7 = vld [vmem:[%s11290_s8 + $0x1748] ss:$16 sps:$4 sm:$0xff]  }
 0x2fe   : > { %7193 = vmatprep.subr.bf16.mxu0 %v10539_v8  ;;  %7849 = vmatprep.subr.bf16.mxu1 %v10542_v42  ;;  %v10617_v8 = vld [vmem:[%s11290_s8 + $0x1764] ss:$16 sps:$4 sm:$0xff]   ;;  %v10620_v42 = vld [vmem:[%s11290_s8 + $0x176c] ss:$16 sps:$4 sm:$0xff]  }
 0x301   : > { %7194 = vmatpush1.bf16.msra.mxu0 %v10537_v10  ;;  %7850 = vmatpush1.bf16.msra.mxu1 %v10540_v11  ;;  %v10618_v10 = vld [vmem:[%s11290_s8 + $0x1768] ss:$16 sps:$4 sm:$0xff]   ;;  %v11042_v11 = vpop.eup %11041 }
 0x302   : > { %7195 = vmatprep.subr.bf16.mxu0 %v10545_v12  ;;  %7851 = vmatprep.subr.bf16.mxu1 %v10548_v14  ;;  %v10623_v12 = vld [vmem:[%s11290_s8 + $0x1784] ss:$16 sps:$4 sm:$0xff]   ;;  %v10626_v14 = vld [vmem:[%s11290_s8 + $0x178c] ss:$16 sps:$4 sm:$0xff]  }
 0x305   : > { %7196 = vmatpush1.bf16.msra.mxu0 %v10543_v44  ;;  %7852 = vmatpush1.bf16.msra.mxu1 %v10546_v16  ;;  %v10621_v44 = vld [vmem:[%s11290_s8 + $0x1780] ss:$16 sps:$4 sm:$0xff]   ;;  %v10624_v16 = vld [vmem:[%s11290_s8 + $0x1788] ss:$16 sps:$4 sm:$0xff]  }
 0x306   : > { %7206 = vmatprep.subr.bf16.mxu0 %v10551_v17  ;;  %7862 = vmatprep.subr.bf16.mxu1 %v10554_v53  ;;  %v389_v17 = vmul.f32 %v11042_v11, %v344_v58  ;;  %v10629_v53 = vld [vmem:[%s11290_s8 + $0x17a4] ss:$16 sps:$4 sm:$0xff]   ;;  %v10704_v11 = vld [vmem:[%s11290_s8 + $0x192c] ss:$16 sps:$4 sm:$0xff]  }
 0x308   : > { %7198 = vmatmul.mubr.bf16.vlgmr.msra.gmra.mrb[0].mxu0 %v598_v19  ;;  %7854 = vmatmul.mubr.bf16.vlgmr.msra.gmra.mrb[0].mxu1 %v598_v19  ;;  %v393_v19 = vand.u32 2147483648, %v344_v58 }
 0x309   : > { %7207 = vmatpush1.bf16.msra.mxu0 %v10549_v21  ;;  %7863 = vmatpush1.bf16.msra.mxu1 %v10552_v23  ;;  %v10627_v21 = vld [vmem:[%s11290_s8 + $0x17a0] ss:$16 sps:$4 sm:$0xff]   ;;  %v10630_v23 = vld [vmem:[%s11290_s8 + $0x17a8] ss:$16 sps:$4 sm:$0xff]  }
 0x30a   : > { %7208 = vmatprep.subr.bf16.mxu0 %v10557_v24  ;;  %7864 = vmatprep.subr.bf16.mxu1 %v10560_v25  ;;  %v391_v24 = vsel %vm390_vm12, %v344_v58, %v389_v17  ;;  %v10635_v25 = vld [vmem:[%s11290_s8 + $0x17c4] ss:$16 sps:$4 sm:$0xff]   ;;  %v10675_v58 = vld [vmem:[%s11290_s8 + $0x18a0] ss:$16 sps:$4 sm:$0xff]  }
 0x30b   : > { %7238 = vmatprep.mubr.bf16.mxu0 %v601_v26  ;;  %7894 = vmatprep.mubr.bf16.mxu1 %v601_v26  ;;  %v10638_v26 = vld [vmem:[%s11290_s8 + $0x17cc] ss:$16 sps:$4 sm:$0xff]   ;;  %v10705_v17 = vld [vmem:[%s11290_s8 + $0x1940] ss:$16 sps:$4 sm:$0xff]  }
 0x30d   : > { %7209 = vmatpush1.bf16.msra.mxu0 %v10555_v6  ;;  %7865 = vmatpush1.bf16.msra.mxu1 %v10558_v27  ;;  %v12203_v6 = vsel %vm392_vm13, %v393_v19, %v391_v24  ;;  %v10633_v27 = vld [vmem:[%s11290_s8 + $0x17c0] ss:$16 sps:$4 sm:$0xff]   ;;  %v10716_v19 = vld [vmem:[%s11290_s8 + $0x196c] ss:$16 sps:$4 sm:$0xff]   ;;  %v10719_v24 = vld [vmem:[%s11290_s8 + $0x1984] ss:$16 sps:$4 sm:$0xff]  }
 0x30e   : > { %7210 = vmatprep.subr.bf16.mxu0 %v10563_v28  ;;  %7866 = vmatprep.subr.bf16.mxu1 %v10566_v29  ;;  %v10636_v28 = vld [vmem:[%s11290_s8 + $0x17c8] ss:$16 sps:$4 sm:$0xff]   ;;  %v10641_v29 = vld [vmem:[%s11290_s8 + $0x17e4] ss:$16 sps:$4 sm:$0xff]  }
 0x311   : > { %7211 = vmatpush1.bf16.msra.mxu0 %v10561_v59  ;;  %7867 = vmatpush1.bf16.msra.mxu1 %v10564_v31  ;;  %v10644_v59 = vld [vmem:[%s11290_s8 + $0x17ec] ss:$16 sps:$4 sm:$0xff]   ;;  %v12211_v31 = vrot.slane %v12203_v6, %v11389_v13 }
 0x312   : > { %7212 = vmatprep.subr.bf16.mxu0 %v10569_v32  ;;  %7868 = vmatprep.subr.bf16.mxu1 %v10572_v4  ;;  %v10639_v32 = vld [vmem:[%s11290_s8 + $0x17e0] ss:$16 sps:$4 sm:$0xff]   ;;  %v10642_v4 = vld [vmem:[%s11290_s8 + $0x17e8] ss:$16 sps:$4 sm:$0xff]  }
 0x315   : > { %7213 = vmatpush1.bf16.msra.mxu0 %v10567_v33  ;;  %7869 = vmatpush1.bf16.msra.mxu1 %v10570_v34  ;;  %v10647_v33 = vld [vmem:[%s11290_s8 + $0x1804] ss:$16 sps:$4 sm:$0xff]   ;;  %v10650_v34 = vld [vmem:[%s11290_s8 + $0x180c] ss:$16 sps:$4 sm:$0xff]  }
 0x316   : > { %7214 = vmatprep.subr.bf16.mxu0 %v10575_v35  ;;  %7870 = vmatprep.subr.bf16.mxu1 %v10578_v36  ;;  %v527_v35 = vcombine.high %v12211_v31, %v12211_v31  ;;  %v600_v36 = vpack.c.bf16 %v12135_v15, %v12135_v15  ;;  %v10651_v15 = vld [vmem:[%s11290_s8 + $0x1820] ss:$16 sps:$4 sm:$0xff]  }
 0x319   : > { %7215 = vmatpush1.bf16.msra.mxu0 %v10573_v37  ;;  %7871 = vmatpush1.bf16.msra.mxu1 %v10576_v38  ;;  %v10645_v37 = vld [vmem:[%s11290_s8 + $0x1800] ss:$16 sps:$4 sm:$0xff]   ;;  %v10648_v38 = vld [vmem:[%s11290_s8 + $0x1808] ss:$16 sps:$4 sm:$0xff]  }
 0x31a   : > { %7216 = vmatprep.subr.bf16.mxu0 %v10581_v39  ;;  %7872 = vmatprep.subr.bf16.mxu1 %v10584_v40  ;;  %v10653_v39 = vld [vmem:[%s11290_s8 + $0x1824] ss:$16 sps:$4 sm:$0xff]   ;;  %v10656_v40 = vld [vmem:[%s11290_s8 + $0x182c] ss:$16 sps:$4 sm:$0xff]  }
 0x31d   : > { %7217 = vmatpush1.bf16.msra.mxu0 %v10579_v22  ;;  %7873 = vmatpush1.bf16.msra.mxu1 %v10582_v41  ;;  %v603_v22 = vpack.c.bf16 %v527_v35, %v527_v35  ;;  %v10654_v41 = vld [vmem:[%s11290_s8 + $0x1828] ss:$16 sps:$4 sm:$0xff]   ;;  %v10729_v35 = vld [vmem:[%s11290_s8 + $0x19c0] ss:$16 sps:$4 sm:$0xff]  }
 0x31e   : > { %7218 = vmatprep.subr.bf16.mxu0 %v10587_v43  ;;  %7874 = vmatprep.subr.bf16.mxu1 %v10590_v45  ;;  %v10659_v43 = vld [vmem:[%s11290_s8 + $0x1844] ss:$16 sps:$4 sm:$0xff]   ;;  %v10662_v45 = vld [vmem:[%s11290_s8 + $0x184c] ss:$16 sps:$4 sm:$0xff]  }
 0x321   : > { %7219 = vmatpush1.bf16.msra.mxu0 %v10585_v46  ;;  %7875 = vmatpush1.bf16.msra.mxu1 %v10588_v47  ;;  %v10657_v46 = vld [vmem:[%s11290_s8 + $0x1840] ss:$16 sps:$4 sm:$0xff]   ;;  %v10660_v47 = vld [vmem:[%s11290_s8 + $0x1848] ss:$16 sps:$4 sm:$0xff]  }
 0x322   : > { %7220 = vmatprep.subr.bf16.mxu0 %v10593_v50  ;;  %7876 = vmatprep.subr.bf16.mxu1 %v10596_v51  ;;  %v10663_v50 = vld [vmem:[%s11290_s8 + $0x1860] ss:$16 sps:$4 sm:$0xff]   ;;  %v10666_v51 = vld [vmem:[%s11290_s8 + $0x1868] ss:$16 sps:$4 sm:$0xff]  }
 0x325   : > { %7221 = vmatpush1.bf16.msra.mxu0 %v10591_v54  ;;  %7877 = vmatpush1.bf16.msra.mxu1 %v10594_v56  ;;  %v10669_v54 = vld [vmem:[%s11290_s8 + $0x1880] ss:$16 sps:$4 sm:$0xff]   ;;  %v10672_v56 = vld [vmem:[%s11290_s8 + $0x1888] ss:$16 sps:$4 sm:$0xff]  }
 0x326   : > { %7222 = vmatprep.subr.bf16.mxu0 %v10599_v30  ;;  %7878 = vmatprep.subr.bf16.mxu1 %v10602_v57  ;;  %v10677_v30 = vld [vmem:[%s11290_s8 + $0x18a4] ss:$16 sps:$4 sm:$0xff]   ;;  %v10680_v57 = vld [vmem:[%s11290_s8 + $0x18ac] ss:$16 sps:$4 sm:$0xff]  }
 0x329   : > { %7223 = vmatpush1.bf16.msra.mxu0 %v10597_v60  ;;  %7879 = vmatpush1.bf16.msra.mxu1 %v10600_v61  ;;  %v10678_v60 = vld [vmem:[%s11290_s8 + $0x18a8] ss:$16 sps:$4 sm:$0xff]   ;;  %v10683_v61 = vld [vmem:[%s11290_s8 + $0x18c4] ss:$16 sps:$4 sm:$0xff]  }
 0x32a   : > { %7224 = vmatprep.subr.bf16.mxu0 %v10605_v62  ;;  %7880 = vmatprep.subr.bf16.mxu1 %v10608_v63  ;;  %v10686_v62 = vld [vmem:[%s11290_s8 + $0x18cc] ss:$16 sps:$4 sm:$0xff]   ;;  %v10681_v63 = vld [vmem:[%s11290_s8 + $0x18c0] ss:$16 sps:$4 sm:$0xff]  }
 0x32d   : > { %7225 = vmatpush1.bf16.msra.mxu0 %v10603_v0  ;;  %7881 = vmatpush1.bf16.msra.mxu1 %v10606_v1  ;;  %v10684_v0 = vld [vmem:[%s11290_s8 + $0x18c8] ss:$16 sps:$4 sm:$0xff]   ;;  %v10689_v1 = vld [vmem:[%s11290_s8 + $0x18e4] ss:$16 sps:$4 sm:$0xff]  }
 0x32e   : > { %7226 = vmatprep.subr.bf16.mxu0 %v10611_v2  ;;  %7882 = vmatprep.subr.bf16.mxu1 %v10614_v3  ;;  %v10692_v2 = vld [vmem:[%s11290_s8 + $0x18ec] ss:$16 sps:$4 sm:$0xff]   ;;  %v10687_v3 = vld [vmem:[%s11290_s8 + $0x18e0] ss:$16 sps:$4 sm:$0xff]  }
 0x331   : > { %7227 = vmatpush1.bf16.msra.mxu0 %v10609_v55  ;;  %7883 = vmatpush1.bf16.msra.mxu1 %v10612_v7  ;;  %v10690_v55 = vld [vmem:[%s11290_s8 + $0x18e8] ss:$16 sps:$4 sm:$0xff]   ;;  %v10695_v7 = vld [vmem:[%s11290_s8 + $0x1904] ss:$16 sps:$4 sm:$0xff]  }
 0x332   : > { %7228 = vmatprep.subr.bf16.mxu0 %v10617_v8  ;;  %7884 = vmatprep.subr.bf16.mxu1 %v10620_v42  ;;  %v10698_v8 = vld [vmem:[%s11290_s8 + $0x190c] ss:$16 sps:$4 sm:$0xff]   ;;  %v10693_v42 = vld [vmem:[%s11290_s8 + $0x1900] ss:$16 sps:$4 sm:$0xff]  }
 0x335   : > { %7229 = vmatpush1.bf16.msra.mxu0 %v10615_v9  ;;  %7885 = vmatpush1.bf16.msra.mxu1 %v10618_v10  ;;  %v10696_v9 = vld [vmem:[%s11290_s8 + $0x1908] ss:$16 sps:$4 sm:$0xff]   ;;  %v10701_v10 = vld [vmem:[%s11290_s8 + $0x1924] ss:$16 sps:$4 sm:$0xff]  }
 0x336   : > { %7230 = vmatprep.subr.bf16.mxu0 %v10623_v12  ;;  %7886 = vmatprep.subr.bf16.mxu1 %v10626_v14  ;;  %v10699_v12 = vld [vmem:[%s11290_s8 + $0x1920] ss:$16 sps:$4 sm:$0xff]   ;;  %v10702_v14 = vld [vmem:[%s11290_s8 + $0x1928] ss:$16 sps:$4 sm:$0xff]  }
 0x339   : > { %7231 = vmatpush1.bf16.msra.mxu0 %v10621_v44  ;;  %7887 = vmatpush1.bf16.msra.mxu1 %v10624_v16  ;;  %v10707_v44 = vld [vmem:[%s11290_s8 + $0x1944] ss:$16 sps:$4 sm:$0xff]   ;;  %v10710_v16 = vld [vmem:[%s11290_s8 + $0x194c] ss:$16 sps:$4 sm:$0xff]  }
 0x33a   : > { %7232 = vmatprep.subr.bf16.mxu0 %v10629_v53  ;;  %7888 = vmatprep.subr.bf16.mxu1 %v10632_v18  ;;  %v10708_v53 = vld [vmem:[%s11290_s8 + $0x1948] ss:$16 sps:$4 sm:$0xff]   ;;  %v10713_v18 = vld [vmem:[%s11290_s8 + $0x1964] ss:$16 sps:$4 sm:$0xff]  }
 0x33d   : > { %7233 = vmatpush1.bf16.msra.mxu0 %v10627_v21  ;;  %7889 = vmatpush1.bf16.msra.mxu1 %v10630_v23  ;;  %v10711_v21 = vld [vmem:[%s11290_s8 + $0x1960] ss:$16 sps:$4 sm:$0xff]   ;;  %v10714_v23 = vld [vmem:[%s11290_s8 + $0x1968] ss:$16 sps:$4 sm:$0xff]  }
 0x33e   : > { %7234 = vmatprep.subr.bf16.mxu0 %v10635_v25  ;;  %7890 = vmatprep.subr.bf16.mxu1 %v10638_v26  ;;  %v10722_v25 = vld [vmem:[%s11290_s8 + $0x198c] ss:$16 sps:$4 sm:$0xff]   ;;  %v10717_v26 = vld [vmem:[%s11290_s8 + $0x1980] ss:$16 sps:$4 sm:$0xff]  }
 0x341   : > { %7235 = vmatpush1.bf16.msra.mxu0 %v10633_v27  ;;  %7891 = vmatpush1.bf16.msra.mxu1 %v10636_v28  ;;  %v10720_v27 = vld [vmem:[%s11290_s8 + $0x1988] ss:$16 sps:$4 sm:$0xff]   ;;  %v10725_v28 = vld [vmem:[%s11290_s8 + $0x19a4] ss:$16 sps:$4 sm:$0xff]  }
 0x342   : > { %7236 = vmatprep.subr.bf16.mxu0 %v10641_v29  ;;  %7892 = vmatprep.subr.bf16.mxu1 %v10644_v59  ;;  %v10728_v29 = vld [vmem:[%s11290_s8 + $0x19ac] ss:$16 sps:$4 sm:$0xff]   ;;  %v10723_v59 = vld [vmem:[%s11290_s8 + $0x19a0] ss:$16 sps:$4 sm:$0xff]  }
 0x345   : > { %7237 = vmatpush1.bf16.msra.mxu0 %v10639_v32  ;;  %7893 = vmatpush1.bf16.msra.mxu1 %v10642_v4  ;;  %v10726_v32 = vld [vmem:[%s11290_s8 + $0x19a8] ss:$16 sps:$4 sm:$0xff]   ;;  %v10731_v4 = vld [vmem:[%s11290_s8 + $0x19c4] ss:$16 sps:$4 sm:$0xff]  }
 0x346   : > { %7247 = vmatprep.subr.bf16.mxu0 %v10647_v33  ;;  %7903 = vmatprep.subr.bf16.mxu1 %v10650_v34  ;;  %v10734_v33 = vld [vmem:[%s11290_s8 + $0x19cc] ss:$16 sps:$4 sm:$0xff]   ;;  %v512_v34 = vcombine.high %v12203_v6, %v12203_v6  ;;  %v10735_v6 = vld [vmem:[%s11290_s8 + $0x19e0] ss:$16 sps:$4 sm:$0xff]  }
 0x348   : > { %7239 = vmatmul.mubr.bf16.vlgmr.msra.gmra.mrb[0].mxu0 %v600_v36  ;;  %7895 = vmatmul.mubr.bf16.vlgmr.msra.gmra.mrb[0].mxu1 %v600_v36  ;;  %v10732_v36 = vld [vmem:[%s11290_s8 + $0x19c8] ss:$16 sps:$4 sm:$0xff]  }
 0x349   : > { %7248 = vmatpush1.bf16.msra.mxu0 %v10645_v37  ;;  %7904 = vmatpush1.bf16.msra.mxu1 %v10648_v38  ;;  %v10737_v37 = vld [vmem:[%s11290_s8 + $0x19e4] ss:$16 sps:$4 sm:$0xff]   ;;  %v10740_v38 = vld [vmem:[%s11290_s8 + $0x19ec] ss:$16 sps:$4 sm:$0xff]  }
 0x34a   : > { %7249 = vmatprep.subr.bf16.mxu0 %v10653_v39  ;;  %7905 = vmatprep.subr.bf16.mxu1 %v10656_v40  ;;  %v12284_v39 = vrot.slane %v512_v34, %v11389_v13  ;;  %v10738_v40 = vld [vmem:[%s11290_s8 + $0x19e8] ss:$16 sps:$4 sm:$0xff]   ;;  %v10807_v34 = vld [vmem:[%s11290_s8 + $0x1b60] ss:$16 sps:$4 sm:$0xff]  }
 0x34b   : > { %7279 = vmatprep.mubr.bf16.mxu0 %v603_v22  ;;  %7935 = vmatprep.mubr.bf16.mxu1 %v603_v22  ;;  %v10743_v22 = vld [vmem:[%s11290_s8 + $0x1a04] ss:$16 sps:$4 sm:$0xff]  }
 0x34d   : > { %7250 = vmatpush1.bf16.msra.mxu0 %v10651_v15  ;;  %7906 = vmatpush1.bf16.msra.mxu1 %v10654_v41  ;;  %v10746_v15 = vld [vmem:[%s11290_s8 + $0x1a0c] ss:$16 sps:$4 sm:$0xff]   ;;  %v528_v41 = vcombine.high %v12284_v39, %v12284_v39 }
 0x34e   : > { %7251 = vmatprep.subr.bf16.mxu0 %v10659_v43  ;;  %7907 = vmatprep.subr.bf16.mxu1 %v10662_v45  ;;  %v602_v43 = vpack.c.bf16 %v12211_v31, %v12211_v31  ;;  %v10741_v45 = vld [vmem:[%s11290_s8 + $0x1a00] ss:$16 sps:$4 sm:$0xff]  }
 0x34f   : > { %v10747_v31 = vld [vmem:[%s11290_s8 + $0x1a20] ss:$16 sps:$4 sm:$0xff]  }
 0x351   : > { %7252 = vmatpush1.bf16.msra.mxu0 %v10657_v46  ;;  %7908 = vmatpush1.bf16.msra.mxu1 %v10660_v47  ;;  %v10744_v46 = vld [vmem:[%s11290_s8 + $0x1a08] ss:$16 sps:$4 sm:$0xff]   ;;  %v10749_v47 = vld [vmem:[%s11290_s8 + $0x1a24] ss:$16 sps:$4 sm:$0xff]  }
 0x352   : > { %7253 = vmatprep.subr.bf16.mxu0 %v10665_v48  ;;  %7909 = vmatprep.subr.bf16.mxu1 %v10668_v49  ;;  %v10752_v48 = vld [vmem:[%s11290_s8 + $0x1a2c] ss:$16 sps:$4 sm:$0xff]   ;;  %v605_v49 = vpack.c.bf16 %v528_v41, %v528_v41 }
 0x353   : > { %v10824_v41 = vld [vmem:[%s11290_s8 + $0x1bac] ss:$16 sps:$4 sm:$0xff]  }
 0x355   : > { %7254 = vmatpush1.bf16.msra.mxu0 %v10663_v50  ;;  %7910 = vmatpush1.bf16.msra.mxu1 %v10666_v51  ;;  %v10750_v50 = vld [vmem:[%s11290_s8 + $0x1a28] ss:$16 sps:$4 sm:$0xff]   ;;  %v10755_v51 = vld [vmem:[%s11290_s8 + $0x1a44] ss:$16 sps:$4 sm:$0xff]  }
 0x356   : > { %7255 = vmatprep.subr.bf16.mxu0 %v10671_v52  ;;  %7911 = vmatprep.subr.bf16.mxu1 %v10674_v20  ;;  %v10758_v52 = vld [vmem:[%s11290_s8 + $0x1a4c] ss:$16 sps:$4 sm:$0xff]   ;;  %v10753_v20 = vld [vmem:[%s11290_s8 + $0x1a40] ss:$16 sps:$4 sm:$0xff]  }
 0x359   : > { %7256 = vmatpush1.bf16.msra.mxu0 %v10669_v54  ;;  %7912 = vmatpush1.bf16.msra.mxu1 %v10672_v56  ;;  %v10756_v54 = vld [vmem:[%s11290_s8 + $0x1a48] ss:$16 sps:$4 sm:$0xff]   ;;  %v10761_v56 = vld [vmem:[%s11290_s8 + $0x1a64] ss:$16 sps:$4 sm:$0xff]  }
 0x35a   : > { %7257 = vmatprep.subr.bf16.mxu0 %v10677_v30  ;;  %7913 = vmatprep.subr.bf16.mxu1 %v10680_v57  ;;  %v10764_v30 = vld [vmem:[%s11290_s8 + $0x1a6c] ss:$16 sps:$4 sm:$0xff]   ;;  %v10759_v57 = vld [vmem:[%s11290_s8 + $0x1a60] ss:$16 sps:$4 sm:$0xff]  }
 0x35d   : > { %7258 = vmatpush1.bf16.msra.mxu0 %v10675_v58  ;;  %7914 = vmatpush1.bf16.msra.mxu1 %v10678_v60  ;;  %v10762_v58 = vld [vmem:[%s11290_s8 + $0x1a68] ss:$16 sps:$4 sm:$0xff]   ;;  %v10767_v60 = vld [vmem:[%s11290_s8 + $0x1a84] ss:$16 sps:$4 sm:$0xff]  }
 0x35e   : > { %7259 = vmatprep.subr.bf16.mxu0 %v10683_v61  ;;  %7915 = vmatprep.subr.bf16.mxu1 %v10686_v62  ;;  %v10770_v61 = vld [vmem:[%s11290_s8 + $0x1a8c] ss:$16 sps:$4 sm:$0xff]   ;;  %v10765_v62 = vld [vmem:[%s11290_s8 + $0x1a80] ss:$16 sps:$4 sm:$0xff]  }
 0x361   : > { %7260 = vmatpush1.bf16.msra.mxu0 %v10681_v63  ;;  %7916 = vmatpush1.bf16.msra.mxu1 %v10684_v0  ;;  %v10768_v63 = vld [vmem:[%s11290_s8 + $0x1a88] ss:$16 sps:$4 sm:$0xff]   ;;  %v10773_v0 = vld [vmem:[%s11290_s8 + $0x1aa4] ss:$16 sps:$4 sm:$0xff]  }
 0x362   : > { %7261 = vmatprep.subr.bf16.mxu0 %v10689_v1  ;;  %7917 = vmatprep.subr.bf16.mxu1 %v10692_v2  ;;  %v10776_v1 = vld [vmem:[%s11290_s8 + $0x1aac] ss:$16 sps:$4 sm:$0xff]   ;;  %v10771_v2 = vld [vmem:[%s11290_s8 + $0x1aa0] ss:$16 sps:$4 sm:$0xff]  }
 0x365   : > { %7262 = vmatpush1.bf16.msra.mxu0 %v10687_v3  ;;  %7918 = vmatpush1.bf16.msra.mxu1 %v10690_v55  ;;  %v10774_v3 = vld [vmem:[%s11290_s8 + $0x1aa8] ss:$16 sps:$4 sm:$0xff]   ;;  %v10779_v55 = vld [vmem:[%s11290_s8 + $0x1ac4] ss:$16 sps:$4 sm:$0xff]  }
 0x366   : > { %7263 = vmatprep.subr.bf16.mxu0 %v10695_v7  ;;  %7919 = vmatprep.subr.bf16.mxu1 %v10698_v8  ;;  %v10782_v7 = vld [vmem:[%s11290_s8 + $0x1acc] ss:$16 sps:$4 sm:$0xff]   ;;  %v10777_v8 = vld [vmem:[%s11290_s8 + $0x1ac0] ss:$16 sps:$4 sm:$0xff]  }
 0x369   : > { %7264 = vmatpush1.bf16.msra.mxu0 %v10693_v42  ;;  %7920 = vmatpush1.bf16.msra.mxu1 %v10696_v9  ;;  %v10780_v42 = vld [vmem:[%s11290_s8 + $0x1ac8] ss:$16 sps:$4 sm:$0xff]   ;;  %v313_v9 = vld [vmem:[%s11303_s6 + $0x38] sm:$0xff] }
 0x36a   : > { %7265 = vmatprep.subr.bf16.mxu0 %v10701_v10  ;;  %7921 = vmatprep.subr.bf16.mxu1 %v10704_v11  ;;  %v321_v10 = vld [vmem:[%s11308_s12 + $0x38] sm:$0xff] }
 0x36b   : > { %v10785_v11 = vld [vmem:[%s11290_s8 + $0x1ae4] ss:$16 sps:$4 sm:$0xff]  }
 0x36d   : > { %7266 = vmatpush1.bf16.msra.mxu0 %v10699_v12  ;;  %7922 = vmatpush1.bf16.msra.mxu1 %v10702_v14  ;;  %v10788_v12 = vld [vmem:[%s11290_s8 + $0x1aec] ss:$16 sps:$4 sm:$0xff]   ;;  %v329_v14 = vmul.f32 %v313_v9, %v313_v9  ;;  %v10857_v9 = vld [vmem:[%s11290_s8 + $0x1c64] ss:$16 sps:$4 sm:$0xff]  }
 0x36e   : > { %7267 = vmatprep.subr.bf16.mxu0 %v10707_v44  ;;  %7923 = vmatprep.subr.bf16.mxu1 %v10710_v16  ;;  %v337_v44 = vmul.f32 %v321_v10, %v321_v10  ;;  %v10783_v16 = vld [vmem:[%s11290_s8 + $0x1ae0] ss:$16 sps:$4 sm:$0xff]   ;;  %v10860_v10 = vld [vmem:[%s11290_s8 + $0x1c6c] ss:$16 sps:$4 sm:$0xff]  }
 0x371   : > { %7268 = vmatpush1.bf16.msra.mxu0 %v10705_v17  ;;  %7924 = vmatpush1.bf16.msra.mxu1 %v10708_v53  ;;  %v10786_v17 = vld [vmem:[%s11290_s8 + $0x1ae8] ss:$16 sps:$4 sm:$0xff]   ;;  %v10791_v53 = vld [vmem:[%s11290_s8 + $0x1b04] ss:$16 sps:$4 sm:$0xff]  }
 0x372   : > { %7269 = vmatprep.subr.bf16.mxu0 %v10713_v18  ;;  %7925 = vmatprep.subr.bf16.mxu1 %v10716_v19  ;;  %v10794_v18 = vld [vmem:[%s11290_s8 + $0x1b0c] ss:$16 sps:$4 sm:$0xff]   ;;  %v345_v19 = vadd.f32 %v337_v44, %v329_v14  ;;  %v10863_v14 = vld [vmem:[%s11290_s8 + $0x1c84] ss:$16 sps:$4 sm:$0xff]  }
 0x373   : > { %v10866_v44 = vld [vmem:[%s11290_s8 + $0x1c8c] ss:$16 sps:$4 sm:$0xff]  }
 0x374   : > { %11043 = vrsqrt.f32 %v345_v19  ;;  %vm397_vm14 = vcmp.eq.f32.partialorder %v345_v19, inf  ;;  %vm399_vm15 = vcmp.eq.f32.partialorder %v345_v19, 0.0 }
 0x375   : > { %7270 = vmatpush1.bf16.msra.mxu0 %v10711_v21  ;;  %7926 = vmatpush1.bf16.msra.mxu1 %v10714_v23  ;;  %v10789_v21 = vld [vmem:[%s11290_s8 + $0x1b00] ss:$16 sps:$4 sm:$0xff]   ;;  %v10792_v23 = vld [vmem:[%s11290_s8 + $0x1b08] ss:$16 sps:$4 sm:$0xff]  }
 0x376   : > { %7271 = vmatprep.subr.bf16.mxu0 %v10719_v24  ;;  %7927 = vmatprep.subr.bf16.mxu1 %v10722_v25  ;;  %v10797_v24 = vld [vmem:[%s11290_s8 + $0x1b24] ss:$16 sps:$4 sm:$0xff]   ;;  %v10800_v25 = vld [vmem:[%s11290_s8 + $0x1b2c] ss:$16 sps:$4 sm:$0xff]  }
 0x379   : > { %7272 = vmatpush1.bf16.msra.mxu0 %v10717_v26  ;;  %7928 = vmatpush1.bf16.msra.mxu1 %v10720_v27  ;;  %v10795_v26 = vld [vmem:[%s11290_s8 + $0x1b20] ss:$16 sps:$4 sm:$0xff]   ;;  %v10798_v27 = vld [vmem:[%s11290_s8 + $0x1b28] ss:$16 sps:$4 sm:$0xff]  }
 0x37a   : > { %7273 = vmatprep.subr.bf16.mxu0 %v10725_v28  ;;  %7929 = vmatprep.subr.bf16.mxu1 %v10728_v29  ;;  %v10803_v28 = vld [vmem:[%s11290_s8 + $0x1b44] ss:$16 sps:$4 sm:$0xff]   ;;  %v10806_v29 = vld [vmem:[%s11290_s8 + $0x1b4c] ss:$16 sps:$4 sm:$0xff]  }
 0x37d   : > { %7274 = vmatpush1.bf16.msra.mxu0 %v10723_v59  ;;  %7930 = vmatpush1.bf16.msra.mxu1 %v10726_v32  ;;  %v10801_v59 = vld [vmem:[%s11290_s8 + $0x1b40] ss:$16 sps:$4 sm:$0xff]   ;;  %v10804_v32 = vld [vmem:[%s11290_s8 + $0x1b48] ss:$16 sps:$4 sm:$0xff]  }
 0x37e   : > { %7275 = vmatprep.subr.bf16.mxu0 %v10731_v4  ;;  %7931 = vmatprep.subr.bf16.mxu1 %v10734_v33  ;;  %v10809_v4 = vld [vmem:[%s11290_s8 + $0x1b64] ss:$16 sps:$4 sm:$0xff]   ;;  %v10812_v33 = vld [vmem:[%s11290_s8 + $0x1b6c] ss:$16 sps:$4 sm:$0xff]  }
 0x381   : > { %7276 = vmatpush1.bf16.msra.mxu0 %v10729_v35  ;;  %7932 = vmatpush1.bf16.msra.mxu1 %v10732_v36  ;;  %v10810_v35 = vld [vmem:[%s11290_s8 + $0x1b68] ss:$16 sps:$4 sm:$0xff]   ;;  %v11044_v36 = vpop.eup %11043 }
 0x382   : > { %7277 = vmatprep.subr.bf16.mxu0 %v10737_v37  ;;  %7933 = vmatprep.subr.bf16.mxu1 %v10740_v38  ;;  %v10815_v37 = vld [vmem:[%s11290_s8 + $0x1b84] ss:$16 sps:$4 sm:$0xff]   ;;  %v10818_v38 = vld [vmem:[%s11290_s8 + $0x1b8c] ss:$16 sps:$4 sm:$0xff]  }
 0x385   : > { %7278 = vmatpush1.bf16.msra.mxu0 %v10735_v6  ;;  %7934 = vmatpush1.bf16.msra.mxu1 %v10738_v40  ;;  %v10813_v6 = vld [vmem:[%s11290_s8 + $0x1b80] ss:$16 sps:$4 sm:$0xff]   ;;  %v10816_v40 = vld [vmem:[%s11290_s8 + $0x1b88] ss:$16 sps:$4 sm:$0xff]  }
 0x386   : > { %7288 = vmatprep.subr.bf16.mxu0 %v10743_v22  ;;  %7944 = vmatprep.subr.bf16.mxu1 %v10746_v15  ;;  %v396_v22 = vmul.f32 %v11044_v36, %v345_v19  ;;  %v10821_v15 = vld [vmem:[%s11290_s8 + $0x1ba4] ss:$16 sps:$4 sm:$0xff]   ;;  %v10896_v36 = vld [vmem:[%s11290_s8 + $0x1d2c] ss:$16 sps:$4 sm:$0xff]  }
 0x388   : > { %7280 = vmatmul.mubr.bf16.vlgmr.msra.gmra.mrb[0].mxu0 %v602_v43  ;;  %7936 = vmatmul.mubr.bf16.vlgmr.msra.gmra.mrb[0].mxu1 %v602_v43  ;;  %v400_v43 = vand.u32 2147483648, %v345_v19 }
 0x389   : > { %7289 = vmatpush1.bf16.msra.mxu0 %v10741_v45  ;;  %7945 = vmatpush1.bf16.msra.mxu1 %v10744_v46  ;;  %v10819_v45 = vld [vmem:[%s11290_s8 + $0x1ba0] ss:$16 sps:$4 sm:$0xff]   ;;  %v10822_v46 = vld [vmem:[%s11290_s8 + $0x1ba8] ss:$16 sps:$4 sm:$0xff]  }
 0x38a   : > { %7290 = vmatprep.subr.bf16.mxu0 %v10749_v47  ;;  %7946 = vmatprep.subr.bf16.mxu1 %v10752_v48  ;;  %v398_v47 = vsel %vm397_vm14, %v345_v19, %v396_v22  ;;  %v10827_v48 = vld [vmem:[%s11290_s8 + $0x1bc4] ss:$16 sps:$4 sm:$0xff]   ;;  %v10867_v19 = vld [vmem:[%s11290_s8 + $0x1ca0] ss:$16 sps:$4 sm:$0xff]  }
 0x38b   : > { %7320 = vmatprep.mubr.bf16.mxu0 %v605_v49  ;;  %7976 = vmatprep.mubr.bf16.mxu1 %v605_v49  ;;  %v10830_v49 = vld [vmem:[%s11290_s8 + $0x1bcc] ss:$16 sps:$4 sm:$0xff]   ;;  %v10897_v22 = vld [vmem:[%s11290_s8 + $0x1d40] ss:$16 sps:$4 sm:$0xff]  }
 0x38d   : > { %7291 = vmatpush1.bf16.msra.mxu0 %v10747_v31  ;;  %7947 = vmatpush1.bf16.msra.mxu1 %v10750_v50  ;;  %v12352_v31 = vsel %vm399_vm15, %v400_v43, %v398_v47  ;;  %v10825_v50 = vld [vmem:[%s11290_s8 + $0x1bc0] ss:$16 sps:$4 sm:$0xff]   ;;  %v10908_v43 = vld [vmem:[%s11290_s8 + $0x1d6c] ss:$16 sps:$4 sm:$0xff]   ;;  %v10911_v47 = vld [vmem:[%s11290_s8 + $0x1d84] ss:$16 sps:$4 sm:$0xff]  }
 0x38e   : > { %7292 = vmatprep.subr.bf16.mxu0 %v10755_v51  ;;  %7948 = vmatprep.subr.bf16.mxu1 %v10758_v52  ;;  %v10828_v51 = vld [vmem:[%s11290_s8 + $0x1bc8] ss:$16 sps:$4 sm:$0xff]   ;;  %v10833_v52 = vld [vmem:[%s11290_s8 + $0x1be4] ss:$16 sps:$4 sm:$0xff]  }
 0x391   : > { %7293 = vmatpush1.bf16.msra.mxu0 %v10753_v20  ;;  %7949 = vmatpush1.bf16.msra.mxu1 %v10756_v54  ;;  %v10836_v20 = vld [vmem:[%s11290_s8 + $0x1bec] ss:$16 sps:$4 sm:$0xff]   ;;  %v12360_v54 = vrot.slane %v12352_v31, %v11389_v13 }
 0x392   : > { %7294 = vmatprep.subr.bf16.mxu0 %v10761_v56  ;;  %7950 = vmatprep.subr.bf16.mxu1 %v10764_v30  ;;  %v10831_v56 = vld [vmem:[%s11290_s8 + $0x1be0] ss:$16 sps:$4 sm:$0xff]   ;;  %v10834_v30 = vld [vmem:[%s11290_s8 + $0x1be8] ss:$16 sps:$4 sm:$0xff]  }
 0x395   : > { %7295 = vmatpush1.bf16.msra.mxu0 %v10759_v57  ;;  %7951 = vmatpush1.bf16.msra.mxu1 %v10762_v58  ;;  %v10839_v57 = vld [vmem:[%s11290_s8 + $0x1c04] ss:$16 sps:$4 sm:$0xff]   ;;  %v10842_v58 = vld [vmem:[%s11290_s8 + $0x1c0c] ss:$16 sps:$4 sm:$0xff]  }
 0x396   : > { %7296 = vmatprep.subr.bf16.mxu0 %v10767_v60  ;;  %7952 = vmatprep.subr.bf16.mxu1 %v10770_v61  ;;  %v544_v60 = vcombine.high %v12360_v54, %v12360_v54  ;;  %v604_v61 = vpack.c.bf16 %v12284_v39, %v12284_v39  ;;  %v10843_v39 = vld [vmem:[%s11290_s8 + $0x1c20] ss:$16 sps:$4 sm:$0xff]  }
 0x399   : > { %7297 = vmatpush1.bf16.msra.mxu0 %v10765_v62  ;;  %7953 = vmatpush1.bf16.msra.mxu1 %v10768_v63  ;;  %v10837_v62 = vld [vmem:[%s11290_s8 + $0x1c00] ss:$16 sps:$4 sm:$0xff]   ;;  %v10840_v63 = vld [vmem:[%s11290_s8 + $0x1c08] ss:$16 sps:$4 sm:$0xff]  }
 0x39a   : > { %7298 = vmatprep.subr.bf16.mxu0 %v10773_v0  ;;  %7954 = vmatprep.subr.bf16.mxu1 %v10776_v1  ;;  %v10845_v0 = vld [vmem:[%s11290_s8 + $0x1c24] ss:$16 sps:$4 sm:$0xff]   ;;  %v10848_v1 = vld [vmem:[%s11290_s8 + $0x1c2c] ss:$16 sps:$4 sm:$0xff]  }
 0x39d   : > { %7299 = vmatpush1.bf16.msra.mxu0 %v10771_v2  ;;  %7955 = vmatpush1.bf16.msra.mxu1 %v10774_v3  ;;  %v607_v2 = vpack.c.bf16 %v544_v60, %v544_v60  ;;  %v10846_v3 = vld [vmem:[%s11290_s8 + $0x1c28] ss:$16 sps:$4 sm:$0xff]   ;;  %v10921_v60 = vld [vmem:[%s11290_s8 + $0x1dc0] ss:$16 sps:$4 sm:$0xff]  }
 0x39e   : > { %7300 = vmatprep.subr.bf16.mxu0 %v10779_v55  ;;  %7956 = vmatprep.subr.bf16.mxu1 %v10782_v7  ;;  %v10851_v55 = vld [vmem:[%s11290_s8 + $0x1c44] ss:$16 sps:$4 sm:$0xff]   ;;  %v10854_v7 = vld [vmem:[%s11290_s8 + $0x1c4c] ss:$16 sps:$4 sm:$0xff]  }
 0x3a1   : > { %7301 = vmatpush1.bf16.msra.mxu0 %v10777_v8  ;;  %7957 = vmatpush1.bf16.msra.mxu1 %v10780_v42  ;;  %v10849_v8 = vld [vmem:[%s11290_s8 + $0x1c40] ss:$16 sps:$4 sm:$0xff]   ;;  %v10852_v42 = vld [vmem:[%s11290_s8 + $0x1c48] ss:$16 sps:$4 sm:$0xff]  }
 0x3a2   : > { %7302 = vmatprep.subr.bf16.mxu0 %v10785_v11  ;;  %7958 = vmatprep.subr.bf16.mxu1 %v10788_v12  ;;  %v10855_v11 = vld [vmem:[%s11290_s8 + $0x1c60] ss:$16 sps:$4 sm:$0xff]   ;;  %v10858_v12 = vld [vmem:[%s11290_s8 + $0x1c68] ss:$16 sps:$4 sm:$0xff]  }
 0x3a5   : > { %7303 = vmatpush1.bf16.msra.mxu0 %v10783_v16  ;;  %7959 = vmatpush1.bf16.msra.mxu1 %v10786_v17  ;;  %v10861_v16 = vld [vmem:[%s11290_s8 + $0x1c80] ss:$16 sps:$4 sm:$0xff]   ;;  %v10864_v17 = vld [vmem:[%s11290_s8 + $0x1c88] ss:$16 sps:$4 sm:$0xff]  }
 0x3a6   : > { %7304 = vmatprep.subr.bf16.mxu0 %v10791_v53  ;;  %7960 = vmatprep.subr.bf16.mxu1 %v10794_v18  ;;  %v10869_v53 = vld [vmem:[%s11290_s8 + $0x1ca4] ss:$16 sps:$4 sm:$0xff]   ;;  %v10872_v18 = vld [vmem:[%s11290_s8 + $0x1cac] ss:$16 sps:$4 sm:$0xff]  }
 0x3a9   : > { %7305 = vmatpush1.bf16.msra.mxu0 %v10789_v21  ;;  %7961 = vmatpush1.bf16.msra.mxu1 %v10792_v23  ;;  %v10870_v21 = vld [vmem:[%s11290_s8 + $0x1ca8] ss:$16 sps:$4 sm:$0xff]   ;;  %v10875_v23 = vld [vmem:[%s11290_s8 + $0x1cc4] ss:$16 sps:$4 sm:$0xff]  }
 0x3aa   : > { %7306 = vmatprep.subr.bf16.mxu0 %v10797_v24  ;;  %7962 = vmatprep.subr.bf16.mxu1 %v10800_v25  ;;  %v10878_v24 = vld [vmem:[%s11290_s8 + $0x1ccc] ss:$16 sps:$4 sm:$0xff]   ;;  %v10873_v25 = vld [vmem:[%s11290_s8 + $0x1cc0] ss:$16 sps:$4 sm:$0xff]  }
 0x3ad   : > { %7307 = vmatpush1.bf16.msra.mxu0 %v10795_v26  ;;  %7963 = vmatpush1.bf16.msra.mxu1 %v10798_v27  ;;  %v10876_v26 = vld [vmem:[%s11290_s8 + $0x1cc8] ss:$16 sps:$4 sm:$0xff]   ;;  %v10881_v27 = vld [vmem:[%s11290_s8 + $0x1ce4] ss:$16 sps:$4 sm:$0xff]  }
 0x3ae   : > { %7308 = vmatprep.subr.bf16.mxu0 %v10803_v28  ;;  %7964 = vmatprep.subr.bf16.mxu1 %v10806_v29  ;;  %v10884_v28 = vld [vmem:[%s11290_s8 + $0x1cec] ss:$16 sps:$4 sm:$0xff]   ;;  %v10879_v29 = vld [vmem:[%s11290_s8 + $0x1ce0] ss:$16 sps:$4 sm:$0xff]  }
 0x3b1   : > { %7309 = vmatpush1.bf16.msra.mxu0 %v10801_v59  ;;  %7965 = vmatpush1.bf16.msra.mxu1 %v10804_v32  ;;  %v10882_v59 = vld [vmem:[%s11290_s8 + $0x1ce8] ss:$16 sps:$4 sm:$0xff]   ;;  %v10887_v32 = vld [vmem:[%s11290_s8 + $0x1d04] ss:$16 sps:$4 sm:$0xff]  }
 0x3b2   : > { %7310 = vmatprep.subr.bf16.mxu0 %v10809_v4  ;;  %7966 = vmatprep.subr.bf16.mxu1 %v10812_v33  ;;  %v10890_v4 = vld [vmem:[%s11290_s8 + $0x1d0c] ss:$16 sps:$4 sm:$0xff]   ;;  %v10885_v33 = vld [vmem:[%s11290_s8 + $0x1d00] ss:$16 sps:$4 sm:$0xff]  }
 0x3b5   : > { %7311 = vmatpush1.bf16.msra.mxu0 %v10807_v34  ;;  %7967 = vmatpush1.bf16.msra.mxu1 %v10810_v35  ;;  %v10888_v34 = vld [vmem:[%s11290_s8 + $0x1d08] ss:$16 sps:$4 sm:$0xff]   ;;  %v10893_v35 = vld [vmem:[%s11290_s8 + $0x1d24] ss:$16 sps:$4 sm:$0xff]  }
 0x3b6   : > { %7312 = vmatprep.subr.bf16.mxu0 %v10815_v37  ;;  %7968 = vmatprep.subr.bf16.mxu1 %v10818_v38  ;;  %v10891_v37 = vld [vmem:[%s11290_s8 + $0x1d20] ss:$16 sps:$4 sm:$0xff]   ;;  %v10894_v38 = vld [vmem:[%s11290_s8 + $0x1d28] ss:$16 sps:$4 sm:$0xff]  }
 0x3b9   : > { %7313 = vmatpush1.bf16.msra.mxu0 %v10813_v6  ;;  %7969 = vmatpush1.bf16.msra.mxu1 %v10816_v40  ;;  %v10899_v6 = vld [vmem:[%s11290_s8 + $0x1d44] ss:$16 sps:$4 sm:$0xff]   ;;  %v10902_v40 = vld [vmem:[%s11290_s8 + $0x1d4c] ss:$16 sps:$4 sm:$0xff]  }
 0x3ba   : > { %7314 = vmatprep.subr.bf16.mxu0 %v10821_v15  ;;  %7970 = vmatprep.subr.bf16.mxu1 %v10824_v41  ;;  %v10900_v15 = vld [vmem:[%s11290_s8 + $0x1d48] ss:$16 sps:$4 sm:$0xff]   ;;  %v10905_v41 = vld [vmem:[%s11290_s8 + $0x1d64] ss:$16 sps:$4 sm:$0xff]  }
 0x3bd   : > { %7315 = vmatpush1.bf16.msra.mxu0 %v10819_v45  ;;  %7971 = vmatpush1.bf16.msra.mxu1 %v10822_v46  ;;  %v10903_v45 = vld [vmem:[%s11290_s8 + $0x1d60] ss:$16 sps:$4 sm:$0xff]   ;;  %v10906_v46 = vld [vmem:[%s11290_s8 + $0x1d68] ss:$16 sps:$4 sm:$0xff]  }
 0x3be   : > { %7316 = vmatprep.subr.bf16.mxu0 %v10827_v48  ;;  %7972 = vmatprep.subr.bf16.mxu1 %v10830_v49  ;;  %v10914_v48 = vld [vmem:[%s11290_s8 + $0x1d8c] ss:$16 sps:$4 sm:$0xff]   ;;  %v10909_v49 = vld [vmem:[%s11290_s8 + $0x1d80] ss:$16 sps:$4 sm:$0xff]  }
 0x3c1   : > { %7317 = vmatpush1.bf16.msra.mxu0 %v10825_v50  ;;  %7973 = vmatpush1.bf16.msra.mxu1 %v10828_v51  ;;  %v10912_v50 = vld [vmem:[%s11290_s8 + $0x1d88] ss:$16 sps:$4 sm:$0xff]   ;;  %v10917_v51 = vld [vmem:[%s11290_s8 + $0x1da4] ss:$16 sps:$4 sm:$0xff]  }
 0x3c2   : > { %7318 = vmatprep.subr.bf16.mxu0 %v10833_v52  ;;  %7974 = vmatprep.subr.bf16.mxu1 %v10836_v20  ;;  %v10920_v52 = vld [vmem:[%s11290_s8 + $0x1dac] ss:$16 sps:$4 sm:$0xff]   ;;  %v10915_v20 = vld [vmem:[%s11290_s8 + $0x1da0] ss:$16 sps:$4 sm:$0xff]  }
 0x3c5   : > { %7319 = vmatpush1.bf16.msra.mxu0 %v10831_v56  ;;  %7975 = vmatpush1.bf16.msra.mxu1 %v10834_v30  ;;  %v10918_v56 = vld [vmem:[%s11290_s8 + $0x1da8] ss:$16 sps:$4 sm:$0xff]   ;;  %v10923_v30 = vld [vmem:[%s11290_s8 + $0x1dc4] ss:$16 sps:$4 sm:$0xff]  }
 0x3c6   : > { %7329 = vmatprep.subr.bf16.mxu0 %v10839_v57  ;;  %7985 = vmatprep.subr.bf16.mxu1 %v10842_v58  ;;  %v10926_v57 = vld [vmem:[%s11290_s8 + $0x1dcc] ss:$16 sps:$4 sm:$0xff]   ;;  %v529_v58 = vcombine.high %v12352_v31, %v12352_v31  ;;  %v10927_v31 = vld [vmem:[%s11290_s8 + $0x1de0] ss:$16 sps:$4 sm:$0xff]  }
 0x3c8   : > { %7321 = vmatmul.mubr.bf16.vlgmr.msra.gmra.mrb[0].mxu0 %v604_v61  ;;  %7977 = vmatmul.mubr.bf16.vlgmr.msra.gmra.mrb[0].mxu1 %v604_v61  ;;  %v10924_v61 = vld [vmem:[%s11290_s8 + $0x1dc8] ss:$16 sps:$4 sm:$0xff]  }
 0x3c9   : > { %7330 = vmatpush1.bf16.msra.mxu0 %v10837_v62  ;;  %7986 = vmatpush1.bf16.msra.mxu1 %v10840_v63  ;;  %v10929_v62 = vld [vmem:[%s11290_s8 + $0x1de4] ss:$16 sps:$4 sm:$0xff]   ;;  %v10932_v63 = vld [vmem:[%s11290_s8 + $0x1dec] ss:$16 sps:$4 sm:$0xff]  }
 0x3ca   : > { %7331 = vmatprep.subr.bf16.mxu0 %v10845_v0  ;;  %7987 = vmatprep.subr.bf16.mxu1 %v10848_v1  ;;  %v12433_v0 = vrot.slane %v529_v58, %v11389_v13  ;;  %v10930_v1 = vld [vmem:[%s11290_s8 + $0x1de8] ss:$16 sps:$4 sm:$0xff]  }
 0x3cb   : > { %7361 = vmatprep.mubr.bf16.mxu0 %v607_v2  ;;  %8017 = vmatprep.mubr.bf16.mxu1 %v607_v2  ;;  %v10935_v2 = vld [vmem:[%s11290_s8 + $0x1e04] ss:$16 sps:$4 sm:$0xff]   ;;  %v11008_v58 = vld [vmem:[%s11290_s8 + $0x1f88] ss:$16 sps:$4 sm:$0xff]  }
 0x3cd   : > { %7332 = vmatpush1.bf16.msra.mxu0 %v10843_v39  ;;  %7988 = vmatpush1.bf16.msra.mxu1 %v10846_v3  ;;  %v10938_v39 = vld [vmem:[%s11290_s8 + $0x1e0c] ss:$16 sps:$4 sm:$0xff]   ;;  %v545_v3 = vcombine.high %v12433_v0, %v12433_v0 }
 0x3ce   : > { %7333 = vmatprep.subr.bf16.mxu0 %v10851_v55  ;;  %7989 = vmatprep.subr.bf16.mxu1 %v10854_v7  ;;  %v606_v55 = vpack.c.bf16 %v12360_v54, %v12360_v54  ;;  %v10933_v7 = vld [vmem:[%s11290_s8 + $0x1e00] ss:$16 sps:$4 sm:$0xff]  }
 0x3cf   : > { %v10939_v54 = vld [vmem:[%s11290_s8 + $0x1e20] ss:$16 sps:$4 sm:$0xff]  }
 0x3d1   : > { %7334 = vmatpush1.bf16.msra.mxu0 %v10849_v8  ;;  %7990 = vmatpush1.bf16.msra.mxu1 %v10852_v42  ;;  %v10936_v8 = vld [vmem:[%s11290_s8 + $0x1e08] ss:$16 sps:$4 sm:$0xff]   ;;  %v10941_v42 = vld [vmem:[%s11290_s8 + $0x1e24] ss:$16 sps:$4 sm:$0xff]  }
 0x3d2   : > { %7335 = vmatprep.subr.bf16.mxu0 %v10857_v9  ;;  %7991 = vmatprep.subr.bf16.mxu1 %v10860_v10  ;;  %v10944_v9 = vld [vmem:[%s11290_s8 + $0x1e2c] ss:$16 sps:$4 sm:$0xff]   ;;  %v609_v10 = vpack.c.bf16 %v545_v3, %v545_v3  ;;  %v11025_v3 = vld [vmem:[%s11290_s8 + $0x1fe4] ss:$16 sps:$4 sm:$0xff]  }
 0x3d5   : > { %7336 = vmatpush1.bf16.msra.mxu0 %v10855_v11  ;;  %7992 = vmatpush1.bf16.msra.mxu1 %v10858_v12  ;;  %v10942_v11 = vld [vmem:[%s11290_s8 + $0x1e28] ss:$16 sps:$4 sm:$0xff]   ;;  %v10947_v12 = vld [vmem:[%s11290_s8 + $0x1e44] ss:$16 sps:$4 sm:$0xff]  }
 0x3d6   : > { %7337 = vmatprep.subr.bf16.mxu0 %v10863_v14  ;;  %7993 = vmatprep.subr.bf16.mxu1 %v10866_v44  ;;  %v10950_v14 = vld [vmem:[%s11290_s8 + $0x1e4c] ss:$16 sps:$4 sm:$0xff]   ;;  %v10945_v44 = vld [vmem:[%s11290_s8 + $0x1e40] ss:$16 sps:$4 sm:$0xff]  }
 0x3d9   : > { %7338 = vmatpush1.bf16.msra.mxu0 %v10861_v16  ;;  %7994 = vmatpush1.bf16.msra.mxu1 %v10864_v17  ;;  %v10948_v16 = vld [vmem:[%s11290_s8 + $0x1e48] ss:$16 sps:$4 sm:$0xff]   ;;  %v10953_v17 = vld [vmem:[%s11290_s8 + $0x1e64] ss:$16 sps:$4 sm:$0xff]  }
 0x3da   : > { %7339 = vmatprep.subr.bf16.mxu0 %v10869_v53  ;;  %7995 = vmatprep.subr.bf16.mxu1 %v10872_v18  ;;  %v10956_v53 = vld [vmem:[%s11290_s8 + $0x1e6c] ss:$16 sps:$4 sm:$0xff]   ;;  %v10951_v18 = vld [vmem:[%s11290_s8 + $0x1e60] ss:$16 sps:$4 sm:$0xff]  }
 0x3dd   : > { %7340 = vmatpush1.bf16.msra.mxu0 %v10867_v19  ;;  %7996 = vmatpush1.bf16.msra.mxu1 %v10870_v21  ;;  %v10954_v19 = vld [vmem:[%s11290_s8 + $0x1e68] ss:$16 sps:$4 sm:$0xff]   ;;  %v10959_v21 = vld [vmem:[%s11290_s8 + $0x1e84] ss:$16 sps:$4 sm:$0xff]  }
 0x3de   : > { %7341 = vmatprep.subr.bf16.mxu0 %v10875_v23  ;;  %7997 = vmatprep.subr.bf16.mxu1 %v10878_v24  ;;  %v10962_v23 = vld [vmem:[%s11290_s8 + $0x1e8c] ss:$16 sps:$4 sm:$0xff]   ;;  %v10957_v24 = vld [vmem:[%s11290_s8 + $0x1e80] ss:$16 sps:$4 sm:$0xff]  }
 0x3e1   : > { %7342 = vmatpush1.bf16.msra.mxu0 %v10873_v25  ;;  %7998 = vmatpush1.bf16.msra.mxu1 %v10876_v26  ;;  %v10960_v25 = vld [vmem:[%s11290_s8 + $0x1e88] ss:$16 sps:$4 sm:$0xff]   ;;  %v10965_v26 = vld [vmem:[%s11290_s8 + $0x1ea4] ss:$16 sps:$4 sm:$0xff]  }
 0x3e2   : > { %7343 = vmatprep.subr.bf16.mxu0 %v10881_v27  ;;  %7999 = vmatprep.subr.bf16.mxu1 %v10884_v28  ;;  %v10968_v27 = vld [vmem:[%s11290_s8 + $0x1eac] ss:$16 sps:$4 sm:$0xff]   ;;  %v10963_v28 = vld [vmem:[%s11290_s8 + $0x1ea0] ss:$16 sps:$4 sm:$0xff]  }
 0x3e5   : > { %7344 = vmatpush1.bf16.msra.mxu0 %v10879_v29  ;;  %8000 = vmatpush1.bf16.msra.mxu1 %v10882_v59  ;;  %v10966_v29 = vld [vmem:[%s11290_s8 + $0x1ea8] ss:$16 sps:$4 sm:$0xff]   ;;  %v10971_v59 = vld [vmem:[%s11290_s8 + $0x1ec4] ss:$16 sps:$4 sm:$0xff]  }
 0x3e6   : > { %7345 = vmatprep.subr.bf16.mxu0 %v10887_v32  ;;  %8001 = vmatprep.subr.bf16.mxu1 %v10890_v4  ;;  %v10974_v32 = vld [vmem:[%s11290_s8 + $0x1ecc] ss:$16 sps:$4 sm:$0xff]   ;;  %v10969_v4 = vld [vmem:[%s11290_s8 + $0x1ec0] ss:$16 sps:$4 sm:$0xff]  }
 0x3e9   : > { %7346 = vmatpush1.bf16.msra.mxu0 %v10885_v33  ;;  %8002 = vmatpush1.bf16.msra.mxu1 %v10888_v34  ;;  %v10972_v33 = vld [vmem:[%s11290_s8 + $0x1ec8] ss:$16 sps:$4 sm:$0xff]   ;;  %v10977_v34 = vld [vmem:[%s11290_s8 + $0x1ee4] ss:$16 sps:$4 sm:$0xff]  }
 0x3ea   : > { %7347 = vmatprep.subr.bf16.mxu0 %v10893_v35  ;;  %8003 = vmatprep.subr.bf16.mxu1 %v10896_v36  ;;  %v10980_v35 = vld [vmem:[%s11290_s8 + $0x1eec] ss:$16 sps:$4 sm:$0xff]   ;;  %v10975_v36 = vld [vmem:[%s11290_s8 + $0x1ee0] ss:$16 sps:$4 sm:$0xff]  }
 0x3ed   : > { %7348 = vmatpush1.bf16.msra.mxu0 %v10891_v37  ;;  %8004 = vmatpush1.bf16.msra.mxu1 %v10894_v38  ;;  %v10978_v37 = vld [vmem:[%s11290_s8 + $0x1ee8] ss:$16 sps:$4 sm:$0xff]   ;;  %v10983_v38 = vld [vmem:[%s11290_s8 + $0x1f04] ss:$16 sps:$4 sm:$0xff]  }
 0x3ee   : > { %7349 = vmatprep.subr.bf16.mxu0 %v10899_v6  ;;  %8005 = vmatprep.subr.bf16.mxu1 %v10902_v40  ;;  %v10986_v6 = vld [vmem:[%s11290_s8 + $0x1f0c] ss:$16 sps:$4 sm:$0xff]   ;;  %v10981_v40 = vld [vmem:[%s11290_s8 + $0x1f00] ss:$16 sps:$4 sm:$0xff]  }
 0x3f1   : > { %7350 = vmatpush1.bf16.msra.mxu0 %v10897_v22  ;;  %8006 = vmatpush1.bf16.msra.mxu1 %v10900_v15  ;;  %v10984_v22 = vld [vmem:[%s11290_s8 + $0x1f08] ss:$16 sps:$4 sm:$0xff]   ;;  %v10989_v15 = vld [vmem:[%s11290_s8 + $0x1f24] ss:$16 sps:$4 sm:$0xff]  }
 0x3f2   : > { %7351 = vmatprep.subr.bf16.mxu0 %v10905_v41  ;;  %8007 = vmatprep.subr.bf16.mxu1 %v10908_v43  ;;  %v10992_v41 = vld [vmem:[%s11290_s8 + $0x1f2c] ss:$16 sps:$4 sm:$0xff]   ;;  %v10987_v43 = vld [vmem:[%s11290_s8 + $0x1f20] ss:$16 sps:$4 sm:$0xff]  }
 0x3f5   : > { %7352 = vmatpush1.bf16.msra.mxu0 %v10903_v45  ;;  %8008 = vmatpush1.bf16.msra.mxu1 %v10906_v46  ;;  %v10990_v45 = vld [vmem:[%s11290_s8 + $0x1f28] ss:$16 sps:$4 sm:$0xff]   ;;  %v10995_v46 = vld [vmem:[%s11290_s8 + $0x1f44] ss:$16 sps:$4 sm:$0xff]  }
 0x3f6   : > { %7353 = vmatprep.subr.bf16.mxu0 %v10911_v47  ;;  %8009 = vmatprep.subr.bf16.mxu1 %v10914_v48  ;;  %v10998_v47 = vld [vmem:[%s11290_s8 + $0x1f4c] ss:$16 sps:$4 sm:$0xff]   ;;  %v10993_v48 = vld [vmem:[%s11290_s8 + $0x1f40] ss:$16 sps:$4 sm:$0xff]  }
 0x3f9   : > { %7354 = vmatpush1.bf16.msra.mxu0 %v10909_v49  ;;  %8010 = vmatpush1.bf16.msra.mxu1 %v10912_v50  ;;  %v10996_v49 = vld [vmem:[%s11290_s8 + $0x1f48] ss:$16 sps:$4 sm:$0xff]   ;;  %v11001_v50 = vld [vmem:[%s11290_s8 + $0x1f64] ss:$16 sps:$4 sm:$0xff]  }
 0x3fa   : > { %7355 = vmatprep.subr.bf16.mxu0 %v10917_v51  ;;  %8011 = vmatprep.subr.bf16.mxu1 %v10920_v52  ;;  %v11004_v51 = vld [vmem:[%s11290_s8 + $0x1f6c] ss:$16 sps:$4 sm:$0xff]   ;;  %v10999_v52 = vld [vmem:[%s11290_s8 + $0x1f60] ss:$16 sps:$4 sm:$0xff]  }
 0x3fd   : > { %7356 = vmatpush1.bf16.msra.mxu0 %v10915_v20  ;;  %8012 = vmatpush1.bf16.msra.mxu1 %v10918_v56  ;;  %v11002_v20 = vld [vmem:[%s11290_s8 + $0x1f68] ss:$16 sps:$4 sm:$0xff]   ;;  %v11007_v56 = vld [vmem:[%s11290_s8 + $0x1f84] ss:$16 sps:$4 sm:$0xff]  }
 0x3fe   : > { %7357 = vmatprep.subr.bf16.mxu0 %v10923_v30  ;;  %8013 = vmatprep.subr.bf16.mxu1 %v10926_v57  ;;  %v11010_v30 = vld [vmem:[%s11290_s8 + $0x1f8c] ss:$16 sps:$4 sm:$0xff]   ;;  %v11005_v57 = vld [vmem:[%s11290_s8 + $0x1f80] ss:$16 sps:$4 sm:$0xff]  }
 0x401   : > { %7358 = vmatpush1.bf16.msra.mxu0 %v10921_v60  ;;  %8014 = vmatpush1.bf16.msra.mxu1 %v10924_v61  ;;  %v11013_v60 = vld [vmem:[%s11290_s8 + $0x1fa4] ss:$16 sps:$4 sm:$0xff]   ;;  %v11016_v61 = vld [vmem:[%s11290_s8 + $0x1fac] ss:$16 sps:$4 sm:$0xff]  }
 0x402   : > { %7359 = vmatprep.subr.bf16.mxu0 %v10929_v62  ;;  %8015 = vmatprep.subr.bf16.mxu1 %v10932_v63  ;;  %v11011_v62 = vld [vmem:[%s11290_s8 + $0x1fa0] ss:$16 sps:$4 sm:$0xff]   ;;  %v11014_v63 = vld [vmem:[%s11290_s8 + $0x1fa8] ss:$16 sps:$4 sm:$0xff]  }
 0x405   : > { %7360 = vmatpush1.bf16.msra.mxu0 %v10927_v31  ;;  %8016 = vmatpush1.bf16.msra.mxu1 %v10930_v1  ;;  %v11019_v31 = vld [vmem:[%s11290_s8 + $0x1fc4] ss:$16 sps:$4 sm:$0xff]   ;;  %v11022_v1 = vld [vmem:[%s11290_s8 + $0x1fcc] ss:$16 sps:$4 sm:$0xff]  }
 0x406   : > { %7370 = vmatprep.subr.bf16.mxu0 %v10935_v2  ;;  %8026 = vmatprep.subr.bf16.mxu1 %v10938_v39  ;;  %v11017_v2 = vld [vmem:[%s11290_s8 + $0x1fc0] ss:$16 sps:$4 sm:$0xff]   ;;  %v11020_v39 = vld [vmem:[%s11290_s8 + $0x1fc8] ss:$16 sps:$4 sm:$0xff]  }
 0x408   : > { %7362 = vmatmul.mubr.bf16.vlgmr.msra.gmra.mrb[0].mxu0 %v606_v55  ;;  %8018 = vmatmul.mubr.bf16.vlgmr.msra.gmra.mrb[0].mxu1 %v606_v55  ;;  %v11028_v55 = vld [vmem:[%s11290_s8 + $0x1fec] ss:$16 sps:$4 sm:$0xff]  }
 0x409   : > { %7371 = vmatpush1.bf16.msra.mxu0 %v10933_v7  ;;  %8027 = vmatpush1.bf16.msra.mxu1 %v10936_v8  ;;  %v11023_v7 = vld [vmem:[%s11290_s8 + $0x1fe0] ss:$16 sps:$4 sm:$0xff]   ;;  %v11026_v8 = vld [vmem:[%s11290_s8 + $0x1fe8] ss:$16 sps:$4 sm:$0xff]  }
 0x40a   : > { %7372 = vmatprep.subr.bf16.mxu0 %v10941_v42  ;;  %8028 = vmatprep.subr.bf16.mxu1 %v10944_v9  ;;  %v608_v42 = vpack.c.bf16 %v12433_v0, %v12433_v0 }
 0x40b   : > { %7402 = vmatprep.mubr.bf16.mxu0 %v609_v10  ;;  %8058 = vmatprep.mubr.bf16.mxu1 %v609_v10 }
 0x40d   : > { %7373 = vmatpush1.bf16.msra.mxu0 %v10939_v54  ;;  %8029 = vmatpush1.bf16.msra.mxu1 %v10942_v11 }
 0x40e   : > { %7374 = vmatprep.subr.bf16.mxu0 %v10947_v12  ;;  %8030 = vmatprep.subr.bf16.mxu1 %v10950_v14 }
 0x411   : > { %7375 = vmatpush1.bf16.msra.mxu0 %v10945_v44  ;;  %8031 = vmatpush1.bf16.msra.mxu1 %v10948_v16 }
 0x412   : > { %7376 = vmatprep.subr.bf16.mxu0 %v10953_v17  ;;  %8032 = vmatprep.subr.bf16.mxu1 %v10956_v53 }
 0x415   : > { %7377 = vmatpush1.bf16.msra.mxu0 %v10951_v18  ;;  %8033 = vmatpush1.bf16.msra.mxu1 %v10954_v19 }
 0x416   : > { %7378 = vmatprep.subr.bf16.mxu0 %v10959_v21  ;;  %8034 = vmatprep.subr.bf16.mxu1 %v10962_v23  ;;  %v610_v21 = vld [vmem:[#allocation2] sm:$0xff] }
 0x419   : > { %7379 = vmatpush1.bf16.msra.mxu0 %v10957_v24  ;;  %8035 = vmatpush1.bf16.msra.mxu1 %v10960_v25  ;;  %v8096_v24 = vld [vmem:[%s293_s15] sm:$0xf] (!%p9293_p6)  ;;  %v8100_v25 = vsub.s32 (!%p9293_p6), 0, %v11382_v5 }
 0x41a   : > { %7380 = vmatprep.subr.bf16.mxu0 %v10965_v26  ;;  %8036 = vmatprep.subr.bf16.mxu1 %v10968_v27  ;;  %v8104_v26 = vsub.s32 (!%p9293_p6), 1, %v11382_v5  ;;  %v8108_v27 = vsub.s32 (!%p9293_p6), 2, %v11382_v5 }
 0x41d   : > { %7381 = vmatpush1.bf16.msra.mxu0 %v10963_v28  ;;  %8037 = vmatpush1.bf16.msra.mxu1 %v10966_v29  ;;  %v8112_v28 = vsub.s32 (!%p9293_p6), 3, %v11382_v5  ;;  %v8101_v29 = vrot.slane (!%p9293_p6), %v8096_v24, %v8100_v25 }
 0x41e   : > { %7382 = vmatprep.subr.bf16.mxu0 %v10971_v59  ;;  %8038 = vmatprep.subr.bf16.mxu1 %v10974_v32  ;;  %v8105_v59 = vrot.slane (!%p9293_p6), %v8096_v24, %v8104_v26  ;;  %v8109_v32 = vrot.slane (!%p9293_p6), %v8096_v24, %v8108_v27 }
 0x421   : > { %7383 = vmatpush1.bf16.msra.mxu0 %v10969_v4  ;;  %8039 = vmatpush1.bf16.msra.mxu1 %v10972_v33  ;;  %v8113_v4 = vrot.slane (!%p9293_p6), %v8096_v24, %v8112_v28  ;;  %v8114_v33 = vcombine.low (!%p9293_p6), %v8101_v29, %v8105_v59 }
 0x422   : > { %7384 = vmatprep.subr.bf16.mxu0 %v10977_v34  ;;  %8040 = vmatprep.subr.bf16.mxu1 %v10980_v35 }
 0x423   : > { %v8115_v34 = vcombine.low (!%p9293_p6), %v8109_v32, %v8113_v4  ;;  %v8122_v35 = vrot.slane (!%p9293_p6), %v8114_v33, %v11389_v13 }
 0x425   : > { %7385 = vmatpush1.bf16.msra.mxu0 %v10975_v36  ;;  %8041 = vmatpush1.bf16.msra.mxu1 %v10978_v37  ;;  %v8129_v36 = vrot.slane (!%p9293_p6), %v8115_v34, %v11389_v13 }
 0x426   : > { %7386 = vmatprep.subr.bf16.mxu0 %v10983_v38  ;;  %8042 = vmatprep.subr.bf16.mxu1 %v10986_v6 }
 0x427   : > { %v8130_v38 = vcombine.low (!%p9293_p6), %v8122_v35, %v8129_v36 }
 0x429   : > { %7387 = vmatpush1.bf16.msra.mxu0 %v10981_v40  ;;  %8043 = vmatpush1.bf16.msra.mxu1 %v10984_v22 }
 0x42a   : > { %7388 = vmatprep.subr.bf16.mxu0 %v10989_v15  ;;  %8044 = vmatprep.subr.bf16.mxu1 %v10992_v41 }
 0x42d   : > { %7389 = vmatpush1.bf16.msra.mxu0 %v10987_v43  ;;  %8045 = vmatpush1.bf16.msra.mxu1 %v10990_v45 }
 0x42e   : > { %7390 = vmatprep.subr.bf16.mxu0 %v10995_v46  ;;  %8046 = vmatprep.subr.bf16.mxu1 %v10998_v47 }
 0x431   : > { %7391 = vmatpush1.bf16.msra.mxu0 %v10993_v48  ;;  %8047 = vmatpush1.bf16.msra.mxu1 %v10996_v49 }
 0x432   : > { %7392 = vmatprep.subr.bf16.mxu0 %v11001_v50  ;;  %8048 = vmatprep.subr.bf16.mxu1 %v11004_v51 }
 0x435   : > { %7393 = vmatpush1.bf16.msra.mxu0 %v10999_v52  ;;  %8049 = vmatpush1.bf16.msra.mxu1 %v11002_v20 }
 0x436   : > { %7394 = vmatprep.subr.bf16.mxu0 %v11007_v56  ;;  %8050 = vmatprep.subr.bf16.mxu1 %v11010_v30 }
 0x439   : > { %7395 = vmatpush1.bf16.msra.mxu0 %v11005_v57  ;;  %8051 = vmatpush1.bf16.msra.mxu1 %v11008_v58 }
 0x43a   : > { %7396 = vmatprep.subr.bf16.mxu0 %v11013_v60  ;;  %8052 = vmatprep.subr.bf16.mxu1 %v11016_v61 }
 0x43d   : > { %7397 = vmatpush1.bf16.msra.mxu0 %v11011_v62  ;;  %8053 = vmatpush1.bf16.msra.mxu1 %v11014_v63 }
 0x43e   : > { %7398 = vmatprep.subr.bf16.mxu0 %v11019_v31  ;;  %8054 = vmatprep.subr.bf16.mxu1 %v11022_v1 }
 0x441   : > { %7399 = vmatpush1.bf16.msra.mxu0 %v11017_v2  ;;  %8055 = vmatpush1.bf16.msra.mxu1 %v11020_v39 }
 0x442   : > { %7400 = vmatprep.subr.bf16.mxu0 %v11025_v3  ;;  %8056 = vmatprep.subr.bf16.mxu1 %v11028_v55 }
 0x445   : > { %7401 = vmatpush1.bf16.msra.mxu0 %v11023_v7  ;;  %8057 = vmatpush1.bf16.msra.mxu1 %v11026_v8 }
 0x448   : > { %7403 = vmatmul.mubr.bf16.vlgmr.msra.gmra.mrb[0].mxu0 %v608_v42  ;;  %8059 = vmatmul.mubr.bf16.vlgmr.msra.gmra.mrb[0].mxu1 %v608_v42 }
 0x51b   : > { %v7404_v9 = vpop.f32.mrb[0].mxu0  ;;  %v8060_v10 = vpop.f32.mrb[0].mxu1 }
 0x51c   : > { %v7406_v54 = vpop.f32.mrb[1].mxu0  ;;  %v8062_v11 = vpop.f32.mrb[1].mxu1 }
 0x51d   : > { %v8071_v12 = vcombine.low %v7404_v9, %v7406_v54  ;;  %v8072_v14 = vcombine.low %v8060_v10, %v8062_v11  ;;  %v7408_v44 = vpop.f32.mrb[2].mxu0  ;;  %v8064_v16 = vpop.f32.mrb[2].mxu1 }
 0x51e   : > { %v7409_v17 = vpop.f32.mrb[3].mxu0  ;;  %v8065_v53 = vpop.f32.mrb[3].mxu1 }
 0x51f   : > { %v8079_v18 = vrot.slane %v8071_v12, %v11389_v13  ;;  %v8086_v19 = vrot.slane %v8072_v14, %v11389_v13  ;;  %8094 = sbr.rel (%p9293_p6) target bundleno = 1330 (0x532), region = 48 }
 0x521   : > { %v8087_v0 = vcombine.low %v8079_v18, %v8086_v19 }
 0x523   : > { %v8089_v23 = vadd.f32 %v8087_v0, %v610_v21 }
 0x525   : > { %8090 = vst [vmem:[#allocation2] sm:$0xff] %v8089_v23 }
 0x52c   : > { %v8095_v37 = vld [vmem:[#allocation2] sm:$0xff] }
 0x52d   : > { %v8132_v6 = vadd.f32 %v8130_v38, %v8095_v37 }
 0x52f   : > { %v8133_v40 = vmax.f32 %v8132_v6, 0.0 }
 0x531   : > { %8134 = vst [vmem:[%s11318_s5] sm:$0xff] %v8133_v40 }
 0x532 PF: > { %s17_s22 = sadd.s32 1, %s11141_s22   ;;  %s12556_s26 = sld [smem:[#allocation6_spill]] }
 0x533   : > { %p14_p8 = scmp.ge.s32.totalorder %s17_s22, 130   ;;  %s12557_s15 = smov %s11117_s16 }
 0x534   : > { %s12558_s16 = smov %s11121_s17  ;;  %s12559_s17 = smov %s11241_s9 }
 0x535   : > { %s12560_s18 = smov %s11133_s20  ;;  %s12561_s19 = smov %s11137_s21 }
 0x536   : > { %s12563_s21 = smov %s12569_s25  ;;  %16 = sbr.rel (!%p14_p8) target bundleno = 5 (0x5), region = 93 }
 0x538   : > { %s12562_s20 = smov %s12556_s26 }
 0x53d   :  { %8157 = vsyncpa [#allocation4], 1 }
 0x53e   :  { %8159 = vsyncpa [#allocation4 + $0x1], 1 }

</bundles_post_ra>
